<compile_context>
chip_gen: v7x
topology: tpu7x:2x2x1
jax: 0.10.0
libtpu: 0.0.40
codegen_flags: <defaults>
</compile_context>

<pallas_src>
import functools

import jax
import jax.numpy as jnp
from jax import lax
from jax.experimental import pallas as pl
from jax.experimental.pallas import tpu as pltpu

NEG_SLOPE = 0.01   # nn.LeakyReLU default
BN_EPS = 1e-5      # nn.BatchNorm3d default


# ------------------------------ Pallas kernels ------------------------------

def _stage1_kernel(x_ref, sc_ref, bi_ref, w1_ref, wsk_ref,
                   h1_ref, s0_ref, st_ref, *, d, h, w, cin, cout):
    """Fused AdaBN1 + LeakyReLU + conv1(3x3x3) + skip conv(1x1x1) + BN partials.

    x_ref   : (1, d+2, h+2, w*cin)   raw input, zero halo on depth/height
    sc/bi   : (1, 1, w*cin)          folded per-sample AdaBN1 scale / bias
    w1_ref  : (9, w*cin, w*cout)     banded conv1 weights, one per (kd, kh)
    wsk_ref : (w*cin, w*cout)        banded 1x1x1 skip weights
    h1_ref  : (1, d+2, h+2, w*cout)  conv1 output written with a zero halo
    s0_ref  : (1, d*h, w*cout)       skip-conv output (pre BN / LeakyReLU)
    st_ref  : (1, 4, w*cout)         per-sample [sum, sumsq] of h1 and s0
    """
    n = w * cout
    x = x_ref[0]                                        # (d+2, h+2, w*cin)

    # AdaptiveBatchNorm (folded) + LeakyReLU, then re-zero the depth/height
    # halo: 'same' padding applies to the *activated* conv input.
    a = x * sc_ref[...] + bi_ref[...]
    a = jnp.where(a >= 0, a, NEG_SLOPE * a)
    di = lax.broadcasted_iota(jnp.int32, (d + 2, h + 2), 0)
    hi = lax.broadcasted_iota(jnp.int32, (d + 2, h + 2), 1)
    inside = ((di >= 1) & (di <= d) & (hi >= 1) & (hi <= h)).astype(a.dtype)
    a = a * inside[:, :, None]

    # 3x3x3 conv: 9 shifted slabs x banded weights, f32 accumulation (MXU).
    acc = None
    for kd in range(3):
        for kh in range(3):
            slab = a[kd:kd + d, kh:kh + h, :].reshape(d * h, w * cin)
            part = jnp.dot(slab, w1_ref[kd * 3 + kh],
                           preferred_element_type=jnp.float32)
            acc = part if acc is None else acc + part

    # skip path: spectral-normed 1x1x1 conv on the raw (un-normalised) input.
    xc = x[1:1 + d, 1:1 + h, :].reshape(d * h, w * cin)
    s0 = jnp.dot(xc, wsk_ref[...], preferred_element_type=jnp.float32)

    # Write conv1's output together with its zero halo so stage 2 does not
    # need an extra HBM pad pass.
    zh = jnp.zeros((d, 1, n), jnp.float32)
    zd = jnp.zeros((1, h + 2, n), jnp.float32)
    core = jnp.concatenate([zh, acc.reshape(d, h, n), zh], axis=1)
    h1_ref[0] = jnp.concatenate([zd, core, zd], axis=0)
    s0_ref[0] = s0

    # Partial sums for the training-mode BatchNorm statistics (finished in JAX).
    st_ref[0] = jnp.concatenate(
        [jnp.sum(acc, axis=0, keepdims=True),
         jnp.sum(acc * acc, axis=0, keepdims=True),
         jnp.sum(s0, axis=0, keepdims=True),
         jnp.sum(s0 * s0, axis=0, keepdims=True)], axis=0)


def _stage2_kernel(h_ref, sc_ref, bi_ref, w2_ref, s0_ref, sks_ref, skb_ref,
                   o_ref, *, d, h, w, cout):
    """Fused AdaBN2 + LeakyReLU + conv2(3x3x3) + skip BN + LeakyReLU + add."""
    n = w * cout
    x = h_ref[0]                                        # (d+2, h+2, n), halo == 0

    a = x * sc_ref[...] + bi_ref[...]
    a = jnp.where(a >= 0, a, NEG_SLOPE * a)
    di = lax.broadcasted_iota(jnp.int32, (d + 2, h + 2), 0)
    hi = lax.broadcasted_iota(jnp.int32, (d + 2, h + 2), 1)
    inside = ((di >= 1) & (di <= d) & (hi >= 1) & (hi <= h)).astype(a.dtype)
    a = a * inside[:, :, None]

    # residual epilogue starts from BN(affine) + LeakyReLU of the skip conv.
    skip = s0_ref[0] * sks_ref[0] + skb_ref[0]
    acc = jnp.where(skip >= 0, skip, NEG_SLOPE * skip)

    for kd in range(3):
        for kh in range(3):
            slab = a[kd:kd + d, kh:kh + h, :].reshape(d * h, n)
            acc = acc + jnp.dot(slab, w2_ref[kd * 3 + kh],
                                preferred_element_type=jnp.float32)
    o_ref[0] = acc


# ------------------------------ Pallas wrappers ------------------------------

def _stage1_call(xpad, scale1, bias1, w1_band, wsk_band, *, d, h, w, cin, cout):
    b = xpad.shape[0]
    n = w * cout
    kern = functools.partial(_stage1_kernel, d=d, h=h, w=w, cin=cin, cout=cout)
    return pl.pallas_call(
        kern,
        out_shape=(jax.ShapeDtypeStruct((b, d + 2, h + 2, n), jnp.float32),
                   jax.ShapeDtypeStruct((b, d * h, n), jnp.float32),
                   jax.ShapeDtypeStruct((b, 4, n), jnp.float32)),
        grid=(b,),
        in_specs=[pl.BlockSpec((1, d + 2, h + 2, w * cin), lambda i: (i, 0, 0, 0)),
                  pl.BlockSpec((1, 1, w * cin), lambda i: (i, 0, 0)),
                  pl.BlockSpec((1, 1, w * cin), lambda i: (i, 0, 0)),
                  pl.BlockSpec((9, w * cin, n), lambda i: (0, 0, 0)),
                  pl.BlockSpec((w * cin, n), lambda i: (0, 0))],
        out_specs=(pl.BlockSpec((1, d + 2, h + 2, n), lambda i: (i, 0, 0, 0)),
                   pl.BlockSpec((1, d * h, n), lambda i: (i, 0, 0)),
                   pl.BlockSpec((1, 4, n), lambda i: (i, 0, 0))),
        compiler_params=pltpu.CompilerParams(dimension_semantics=("parallel",)),
    )(xpad, scale1, bias1, w1_band, wsk_band)


def _stage2_call(h1pad, scale2, bias2, w2_band, s0, sk_scale, sk_bias,
                 *, d, h, w, cout):
    b = h1pad.shape[0]
    n = w * cout
    kern = functools.partial(_stage2_kernel, d=d, h=h, w=w, cout=cout)
    return pl.pallas_call(
        kern,
        out_shape=jax.ShapeDtypeStruct((b, d * h, n), jnp.float32),
        grid=(b,),
        in_specs=[pl.BlockSpec((1, d + 2, h + 2, n), lambda i: (i, 0, 0, 0)),
                  pl.BlockSpec((1, 1, n), lambda i: (i, 0, 0)),
                  pl.BlockSpec((1, 1, n), lambda i: (i, 0, 0)),
                  pl.BlockSpec((9, n, n), lambda i: (0, 0, 0)),
                  pl.BlockSpec((1, d * h, n), lambda i: (i, 0, 0)),
                  pl.BlockSpec((1, 1, n), lambda i: (0, 0, 0)),
                  pl.BlockSpec((1, 1, n), lambda i: (0, 0, 0))],
        out_specs=pl.BlockSpec((1, d * h, n), lambda i: (i, 0, 0)),
        compiler_params=pltpu.CompilerParams(dimension_semantics=("parallel",)),
    )(h1pad, scale2, bias2, w2_band, s0, sk_scale, sk_bias)


# ------------------------------ weight plumbing ------------------------------

def _banded_conv3(k, width):
    """PyTorch Conv3d weight (Cout, Cin, 3, 3, 3) -> 9 banded matrices.

    band[kd*3+kh, wp*Cin+ci, w*Cout+co] = k[co, ci, kd, kh, kw] with wp = w+kw-1;
    taps falling outside [0, width) are dropped == zero 'same' padding along W.
    """
    cout, cin = k.shape[0], k.shape[1]
    wp = jnp.arange(width)[None, :, None]
    wo = jnp.arange(width)[None, None, :]
    kw = jnp.arange(3)[:, None, None]
    sel = (wp == wo + kw - 1).astype(k.dtype)                  # (3, W, W)
    kdh = jnp.transpose(k, (2, 3, 4, 1, 0))                    # (kd, kh, kw, ci, co)
    band = jnp.einsum("kpw,dhkio->dhpiwo", sel, kdh)
    return band.reshape(9, width * cin, width * cout)


def _banded_conv1(k, width):
    """1x1x1 conv weight (Cout, Cin) -> block-diagonal (W*Cin, W*Cout) matrix."""
    band = jnp.einsum("pw,io->piwo", jnp.eye(width, dtype=k.dtype), k.T)
    return band.reshape(width * k.shape[1], width * k.shape[0])


def _spectral_normalize(wt, key, eps=1e-12):
    # torch.nn.utils.spectral_norm default: one power iteration, sigma = u^T W v.
    w2 = wt.reshape(wt.shape[0], -1)
    u = jax.random.normal(key, (w2.shape[0],), jnp.float32)
    u = u / (jnp.linalg.norm(u) + eps)
    v = w2.T @ u
    v = v / (jnp.linalg.norm(v) + eps)
    u = w2 @ v
    u = u / (jnp.linalg.norm(u) + eps)
    sigma = u @ (w2 @ v)
    return (w2 / sigma).reshape(wt.shape)


def init_params(key, in_channels, out_channels, noise_dim, embed_features):
    ks = jax.random.split(key, 12)
    fin = noise_dim + embed_features
    bound = 1.0 / (fin ** 0.5)

    def linear(kw_, kb_, fout):
        wt = jax.random.uniform(kw_, (fout, fin), jnp.float32, -bound, bound)
        bs = jax.random.uniform(kb_, (fout,), jnp.float32, -bound, bound)
        return wt, bs

    g1_w, g1_b = linear(ks[0], ks[1], in_channels)
    b1_w, b1_b = linear(ks[2], ks[3], in_channels)
    g2_w, g2_b = linear(ks[4], ks[5], out_channels)
    b2_w, b2_b = linear(ks[6], ks[7], out_channels)

    conv1 = jax.random.normal(ks[8], (out_channels, in_channels, 3, 3, 3),
                              jnp.float32) * 0.1
    conv2 = jax.random.normal(ks[9], (out_channels, out_channels, 3, 3, 3),
                              jnp.float32) * 0.1
    skip = jax.random.normal(ks[10], (out_channels, in_channels), jnp.float32) * 0.1

    return dict(
        conv1_w=_spectral_normalize(conv1, jax.random.fold_in(ks[8], 1)),
        conv2_w=_spectral_normalize(conv2, jax.random.fold_in(ks[9], 1)),
        skip_w=_spectral_normalize(skip, jax.random.fold_in(ks[10], 1)),
        skip_bn_gamma=jnp.ones((out_channels,), jnp.float32),
        skip_bn_beta=jnp.zeros((out_channels,), jnp.float32),
        g1_w=g1_w, g1_b=g1_b, b1_w=b1_w, b1_b=b1_b,
        g2_w=g2_w, g2_b=g2_b, b2_w=b2_w, b2_b=b2_b,
    )


# ------------------------------ forward pass ------------------------------

def preact_resblock_up(params, x, noise, embeddings):
    """PreActResBlockUp forward, NCDHW in / NCDHW out, training-mode BatchNorm."""
    b, cin, d, h, w = x.shape
    cout = params["conv1_w"].shape[0]
    n = w * cout

    # NCDHW -> channels-last with a depth/height zero halo, minor dim = W*Cin.
    xcl = jnp.transpose(x, (0, 2, 3, 4, 1))
    xpad = jnp.pad(xcl, ((0, 0), (1, 1), (1, 1), (0, 0), (0, 0)))
    xpad = xpad.reshape(b, d + 2, h + 2, w * cin)

    # AdaptiveBatchNorm affine parameters from cat([noise, embeddings]).
    feats = jnp.concatenate([noise, embeddings], axis=1)
    g1 = feats @ params["g1_w"].T + params["g1_b"]               # (B, Cin)
    b1 = feats @ params["b1_w"].T + params["b1_b"]
    g2 = feats @ params["g2_w"].T + params["g2_b"]               # (B, Cout)
    b2 = feats @ params["b2_w"].T + params["b2_b"]

    # Training-mode BN statistics of x (per channel, biased variance).
    mean_x = jnp.mean(xcl, axis=(0, 1, 2, 3))
    var_x = jnp.maximum(jnp.mean(jnp.square(xcl), axis=(0, 1, 2, 3))
                        - jnp.square(mean_x), 0.0)
    inv_x = lax.rsqrt(var_x + BN_EPS)
    scale1 = g1 * inv_x
    bias1 = b1 - g1 * mean_x * inv_x
    scale1_t = jnp.tile(scale1, (1, w)).reshape(b, 1, w * cin)
    bias1_t = jnp.tile(bias1, (1, w)).reshape(b, 1, w * cin)

    # Banded (shift-and-accumulate) weight matrices, lane-dense N = W*Cout.
    w1_band = _banded_conv3(params["conv1_w"], w)
    w2_band = _banded_conv3(params["conv2_w"], w)
    wsk_band = _banded_conv1(params["skip_w"], w)

    h1pad, s0, stats = _stage1_call(xpad, scale1_t, bias1_t, w1_band, wsk_band,
                                    d=d, h=h, w=w, cin=cin, cout=cout)

    # Finish batch statistics of conv1's output (AdaBN2) and of the skip conv.
    cnt = b * d * h * w
    st = jnp.sum(stats, axis=0).reshape(4, w, cout).sum(axis=1) / cnt
    mean_h, msq_h, mean_s, msq_s = st[0], st[1], st[2], st[3]
    var_h = jnp.maximum(msq_h - jnp.square(mean_h), 0.0)
    var_s = jnp.maximum(msq_s - jnp.square(mean_s), 0.0)

    inv_h = lax.rsqrt(var_h + BN_EPS)
    scale2 = g2 * inv_h
    bias2 = b2 - g2 * mean_h * inv_h
    scale2_t = jnp.tile(scale2, (1, w)).reshape(b, 1, n)
    bias2_t = jnp.tile(bias2, (1, w)).reshape(b, 1, n)

    inv_s = lax.rsqrt(var_s + BN_EPS)
    sk_scale = params["skip_bn_gamma"] * inv_s
    sk_bias = params["skip_bn_beta"] - params["skip_bn_gamma"] * mean_s * inv_s
    sk_scale_t = jnp.tile(sk_scale, (w,)).reshape(1, 1, n)
    sk_bias_t = jnp.tile(sk_bias, (w,)).reshape(1, 1, n)

    out = _stage2_call(h1pad, scale2_t, bias2_t, w2_band, s0,
                       sk_scale_t, sk_bias_t, d=d, h=h, w=w, cout=cout)
    out = out.reshape(b, d, h, w, cout)
    return jnp.transpose(out, (0, 4, 1, 2, 3))                   # -> NCDHW


# ------------------------------ pure-JAX reference ------------------------------

def preact_resblock_up_reference(params, x, noise, embeddings):
    xcl = jnp.transpose(x, (0, 2, 3, 4, 1))
    feats = jnp.concatenate([noise, embeddings], axis=1)
    g1 = feats @ params["g1_w"].T + params["g1_b"]
    b1 = feats @ params["b1_w"].T + params["b1_b"]
    g2 = feats @ params["g2_w"].T + params["g2_b"]
    b2 = feats @ params["b2_w"].T + params["b2_b"]

    def bn(v):
        m = jnp.mean(v, axis=(0, 1, 2, 3))
        var = jnp.mean(jnp.square(v), axis=(0, 1, 2, 3)) - jnp.square(m)
        return (v - m) * lax.rsqrt(var + BN_EPS)

    def lrelu(v):
        return jnp.where(v >= 0, v, NEG_SLOPE * v)

    def conv3(v, k):
        rhs = jnp.transpose(k, (2, 3, 4, 1, 0))                  # DHWIO
        return lax.conv_general_dilated(
            v, rhs, window_strides=(1, 1, 1), padding="SAME",
            dimension_numbers=("NDHWC", "DHWIO", "NDHWC"),
            precision=lax.Precision.HIGHEST)

    bc = lambda t: t[:, None, None, None, :]
    a1 = lrelu(bn(xcl) * bc(g1) + bc(b1))
    h1 = conv3(a1, params["conv1_w"])
    s0 = jnp.einsum("bdhwi,oi->bdhwo", xcl, params["skip_w"],
                    precision=lax.Precision.HIGHEST)
    skip = lrelu(bn(s0) * params["skip_bn_gamma"] + params["skip_bn_beta"])
    a2 = lrelu(bn(h1) * bc(g2) + bc(b2))
    out = conv3(a2, params["conv2_w"]) + skip
    return jnp.transpose(out, (0, 4, 1, 2, 3))


# ------------------------------ main ------------------------------

if __name__ == "__main__":
    batch, in_channels, out_channels = 2, 4, 8
    depth = height = width = 16
    noise_dim, embed_features = 8, 8

    key = jax.random.PRNGKey(0)
    kp, kx, kn, ke = jax.random.split(key, 4)
    params = init_params(kp, in_channels, out_channels, noise_dim, embed_features)
    x = jax.random.normal(kx, (batch, in_channels, depth, height, width), jnp.float32)
    noise = jax.random.normal(kn, (batch, noise_dim), jnp.float32)
    embeddings = jax.random.normal(ke, (batch, embed_features), jnp.float32)

    fwd = jax.jit(preact_resblock_up)
    out = jax.block_until_ready(fwd(params, x, noise, embeddings))
    assert out.shape == (batch, out_channels, depth, height, width)
    assert bool(jnp.all(jnp.isfinite(out)))

    ref = preact_resblock_up_reference(params, x, noise, embeddings)
    err = float(jnp.max(jnp.abs(out - ref)) / (jnp.max(jnp.abs(ref)) + 1e-6))
    assert err < 5e-2, f"mismatch vs reference: rel_err={err}"
    print("KERNEL_OK")
</pallas_src>

<mosaic_0001>
module attributes {stable_mosaic.version = 11 : i64} {
  func.func @_stage1_kernel(%arg0: i32, %arg1: memref<1x18x18x64xf32, #tpu.memory_space<vmem>>, %arg2: memref<1x1x64xf32, #tpu.memory_space<vmem>>, %arg3: memref<1x1x64xf32, #tpu.memory_space<vmem>>, %arg4: memref<9x64x128xf32, #tpu.memory_space<vmem>>, %arg5: memref<64x128xf32, #tpu.memory_space<vmem>>, %arg6: memref<1x18x18x128xf32, #tpu.memory_space<vmem>>, %arg7: memref<1x256x128xf32, #tpu.memory_space<vmem>>, %arg8: memref<1x4x128xf32, #tpu.memory_space<vmem>>) attributes {dimension_semantics = [#tpu.dimension_semantics<parallel>], iteration_bounds = array<i64: 2>, scalar_prefetch = 0 : i64, scratch_operands = 0 : i64, tpu.core_type = #tpu.core_type<tc>, window_params = [{transform_indices = @transform_0, window_bounds = array<i64: 1, 18, 18, 64>}, {transform_indices = @transform_1, window_bounds = array<i64: 1, 1, 64>}, {transform_indices = @transform_2, window_bounds = array<i64: 1, 1, 64>}, {pipeline_mode = #tpu.pipeline_mode<synchronous>, transform_indices = @transform_3, window_bounds = array<i64: 9, 64, 128>}, {pipeline_mode = #tpu.pipeline_mode<synchronous>, transform_indices = @transform_4, window_bounds = array<i64: 64, 128>}, {transform_indices = @transform_5, window_bounds = array<i64: 1, 18, 18, 128>}, {transform_indices = @transform_6, window_bounds = array<i64: 1, 256, 128>}, {transform_indices = @transform_7, window_bounds = array<i64: 1, 4, 128>}]} {
    %c0 = arith.constant 0 : index
    %c0_0 = arith.constant 0 : index
    %c0_1 = arith.constant 0 : index
    %c0_2 = arith.constant 0 : index
    %0 = vector.load %arg1[%c0, %c0_0, %c0_1, %c0_2] : memref<1x18x18x64xf32, #tpu.memory_space<vmem>>, vector<1x18x18x64xf32>
    %1 = vector.shape_cast %0 : vector<1x18x18x64xf32> to vector<18x18x64xf32>
    %c0_3 = arith.constant 0 : index
    %c0_4 = arith.constant 0 : index
    %c0_5 = arith.constant 0 : index
    %2 = vector.load %arg2[%c0_3, %c0_4, %c0_5] : memref<1x1x64xf32, #tpu.memory_space<vmem>>, vector<1x1x64xf32>
    %3 = vector.broadcast %2 : vector<1x1x64xf32> to vector<18x18x64xf32>
    %4 = arith.mulf %1, %3 : vector<18x18x64xf32>
    %c0_6 = arith.constant 0 : index
    %c0_7 = arith.constant 0 : index
    %c0_8 = arith.constant 0 : index
    %5 = vector.load %arg3[%c0_6, %c0_7, %c0_8] : memref<1x1x64xf32, #tpu.memory_space<vmem>>, vector<1x1x64xf32>
    %6 = vector.broadcast %5 : vector<1x1x64xf32> to vector<18x18x64xf32>
    %7 = arith.addf %4, %6 : vector<18x18x64xf32>
    %cst = arith.constant 0.000000e+00 : f32
    %8 = vector.broadcast %cst : f32 to vector<18x18x64xf32>
    %9 = arith.cmpf oge, %7, %8 : vector<18x18x64xf32>
    %cst_9 = arith.constant 0.00999999977 : f32
    %10 = vector.broadcast %cst_9 : f32 to vector<18x18x64xf32>
    %11 = arith.mulf %10, %7 : vector<18x18x64xf32>
    %12 = arith.select %9, %7, %11 : vector<18x18x64xi1>, vector<18x18x64xf32>
    %13 = tpu.iota {dimensions = array<i32: 0>} : vector<18x18xi32>
    %14 = tpu.iota {dimensions = array<i32: 1>} : vector<18x18xi32>
    %c1_i32 = arith.constant 1 : i32
    %15 = vector.broadcast %c1_i32 : i32 to vector<18x18xi32>
    %16 = arith.cmpi sge, %13, %15 : vector<18x18xi32>
    %c16_i32 = arith.constant 16 : i32
    %17 = vector.broadcast %c16_i32 : i32 to vector<18x18xi32>
    %18 = arith.cmpi sle, %13, %17 : vector<18x18xi32>
    %19 = arith.andi %16, %18 : vector<18x18xi1>
    %c1_i32_10 = arith.constant 1 : i32
    %20 = vector.broadcast %c1_i32_10 : i32 to vector<18x18xi32>
    %21 = arith.cmpi sge, %14, %20 : vector<18x18xi32>
    %22 = arith.andi %19, %21 : vector<18x18xi1>
    %c16_i32_11 = arith.constant 16 : i32
    %23 = vector.broadcast %c16_i32_11 : i32 to vector<18x18xi32>
    %24 = arith.cmpi sle, %14, %23 : vector<18x18xi32>
    %25 = arith.andi %22, %24 : vector<18x18xi1>
    %26 = arith.extui %25 : vector<18x18xi1> to vector<18x18xi32>
    %27 = arith.sitofp %26 : vector<18x18xi32> to vector<18x18xf32>
    %28 = vector.shape_cast %27 : vector<18x18xf32> to vector<18x18x1xf32>
    %29 = vector.broadcast %28 : vector<18x18x1xf32> to vector<18x18x64xf32>
    %30 = arith.mulf %12, %29 : vector<18x18x64xf32>
    %31 = vector.extract_strided_slice %30 {offsets = [0, 0, 0], sizes = [16, 16, 64], strides = [1, 1, 1]} : vector<18x18x64xf32> to vector<16x16x64xf32>
    %32 = vector.shape_cast %31 : vector<16x16x64xf32> to vector<256x64xf32>
    %c0_12 = arith.constant 0 : index
    %c0_13 = arith.constant 0 : index
    %c0_14 = arith.constant 0 : index
    %33 = vector.load %arg4[%c0_12, %c0_13, %c0_14] : memref<9x64x128xf32, #tpu.memory_space<vmem>>, vector<1x64x128xf32>
    %34 = vector.shape_cast %33 : vector<1x64x128xf32> to vector<64x128xf32>
    %cst_15 = arith.constant dense<0.000000e+00> : vector<256x128xf32>
    %35 = tpu.matmul %32, %34, %cst_15 {dimension_numbers = #tpu.dot_dimension_numbers<[1], [0], [0], [1], [0, 0, 1, 1], [], []>} : vector<256x64xf32>, vector<64x128xf32>, vector<256x128xf32> -> vector<256x128xf32>
    %36 = vector.extract_strided_slice %30 {offsets = [0, 1, 0], sizes = [16, 16, 64], strides = [1, 1, 1]} : vector<18x18x64xf32> to vector<16x16x64xf32>
    %37 = vector.shape_cast %36 : vector<16x16x64xf32> to vector<256x64xf32>
    %c1 = arith.constant 1 : index
    %c0_16 = arith.constant 0 : index
    %c0_17 = arith.constant 0 : index
    %38 = vector.load %arg4[%c1, %c0_16, %c0_17] : memref<9x64x128xf32, #tpu.memory_space<vmem>>, vector<1x64x128xf32>
    %39 = vector.shape_cast %38 : vector<1x64x128xf32> to vector<64x128xf32>
    %cst_18 = arith.constant dense<0.000000e+00> : vector<256x128xf32>
    %40 = tpu.matmul %37, %39, %cst_18 {dimension_numbers = #tpu.dot_dimension_numbers<[1], [0], [0], [1], [0, 0, 1, 1], [], []>} : vector<256x64xf32>, vector<64x128xf32>, vector<256x128xf32> -> vector<256x128xf32>
    %41 = arith.addf %35, %40 : vector<256x128xf32>
    %42 = vector.extract_strided_slice %30 {offsets = [0, 2, 0], sizes = [16, 16, 64], strides = [1, 1, 1]} : vector<18x18x64xf32> to vector<16x16x64xf32>
    %43 = vector.shape_cast %42 : vector<16x16x64xf32> to vector<256x64xf32>
    %c2 = arith.constant 2 : index
    %c0_19 = arith.constant 0 : index
    %c0_20 = arith.constant 0 : index
    %44 = vector.load %arg4[%c2, %c0_19, %c0_20] : memref<9x64x128xf32, #tpu.memory_space<vmem>>, vector<1x64x128xf32>
    %45 = vector.shape_cast %44 : vector<1x64x128xf32> to vector<64x128xf32>
    %cst_21 = arith.constant dense<0.000000e+00> : vector<256x128xf32>
    %46 = tpu.matmul %43, %45, %cst_21 {dimension_numbers = #tpu.dot_dimension_numbers<[1], [0], [0], [1], [0, 0, 1, 1], [], []>} : vector<256x64xf32>, vector<64x128xf32>, vector<256x128xf32> -> vector<256x128xf32>
    %47 = arith.addf %41, %46 : vector<256x128xf32>
    %48 = vector.extract_strided_slice %30 {offsets = [1, 0, 0], sizes = [16, 16, 64], strides = [1, 1, 1]} : vector<18x18x64xf32> to vector<16x16x64xf32>
    %49 = vector.shape_cast %48 : vector<16x16x64xf32> to vector<256x64xf32>
    %c3 = arith.constant 3 : index
    %c0_22 = arith.constant 0 : index
    %c0_23 = arith.constant 0 : index
    %50 = vector.load %arg4[%c3, %c0_22, %c0_23] : memref<9x64x128xf32, #tpu.memory_space<vmem>>, vector<1x64x128xf32>
    %51 = vector.shape_cast %50 : vector<1x64x128xf32> to vector<64x128xf32>
    %cst_24 = arith.constant dense<0.000000e+00> : vector<256x128xf32>
    %52 = tpu.matmul %49, %51, %cst_24 {dimension_numbers = #tpu.dot_dimension_numbers<[1], [0], [0], [1], [0, 0, 1, 1], [], []>} : vector<256x64xf32>, vector<64x128xf32>, vector<256x128xf32> -> vector<256x128xf32>
    %53 = arith.addf %47, %52 : vector<256x128xf32>
    %54 = vector.extract_strided_slice %30 {offsets = [1, 1, 0], sizes = [16, 16, 64], strides = [1, 1, 1]} : vector<18x18x64xf32> to vector<16x16x64xf32>
    %55 = vector.shape_cast %54 : vector<16x16x64xf32> to vector<256x64xf32>
    %c4 = arith.constant 4 : index
    %c0_25 = arith.constant 0 : index
    %c0_26 = arith.constant 0 : index
    %56 = vector.load %arg4[%c4, %c0_25, %c0_26] : memref<9x64x128xf32, #tpu.memory_space<vmem>>, vector<1x64x128xf32>
    %57 = vector.shape_cast %56 : vector<1x64x128xf32> to vector<64x128xf32>
    %cst_27 = arith.constant dense<0.000000e+00> : vector<256x128xf32>
    %58 = tpu.matmul %55, %57, %cst_27 {dimension_numbers = #tpu.dot_dimension_numbers<[1], [0], [0], [1], [0, 0, 1, 1], [], []>} : vector<256x64xf32>, vector<64x128xf32>, vector<256x128xf32> -> vector<256x128xf32>
    %59 = arith.addf %53, %58 : vector<256x128xf32>
    %60 = vector.extract_strided_slice %30 {offsets = [1, 2, 0], sizes = [16, 16, 64], strides = [1, 1, 1]} : vector<18x18x64xf32> to vector<16x16x64xf32>
    %61 = vector.shape_cast %60 : vector<16x16x64xf32> to vector<256x64xf32>
    %c5 = arith.constant 5 : index
    %c0_28 = arith.constant 0 : index
    %c0_29 = arith.constant 0 : index
    %62 = vector.load %arg4[%c5, %c0_28, %c0_29] : memref<9x64x128xf32, #tpu.memory_space<vmem>>, vector<1x64x128xf32>
    %63 = vector.shape_cast %62 : vector<1x64x128xf32> to vector<64x128xf32>
    %cst_30 = arith.constant dense<0.000000e+00> : vector<256x128xf32>
    %64 = tpu.matmul %61, %63, %cst_30 {dimension_numbers = #tpu.dot_dimension_numbers<[1], [0], [0], [1], [0, 0, 1, 1], [], []>} : vector<256x64xf32>, vector<64x128xf32>, vector<256x128xf32> -> vector<256x128xf32>
    %65 = arith.addf %59, %64 : vector<256x128xf32>
    %66 = vector.extract_strided_slice %30 {offsets = [2, 0, 0], sizes = [16, 16, 64], strides = [1, 1, 1]} : vector<18x18x64xf32> to vector<16x16x64xf32>
    %67 = vector.shape_cast %66 : vector<16x16x64xf32> to vector<256x64xf32>
    %c6 = arith.constant 6 : index
    %c0_31 = arith.constant 0 : index
    %c0_32 = arith.constant 0 : index
    %68 = vector.load %arg4[%c6, %c0_31, %c0_32] : memref<9x64x128xf32, #tpu.memory_space<vmem>>, vector<1x64x128xf32>
    %69 = vector.shape_cast %68 : vector<1x64x128xf32> to vector<64x128xf32>
    %cst_33 = arith.constant dense<0.000000e+00> : vector<256x128xf32>
    %70 = tpu.matmul %67, %69, %cst_33 {dimension_numbers = #tpu.dot_dimension_numbers<[1], [0], [0], [1], [0, 0, 1, 1], [], []>} : vector<256x64xf32>, vector<64x128xf32>, vector<256x128xf32> -> vector<256x128xf32>
    %71 = arith.addf %65, %70 : vector<256x128xf32>
    %72 = vector.extract_strided_slice %30 {offsets = [2, 1, 0], sizes = [16, 16, 64], strides = [1, 1, 1]} : vector<18x18x64xf32> to vector<16x16x64xf32>
    %73 = vector.shape_cast %72 : vector<16x16x64xf32> to vector<256x64xf32>
    %c7 = arith.constant 7 : index
    %c0_34 = arith.constant 0 : index
    %c0_35 = arith.constant 0 : index
    %74 = vector.load %arg4[%c7, %c0_34, %c0_35] : memref<9x64x128xf32, #tpu.memory_space<vmem>>, vector<1x64x128xf32>
    %75 = vector.shape_cast %74 : vector<1x64x128xf32> to vector<64x128xf32>
    %cst_36 = arith.constant dense<0.000000e+00> : vector<256x128xf32>
    %76 = tpu.matmul %73, %75, %cst_36 {dimension_numbers = #tpu.dot_dimension_numbers<[1], [0], [0], [1], [0, 0, 1, 1], [], []>} : vector<256x64xf32>, vector<64x128xf32>, vector<256x128xf32> -> vector<256x128xf32>
    %77 = arith.addf %71, %76 : vector<256x128xf32>
    %78 = vector.extract_strided_slice %30 {offsets = [2, 2, 0], sizes = [16, 16, 64], strides = [1, 1, 1]} : vector<18x18x64xf32> to vector<16x16x64xf32>
    %79 = vector.shape_cast %78 : vector<16x16x64xf32> to vector<256x64xf32>
    %c8 = arith.constant 8 : index
    %c0_37 = arith.constant 0 : index
    %c0_38 = arith.constant 0 : index
    %80 = vector.load %arg4[%c8, %c0_37, %c0_38] : memref<9x64x128xf32, #tpu.memory_space<vmem>>, vector<1x64x128xf32>
    %81 = vector.shape_cast %80 : vector<1x64x128xf32> to vector<64x128xf32>
    %cst_39 = arith.constant dense<0.000000e+00> : vector<256x128xf32>
    %82 = tpu.matmul %79, %81, %cst_39 {dimension_numbers = #tpu.dot_dimension_numbers<[1], [0], [0], [1], [0, 0, 1, 1], [], []>} : vector<256x64xf32>, vector<64x128xf32>, vector<256x128xf32> -> vector<256x128xf32>
    %83 = arith.addf %77, %82 : vector<256x128xf32>
    %84 = vector.extract_strided_slice %1 {offsets = [1, 1, 0], sizes = [16, 16, 64], strides = [1, 1, 1]} : vector<18x18x64xf32> to vector<16x16x64xf32>
    %85 = vector.shape_cast %84 : vector<16x16x64xf32> to vector<256x64xf32>
    %c0_40 = arith.constant 0 : index
    %c0_41 = arith.constant 0 : index
    %86 = vector.load %arg5[%c0_40, %c0_41] : memref<64x128xf32, #tpu.memory_space<vmem>>, vector<64x128xf32>
    %cst_42 = arith.constant dense<0.000000e+00> : vector<256x128xf32>
    %87 = tpu.matmul %85, %86, %cst_42 {dimension_numbers = #tpu.dot_dimension_numbers<[1], [0], [0], [1], [0, 0, 1, 1], [], []>} : vector<256x64xf32>, vector<64x128xf32>, vector<256x128xf32> -> vector<256x128xf32>
    %cst_43 = arith.constant 0.000000e+00 : f32
    %88 = vector.broadcast %cst_43 : f32 to vector<16x1x128xf32>
    %cst_44 = arith.constant 0.000000e+00 : f32
    %89 = vector.broadcast %cst_44 : f32 to vector<1x18x128xf32>
    %90 = vector.shape_cast %83 : vector<256x128xf32> to vector<16x16x128xf32>
    %91 = tpu.concatenate %88, %90, %88 in 1 : vector<16x1x128xf32>, vector<16x16x128xf32>, vector<16x1x128xf32> -> vector<16x18x128xf32>
    %92 = tpu.concatenate %89, %91, %89 in 0 : vector<1x18x128xf32>, vector<16x18x128xf32>, vector<1x18x128xf32> -> vector<18x18x128xf32>
    %c0_45 = arith.constant 0 : index
    %c0_46 = arith.constant 0 : index
    %c0_47 = arith.constant 0 : index
    %c0_48 = arith.constant 0 : index
    %93 = vector.load %arg6[%c0_45, %c0_46, %c0_47, %c0_48] : memref<1x18x18x128xf32, #tpu.memory_space<vmem>>, vector<1x18x18x128xf32>
    %94 = vector.shape_cast %93 : vector<1x18x18x128xf32> to vector<18x18x128xf32>
    %95 = vector.shape_cast %92 : vector<18x18x128xf32> to vector<1x18x18x128xf32>
    tpu.vector_store %arg6[%c0_45, %c0_46, %c0_47, %c0_48], %95 {strides = array<i32>} : memref<1x18x18x128xf32, #tpu.memory_space<vmem>>, vector<1x18x18x128xf32>,
    %c0_49 = arith.constant 0 : index
    %c0_50 = arith.constant 0 : index
    %c0_51 = arith.constant 0 : index
    %96 = vector.load %arg7[%c0_49, %c0_50, %c0_51] : memref<1x256x128xf32, #tpu.memory_space<vmem>>, vector<1x256x128xf32>
    %97 = vector.shape_cast %96 : vector<1x256x128xf32> to vector<256x128xf32>
    %98 = vector.shape_cast %87 : vector<256x128xf32> to vector<1x256x128xf32>
    tpu.vector_store %arg7[%c0_49, %c0_50, %c0_51], %98 {strides = array<i32>} : memref<1x256x128xf32, #tpu.memory_space<vmem>>, vector<1x256x128xf32>,
    %cst_52 = arith.constant dense<0.000000e+00> : vector<128xf32>
    %99 = vector.multi_reduction <add>, %83, %cst_52 [0] : vector<256x128xf32> to vector<128xf32>
    %100 = vector.shape_cast %99 : vector<128xf32> to vector<1x128xf32>
    %101 = arith.mulf %83, %83 : vector<256x128xf32>
    %cst_53 = arith.constant dense<0.000000e+00> : vector<128xf32>
    %102 = vector.multi_reduction <add>, %101, %cst_53 [0] : vector<256x128xf32> to vector<128xf32>
    %103 = vector.shape_cast %102 : vector<128xf32> to vector<1x128xf32>
    %cst_54 = arith.constant dense<0.000000e+00> : vector<128xf32>
    %104 = vector.multi_reduction <add>, %87, %cst_54 [0] : vector<256x128xf32> to vector<128xf32>
    %105 = vector.shape_cast %104 : vector<128xf32> to vector<1x128xf32>
    %106 = arith.mulf %87, %87 : vector<256x128xf32>
    %cst_55 = arith.constant dense<0.000000e+00> : vector<128xf32>
    %107 = vector.multi_reduction <add>, %106, %cst_55 [0] : vector<256x128xf32> to vector<128xf32>
    %108 = vector.shape_cast %107 : vector<128xf32> to vector<1x128xf32>
    %109 = tpu.concatenate %100, %103, %105, %108 in 0 : vector<1x128xf32>, vector<1x128xf32>, vector<1x128xf32>, vector<1x128xf32> -> vector<4x128xf32>
    %c0_56 = arith.constant 0 : index
    %c0_57 = arith.constant 0 : index
    %c0_58 = arith.constant 0 : index
    %110 = vector.load %arg8[%c0_56, %c0_57, %c0_58] : memref<1x4x128xf32, #tpu.memory_space<vmem>>, vector<1x4x128xf32>
    %111 = vector.shape_cast %110 : vector<1x4x128xf32> to vector<4x128xf32>
    %112 = vector.shape_cast %109 : vector<4x128xf32> to vector<1x4x128xf32>
    tpu.vector_store %arg8[%c0_56, %c0_57, %c0_58], %112 {strides = array<i32>} : memref<1x4x128xf32, #tpu.memory_space<vmem>>, vector<1x4x128xf32>,
    return
  }
  func.func @transform_0(%arg0: i32) -> (i32, i32, i32, i32) {
    %c0_i32 = arith.constant 0 : i32
    %c0_i32_0 = arith.constant 0 : i32
    %c0_i32_1 = arith.constant 0 : i32
    %c0_i32_2 = arith.constant 0 : i32
    return %arg0, %c0_i32, %c0_i32_0, %c0_i32_1 : i32, i32, i32, i32
  }
  func.func @transform_1(%arg0: i32) -> (i32, i32, i32) {
    %c0_i32 = arith.constant 0 : i32
    %c0_i32_0 = arith.constant 0 : i32
    %c0_i32_1 = arith.constant 0 : i32
    return %arg0, %c0_i32, %c0_i32_0 : i32, i32, i32
  }
  func.func @transform_2(%arg0: i32) -> (i32, i32, i32) {
    %c0_i32 = arith.constant 0 : i32
    %c0_i32_0 = arith.constant 0 : i32
    %c0_i32_1 = arith.constant 0 : i32
    return %arg0, %c0_i32, %c0_i32_0 : i32, i32, i32
  }
  func.func @transform_3(%arg0: i32) -> (i32, i32, i32) {
    %c0_i32 = arith.constant 0 : i32
    %c0_i32_0 = arith.constant 0 : i32
    %c0_i32_1 = arith.constant 0 : i32
    %c0_i32_2 = arith.constant 0 : i32
    return %c0_i32, %c0_i32_0, %c0_i32_1 : i32, i32, i32
  }
  func.func @transform_4(%arg0: i32) -> (i32, i32) {
    %c0_i32 = arith.constant 0 : i32
    %c0_i32_0 = arith.constant 0 : i32
    %c0_i32_1 = arith.constant 0 : i32
    return %c0_i32, %c0_i32_0 : i32, i32
  }
  func.func @transform_5(%arg0: i32) -> (i32, i32, i32, i32) {
    %c0_i32 = arith.constant 0 : i32
    %c0_i32_0 = arith.constant 0 : i32
    %c0_i32_1 = arith.constant 0 : i32
    %c0_i32_2 = arith.constant 0 : i32
    return %arg0, %c0_i32, %c0_i32_0, %c0_i32_1 : i32, i32, i32, i32
  }
  func.func @transform_6(%arg0: i32) -> (i32, i32, i32) {
    %c0_i32 = arith.constant 0 : i32
    %c0_i32_0 = arith.constant 0 : i32
    %c0_i32_1 = arith.constant 0 : i32
    return %arg0, %c0_i32, %c0_i32_0 : i32, i32, i32
  }
  func.func @transform_7(%arg0: i32) -> (i32, i32, i32) {
    %c0_i32 = arith.constant 0 : i32
    %c0_i32_0 = arith.constant 0 : i32
    %c0_i32_1 = arith.constant 0 : i32
    return %arg0, %c0_i32, %c0_i32_0 : i32, i32, i32
  }
}

module attributes {stable_mosaic.version = 11 : i64} {
  func.func @_stage2_kernel(%arg0: i32, %arg1: memref<1x18x18x128xf32, #tpu.memory_space<vmem>>, %arg2: memref<1x1x128xf32, #tpu.memory_space<vmem>>, %arg3: memref<1x1x128xf32, #tpu.memory_space<vmem>>, %arg4: memref<9x128x128xf32, #tpu.memory_space<vmem>>, %arg5: memref<1x256x128xf32, #tpu.memory_space<vmem>>, %arg6: memref<1x1x128xf32, #tpu.memory_space<vmem>>, %arg7: memref<1x1x128xf32, #tpu.memory_space<vmem>>, %arg8: memref<1x256x128xf32, #tpu.memory_space<vmem>>) attributes {dimension_semantics = [#tpu.dimension_semantics<parallel>], iteration_bounds = array<i64: 2>, scalar_prefetch = 0 : i64, scratch_operands = 0 : i64, tpu.core_type = #tpu.core_type<tc>, window_params = [{transform_indices = @transform_0, window_bounds = array<i64: 1, 18, 18, 128>}, {transform_indices = @transform_1, window_bounds = array<i64: 1, 1, 128>}, {transform_indices = @transform_2, window_bounds = array<i64: 1, 1, 128>}, {pipeline_mode = #tpu.pipeline_mode<synchronous>, transform_indices = @transform_3, window_bounds = array<i64: 9, 128, 128>}, {transform_indices = @transform_4, window_bounds = array<i64: 1, 256, 128>}, {pipeline_mode = #tpu.pipeline_mode<synchronous>, transform_indices = @transform_5, window_bounds = array<i64: 1, 1, 128>}, {pipeline_mode = #tpu.pipeline_mode<synchronous>, transform_indices = @transform_6, window_bounds = array<i64: 1, 1, 128>}, {transform_indices = @transform_7, window_bounds = array<i64: 1, 256, 128>}]} {
    %c0 = arith.constant 0 : index
    %c0_0 = arith.constant 0 : index
    %c0_1 = arith.constant 0 : index
    %c0_2 = arith.constant 0 : index
    %0 = vector.load %arg1[%c0, %c0_0, %c0_1, %c0_2] : memref<1x18x18x128xf32, #tpu.memory_space<vmem>>, vector<1x18x18x128xf32>
    %1 = vector.shape_cast %0 : vector<1x18x18x128xf32> to vector<18x18x128xf32>
    %c0_3 = arith.constant 0 : index
    %c0_4 = arith.constant 0 : index
    %c0_5 = arith.constant 0 : index
    %2 = vector.load %arg2[%c0_3, %c0_4, %c0_5] : memref<1x1x128xf32, #tpu.memory_space<vmem>>, vector<1x1x128xf32>
    %3 = vector.broadcast %2 : vector<1x1x128xf32> to vector<18x18x128xf32>
    %4 = arith.mulf %1, %3 : vector<18x18x128xf32>
    %c0_6 = arith.constant 0 : index
    %c0_7 = arith.constant 0 : index
    %c0_8 = arith.constant 0 : index
    %5 = vector.load %arg3[%c0_6, %c0_7, %c0_8] : memref<1x1x128xf32, #tpu.memory_space<vmem>>, vector<1x1x128xf32>
    %6 = vector.broadcast %5 : vector<1x1x128xf32> to vector<18x18x128xf32>
    %7 = arith.addf %4, %6 : vector<18x18x128xf32>
    %cst = arith.constant 0.000000e+00 : f32
    %8 = vector.broadcast %cst : f32 to vector<18x18x128xf32>
    %9 = arith.cmpf oge, %7, %8 : vector<18x18x128xf32>
    %cst_9 = arith.constant 0.00999999977 : f32
    %10 = vector.broadcast %cst_9 : f32 to vector<18x18x128xf32>
    %11 = arith.mulf %10, %7 : vector<18x18x128xf32>
    %12 = arith.select %9, %7, %11 : vector<18x18x128xi1>, vector<18x18x128xf32>
    %13 = tpu.iota {dimensions = array<i32: 0>} : vector<18x18xi32>
    %14 = tpu.iota {dimensions = array<i32: 1>} : vector<18x18xi32>
    %c1_i32 = arith.constant 1 : i32
    %15 = vector.broadcast %c1_i32 : i32 to vector<18x18xi32>
    %16 = arith.cmpi sge, %13, %15 : vector<18x18xi32>
    %c16_i32 = arith.constant 16 : i32
    %17 = vector.broadcast %c16_i32 : i32 to vector<18x18xi32>
    %18 = arith.cmpi sle, %13, %17 : vector<18x18xi32>
    %19 = arith.andi %16, %18 : vector<18x18xi1>
    %c1_i32_10 = arith.constant 1 : i32
    %20 = vector.broadcast %c1_i32_10 : i32 to vector<18x18xi32>
    %21 = arith.cmpi sge, %14, %20 : vector<18x18xi32>
    %22 = arith.andi %19, %21 : vector<18x18xi1>
    %c16_i32_11 = arith.constant 16 : i32
    %23 = vector.broadcast %c16_i32_11 : i32 to vector<18x18xi32>
    %24 = arith.cmpi sle, %14, %23 : vector<18x18xi32>
    %25 = arith.andi %22, %24 : vector<18x18xi1>
    %26 = arith.extui %25 : vector<18x18xi1> to vector<18x18xi32>
    %27 = arith.sitofp %26 : vector<18x18xi32> to vector<18x18xf32>
    %28 = vector.shape_cast %27 : vector<18x18xf32> to vector<18x18x1xf32>
    %29 = vector.broadcast %28 : vector<18x18x1xf32> to vector<18x18x128xf32>
    %30 = arith.mulf %12, %29 : vector<18x18x128xf32>
    %c0_12 = arith.constant 0 : index
    %c0_13 = arith.constant 0 : index
    %c0_14 = arith.constant 0 : index
    %31 = vector.load %arg5[%c0_12, %c0_13, %c0_14] : memref<1x256x128xf32, #tpu.memory_space<vmem>>, vector<1x256x128xf32>
    %32 = vector.shape_cast %31 : vector<1x256x128xf32> to vector<256x128xf32>
    %c0_15 = arith.constant 0 : index
    %c0_16 = arith.constant 0 : index
    %c0_17 = arith.constant 0 : index
    %33 = vector.load %arg6[%c0_15, %c0_16, %c0_17] : memref<1x1x128xf32, #tpu.memory_space<vmem>>, vector<1x1x128xf32>
    %34 = vector.shape_cast %33 : vector<1x1x128xf32> to vector<1x128xf32>
    %35 = vector.broadcast %34 : vector<1x128xf32> to vector<256x128xf32>
    %36 = arith.mulf %32, %35 : vector<256x128xf32>
    %c0_18 = arith.constant 0 : index
    %c0_19 = arith.constant 0 : index
    %c0_20 = arith.constant 0 : index
    %37 = vector.load %arg7[%c0_18, %c0_19, %c0_20] : memref<1x1x128xf32, #tpu.memory_space<vmem>>, vector<1x1x128xf32>
    %38 = vector.shape_cast %37 : vector<1x1x128xf32> to vector<1x128xf32>
    %39 = vector.broadcast %38 : vector<1x128xf32> to vector<256x128xf32>
    %40 = arith.addf %36, %39 : vector<256x128xf32>
    %cst_21 = arith.constant 0.000000e+00 : f32
    %41 = vector.broadcast %cst_21 : f32 to vector<256x128xf32>
    %42 = arith.cmpf oge, %40, %41 : vector<256x128xf32>
    %cst_22 = arith.constant 0.00999999977 : f32
    %43 = vector.broadcast %cst_22 : f32 to vector<256x128xf32>
    %44 = arith.mulf %43, %40 : vector<256x128xf32>
    %45 = arith.select %42, %40, %44 : vector<256x128xi1>, vector<256x128xf32>
    %46 = vector.extract_strided_slice %30 {offsets = [0, 0, 0], sizes = [16, 16, 128], strides = [1, 1, 1]} : vector<18x18x128xf32> to vector<16x16x128xf32>
    %47 = vector.shape_cast %46 : vector<16x16x128xf32> to vector<256x128xf32>
    %c0_23 = arith.constant 0 : index
    %c0_24 = arith.constant 0 : index
    %c0_25 = arith.constant 0 : index
    %48 = vector.load %arg4[%c0_23, %c0_24, %c0_25] : memref<9x128x128xf32, #tpu.memory_space<vmem>>, vector<1x128x128xf32>
    %49 = vector.shape_cast %48 : vector<1x128x128xf32> to vector<128x128xf32>
    %cst_26 = arith.constant dense<0.000000e+00> : vector<256x128xf32>
    %50 = tpu.matmul %47, %49, %cst_26 {dimension_numbers = #tpu.dot_dimension_numbers<[1], [0], [0], [1], [0, 0, 1, 1], [], []>} : vector<256x128xf32>, vector<128x128xf32>, vector<256x128xf32> -> vector<256x128xf32>
    %51 = arith.addf %45, %50 : vector<256x128xf32>
    %52 = vector.extract_strided_slice %30 {offsets = [0, 1, 0], sizes = [16, 16, 128], strides = [1, 1, 1]} : vector<18x18x128xf32> to vector<16x16x128xf32>
    %53 = vector.shape_cast %52 : vector<16x16x128xf32> to vector<256x128xf32>
    %c1 = arith.constant 1 : index
    %c0_27 = arith.constant 0 : index
    %c0_28 = arith.constant 0 : index
    %54 = vector.load %arg4[%c1, %c0_27, %c0_28] : memref<9x128x128xf32, #tpu.memory_space<vmem>>, vector<1x128x128xf32>
    %55 = vector.shape_cast %54 : vector<1x128x128xf32> to vector<128x128xf32>
    %cst_29 = arith.constant dense<0.000000e+00> : vector<256x128xf32>
    %56 = tpu.matmul %53, %55, %cst_29 {dimension_numbers = #tpu.dot_dimension_numbers<[1], [0], [0], [1], [0, 0, 1, 1], [], []>} : vector<256x128xf32>, vector<128x128xf32>, vector<256x128xf32> -> vector<256x128xf32>
    %57 = arith.addf %51, %56 : vector<256x128xf32>
    %58 = vector.extract_strided_slice %30 {offsets = [0, 2, 0], sizes = [16, 16, 128], strides = [1, 1, 1]} : vector<18x18x128xf32> to vector<16x16x128xf32>
    %59 = vector.shape_cast %58 : vector<16x16x128xf32> to vector<256x128xf32>
    %c2 = arith.constant 2 : index
    %c0_30 = arith.constant 0 : index
    %c0_31 = arith.constant 0 : index
    %60 = vector.load %arg4[%c2, %c0_30, %c0_31] : memref<9x128x128xf32, #tpu.memory_space<vmem>>, vector<1x128x128xf32>
    %61 = vector.shape_cast %60 : vector<1x128x128xf32> to vector<128x128xf32>
    %cst_32 = arith.constant dense<0.000000e+00> : vector<256x128xf32>
    %62 = tpu.matmul %59, %61, %cst_32 {dimension_numbers = #tpu.dot_dimension_numbers<[1], [0], [0], [1], [0, 0, 1, 1], [], []>} : vector<256x128xf32>, vector<128x128xf32>, vector<256x128xf32> -> vector<256x128xf32>
    %63 = arith.addf %57, %62 : vector<256x128xf32>
    %64 = vector.extract_strided_slice %30 {offsets = [1, 0, 0], sizes = [16, 16, 128], strides = [1, 1, 1]} : vector<18x18x128xf32> to vector<16x16x128xf32>
    %65 = vector.shape_cast %64 : vector<16x16x128xf32> to vector<256x128xf32>
    %c3 = arith.constant 3 : index
    %c0_33 = arith.constant 0 : index
    %c0_34 = arith.constant 0 : index
    %66 = vector.load %arg4[%c3, %c0_33, %c0_34] : memref<9x128x128xf32, #tpu.memory_space<vmem>>, vector<1x128x128xf32>
    %67 = vector.shape_cast %66 : vector<1x128x128xf32> to vector<128x128xf32>
    %cst_35 = arith.constant dense<0.000000e+00> : vector<256x128xf32>
    %68 = tpu.matmul %65, %67, %cst_35 {dimension_numbers = #tpu.dot_dimension_numbers<[1], [0], [0], [1], [0, 0, 1, 1], [], []>} : vector<256x128xf32>, vector<128x128xf32>, vector<256x128xf32> -> vector<256x128xf32>
    %69 = arith.addf %63, %68 : vector<256x128xf32>
    %70 = vector.extract_strided_slice %30 {offsets = [1, 1, 0], sizes = [16, 16, 128], strides = [1, 1, 1]} : vector<18x18x128xf32> to vector<16x16x128xf32>
    %71 = vector.shape_cast %70 : vector<16x16x128xf32> to vector<256x128xf32>
    %c4 = arith.constant 4 : index
    %c0_36 = arith.constant 0 : index
    %c0_37 = arith.constant 0 : index
    %72 = vector.load %arg4[%c4, %c0_36, %c0_37] : memref<9x128x128xf32, #tpu.memory_space<vmem>>, vector<1x128x128xf32>
    %73 = vector.shape_cast %72 : vector<1x128x128xf32> to vector<128x128xf32>
    %cst_38 = arith.constant dense<0.000000e+00> : vector<256x128xf32>
    %74 = tpu.matmul %71, %73, %cst_38 {dimension_numbers = #tpu.dot_dimension_numbers<[1], [0], [0], [1], [0, 0, 1, 1], [], []>} : vector<256x128xf32>, vector<128x128xf32>, vector<256x128xf32> -> vector<256x128xf32>
    %75 = arith.addf %69, %74 : vector<256x128xf32>
    %76 = vector.extract_strided_slice %30 {offsets = [1, 2, 0], sizes = [16, 16, 128], strides = [1, 1, 1]} : vector<18x18x128xf32> to vector<16x16x128xf32>
    %77 = vector.shape_cast %76 : vector<16x16x128xf32> to vector<256x128xf32>
    %c5 = arith.constant 5 : index
    %c0_39 = arith.constant 0 : index
    %c0_40 = arith.constant 0 : index
    %78 = vector.load %arg4[%c5, %c0_39, %c0_40] : memref<9x128x128xf32, #tpu.memory_space<vmem>>, vector<1x128x128xf32>
    %79 = vector.shape_cast %78 : vector<1x128x128xf32> to vector<128x128xf32>
    %cst_41 = arith.constant dense<0.000000e+00> : vector<256x128xf32>
    %80 = tpu.matmul %77, %79, %cst_41 {dimension_numbers = #tpu.dot_dimension_numbers<[1], [0], [0], [1], [0, 0, 1, 1], [], []>} : vector<256x128xf32>, vector<128x128xf32>, vector<256x128xf32> -> vector<256x128xf32>
    %81 = arith.addf %75, %80 : vector<256x128xf32>
    %82 = vector.extract_strided_slice %30 {offsets = [2, 0, 0], sizes = [16, 16, 128], strides = [1, 1, 1]} : vector<18x18x128xf32> to vector<16x16x128xf32>
    %83 = vector.shape_cast %82 : vector<16x16x128xf32> to vector<256x128xf32>
    %c6 = arith.constant 6 : index
    %c0_42 = arith.constant 0 : index
    %c0_43 = arith.constant 0 : index
    %84 = vector.load %arg4[%c6, %c0_42, %c0_43] : memref<9x128x128xf32, #tpu.memory_space<vmem>>, vector<1x128x128xf32>
    %85 = vector.shape_cast %84 : vector<1x128x128xf32> to vector<128x128xf32>
    %cst_44 = arith.constant dense<0.000000e+00> : vector<256x128xf32>
    %86 = tpu.matmul %83, %85, %cst_44 {dimension_numbers = #tpu.dot_dimension_numbers<[1], [0], [0], [1], [0, 0, 1, 1], [], []>} : vector<256x128xf32>, vector<128x128xf32>, vector<256x128xf32> -> vector<256x128xf32>
    %87 = arith.addf %81, %86 : vector<256x128xf32>
    %88 = vector.extract_strided_slice %30 {offsets = [2, 1, 0], sizes = [16, 16, 128], strides = [1, 1, 1]} : vector<18x18x128xf32> to vector<16x16x128xf32>
    %89 = vector.shape_cast %88 : vector<16x16x128xf32> to vector<256x128xf32>
    %c7 = arith.constant 7 : index
    %c0_45 = arith.constant 0 : index
    %c0_46 = arith.constant 0 : index
    %90 = vector.load %arg4[%c7, %c0_45, %c0_46] : memref<9x128x128xf32, #tpu.memory_space<vmem>>, vector<1x128x128xf32>
    %91 = vector.shape_cast %90 : vector<1x128x128xf32> to vector<128x128xf32>
    %cst_47 = arith.constant dense<0.000000e+00> : vector<256x128xf32>
    %92 = tpu.matmul %89, %91, %cst_47 {dimension_numbers = #tpu.dot_dimension_numbers<[1], [0], [0], [1], [0, 0, 1, 1], [], []>} : vector<256x128xf32>, vector<128x128xf32>, vector<256x128xf32> -> vector<256x128xf32>
    %93 = arith.addf %87, %92 : vector<256x128xf32>
    %94 = vector.extract_strided_slice %30 {offsets = [2, 2, 0], sizes = [16, 16, 128], strides = [1, 1, 1]} : vector<18x18x128xf32> to vector<16x16x128xf32>
    %95 = vector.shape_cast %94 : vector<16x16x128xf32> to vector<256x128xf32>
    %c8 = arith.constant 8 : index
    %c0_48 = arith.constant 0 : index
    %c0_49 = arith.constant 0 : index
    %96 = vector.load %arg4[%c8, %c0_48, %c0_49] : memref<9x128x128xf32, #tpu.memory_space<vmem>>, vector<1x128x128xf32>
    %97 = vector.shape_cast %96 : vector<1x128x128xf32> to vector<128x128xf32>
    %cst_50 = arith.constant dense<0.000000e+00> : vector<256x128xf32>
    %98 = tpu.matmul %95, %97, %cst_50 {dimension_numbers = #tpu.dot_dimension_numbers<[1], [0], [0], [1], [0, 0, 1, 1], [], []>} : vector<256x128xf32>, vector<128x128xf32>, vector<256x128xf32> -> vector<256x128xf32>
    %99 = arith.addf %93, %98 : vector<256x128xf32>
    %c0_51 = arith.constant 0 : index
    %c0_52 = arith.constant 0 : index
    %c0_53 = arith.constant 0 : index
    %100 = vector.load %arg8[%c0_51, %c0_52, %c0_53] : memref<1x256x128xf32, #tpu.memory_space<vmem>>, vector<1x256x128xf32>
    %101 = vector.shape_cast %100 : vector<1x256x128xf32> to vector<256x128xf32>
    %102 = vector.shape_cast %99 : vector<256x128xf32> to vector<1x256x128xf32>
    tpu.vector_store %arg8[%c0_51, %c0_52, %c0_53], %102 {strides = array<i32>} : memref<1x256x128xf32, #tpu.memory_space<vmem>>, vector<1x256x128xf32>,
    return
  }
  func.func @transform_0(%arg0: i32) -> (i32, i32, i32, i32) {
    %c0_i32 = arith.constant 0 : i32
    %c0_i32_0 = arith.constant 0 : i32
    %c0_i32_1 = arith.constant 0 : i32
    %c0_i32_2 = arith.constant 0 : i32
    return %arg0, %c0_i32, %c0_i32_0, %c0_i32_1 : i32, i32, i32, i32
  }
  func.func @transform_1(%arg0: i32) -> (i32, i32, i32) {
    %c0_i32 = arith.constant 0 : i32
    %c0_i32_0 = arith.constant 0 : i32
    %c0_i32_1 = arith.constant 0 : i32
    return %arg0, %c0_i32, %c0_i32_0 : i32, i32, i32
  }
  func.func @transform_2(%arg0: i32) -> (i32, i32, i32) {
    %c0_i32 = arith.constant 0 : i32
    %c0_i32_0 = arith.constant 0 : i32
    %c0_i32_1 = arith.constant 0 : i32
    return %arg0, %c0_i32, %c0_i32_0 : i32, i32, i32
  }
  func.func @transform_3(%arg0: i32) -> (i32, i32, i32) {
    %c0_i32 = arith.constant 0 : i32
    %c0_i32_0 = arith.constant 0 : i32
    %c0_i32_1 = arith.constant 0 : i32
    %c0_i32_2 = arith.constant 0 : i32
    return %c0_i32, %c0_i32_0, %c0_i32_1 : i32, i32, i32
  }
  func.func @transform_4(%arg0: i32) -> (i32, i32, i32) {
    %c0_i32 = arith.constant 0 : i32
    %c0_i32_0 = arith.constant 0 : i32
    %c0_i32_1 = arith.constant 0 : i32
    return %arg0, %c0_i32, %c0_i32_0 : i32, i32, i32
  }
  func.func @transform_5(%arg0: i32) -> (i32, i32, i32) {
    %c0_i32 = arith.constant 0 : i32
    %c0_i32_0 = arith.constant 0 : i32
    %c0_i32_1 = arith.constant 0 : i32
    %c0_i32_2 = arith.constant 0 : i32
    return %c0_i32, %c0_i32_0, %c0_i32_1 : i32, i32, i32
  }
  func.func @transform_6(%arg0: i32) -> (i32, i32, i32) {
    %c0_i32 = arith.constant 0 : i32
    %c0_i32_0 = arith.constant 0 : i32
    %c0_i32_1 = arith.constant 0 : i32
    %c0_i32_2 = arith.constant 0 : i32
    return %c0_i32, %c0_i32_0, %c0_i32_1 : i32, i32, i32
  }
  func.func @transform_7(%arg0: i32) -> (i32, i32, i32) {
    %c0_i32 = arith.constant 0 : i32
    %c0_i32_0 = arith.constant 0 : i32
    %c0_i32_1 = arith.constant 0 : i32
    return %arg0, %c0_i32, %c0_i32_0 : i32, i32, i32
  }
}

</mosaic_0001>

<bundles_post_ra>
// kernel: tile.58
= control target key start
LH: loop header
LB: loop body
LE: loop exit
PB: predicated region body
PF: predicated region fallthrough
CT: control target
= control target key end

     0   :  { %s28_s0 = inlined_call_operand.vmem [shape: f32[8], index: 0, kind: input, shape index: {}]   ;;  %s29_s1 = inlined_call_operand.vmem [shape: f32[16,8], index: 1, kind: output, shape index: {}]  }
   0x1   :  { %v4_v0 = vld [vmem:[%s28_s0] ss:$0 sm:$0xff] }
   0x2   :  { %5 = vst [vmem:[%s29_s1] sm:$0xff] %v4_v0  ;;  %8 = vst [vmem:[%s29_s1 + $0x8] sm:$0xff] %v4_v0 }

// kernel: tile.59
= control target key start
LH: loop header
LB: loop body
LE: loop exit
PB: predicated region body
PF: predicated region fallthrough
CT: control target
= control target key end

     0   :  { %s131_s10 = smov 120   ;;  %s132_s11 = smov 104   ;;  %vm3_vm0 = vcmask 64512   ;;  %vm9_vm1 = vcmask 1048512   ;;  %vm15_vm2 = vcmask 982912   ;;  %vm21_vm3 = vcmask 917312   ;;  %s207_s0 = inlined_call_operand.vmem [shape: f32[16,8], index: 0, kind: input, shape index: {}]   ;;  %s208_s1 = inlined_call_operand.vmem [shape: f32[1,1,128], index: 1, kind: output, shape index: {}]  }
   0x1   :  { %v101_v0 = vld [vmem:[%s207_s0 + $0xf] sm:$0x1]   ;;  %v103_v1 = vld [vmem:[%s207_s0 + $0xd] sm:$0x1]   ;;  %v102_v2 = vld [vmem:[%s207_s0 + $0xe] sm:$0x1]  }
   0x2   :  { %7 = vrot.lane.b32.xlu0 %v101_v0, %s131_s10  ;;  %19 = vrot.lane.b32.xlu1 %v103_v1, %s132_s11  ;;  %v104_v3 = vld [vmem:[%s207_s0 + $0xc] sm:$0x1]   ;;  %s133_s16 = smov 112   ;;  %s134_s17 = smov 96   ;;  %v105_v4 = vld [vmem:[%s207_s0 + $0xb] sm:$0x1]  }
   0x3   :  { %v106_v5 = vld [vmem:[%s207_s0 + $0xa] sm:$0x1]   ;;  %v2_v6 = vld [vmem:[%s207_s0] sm:$0x1]   ;;  %s135_s24 = smov 88   ;;  %s136_s25 = smov 80  }
   0x4   :  { %4 = vst.msk [vmem:[#allocation0] sm:$0x1] %vm3_vm0, %v2_v6   ;;  %v107_v7 = vld [vmem:[%s207_s0 + $0x9] sm:$0x1]   ;;  %v108_v8 = vld [vmem:[%s207_s0 + $0x8] sm:$0x1]  }
   0x5   :  { %s137_s30 = smov 72   ;;  %s138_s2 = smov 64   ;;  %v109_v9 = vld [vmem:[%s207_s0 + $0x7] sm:$0x1]   ;;  %v110_v10 = vld [vmem:[%s207_s0 + $0x6] sm:$0x1]  }
   0x6   :  { %13 = vrot.lane.b32.xlu0 %v102_v2, %s133_s16  ;;  %25 = vrot.lane.b32.xlu1 %v104_v3, %s134_s17  ;;  %s139_s7 = smov 56   ;;  %s140_s8 = smov 48   ;;  %v111_v11 = vld [vmem:[%s207_s0 + $0x5] sm:$0x1]   ;;  %v112_v12 = vld [vmem:[%s207_s0 + $0x4] sm:$0x1]  }
   0x7   :  { %s141_s13 = smov 40   ;;  %s142_s14 = smov 32   ;;  %v113_v13 = vld [vmem:[%s207_s0 + $0x3] sm:$0x1]   ;;  %v114_v14 = vld [vmem:[%s207_s0 + $0x2] sm:$0x1]  }
   0x8   :  { %s143_s19 = smov 24   ;;  %s144_s20 = smov 16   ;;  %v115_v15 = vld [vmem:[%s207_s0 + $0x1] sm:$0x1]   ;;  %vm27_vm4 = vcmask 851712   ;;  %vm33_vm5 = vcmask 786112  }
   0x9   :  { %s145_s0 = smov 8   ;;  %vm39_vm6 = vcmask 720512   ;;  %vm45_vm7 = vcmask 654912   ;;  %vm51_vm8 = vcmask 589312   ;;  %vm57_vm9 = vcmask 523712  }
   0xa   :  { %31 = vrot.lane.b32.xlu0 %v105_v4, %s135_s24  ;;  %37 = vrot.lane.b32.xlu1 %v106_v5, %s136_s25  ;;  %vm63_vm10 = vcmask 458112   ;;  %vm69_vm11 = vcmask 392512   ;;  %vm75_vm12 = vcmask 326912   ;;  %vm81_vm13 = vcmask 261312  }
   0xb   :  { %vm87_vm14 = vcmask 195712   ;;  %vm93_vm15 = vcmask 130112  }
   0xe   :  { %43 = vrot.lane.b32.xlu0 %v107_v7, %s137_s30  ;;  %49 = vrot.lane.b32.xlu1 %v108_v8, %s138_s2 }
  0x12   :  { %55 = vrot.lane.b32.xlu0 %v109_v9, %s139_s7  ;;  %61 = vrot.lane.b32.xlu1 %v110_v10, %s140_s8 }
  0x16   :  { %67 = vrot.lane.b32.xlu0 %v111_v11, %s141_s13  ;;  %73 = vrot.lane.b32.xlu1 %v112_v12, %s142_s14 }
  0x1a   :  { %79 = vrot.lane.b32.xlu0 %v113_v13, %s143_s19  ;;  %85 = vrot.lane.b32.xlu1 %v114_v14, %s144_s20 }
  0x1e   :  { %91 = vrot.lane.b32.xlu0 %v115_v15, %s145_s0 }
  0x74   :  { %v8_v16 = vpop.permute.xlu0 %7   ;;  %v20_v17 = vpop.permute.xlu1 %19  }
  0x75   :  { %10 = vst.msk [vmem:[#allocation0] sm:$0x1] %vm9_vm1, %v8_v16  }
  0x78   :  { %v14_v18 = vpop.permute.xlu0 %13   ;;  %v26_v19 = vpop.permute.xlu1 %25  }
  0x79   :  { %16 = vst.msk [vmem:[#allocation0] sm:$0x1] %vm15_vm2, %v14_v18  }
  0x7a   :  { %22 = vst.msk [vmem:[#allocation0] sm:$0x1] %vm21_vm3, %v20_v17  }
  0x7b   :  { %28 = vst.msk [vmem:[#allocation0] sm:$0x1] %vm27_vm4, %v26_v19  }
  0x7c   :  { %v32_v20 = vpop.permute.xlu0 %31   ;;  %v38_v21 = vpop.permute.xlu1 %37  }
  0x7d   :  { %34 = vst.msk [vmem:[#allocation0] sm:$0x1] %vm33_vm5, %v32_v20  }
  0x7e   :  { %40 = vst.msk [vmem:[#allocation0] sm:$0x1] %vm39_vm6, %v38_v21  }
  0x80   :  { %v44_v22 = vpop.permute.xlu0 %43   ;;  %v50_v23 = vpop.permute.xlu1 %49  }
  0x81   :  { %46 = vst.msk [vmem:[#allocation0] sm:$0x1] %vm45_vm7, %v44_v22  }
  0x82   :  { %52 = vst.msk [vmem:[#allocation0] sm:$0x1] %vm51_vm8, %v50_v23  }
  0x84   :  { %v56_v24 = vpop.permute.xlu0 %55   ;;  %v62_v25 = vpop.permute.xlu1 %61  }
  0x85   :  { %58 = vst.msk [vmem:[#allocation0] sm:$0x1] %vm57_vm9, %v56_v24  }
  0x86   :  { %64 = vst.msk [vmem:[#allocation0] sm:$0x1] %vm63_vm10, %v62_v25  }
  0x88   :  { %v68_v26 = vpop.permute.xlu0 %67   ;;  %v74_v27 = vpop.permute.xlu1 %73  }
  0x89   :  { %70 = vst.msk [vmem:[#allocation0] sm:$0x1] %vm69_vm11, %v68_v26  }
  0x8a   :  { %76 = vst.msk [vmem:[#allocation0] sm:$0x1] %vm75_vm12, %v74_v27  }
  0x8c   :  { %v80_v28 = vpop.permute.xlu0 %79   ;;  %v86_v29 = vpop.permute.xlu1 %85  }
  0x8d   :  { %82 = vst.msk [vmem:[#allocation0] sm:$0x1] %vm81_vm13, %v80_v28  }
  0x8e   :  { %88 = vst.msk [vmem:[#allocation0] sm:$0x1] %vm87_vm14, %v86_v29  }
  0x90   :  { %v92_v30 = vpop.permute.xlu0 %91  }
  0x91   :  { %94 = vst.msk [vmem:[#allocation0] sm:$0x1] %vm93_vm15, %v92_v30  }
  0x98   :  { %v98_v31 = vld [vmem:[#allocation0] sm:$0x1] }
  0x99   :  { %100 = vst [vmem:[%s208_s1] sm:$0x1] %v98_v31 }

// kernel: preact_resblock_up.2
= control target key start
LH: loop header
LB: loop body
LE: loop exit
PB: predicated region body
PF: predicated region fallthrough
CT: control target
= control target key end

     0   :  { %s6797_s24 = smov 0   ;;  %s8811_s0 = inlined_call_operand.vmem [shape: f32[2,18,18,64], index: 0, kind: input, shape index: {}]   ;;  %s8812_s1 = inlined_call_operand.vmem [shape: f32[2,1,64], index: 1, kind: input, shape index: {}]   ;;  %s8813_s2 = inlined_call_operand.vmem [shape: f32[2,1,64], index: 2, kind: input, shape index: {}]   ;;  %s8814_s3 = inlined_call_operand.vmem [shape: f32[9,64,128], index: 3, kind: input, shape index: {}]   ;;  %s8815_s4 = inlined_call_operand.vmem [shape: f32[64,128], index: 4, kind: input, shape index: {}]   ;;  %s8816_s5 = inlined_call_operand.vmem [shape: f32[2,18,18,128], index: 5, kind: output, shape index: {0}]   ;;  %s8817_s6 = inlined_call_operand.vmem [shape: f32[2,256,128], index: 6, kind: output, shape index: {1}]   ;;  %s8818_s7 = inlined_call_operand.vmem [shape: f32[2,4,128], index: 7, kind: output, shape index: {2}]  }
   0x1 LB: > { %s4830_s25 = sadd.s32 4294967295, %s6754_s24   ;;  %p4834_p0 = scmp.ge.s32.totalorder %s6754_s24, 1  ;;  %s6754_s24 = sphi %s6797_s24, %s18_s24  }
   0x2   : > { %p258_p1 = scmp.lt.s32.totalorder %s6754_s24, 3 }
   0x4   : > { %p259_p2 = pnand %p4834_p0, %p258_p1 }
   0x6   : > { %262 = sbr.rel (%p259_p2) target bundleno = 748 (0x2ec), region = 40 }
   0xd   : > { %v668_v0 = vlaneseq  ;;  %p305_p3 = scmp.lt.s32.totalorder %s4830_s25, 1  ;;  %v4997_v1 = vld [vmem:[%s8814_s3 + $0x100] sm:$0xff]  ;;  %v4998_v2 = vld [vmem:[%s8814_s3 + $0x108] sm:$0xff]  ;;  %v4999_v3 = vld [vmem:[%s8814_s3 + $0x110] sm:$0xff]  ;;  %v6756_v22 = vmov 0.0   ;;  %vm1077_vm13 = vcmask 1046528  }
   0xe   : > { %v6336_v4 = vpack.c.bf16 %v4998_v2, %v4997_v1  ;;  %v5000_v5 = vld [vmem:[%s8814_s3 + $0x118] sm:$0xff]  ;;  %v4845_v6 = vld [vmem:[%s8814_s3 + $0x40] sm:$0xff]  ;;  %v4846_v7 = vld [vmem:[%s8814_s3 + $0x48] sm:$0xff]  ;;  %vm1167_vm14 = vcmask 523264  }
   0xf   : > { %v6823_v8 = vshrl.u32 %v668_v0, 7  ;;  %v6825_v9 = vand.u32 127, %v668_v0  ;;  %s9026_s25 = smov (!%p305_p3, %s4830_s25), 1  ;;  %v6340_v10 = vpack.c.bf16 %v5000_v5, %v4999_v3  ;;  %v6272_v11 = vpack.c.bf16 %v4846_v7, %v4845_v6  ;;  %v5001_v12 = vld [vmem:[%s8814_s3 + $0x120] sm:$0xff]  ;;  %v5002_v13 = vld [vmem:[%s8814_s3 + $0x128] sm:$0xff]  ;;  %v4847_v14 = vld [vmem:[%s8814_s3 + $0x50] sm:$0xff] }
  0x10   : > { %6337 = vmatprep.subr.bf16.mxu0 %v6336_v4  ;;  %s6688_s21 = smul.u32 432, %s9026_s25  ;;  %v4848_v16 = vld [vmem:[%s8814_s3 + $0x58] sm:$0xff]  ;;  %v6344_v17 = vpack.c.bf16 %v5002_v13, %v5001_v12  ;;  %v5003_v20 = vld [vmem:[%s8814_s3 + $0x130] sm:$0xff]  ;;  %v4849_v30 = vld [vmem:[%s8814_s3 + $0x60] sm:$0xff]  ;;  %s6963_s12 = scalar_lea.vmem %s8812_s1, %s9026_s25 }
  0x11   : > { %vm674_vm0 = vcmp.ge.s32.totalorder %v6823_v8, 1  ;;  %vm683_vm1 = vcmp.ge.s32.totalorder %v6825_v9, 1  ;;  %vm687_vm2 = vcmp.le.s32.totalorder %v6825_v9, 16  ;;  %v6842_v15 = vsub.s32 1, %v6823_v8  ;;  %6339 = vmatpush3.bf16.msra.mxu0 %v6336_v4  ;;  %6273 = vmatprep.subr.bf16.mxu1 %v6272_v11  ;;  %v5004_v21 = vld [vmem:[%s8814_s3 + $0x138] sm:$0xff]  ;;  %v4850_v31 = vld [vmem:[%s8814_s3 + $0x68] sm:$0xff]  ;;  %s6977_s14 = scalar_lea.vmem %s8813_s2, %s9026_s25 }
  0x12   : > { %vm684_vm3 = vmand %vm674_vm0, %vm683_vm1  ;;  %6341 = vmatprep.subr.bf16.mxu0 %v6340_v10  ;;  %6275 = vmatpush3.bf16.msra.mxu1 %v6272_v11  ;;  %s6857_s28 = scalar_lea.vmem %s8816_s5, %s6688_s21  ;;  %v6860_v18 = vsub.s32 0, %v6823_v8  ;;  %v671_v19 = vadd.s32 16, %v6823_v8  ;;  %v6276_v24 = vpack.c.bf16 %v4848_v16, %v4847_v14  ;;  %v6348_v26 = vpack.c.bf16 %v5004_v21, %v5003_v20  ;;  %v4851_v36 = vld [vmem:[%s8814_s3 + $0x70] sm:$0xff]  ;;  %v4852_v37 = vld [vmem:[%s8814_s3 + $0x78] sm:$0xff]  ;;  %s6957_s9 = scalar_lea.vmem %s8811_s0, %s6688_s21 }
  0x13   : > { %vm688_vm4 = vmand %vm684_vm3, %vm687_vm2  ;;  %4389 = vst [vmem:[%s6857_s28] sm:$0xff] %v6756_v22  ;;  %v729_v28 = vsub.s32 2, %v6823_v8  ;;  %v6280_v34 = vpack.c.bf16 %v4850_v31, %v4849_v30  ;;  %v744_v35 = vsub.s32 3, %v6823_v8  ;;  %v6284_v39 = vpack.c.bf16 %v4852_v37, %v4851_v36  ;;  %v5037_v47 = vld [vmem:[%s8814_s3 + $0x140] sm:$0xff]  ;;  %v5038_v48 = vld [vmem:[%s8814_s3 + $0x148] sm:$0xff] }
  0x14   : > { %v6870_v23 = vsel %vm688_vm4, 1.0, %v6756_v22  ;;  %4390 = vst [vmem:[%s6857_s28 + $0x8] sm:$0xff] %v6756_v22  ;;  %4391 = vst [vmem:[%s6857_s28 + $0x10] sm:$0x3] %v6756_v22  ;;  %vm679_vm5 = vcmp.le.s32.totalorder %v671_v19, 16  ;;  %6277 = vmatprep.subr.bf16.mxu1 %v6276_v24  ;;  %v759_v40 = vsub.s32 4, %v6823_v8  ;;  %v6930_v49 = vpack.c.bf16 %v5038_v48, %v5037_v47 }
  0x15   : > { %4440 = vst [vmem:[%s6857_s28 + $0x198] sm:$0xff] %v6756_v22  ;;  %4441 = vst [vmem:[%s6857_s28 + $0x1a0] sm:$0xff] %v6756_v22  ;;  %v715_v25 = vrot.slane %v6870_v23, %v6842_v15  ;;  %6343 = vmatpush3.bf16.msra.mxu0 %v6340_v10  ;;  %v700_v27 = vrot.slane %v6870_v23, %v6860_v18  ;;  %v730_v32 = vrot.slane %v6870_v23, %v729_v28  ;;  %v1021_v50 = vld [vmem:[%s8814_s3] sm:$0xff]  ;;  %v1022_v51 = vld [vmem:[%s8814_s3 + $0x8] sm:$0xff] }
  0x16   : > { %4442 = vst [vmem:[%s6857_s28 + $0x1a8] sm:$0x3] %v6756_v22  ;;  %6345 = vmatprep.subr.bf16.mxu0 %v6344_v17  ;;  %vm686_vm6 = vmand %vm679_vm5, %vm683_vm1  ;;  %6279 = vmatpush3.bf16.msra.mxu1 %v6276_v24  ;;  %v745_v38 = vrot.slane %v6870_v23, %v744_v35  ;;  %v760_v41 = vrot.slane %v6870_v23, %v759_v40  ;;  %v774_v42 = vsub.s32 5, %v6823_v8  ;;  %v789_v44 = vsub.s32 6, %v6823_v8  ;;  %v335_v63 = vld [vmem:[%s6957_s9 + $0x28] sm:$0x3] }
  0x17   : > { %725 = vbcast.lane.b32.xlu1 %v715_v25, 272  ;;  %717 = vbcast.lane.b32.xlu0 %v715_v25, 256  ;;  %vm690_vm7 = vmand %vm686_vm6, %vm687_vm2  ;;  %v804_v46 = vsub.s32 7, %v6823_v8  ;;  %v6940_v53 = vpack.c.bf16 %v1022_v51, %v1021_v50  ;;  %v6969_v0 = vld [vmem:[%s6963_s12] ss:$0 sm:$0xff]  ;;  %v333_v3 = vld [vmem:[%s6957_s9 + $0x18] sm:$0xff] }
  0x18   : > { %v6894_v29 = vsel %vm690_vm7, 1.0, %v6756_v22  ;;  %6281 = vmatprep.subr.bf16.mxu1 %v6280_v34  ;;  %v775_v43 = vrot.slane %v6870_v23, %v774_v42  ;;  %v790_v45 = vrot.slane %v6870_v23, %v789_v44  ;;  %vm689_vm8 = vmand %vm683_vm1, %vm687_vm2  ;;  %v396_v2 = vmul.f32 %v6969_v0, %v335_v63  ;;  %v334_v4 = vld [vmem:[%s6957_s9 + $0x20] sm:$0xff]  ;;  %v331_v10 = vld [vmem:[%s6957_s9 + $0x8] sm:$0xff] }
  0x19   : > { %6347 = vmatpush3.bf16.msra.mxu0 %v6344_v17  ;;  %v6907_v33 = vrot.slane %v6894_v29, %v6860_v18  ;;  %v805_v52 = vrot.slane %v6870_v23, %v804_v46  ;;  %v4843_v54 = vsel %vm689_vm8, 1.0, %v6756_v22  ;;  %v955_v1 = vrot.slane %v6894_v29, %v6842_v15  ;;  %v330_v5 = vld [vmem:[%s6957_s9] sm:$0xff]  ;;  %v336_v12 = vld [vmem:[%s6957_s9 + $0x30] sm:$0xff]  ;;  %v337_v13 = vld [vmem:[%s6957_s9 + $0x38] sm:$0xff] }
  0x1a   : > { %6349 = vmatprep.subr.bf16.mxu0 %v6348_v26  ;;  %6283 = vmatpush3.bf16.msra.mxu1 %v6280_v34  ;;  %v820_v55 = vrot.slane %v4843_v54, %v6860_v18  ;;  %v835_v56 = vrot.slane %v4843_v54, %v6842_v15  ;;  %v850_v57 = vrot.slane %v4843_v54, %v729_v28  ;;  %v6985_v6 = vld [vmem:[%s6977_s14] ss:$0 sm:$0xff]  ;;  %v332_v16 = vld [vmem:[%s6957_s9 + $0x10] sm:$0x3]  ;;  %v339_v29 = vld [vmem:[%s6957_s9 + $0x48] sm:$0xff] }
  0x1b   : > { %721 = vbcast.lane.b32.xlu0 %v715_v25, 264  ;;  %702 = vbcast.lane.b32.xlu1 %v700_v27, 256  ;;  %v865_v58 = vrot.slane %v4843_v54, %v744_v35  ;;  %v880_v59 = vrot.slane %v4843_v54, %v759_v40  ;;  %v895_v60 = vrot.slane %v4843_v54, %v774_v42  ;;  %v338_v23 = vld [vmem:[%s6957_s9 + $0x40] sm:$0x3]  ;;  %v340_v34 = vld [vmem:[%s6957_s9 + $0x50] sm:$0xff] }
  0x1c   : > { %6285 = vmatprep.subr.bf16.mxu1 %v6284_v39  ;;  %v910_v61 = vrot.slane %v4843_v54, %v789_v44  ;;  %v925_v62 = vrot.slane %v4843_v54, %v804_v46  ;;  %v394_v7 = vmul.f32 %v6969_v0, %v333_v3  ;;  %v457_v8 = vadd.f32 %v6985_v6, %v396_v2  ;;  %v341_v40 = vld [vmem:[%s6957_s9 + $0x58] sm:$0x3]  ;;  %v342_v44 = vld [vmem:[%s6957_s9 + $0x60] sm:$0xff]  ;;  %v5039_v63 = vld [vmem:[%s8814_s3 + $0x150] sm:$0xff] }
  0x1d   : > { %6351 = vmatpush3.bf16.msra.mxu0 %v6348_v26  ;;  %v395_v9 = vmul.f32 %v6969_v0, %v334_v4  ;;  %v391_v11 = vmul.f32 %v6969_v0, %v330_v5  ;;  %v392_v15 = vmul.f32 %v6969_v0, %v331_v10  ;;  %v397_v19 = vmul.f32 %v6969_v0, %v336_v12  ;;  %v343_v10 = vld [vmem:[%s6957_s9 + $0x68] sm:$0xff] }
  0x1e   : > { %6287 = vmatpush3.bf16.msra.mxu1 %v6284_v39  ;;  %6353 = vmatprep.subr.bf16.mxu0 %v6930_v49  ;;  %v455_v14 = vadd.f32 %v6985_v6, %v394_v7  ;;  %v565_v17 = vmul.f32 0.01, %v457_v8  ;;  %vm511_vm9 = vcmp.ge.f32.partialorder %v457_v8, 0.0  ;;  %v398_v21 = vmul.f32 %v6969_v0, %v337_v13 }
  0x1f   : > { %706 = vbcast.lane.b32.xlu0 %v700_v27, 264  ;;  %732 = vbcast.lane.b32.xlu1 %v730_v32, 256  ;;  %v456_v18 = vadd.f32 %v6985_v6, %v395_v9  ;;  %v452_v20 = vadd.f32 %v6985_v6, %v391_v11  ;;  %v393_v22 = vmul.f32 %v6969_v0, %v332_v16 }
  0x20   : > { %6289 = vmatprep.subr.bf16.mxu1 %v6940_v53  ;;  %v563_v24 = vmul.f32 0.01, %v455_v14  ;;  %v453_v25 = vadd.f32 %v6985_v6, %v392_v15  ;;  %v619_v26 = vsel %vm511_vm9, %v457_v8, %v565_v17  ;;  %vm509_vm10 = vcmp.ge.f32.partialorder %v455_v14, 0.0  ;;  %v344_v15 = vld [vmem:[%s6957_s9 + $0x70] sm:$0x3] }
  0x21   : > { %v458_v28 = vadd.f32 %v6985_v6, %v397_v19  ;;  %vm510_vm11 = vcmp.ge.f32.partialorder %v456_v18, 0.0  ;;  %v560_v30 = vmul.f32 0.01, %v452_v20  ;;  %v459_v31 = vadd.f32 %v6985_v6, %v398_v21 }
  0x22   : > { %vm506_vm12 = vcmp.ge.f32.partialorder %v452_v20, 0.0  ;;  %v617_v37 = vsel %vm509_vm10, %v455_v14, %v563_v24  ;;  %vm507_vm15 = vcmp.ge.f32.partialorder %v453_v25, 0.0  ;;  %v400_v39 = vmul.f32 %v6969_v0, %v339_v29  ;;  %v345_v29 = vld [vmem:[%s6957_s9 + $0x78] sm:$0xff] }
  0x23   : > { %736 = vbcast.lane.b32.xlu0 %v730_v32, 264  ;;  %710 = vbcast.lane.b32.xlu1 %v700_v27, 272  ;;  %v564_v27 = vmul.f32 0.01, %v456_v18  ;;  %vm512_vm0 = vcmp.ge.f32.partialorder %v458_v28, 0.0  ;;  %v401_v48 = vmul.f32 %v6969_v0, %v340_v34  ;;  %vm513_vm1 = vcmp.ge.f32.partialorder %v459_v31, 0.0 }
  0x24   : > { %v567_v46 = vmul.f32 0.01, %v459_v31  ;;  %v404_v24 = vmul.f32 %v6969_v0, %v343_v10 }
  0x25   : > { %v618_v42 = vsel %vm510_vm11, %v456_v18, %v564_v27  ;;  %v462_v4 = vadd.f32 %v6985_v6, %v401_v48  ;;  %v5044_v48 = vld [vmem:[%s8814_s3 + $0x178] sm:$0xff] }
  0x26   : > { %v621_v2 = vsel %vm513_vm1, %v459_v31, %v567_v46  ;;  %v406_v46 = vmul.f32 %v6969_v0, %v345_v29 }
  0x27   : > { %740 = vbcast.lane.b32.xlu0 %v730_v32, 272  ;;  %747 = vbcast.lane.b32.xlu1 %v745_v38, 256  ;;  %v399_v32 = vmul.f32 %v6969_v0, %v338_v23  ;;  %v570_v23 = vmul.f32 0.01, %v462_v4  ;;  %vm516_vm5 = vcmp.ge.f32.partialorder %v462_v4, 0.0 }
  0x29   : > { %v460_v47 = vadd.f32 %v6985_v6, %v399_v32 }
  0x2b   : > { %751 = vbcast.lane.b32.xlu0 %v745_v38, 264  ;;  %755 = vbcast.lane.b32.xlu1 %v745_v38, 272  ;;  %v561_v38 = vmul.f32 0.01, %v453_v25  ;;  %vm514_vm3 = vcmp.ge.f32.partialorder %v460_v47, 0.0 }
  0x2c   : > { %v568_v3 = vmul.f32 0.01, %v460_v47 }
  0x2f   : > { %762 = vbcast.lane.b32.xlu0 %v760_v41, 256  ;;  %766 = vbcast.lane.b32.xlu1 %v760_v41, 264 }
  0x33   : > { %770 = vbcast.lane.b32.xlu0 %v760_v41, 272  ;;  %777 = vbcast.lane.b32.xlu1 %v775_v43, 256 }
  0x37   : > { %781 = vbcast.lane.b32.xlu0 %v775_v43, 264  ;;  %785 = vbcast.lane.b32.xlu1 %v775_v43, 272  ;;  %v566_v43 = vmul.f32 0.01, %v458_v28 }
  0x3b   : > { %792 = vbcast.lane.b32.xlu0 %v790_v45, 256  ;;  %796 = vbcast.lane.b32.xlu1 %v790_v45, 264 }
  0x3f   : > { %800 = vbcast.lane.b32.xlu0 %v790_v45, 272  ;;  %807 = vbcast.lane.b32.xlu1 %v805_v52, 256  ;;  %v614_v45 = vsel %vm506_vm12, %v452_v20, %v560_v30 }
  0x43   : > { %811 = vbcast.lane.b32.xlu0 %v805_v52, 264  ;;  %815 = vbcast.lane.b32.xlu1 %v805_v52, 272  ;;  %v402_v52 = vmul.f32 %v6969_v0, %v341_v40  ;;  %v1023_v40 = vld [vmem:[%s8814_s3 + $0x10] sm:$0xff] }
  0x45   : > { %v463_v9 = vadd.f32 %v6985_v6, %v402_v52 }
  0x47   : > { %822 = vbcast.lane.b32.xlu0 %v820_v55, 256  ;;  %826 = vbcast.lane.b32.xlu1 %v820_v55, 264  ;;  %vm517_vm6 = vcmp.ge.f32.partialorder %v463_v9, 0.0 }
  0x4b   : > { %830 = vbcast.lane.b32.xlu0 %v820_v55, 272  ;;  %837 = vbcast.lane.b32.xlu1 %v835_v56, 256 }
  0x4f   : > { %841 = vbcast.lane.b32.xlu0 %v835_v56, 264  ;;  %845 = vbcast.lane.b32.xlu1 %v835_v56, 272  ;;  %v615_v56 = vsel %vm507_vm15, %v453_v25, %v561_v38  ;;  %v5041_v25 = vld [vmem:[%s8814_s3 + $0x160] sm:$0xff] }
  0x53   : > { %852 = vbcast.lane.b32.xlu0 %v850_v57, 256  ;;  %856 = vbcast.lane.b32.xlu1 %v850_v57, 264 }
  0x57   : > { %860 = vbcast.lane.b32.xlu0 %v850_v57, 272  ;;  %867 = vbcast.lane.b32.xlu1 %v865_v58, 256  ;;  %v461_v57 = vadd.f32 %v6985_v6, %v400_v39  ;;  %v347_v39 = vld [vmem:[%s6957_s9 + $0x88] sm:$0x3] }
  0x59   : > { %vm515_vm4 = vcmp.ge.f32.partialorder %v461_v57, 0.0  ;;  %v569_v13 = vmul.f32 0.01, %v461_v57 }
  0x5b   : > { %871 = vbcast.lane.b32.xlu0 %v865_v58, 264  ;;  %875 = vbcast.lane.b32.xlu1 %v865_v58, 272  ;;  %v403_v58 = vmul.f32 %v6969_v0, %v342_v44  ;;  %v623_v32 = vsel %vm515_vm4, %v461_v57, %v569_v13  ;;  %v624_v44 = vsel %vm516_vm5, %v462_v4, %v570_v23 }
  0x5c   : > { %v467_v13 = vadd.f32 %v6985_v6, %v406_v46 }
  0x5d   : > { %v464_v14 = vadd.f32 %v6985_v6, %v403_v58 }
  0x5e   : > { %vm521_vm10 = vcmp.ge.f32.partialorder %v467_v13, 0.0 }
  0x5f   : > { %882 = vbcast.lane.b32.xlu0 %v880_v59, 256  ;;  %886 = vbcast.lane.b32.xlu1 %v880_v59, 264  ;;  %vm518_vm7 = vcmp.ge.f32.partialorder %v464_v14, 0.0  ;;  %v572_v34 = vmul.f32 0.01, %v464_v14 }
  0x63   : > { %890 = vbcast.lane.b32.xlu0 %v880_v59, 272  ;;  %897 = vbcast.lane.b32.xlu1 %v895_v60, 256 }
  0x67   : > { %901 = vbcast.lane.b32.xlu0 %v895_v60, 264  ;;  %905 = vbcast.lane.b32.xlu1 %v895_v60, 272 }
  0x6b   : > { %912 = vbcast.lane.b32.xlu0 %v910_v61, 256  ;;  %916 = vbcast.lane.b32.xlu1 %v910_v61, 264 }
  0x6f   : > { %920 = vbcast.lane.b32.xlu0 %v910_v61, 272  ;;  %927 = vbcast.lane.b32.xlu1 %v925_v62, 256 }
  0x73   : > { %931 = vbcast.lane.b32.xlu0 %v925_v62, 264  ;;  %935 = vbcast.lane.b32.xlu1 %v925_v62, 272  ;;  %v620_v62 = vsel %vm512_vm0, %v458_v28, %v566_v43  ;;  %v405_v28 = vmul.f32 %v6969_v0, %v344_v15 }
  0x77   : > { %946 = vbcast.lane.b32.xlu1 %v6907_v33, 264  ;;  %942 = vbcast.lane.b32.xlu0 %v6907_v33, 256 }
  0x7b   : > { %950 = vbcast.lane.b32.xlu0 %v6907_v33, 272  ;;  %957 = vbcast.lane.b32.xlu1 %v955_v1, 256  ;;  %v454_v33 = vadd.f32 %v6985_v6, %v393_v22  ;;  %v622_v22 = vsel %vm514_vm3, %v460_v47, %v568_v3  ;;  %v5043_v47 = vld [vmem:[%s8814_s3 + $0x170] sm:$0xff] }
  0x7c   : > { %v6364_v10 = vpack.c.bf16 %v5044_v48, %v5043_v47 }
  0x7d   : > { %v562_v51 = vmul.f32 0.01, %v454_v33  ;;  %vm508_vm2 = vcmp.ge.f32.partialorder %v454_v33, 0.0 }
  0x7f   : > { %961 = vbcast.lane.b32.xlu0 %v955_v1, 264  ;;  %965 = vbcast.lane.b32.xlu1 %v955_v1, 272  ;;  %v5040_v1 = vld [vmem:[%s8814_s3 + $0x158] sm:$0xff]  ;;  %v616_v8 = vsel %vm508_vm2, %v454_v33, %v562_v51  ;;  %v571_v33 = vmul.f32 0.01, %v463_v9 }
  0x80   : > { %v6356_v16 = vpack.c.bf16 %v5040_v1, %v5039_v63  ;;  %v408_v63 = vmul.f32 %v6969_v0, %v347_v39  ;;  %v349_v1 = vld [vmem:[%s6957_s9 + $0x98] sm:$0xff] }
  0x89   : > { %v726_v35 = vpop.permute.xlu1 %725  ;;  %v718_v36 = vpop.permute.xlu0 %717 }
  0x8a   : > { %v7012_v41 = vmul.f32 %v726_v35, %v619_v26  ;;  %v7019_v50 = vmul.f32 %v718_v36, %v617_v37  ;;  %v5042_v26 = vld [vmem:[%s8814_s3 + $0x168] sm:$0xff]  ;;  %v346_v35 = vld [vmem:[%s6957_s9 + $0x80] sm:$0xff] }
  0x8b   : > { %v6360_v43 = vpack.c.bf16 %v5042_v26, %v5041_v25 }
  0x8c   : > { %8898 = vst [vmem:[#allocation2_spill] sm:$0xff] %v7019_v50  ;;  %v1086_v59 = vrot.slane %v7012_v41, 1  ;;  %v1083_v5 = vrot.slane %v7019_v50, 1 }
  0x8d   : > { %v722_v54 = vpop.permute.xlu0 %721  ;;  %v703_v55 = vpop.permute.xlu1 %702 }
  0x8e   : > { %v7026_v60 = vmul.f32 %v722_v54, %v618_v42  ;;  %v7028_v61 = vmul.f32 %v703_v55, %v614_v45  ;;  %v1024_v42 = vld [vmem:[%s8814_s3 + $0x18] sm:$0xff]  ;;  %v465_v45 = vadd.f32 %v6985_v6, %v404_v24  ;;  %v466_v54 = vadd.f32 %v6985_v6, %v405_v28 }
  0x8f   : > { %v407_v55 = vmul.f32 %v6969_v0, %v346_v35  ;;  %v410_v24 = vmul.f32 %v6969_v0, %v349_v1  ;;  %v469_v35 = vadd.f32 %v6985_v6, %v408_v63 }
  0x90   : > { %8899 = vst [vmem:[#allocation3_spill] sm:$0xff] %v7026_v60  ;;  %v1084_v7 = vrot.slane %v7026_v60, 1  ;;  %v1078_v20 = vrot.slane %v7028_v61, 1  ;;  %vm519_vm8 = vcmp.ge.f32.partialorder %v465_v45, 0.0  ;;  %vm520_vm9 = vcmp.ge.f32.partialorder %v466_v54, 0.0 }
  0x91   : > { %v707_v11 = vpop.permute.xlu0 %706  ;;  %v733_v12 = vpop.permute.xlu1 %732  ;;  %vm523_vm12 = vcmp.ge.f32.partialorder %v469_v35, 0.0 }
  0x92   : > { %v7044_v17 = vmul.f32 %v707_v11, %v615_v56  ;;  %v7047_v18 = vsel %vm1077_vm13, %v1083_v5, %v1084_v7  ;;  %v7050_v19 = vsel %vm1077_vm13, %v1084_v7, %v1086_v59  ;;  %v7053_v21 = vmul.f32 %v733_v12, %v620_v62  ;;  %v348_v56 = vld [vmem:[%s6957_s9 + $0x90] sm:$0xff]  ;;  %v350_v7 = vld [vmem:[%s6957_s9 + $0xa0] sm:$0x3] }
  0x93   : > { %5904 = vmatprep.mubr.msk.f32.mxu0 %vm1167_vm14, %v7047_v18  ;;  %v625_v59 = vsel %vm517_vm6, %v463_v9, %v571_v33  ;;  %v626_v62 = vsel %vm518_vm7, %v464_v14, %v572_v34  ;;  %v1026_v9 = vld [vmem:[%s8814_s3 + $0x28] sm:$0xff]  ;;  %v573_v12 = vmul.f32 0.01, %v465_v45  ;;  %v409_v14 = vmul.f32 %v6969_v0, %v348_v56 }
  0x94   : > { %5905 = vmatmul.mubr.msk.f32.vlgmr.msra.gmra.mrb[0].mxu0 %vm1167_vm14, %v7050_v19  ;;  %v1079_v27 = vrot.slane %v7044_v17, 1  ;;  %v411_v25 = vmul.f32 %v6969_v0, %v350_v7  ;;  %v575_v34 = vmul.f32 0.01, %v467_v13  ;;  %v577_v56 = vmul.f32 0.01, %v469_v35 }
  0x95   : > { %v737_v30 = vpop.permute.xlu0 %736  ;;  %v711_v31 = vpop.permute.xlu1 %710  ;;  %6355 = vmatpush3.bf16.msra.mxu0 %v6930_v49  ;;  %v1088_v49 = vrot.slane %v7053_v21, 1  ;;  %v627_v33 = vsel %vm519_vm8, %v465_v45, %v573_v12 }
  0x96   : > { %v7073_v36 = vmul.f32 %v737_v30, %v621_v2  ;;  %v7075_v37 = vmul.f32 %v711_v31, %v616_v8  ;;  %v1080_v38 = vsel %vm1077_vm13, %v1078_v20, %v1079_v27  ;;  %6357 = vmatprep.subr.bf16.mxu0 %v6356_v16  ;;  %v6292_v2 = vpack.c.bf16 %v1024_v42, %v1023_v40  ;;  %v1025_v8 = vld [vmem:[%s8814_s3 + $0x20] sm:$0xff] }
  0x97   : > { %5648 = vmatprep.mubr.msk.f32.mxu1 %vm1167_vm14, %v1080_v38  ;;  %v7129_v20 = vadd.f32 %v6985_v6, %v407_v55  ;;  %v6296_v26 = vpack.c.bf16 %v1026_v9, %v1025_v8  ;;  %v5077_v31 = vld [vmem:[%s8814_s3 + $0x180] sm:$0xff]  ;;  %v629_v55 = vsel %vm521_vm10, %v467_v13, %v575_v34 }
  0x98   : > { %8900 = vst [vmem:[#allocation4_spill] sm:$0xff] %v7075_v37  ;;  %v1081_v51 = vrot.slane %v7075_v37, 1  ;;  %v1089_v52 = vrot.slane %v7073_v36, 1 }
  0x99   : > { %v741_v57 = vpop.permute.xlu0 %740  ;;  %v748_v58 = vpop.permute.xlu1 %747  ;;  %6359 = vmatpush3.bf16.msra.mxu0 %v6356_v16  ;;  %v574_v16 = vmul.f32 0.01, %v466_v54  ;;  %vm522_vm11 = vcmp.ge.f32.partialorder %v7129_v20, 0.0 }
  0x9a   : > { %v7105_v3 = vmul.f32 %v741_v57, %v622_v22  ;;  %v7107_v4 = vmul.f32 %v748_v58, %v623_v32  ;;  %v1082_v5 = vsel %vm1077_vm13, %v1079_v27, %v1081_v51  ;;  %6361 = vmatprep.subr.bf16.mxu0 %v6360_v43  ;;  %v7119_v11 = vsel %vm1077_vm13, %v1088_v49, %v1089_v52  ;;  %v5078_v32 = vld [vmem:[%s8814_s3 + $0x188] sm:$0xff] }
  0x9b   : > { %5649 = vmatmul.mubr.msk.f32.vlgmr.msra.gmra.mrb[0].mxu1 %vm1167_vm14, %v1082_v5  ;;  %8901 = vst [vmem:[#allocation5_spill] sm:$0xff] %v7119_v11  ;;  %5907 = vmatprep.mubr.msk.f32.mxu0 %vm1167_vm14, %v7119_v11  ;;  %v628_v40 = vsel %vm520_vm9, %v466_v54, %v574_v16  ;;  %v576_v49 = vmul.f32 0.01, %v7129_v20  ;;  %v7169_v46 = vpack.c.bf16 %v5078_v32, %v5077_v31  ;;  %v352_v54 = vld [vmem:[%s6957_s9 + $0xb0] sm:$0xff]  ;;  %v353_v5 = vld [vmem:[%s6957_s9 + $0xb8] sm:$0x3] }
  0x9c   : > { %v1091_v15 = vrot.slane %v7105_v3, 1  ;;  %5651 = vmatprep.mubr.msk.f32.mxu1 %vm1167_vm14, %v7047_v18  ;;  %6291 = vmatpush3.bf16.msra.mxu1 %v6940_v53  ;;  %v1027_v18 = vld [vmem:[%s8814_s3 + $0x30] sm:$0xff]  ;;  %v1093_v30 = vrot.slane %v7107_v4, 1  ;;  %v1028_v53 = vld [vmem:[%s8814_s3 + $0x38] sm:$0xff]  ;;  %v471_v57 = vadd.f32 %v6985_v6, %v410_v24  ;;  %v413_v12 = vmul.f32 %v6969_v0, %v352_v54  ;;  %v354_v16 = vld [vmem:[%s6957_s9 + $0xc0] sm:$0xff] }
  0x9d   : > { %v752_v22 = vpop.permute.xlu0 %751  ;;  %v756_v23 = vpop.permute.xlu1 %755  ;;  %6363 = vmatpush3.bf16.msra.mxu0 %v6360_v43  ;;  %6293 = vmatprep.subr.bf16.mxu1 %v6292_v2  ;;  %v6300_v45 = vpack.c.bf16 %v1028_v53, %v1027_v18  ;;  %v630_v9 = vsel %vm522_vm11, %v7129_v20, %v576_v49  ;;  %v631_v20 = vsel %vm523_vm12, %v469_v35, %v577_v56  ;;  %v357_v56 = vld [vmem:[%s6957_s9 + $0xd8] sm:$0xff] }
  0x9e   : > { %v7137_v27 = vmul.f32 %v752_v22, %v624_v44  ;;  %v7139_v28 = vmul.f32 %v756_v23, %v625_v59  ;;  %v7142_v29 = vsel %vm1077_vm13, %v1089_v52, %v1091_v15  ;;  %6365 = vmatprep.subr.bf16.mxu0 %v6364_v10  ;;  %v470_v44 = vadd.f32 %v6985_v6, %v409_v14  ;;  %v4917_v59 = vld [vmem:[%s8814_s3 + $0x80] sm:$0xff] }
  0x9f   : > { %8902 = vst [vmem:[#allocation6_spill] sm:$0xff] %v7142_v29  ;;  %5652 = vmatmul.mubr.msk.f32.gmra.mrb[2].mxu1 %vm1167_vm14, %v7050_v19  ;;  %5908 = vmatmul.mubr.msk.f32.gmra.mrb[2].mxu0 %vm1167_vm14, %v7142_v29  ;;  %v351_v19 = vld [vmem:[%s6957_s9 + $0xa8] sm:$0xff]  ;;  %v579_v23 = vmul.f32 0.01, %v471_v57  ;;  %vm525_vm0 = vcmp.ge.f32.partialorder %v471_v57, 0.0  ;;  %v415_v34 = vmul.f32 %v6969_v0, %v354_v16  ;;  %v418_v16 = vmul.f32 %v6969_v0, %v357_v56 }
  0xa0   : > { %v1096_v38 = vrot.slane %v7139_v28, 1  ;;  %5654 = vmatprep.mubr.msk.f32.mxu1 %vm1167_vm14, %v7119_v11  ;;  %v1094_v39 = vrot.slane %v7137_v27, 1  ;;  %6295 = vmatpush3.bf16.msra.mxu1 %v6292_v2  ;;  %v412_v58 = vmul.f32 %v6969_v0, %v351_v19  ;;  %v472_v2 = vadd.f32 %v6985_v6, %v411_v25  ;;  %v356_v19 = vld [vmem:[%s6957_s9 + $0xd0] sm:$0x3] }
  0xa1   : > { %v763_v42 = vpop.permute.xlu0 %762  ;;  %v767_v43 = vpop.permute.xlu1 %766  ;;  %6367 = vmatpush3.bf16.msra.mxu0 %v6364_v10  ;;  %6297 = vmatprep.subr.bf16.mxu1 %v6296_v26  ;;  %vm524_vm15 = vcmp.ge.f32.partialorder %v470_v44, 0.0  ;;  %v578_v10 = vmul.f32 0.01, %v470_v44  ;;  %v414_v25 = vmul.f32 %v6969_v0, %v353_v5 }
  0xa2   : > { %v7171_v47 = vmul.f32 %v763_v42, %v626_v62  ;;  %v7173_v48 = vmul.f32 %v767_v43, %v627_v33  ;;  %v7176_v51 = vsel %vm1077_vm13, %v1093_v30, %v1094_v39  ;;  %v7179_v52 = vsel %vm1077_vm13, %v1094_v39, %v1096_v38  ;;  %v4918_v62 = vld [vmem:[%s8814_s3 + $0x88] sm:$0xff]  ;;  %6369 = vmatprep.subr.bf16.mxu0 %v7169_v46 }
  0xa3   : > { %8903 = vst [vmem:[#allocation7_spill] sm:$0xff] %v7176_v51  ;;  %8904 = vst [vmem:[#allocation8_spill] sm:$0xff] %v7179_v52  ;;  %5655 = vmatmul.mubr.msk.f32.gmra.mrb[4].mxu1 %vm1167_vm14, %v7142_v29  ;;  %5910 = vmatprep.mubr.msk.f32.mxu0 %vm1167_vm14, %v7176_v51  ;;  %v7216_v22 = vpack.c.bf16 %v4918_v62, %v4917_v59  ;;  %v473_v24 = vadd.f32 %v6985_v6, %v412_v58  ;;  %v580_v18 = vmul.f32 0.01, %v472_v2  ;;  %v355_v30 = vld [vmem:[%s6957_s9 + $0xc8] sm:$0xff] }
  0xa4   : > { %5657 = vmatprep.mubr.msk.f32.mxu1 %vm1167_vm14, %v7176_v51  ;;  %5911 = vmatmul.mubr.msk.f32.gmra.mrb[4].mxu0 %vm1167_vm14, %v7179_v52  ;;  %v1098_v63 = vrot.slane %v7171_v47, 1  ;;  %v1099_v1 = vrot.slane %v7173_v48, 1  ;;  %v632_v32 = vsel %vm524_vm15, %v470_v44, %v578_v10  ;;  %vm526_vm1 = vcmp.ge.f32.partialorder %v472_v2, 0.0 }
  0xa5   : > { %v771_v7 = vpop.permute.xlu0 %770  ;;  %v778_v8 = vpop.permute.xlu1 %777  ;;  %6299 = vmatpush3.bf16.msra.mxu1 %v6296_v26  ;;  %v474_v33 = vadd.f32 %v6985_v6, %v413_v12  ;;  %v633_v42 = vsel %vm525_vm0, %v471_v57, %v579_v23  ;;  %v581_v43 = vmul.f32 0.01, %v473_v24  ;;  %v475_v49 = vadd.f32 %v6985_v6, %v414_v25  ;;  %v359_v25 = vld [vmem:[%s6957_s9 + $0xe8] sm:$0x3] }
  0xa6   : > { %v7208_v13 = vmul.f32 %v771_v7, %v628_v40  ;;  %v7210_v14 = vmul.f32 %v778_v8, %v629_v55  ;;  %v7213_v15 = vsel %vm1077_vm13, %v1098_v63, %v1099_v1  ;;  %6301 = vmatprep.subr.bf16.mxu1 %v6300_v45  ;;  %v416_v44 = vmul.f32 %v6969_v0, %v355_v30 }
  0xa7   : > { %8905 = vst [vmem:[#allocation9_spill] sm:$0xff] %v7213_v15  ;;  %5658 = vmatmul.mubr.msk.f32.gmra.mrb[6].mxu1 %vm1167_vm14, %v7179_v52  ;;  %5913 = vmatprep.mubr.msk.f32.mxu0 %vm1167_vm14, %v7213_v15  ;;  %v634_v55 = vsel %vm526_vm1, %v472_v2, %v580_v18  ;;  %vm527_vm2 = vcmp.ge.f32.partialorder %v473_v24, 0.0  ;;  %vm528_vm3 = vcmp.ge.f32.partialorder %v474_v33, 0.0  ;;  %v582_v62 = vmul.f32 0.01, %v474_v33 }
  0xa8   : > { %v1101_v26 = vrot.slane %v7208_v13, 1  ;;  %5660 = vmatprep.mubr.msk.f32.mxu1 %vm1167_vm14, %v7213_v15  ;;  %v1103_v40 = vrot.slane %v7210_v14, 1  ;;  %v476_v63 = vadd.f32 %v6985_v6, %v415_v34  ;;  %v417_v57 = vmul.f32 %v6969_v0, %v356_v19 }
  0xa9   : > { %v782_v53 = vpop.permute.xlu0 %781  ;;  %v786_v31 = vpop.permute.xlu1 %785  ;;  %6303 = vmatpush3.bf16.msra.mxu1 %v6300_v45  ;;  %v583_v10 = vmul.f32 0.01, %v475_v49  ;;  %v477_v12 = vadd.f32 %v6985_v6, %v416_v44  ;;  %vm529_vm4 = vcmp.ge.f32.partialorder %v475_v49, 0.0  ;;  %v636_v19 = vsel %vm528_vm3, %v474_v33, %v582_v62 }
  0xaa   : > { %v7232_v35 = vmul.f32 %v782_v53, %v630_v9  ;;  %v7234_v38 = vmul.f32 %v786_v31, %v631_v20  ;;  %v7237_v39 = vsel %vm1077_vm13, %v1099_v1, %v1101_v26  ;;  %6305 = vmatprep.subr.bf16.mxu1 %v7216_v22  ;;  %v358_v1 = vld [vmem:[%s6957_s9 + $0xe0] sm:$0xff]  ;;  %v635_v9 = vsel %vm527_vm2, %v473_v24, %v581_v43  ;;  %v360_v31 = vld [vmem:[%s6957_s9 + $0xf0] sm:$0xff] }
  0xab   : > { %8906 = vst [vmem:[#allocation10_spill] sm:$0xff] %v7237_v39  ;;  %5661 = vmatmul.mubr.msk.f32.gmra.mrb[8].mxu1 %vm1167_vm14, %v7237_v39  ;;  %5914 = vmatmul.mubr.msk.f32.gmra.mrb[6].mxu0 %vm1167_vm14, %v7237_v39  ;;  %v419_v24 = vmul.f32 %v6969_v0, %v358_v1  ;;  %vm530_vm5 = vcmp.ge.f32.partialorder %v476_v63, 0.0  ;;  %v584_v30 = vmul.f32 0.01, %v476_v63  ;;  %v478_v53 = vadd.f32 %v6985_v6, %v417_v57 }
  0xac   : > { %v1106_v45 = vrot.slane %v7234_v38, 1  ;;  %v1104_v54 = vrot.slane %v7232_v35, 1  ;;  %v637_v43 = vsel %vm529_vm4, %v475_v49, %v583_v10  ;;  %v585_v44 = vmul.f32 0.01, %v477_v12 }
  0xad   : > { %v793_v58 = vpop.permute.xlu0 %792  ;;  %v797_v59 = vpop.permute.xlu1 %796  ;;  %vm531_vm6 = vcmp.ge.f32.partialorder %v477_v12, 0.0  ;;  %v480_v33 = vadd.f32 %v6985_v6, %v419_v24  ;;  %v421_v56 = vmul.f32 %v6969_v0, %v360_v31  ;;  %v638_v62 = vsel %vm530_vm5, %v476_v63, %v584_v30  ;;  %v363_v31 = vld [vmem:[%s6957_s9 + $0x108] sm:$0xff] }
  0xae   : > { %v7256_v5 = vmul.f32 %v793_v58, %v632_v32  ;;  %v7258_v7 = vmul.f32 %v797_v59, %v633_v42  ;;  %v7261_v8 = vsel %vm1077_vm13, %v1103_v40, %v1104_v54  ;;  %v7264_v2 = vsel %vm1077_vm13, %v1104_v54, %v1106_v45  ;;  %v361_v42 = vld [vmem:[%s6957_s9 + $0xf8] sm:$0xff] }
  0xaf   : > { %8907 = vst [vmem:[#allocation11_spill] sm:$0xff] %v7261_v8  ;;  %8908 = vst [vmem:[#allocation12_spill] sm:$0xff] %v7264_v2  ;;  %5663 = vmatprep.mubr.msk.f32.mxu1 %vm1167_vm14, %v7261_v8  ;;  %5916 = vmatprep.mubr.msk.f32.mxu0 %vm1167_vm14, %v7261_v8  ;;  %v479_v45 = vadd.f32 %v6985_v6, %v418_v16  ;;  %v420_v54 = vmul.f32 %v6969_v0, %v359_v25  ;;  %vm532_vm7 = vcmp.ge.f32.partialorder %v478_v53, 0.0  ;;  %v368_v8 = vld [vmem:[%s6957_s9 + $0x130] sm:$0x3] }
  0xb0   : > { %5664 = vmatmul.mubr.msk.f32.gmra.mrb[10].mxu1 %vm1167_vm14, %v7264_v2  ;;  %5917 = vmatmul.mubr.msk.f32.gmra.mrb[8].mxu0 %vm1167_vm14, %v7264_v2  ;;  %v1108_v20 = vrot.slane %v7256_v5, 1  ;;  %v1109_v23 = vrot.slane %v7258_v7, 1  ;;  %v586_v57 = vmul.f32 0.01, %v478_v53  ;;  %v422_v49 = vmul.f32 %v6969_v0, %v361_v42 }
  0xb1   : > { %v801_v26 = vpop.permute.xlu0 %800  ;;  %v808_v18 = vpop.permute.xlu1 %807  ;;  %v639_v63 = vsel %vm531_vm6, %v477_v12, %v585_v44  ;;  %vm533_vm8 = vcmp.ge.f32.partialorder %v479_v45, 0.0  ;;  %v587_v24 = vmul.f32 0.01, %v479_v45  ;;  %v481_v25 = vadd.f32 %v6985_v6, %v420_v54 }
  0xb2   : > { %v7282_v32 = vmul.f32 %v801_v26, %v634_v55  ;;  %v7284_v34 = vmul.f32 %v808_v18, %v635_v9  ;;  %v7287_v40 = vsel %vm1077_vm13, %v1108_v20, %v1109_v23  ;;  %v362_v20 = vld [vmem:[%s6957_s9 + $0x100] sm:$0x3]  ;;  %v588_v18 = vmul.f32 0.01, %v480_v33 }
  0xb3   : > { %8909 = vst [vmem:[#allocation13_spill] sm:$0xff] %v7287_v40  ;;  %5666 = vmatprep.mubr.msk.f32.mxu1 %vm1167_vm14, %v7287_v40  ;;  %5919 = vmatprep.mubr.msk.f32.mxu0 %vm1167_vm14, %v7287_v40  ;;  %v482_v30 = vadd.f32 %v6985_v6, %v421_v56  ;;  %vm534_vm9 = vcmp.ge.f32.partialorder %v480_v33, 0.0  ;;  %v483_v12 = vadd.f32 %v6985_v6, %v422_v49  ;;  %vm535_vm10 = vcmp.ge.f32.partialorder %v481_v25, 0.0 }
  0xb4   : > { %v1111_v55 = vrot.slane %v7282_v32, 1  ;;  %v1113_v16 = vrot.slane %v7284_v34, 1  ;;  %v423_v44 = vmul.f32 %v6969_v0, %v362_v20  ;;  %v642_v20 = vsel %vm534_vm9, %v480_v33, %v588_v18 }
  0xb5   : > { %v812_v58 = vpop.permute.xlu0 %811  ;;  %v816_v59 = vpop.permute.xlu1 %815  ;;  %vm536_vm11 = vcmp.ge.f32.partialorder %v482_v30, 0.0  ;;  %vm537_vm12 = vcmp.ge.f32.partialorder %v483_v12, 0.0 }
  0xb6   : > { %v7303_v1 = vmul.f32 %v812_v58, %v636_v19  ;;  %v7305_v9 = vmul.f32 %v816_v59, %v637_v43  ;;  %v7308_v10 = vsel %vm1077_vm13, %v1109_v23, %v1111_v55  ;;  %v640_v43 = vsel %vm532_vm7, %v478_v53, %v586_v57  ;;  %v364_v59 = vld [vmem:[%s6957_s9 + $0x110] sm:$0xff] }
  0xb7   : > { %8910 = vst [vmem:[#allocation14_spill] sm:$0xff] %v7308_v10  ;;  %5667 = vmatmul.mubr.msk.f32.gmra.mrb[12].mxu1 %vm1167_vm14, %v7308_v10  ;;  %5920 = vmatmul.mubr.msk.f32.gmra.mrb[10].mxu0 %vm1167_vm14, %v7308_v10  ;;  %v641_v53 = vsel %vm533_vm8, %v479_v45, %v587_v24  ;;  %v424_v57 = vmul.f32 %v6969_v0, %v363_v31 }
  0xb8   : > { %v1116_v26 = vrot.slane %v7305_v9, 1  ;;  %v1114_v23 = vrot.slane %v7303_v1, 1  ;;  %v484_v31 = vadd.f32 %v6985_v6, %v423_v44 }
  0xb9   : > { %v823_v19 = vpop.permute.xlu0 %822  ;;  %v827_v42 = vpop.permute.xlu1 %826  ;;  %v485_v18 = vadd.f32 %v6985_v6, %v424_v57 }
  0xba   : > { %v7325_v55 = vmul.f32 %v823_v19, %v638_v62  ;;  %v7327_v54 = vmul.f32 %v827_v42, %v639_v63  ;;  %v7330_v58 = vsel %vm1077_vm13, %v1113_v16, %v1114_v23  ;;  %v7333_v56 = vsel %vm1077_vm13, %v1114_v23, %v1116_v26  ;;  %v365_v26 = vld [vmem:[%s6957_s9 + $0x118] sm:$0x3]  ;;  %v366_v42 = vld [vmem:[%s6957_s9 + $0x120] sm:$0xff] }
  0xbb   : > { %8911 = vst [vmem:[#allocation15_spill] sm:$0xff] %v7330_v58  ;;  %8912 = vst [vmem:[#allocation16_spill] sm:$0xff] %v7333_v56  ;;  %5669 = vmatprep.mubr.msk.f32.mxu1 %vm1167_vm14, %v7330_v58  ;;  %5922 = vmatprep.mubr.msk.f32.mxu0 %vm1167_vm14, %v7330_v58  ;;  %v589_v62 = vmul.f32 0.01, %v481_v25  ;;  %v590_v63 = vmul.f32 0.01, %v482_v30  ;;  %v425_v19 = vmul.f32 %v6969_v0, %v364_v59 }
  0xbc   : > { %5670 = vmatmul.mubr.msk.f32.gmra.mrb[14].mxu1 %vm1167_vm14, %v7333_v56  ;;  %5923 = vmatmul.mubr.msk.f32.gmra.mrb[12].mxu0 %vm1167_vm14, %v7333_v56  ;;  %v1118_v49 = vrot.slane %v7325_v55, 1  ;;  %v1119_v16 = vrot.slane %v7327_v54, 1  ;;  %v591_v23 = vmul.f32 0.01, %v483_v12  ;;  %vm538_vm15 = vcmp.ge.f32.partialorder %v484_v31, 0.0 }
  0xbd   : > { %v831_v45 = vpop.permute.xlu0 %830  ;;  %v838_v24 = vpop.permute.xlu1 %837  ;;  %v643_v33 = vsel %vm535_vm10, %v481_v25, %v589_v62  ;;  %v644_v59 = vsel %vm536_vm11, %v482_v30, %v590_v63  ;;  %v592_v2 = vmul.f32 0.01, %v484_v31  ;;  %v369_v63 = vld [vmem:[%s6957_s9 + $0x138] sm:$0xff]  ;;  %vm539_vm0 = vcmp.ge.f32.partialorder %v485_v18, 0.0 }
  0xbe   : > { %v7353_v58 = vmul.f32 %v831_v45, %v640_v43  ;;  %v7355_v56 = vmul.f32 %v838_v24, %v641_v53  ;;  %v7358_v10 = vsel %vm1077_vm13, %v1118_v49, %v1119_v16  ;;  %v426_v43 = vmul.f32 %v6969_v0, %v365_v26  ;;  %v367_v49 = vld [vmem:[%s6957_s9 + $0x128] sm:$0xff] }
  0xbf   : > { %8913 = vst [vmem:[#allocation17_spill] sm:$0xff] %v7358_v10  ;;  %5672 = vmatprep.mubr.msk.f32.mxu1 %vm1167_vm14, %v7358_v10  ;;  %5925 = vmatprep.mubr.msk.f32.mxu0 %vm1167_vm14, %v7358_v10  ;;  %v427_v53 = vmul.f32 %v6969_v0, %v366_v42  ;;  %v645_v40 = vsel %vm537_vm12, %v483_v12, %v591_v23  ;;  %v593_v12 = vmul.f32 0.01, %v485_v18 }
  0xc0   : > { %v1121_v44 = vrot.slane %v7353_v58, 1  ;;  %v486_v10 = vadd.f32 %v6985_v6, %v425_v19  ;;  %v1123_v30 = vrot.slane %v7355_v56, 1  ;;  %v487_v26 = vadd.f32 %v6985_v6, %v426_v43 }
  0xc1   : > { %v842_v45 = vpop.permute.xlu0 %841  ;;  %v846_v24 = vpop.permute.xlu1 %845  ;;  %v488_v19 = vadd.f32 %v6985_v6, %v427_v53  ;;  %v429_v42 = vmul.f32 %v6969_v0, %v368_v8  ;;  %v370_v8 = vld [vmem:[%s6957_s9 + $0x140] sm:$0xff] }
  0xc2   : > { %v7372_v25 = vmul.f32 %v842_v45, %v642_v20  ;;  %v7374_v62 = vmul.f32 %v846_v24, %v643_v33  ;;  %v7377_v57 = vsel %vm1077_vm13, %v1119_v16, %v1121_v44  ;;  %v428_v20 = vmul.f32 %v6969_v0, %v367_v49 }
  0xc3   : > { %8914 = vst [vmem:[#allocation18_spill] sm:$0xff] %v7377_v57  ;;  %5673 = vmatmul.mubr.msk.f32.gmra.mrb[16].mxu1 %vm1167_vm14, %v7377_v57  ;;  %5926 = vmatmul.mubr.msk.f32.gmra.mrb[14].mxu0 %vm1167_vm14, %v7377_v57  ;;  %v646_v45 = vsel %vm538_vm15, %v484_v31, %v592_v2  ;;  %vm540_vm1 = vcmp.ge.f32.partialorder %v486_v10, 0.0  ;;  %v594_v24 = vmul.f32 0.01, %v486_v10  ;;  %v430_v57 = vmul.f32 %v6969_v0, %v369_v63 }
  0xc4   : > { %v1126_v23 = vrot.slane %v7374_v62, 1  ;;  %v1124_v16 = vrot.slane %v7372_v25, 1  ;;  %v647_v2 = vsel %vm539_vm0, %v485_v18, %v593_v12  ;;  %vm541_vm2 = vcmp.ge.f32.partialorder %v487_v26, 0.0 }
  0xc5   : > { %v853_v33 = vpop.permute.xlu0 %852  ;;  %v857_v44 = vpop.permute.xlu1 %856  ;;  %v489_v31 = vadd.f32 %v6985_v6, %v428_v20  ;;  %v596_v63 = vmul.f32 0.01, %v488_v19  ;;  %vm542_vm3 = vcmp.ge.f32.partialorder %v488_v19, 0.0  ;;  %v431_v20 = vmul.f32 %v6969_v0, %v370_v8 }
  0xc6   : > { %v7393_v43 = vmul.f32 %v853_v33, %v644_v59  ;;  %v7395_v39 = vmul.f32 %v857_v44, %v645_v40  ;;  %v7398_v49 = vsel %vm1077_vm13, %v1123_v30, %v1124_v16  ;;  %v7401_v53 = vsel %vm1077_vm13, %v1124_v16, %v1126_v23  ;;  %v371_v16 = vld [vmem:[%s6957_s9 + $0x148] sm:$0x3]  ;;  %v372_v44 = vld [vmem:[%s6957_s9 + $0x150] sm:$0xff] }
  0xc7   : > { %8917 = vst [vmem:[#allocation21_spill] sm:$0xff] %v7398_v49  ;;  %8918 = vst [vmem:[#allocation22_spill] sm:$0xff] %v7401_v53  ;;  %5675 = vmatprep.mubr.msk.f32.mxu1 %vm1167_vm14, %v7398_v49  ;;  %5928 = vmatprep.mubr.msk.f32.mxu0 %vm1167_vm14, %v7398_v49  ;;  %v595_v40 = vmul.f32 0.01, %v487_v26  ;;  %v490_v23 = vadd.f32 %v6985_v6, %v429_v42  ;;  %v491_v33 = vadd.f32 %v6985_v6, %v430_v57 }
  0xc8   : > { %8915 = vst [vmem:[#allocation19_spill] sm:$0xff] %v7393_v43  ;;  %8916 = vst [vmem:[#allocation20_spill] sm:$0xff] %v7395_v39  ;;  %5676 = vmatmul.mubr.msk.f32.gmra.mrb[18].mxu1 %vm1167_vm14, %v7401_v53  ;;  %5929 = vmatmul.mubr.msk.f32.gmra.mrb[16].mxu0 %vm1167_vm14, %v7401_v53  ;;  %v1128_v59 = vrot.slane %v7393_v43, 1  ;;  %v1129_v30 = vrot.slane %v7395_v39, 1  ;;  %v648_v52 = vsel %vm540_vm1, %v486_v10, %v594_v24  ;;  %vm543_vm4 = vcmp.ge.f32.partialorder %v489_v31, 0.0  ;;  %v373_v24 = vld [vmem:[%s6957_s9 + $0x158] sm:$0xff] }
  0xc9   : > { %v861_v18 = vpop.permute.xlu0 %860  ;;  %v868_v12 = vpop.permute.xlu1 %867  ;;  %v649_v57 = vsel %vm541_vm2, %v487_v26, %v595_v40  ;;  %v597_v42 = vmul.f32 0.01, %v489_v31  ;;  %v433_v10 = vmul.f32 %v6969_v0, %v372_v44  ;;  %vm544_vm5 = vcmp.ge.f32.partialorder %v490_v23, 0.0  ;;  %v374_v26 = vld [vmem:[%s6957_s9 + $0x160] sm:$0x3] }
  0xca   : > { %v7421_v49 = vmul.f32 %v861_v18, %v646_v45  ;;  %v7423_v53 = vmul.f32 %v868_v12, %v647_v2  ;;  %v7426_v15 = vsel %vm1077_vm13, %v1128_v59, %v1129_v30  ;;  %v432_v45 = vmul.f32 %v6969_v0, %v371_v16 }
  0xcb   : > { %8920 = vst [vmem:[#allocation24_spill] sm:$0xff] %v7426_v15  ;;  %5678 = vmatprep.mubr.msk.f32.mxu1 %vm1167_vm14, %v7426_v15  ;;  %5931 = vmatprep.mubr.msk.f32.mxu0 %vm1167_vm14, %v7426_v15  ;;  %v650_v2 = vsel %vm542_vm3, %v488_v19, %v596_v63  ;;  %v598_v59 = vmul.f32 0.01, %v490_v23  ;;  %vm545_vm6 = vcmp.ge.f32.partialorder %v491_v33, 0.0  ;;  %v599_v15 = vmul.f32 0.01, %v491_v33 }
  0xcc   : > { %8919 = vst [vmem:[#allocation23_spill] sm:$0xff] %v7423_v53  ;;  %v1131_v8 = vrot.slane %v7421_v49, 1  ;;  %v492_v51 = vadd.f32 %v6985_v6, %v431_v20  ;;  %v1133_v19 = vrot.slane %v7423_v53, 1  ;;  %v375_v63 = vld [vmem:[%s6957_s9 + $0x168] sm:$0xff]  ;;  %v651_v44 = vsel %vm543_vm4, %v489_v31, %v597_v42 }
  0xcd   : > { %v872_v18 = vpop.permute.xlu0 %871  ;;  %v876_v12 = vpop.permute.xlu1 %875  ;;  %v493_v20 = vadd.f32 %v6985_v6, %v432_v45  ;;  %v653_v31 = vsel %vm545_vm6, %v491_v33, %v599_v15  ;;  %v436_v45 = vmul.f32 %v6969_v0, %v375_v63  ;;  %vm1746_vm4 = vcmask 1045504  }
  0xce   : > { %v7440_v40 = vmul.f32 %v872_v18, %v648_v52  ;;  %v7442_v29 = vmul.f32 %v876_v12, %v649_v57  ;;  %v7445_v16 = vsel %vm1077_vm13, %v1129_v30, %v1131_v8  ;;  %v434_v52 = vmul.f32 %v6969_v0, %v373_v24 }
  0xcf   : > { %8923 = vst [vmem:[#allocation27_spill] sm:$0xff] %v7445_v16  ;;  %5679 = vmatmul.mubr.msk.f32.gmra.mrb[20].mxu1 %vm1167_vm14, %v7445_v16  ;;  %5932 = vmatmul.mubr.msk.f32.gmra.mrb[18].mxu0 %vm1167_vm14, %v7445_v16  ;;  %v494_v8 = vadd.f32 %v6985_v6, %v433_v10  ;;  %v435_v18 = vmul.f32 %v6969_v0, %v374_v26  ;;  %v600_v42 = vmul.f32 0.01, %v492_v51  ;;  %v376_v26 = vld [vmem:[%s6957_s9 + $0x170] sm:$0xff]  ;;  %vm546_vm7 = vcmp.ge.f32.partialorder %v492_v51, 0.0 }
  0xd0   : > { %8921 = vst [vmem:[#allocation25_spill] sm:$0xff] %v7440_v40  ;;  %8922 = vst [vmem:[#allocation26_spill] sm:$0xff] %v7442_v29  ;;  %v1136_v30 = vrot.slane %v7442_v29, 1  ;;  %v1134_v57 = vrot.slane %v7440_v40, 1  ;;  %v652_v16 = vsel %vm544_vm5, %v490_v23, %v598_v59  ;;  %v377_v40 = vld [vmem:[%s6957_s9 + $0x178] sm:$0x3] }
  0xd1   : > { %v883_v12 = vpop.permute.xlu0 %882  ;;  %v887_v11 = vpop.permute.xlu1 %886  ;;  %vm547_vm8 = vcmp.ge.f32.partialorder %v493_v20, 0.0  ;;  %v601_v15 = vmul.f32 0.01, %v493_v20  ;;  %v496_v59 = vadd.f32 %v6985_v6, %v435_v18  ;;  %vm548_vm9 = vcmp.ge.f32.partialorder %v494_v8, 0.0 }
  0xd2   : > { %v7463_v37 = vmul.f32 %v883_v12, %v650_v2  ;;  %v7465_v24 = vmul.f32 %v887_v11, %v651_v44  ;;  %v7468_v29 = vsel %vm1077_vm13, %v1133_v19, %v1134_v57  ;;  %v7471_v10 = vsel %vm1077_vm13, %v1134_v57, %v1136_v30 }
  0xd3   : > { %8925 = vst [vmem:[#allocation29_spill] sm:$0xff] %v7468_v29  ;;  %8926 = vst [vmem:[#allocation30_spill] sm:$0xff] %v7471_v10  ;;  %5681 = vmatprep.mubr.msk.f32.mxu1 %vm1167_vm14, %v7468_v29  ;;  %5934 = vmatprep.mubr.msk.f32.mxu0 %vm1167_vm14, %v7468_v29  ;;  %v495_v11 = vadd.f32 %v6985_v6, %v434_v52  ;;  %v602_v2 = vmul.f32 0.01, %v494_v8  ;;  %v497_v44 = vadd.f32 %v6985_v6, %v436_v45  ;;  %v379_v45 = vld [vmem:[%s6957_s9 + $0x188] sm:$0xff] }
  0xd4   : > { %8924 = vst [vmem:[#allocation28_spill] sm:$0xff] %v7465_v24  ;;  %5682 = vmatmul.mubr.msk.f32.gmra.mrb[22].mxu1 %vm1167_vm14, %v7471_v10  ;;  %5935 = vmatmul.mubr.msk.f32.gmra.mrb[20].mxu0 %vm1167_vm14, %v7471_v10  ;;  %v1138_v23 = vrot.slane %v7463_v37, 1  ;;  %v1139_v33 = vrot.slane %v7465_v24, 1  ;;  %v437_v52 = vmul.f32 %v6969_v0, %v376_v26  ;;  %v438_v30 = vmul.f32 %v6969_v0, %v377_v40  ;;  %v378_v26 = vld [vmem:[%s6957_s9 + $0x180] sm:$0xff] }
  0xd5   : > { %v891_v19 = vpop.permute.xlu0 %890  ;;  %v898_v63 = vpop.permute.xlu1 %897  ;;  %v654_v6 = vsel %vm546_vm7, %v492_v51, %v600_v42  ;;  %v655_v18 = vsel %vm547_vm8, %v493_v20, %v601_v15  ;;  %vm549_vm10 = vcmp.ge.f32.partialorder %v495_v11, 0.0  ;;  %v603_v0 = vmul.f32 0.01, %v495_v11 }
  0xd6   : > { %v7490_v57 = vmul.f32 %v891_v19, %v652_v16  ;;  %v7492_v12 = vmul.f32 %v898_v63, %v653_v31  ;;  %v7495_v10 = vsel %vm1077_vm13, %v1138_v23, %v1139_v33  ;;  %v656_v16 = vsel %vm548_vm9, %v494_v8, %v602_v2 }
  0xd7   : > { %8929 = vst [vmem:[#allocation33_spill] sm:$0xff] %v7495_v10  ;;  %5684 = vmatprep.mubr.msk.f32.mxu1 %vm1167_vm14, %v7495_v10  ;;  %5937 = vmatprep.mubr.msk.f32.mxu0 %vm1167_vm14, %v7495_v10  ;;  %vm550_vm11 = vcmp.ge.f32.partialorder %v496_v59, 0.0  ;;  %v604_v31 = vmul.f32 0.01, %v496_v59  ;;  %vm551_vm12 = vcmp.ge.f32.partialorder %v497_v44, 0.0  ;;  %v657_v29 = vsel %vm549_vm10, %v495_v11, %v603_v0 }
  0xd8   : > { %8927 = vst [vmem:[#allocation31_spill] sm:$0xff] %v7490_v57  ;;  %8928 = vst [vmem:[#allocation32_spill] sm:$0xff] %v7492_v12  ;;  %v1141_v40 = vrot.slane %v7490_v57, 1  ;;  %v605_v63 = vmul.f32 0.01, %v497_v44  ;;  %v1143_v2 = vrot.slane %v7492_v12, 1 }
  0xd9   : > { %v902_v23 = vpop.permute.xlu0 %901  ;;  %v906_v19 = vpop.permute.xlu1 %905  ;;  %v7507_v10 = vld [vmem:[%s6977_s14] ss:$0 sm:$0xff]  ;;  %v658_v12 = vsel %vm550_vm11, %v496_v59, %v604_v31  ;;  %vm4690_vm8 = vcmask 1042432  }
  0xda   : > { %8930 = vst [vmem:[#allocation34_spill] sm:$0xff] %v7507_v10  ;;  %v498_v51 = vadd.f32 %v7507_v10, %v437_v52  ;;  %v499_v20 = vadd.f32 %v7507_v10, %v438_v30  ;;  %v7511_v42 = vmul.f32 %v902_v23, %v654_v6  ;;  %v7513_v15 = vmul.f32 %v906_v19, %v655_v18  ;;  %v7525_v52 = vld [vmem:[%s6963_s12] ss:$0 sm:$0xff] }
  0xdb   : > { %v7516_v8 = vsel %vm1077_vm13, %v1139_v33, %v1141_v40  ;;  %8933 = vst [vmem:[#allocation37_spill] sm:$0xff] %v7525_v52  ;;  %v440_v30 = vmul.f32 %v7525_v52, %v379_v45  ;;  %v439_v6 = vmul.f32 %v7525_v52, %v378_v26  ;;  %v380_v40 = vld [vmem:[%s6957_s9 + $0x190] sm:$0x3]  ;;  %v659_v57 = vsel %vm551_vm12, %v497_v44, %v605_v63 }
  0xdc   : > { %8931 = vst [vmem:[#allocation35_spill] sm:$0xff] %v7511_v42  ;;  %8932 = vst [vmem:[#allocation36_spill] sm:$0xff] %v7516_v8  ;;  %5685 = vmatmul.mubr.msk.f32.gmra.mrb[24].mxu1 %vm1167_vm14, %v7516_v8  ;;  %5938 = vmatmul.mubr.msk.f32.gmra.mrb[22].mxu0 %vm1167_vm14, %v7516_v8  ;;  %v1146_v18 = vrot.slane %v7513_v15, 1  ;;  %v1144_v33 = vrot.slane %v7511_v42, 1  ;;  %v606_v8 = vmul.f32 0.01, %v498_v51 }
  0xdd   : > { %v913_v23 = vpop.permute.xlu0 %912  ;;  %v917_v19 = vpop.permute.xlu1 %916  ;;  %v607_v24 = vmul.f32 0.01, %v499_v20  ;;  %vm552_vm15 = vcmp.ge.f32.partialorder %v498_v51, 0.0  ;;  %v501_v59 = vadd.f32 %v7507_v10, %v440_v30  ;;  %v500_v44 = vadd.f32 %v7507_v10, %v439_v6 }
  0xde   : > { %v7534_v11 = vmul.f32 %v913_v23, %v656_v16  ;;  %v7536_v0 = vmul.f32 %v917_v19, %v657_v29  ;;  %v7539_v45 = vsel %vm1077_vm13, %v1143_v2, %v1144_v33  ;;  %v7542_v26 = vsel %vm1077_vm13, %v1144_v33, %v1146_v18 }
  0xdf   : > { %8935 = vst [vmem:[#allocation39_spill] sm:$0xff] %v7539_v45  ;;  %8936 = vst [vmem:[#allocation40_spill] sm:$0xff] %v7542_v26  ;;  %5687 = vmatprep.mubr.msk.f32.mxu1 %vm1167_vm14, %v7539_v45  ;;  %5940 = vmatprep.mubr.msk.f32.mxu0 %vm1167_vm14, %v7539_v45  ;;  %v441_v29 = vmul.f32 %v7525_v52, %v380_v40  ;;  %vm553_vm0 = vcmp.ge.f32.partialorder %v499_v20, 0.0  ;;  %v660_v33 = vsel %vm552_vm15, %v498_v51, %v606_v8 }
  0xe0   : > { %8934 = vst [vmem:[#allocation38_spill] sm:$0xff] %v7536_v0  ;;  %5688 = vmatmul.mubr.msk.f32.gmra.mrb[26].mxu1 %vm1167_vm14, %v7542_v26  ;;  %5941 = vmatmul.mubr.msk.f32.gmra.mrb[24].mxu0 %vm1167_vm14, %v7542_v26  ;;  %v1148_v16 = vrot.slane %v7534_v11, 1  ;;  %v1149_v31 = vrot.slane %v7536_v0, 1  ;;  %v661_v40 = vsel %vm553_vm0, %v499_v20, %v607_v24  ;;  %v609_v23 = vmul.f32 0.01, %v501_v59 }
  0xe1   : > { %v921_v63 = vpop.permute.xlu0 %920  ;;  %v928_v2 = vpop.permute.xlu1 %927  ;;  %v608_v19 = vmul.f32 0.01, %v500_v44  ;;  %v502_v26 = vadd.f32 %v7507_v10, %v441_v29  ;;  %vm555_vm1 = vcmp.ge.f32.partialorder %v501_v59, 0.0  ;;  %vm554_vm2 = vcmp.ge.f32.partialorder %v500_v44, 0.0 }
  0xe2   : > { %v7557_v18 = vmul.f32 %v921_v63, %v658_v12  ;;  %v7559_v30 = vmul.f32 %v928_v2, %v659_v57  ;;  %v7562_v6 = vsel %vm1077_vm13, %v1148_v16, %v1149_v31  ;;  %v663_v24 = vsel %vm555_vm1, %v501_v59, %v609_v23  ;;  %v4920_v23 = vld [vmem:[%s8814_s3 + $0x98] sm:$0xff] }
  0xe3   : > { %8938 = vst [vmem:[#allocation42_spill] sm:$0xff] %v7562_v6  ;;  %5690 = vmatprep.mubr.msk.f32.mxu1 %vm1167_vm14, %v7562_v6  ;;  %5943 = vmatprep.mubr.msk.f32.mxu0 %vm1167_vm14, %v7562_v6  ;;  %v662_v20 = vsel %vm554_vm2, %v500_v44, %v608_v19  ;;  %v610_v29 = vmul.f32 0.01, %v502_v26  ;;  %vm556_vm3 = vcmp.ge.f32.partialorder %v502_v26, 0.0  ;;  %v4919_v44 = vld [vmem:[%s8814_s3 + $0x90] sm:$0xff]  ;;  %v1807_v52 = vrot.slane %v7463_v37, 2 }
  0xe4   : > { %8937 = vst [vmem:[#allocation41_spill] sm:$0xff] %v7559_v30  ;;  %v1151_v12 = vrot.slane %v7557_v18, 1  ;;  %v1153_v2 = vrot.slane %v7559_v30, 1 }
  0xe5   : > { %v932_v57 = vpop.permute.xlu0 %931  ;;  %v936_v63 = vpop.permute.xlu1 %935  ;;  %v664_v59 = vsel %vm556_vm3, %v502_v26, %v610_v29  ;;  %v1753_v29 = vrot.slane %v7026_v60, 2 }
  0xe6   : > { %v7570_v16 = vmul.f32 %v932_v57, %v660_v33  ;;  %v7572_v51 = vmul.f32 %v936_v63, %v661_v40  ;;  %v7575_v8 = vsel %vm1077_vm13, %v1149_v31, %v1151_v12 }
  0xe7   : > { %8939 = vst [vmem:[#allocation43_spill] sm:$0xff] %v7575_v8  ;;  %5691 = vmatmul.mubr.msk.f32.gmra.mrb[28].mxu1 %vm1167_vm14, %v7575_v8  ;;  %5944 = vmatmul.mubr.msk.f32.gmra.mrb[26].mxu0 %vm1167_vm14, %v7575_v8  ;;  %v5081_v8 = vld [vmem:[%s8814_s3 + $0x1a0] sm:$0xff] }
  0xe8   : > { %v1156_v6 = vrot.slane %v7572_v51, 1  ;;  %v1154_v33 = vrot.slane %v7570_v16, 1 }
  0xe9   : > { %v947_v40 = vpop.permute.xlu1 %946  ;;  %v943_v57 = vpop.permute.xlu0 %942 }
  0xea   : > { %v7584_v31 = vmul.f32 %v947_v40, %v663_v24  ;;  %v7586_v12 = vmul.f32 %v943_v57, %v662_v20  ;;  %v7589_v63 = vsel %vm1077_vm13, %v1153_v2, %v1154_v33  ;;  %v7592_v45 = vsel %vm1077_vm13, %v1154_v33, %v1156_v6  ;;  %v4921_v33 = vld [vmem:[%s8814_s3 + $0xa0] sm:$0xff]  ;;  %v4922_v40 = vld [vmem:[%s8814_s3 + $0xa8] sm:$0xff] }
  0xeb   : > { %8942 = vst [vmem:[#allocation46_spill] sm:$0xff] %v7589_v63  ;;  %8943 = vst [vmem:[#allocation47_spill] sm:$0xff] %v7592_v45  ;;  %5693 = vmatprep.mubr.msk.f32.mxu1 %vm1167_vm14, %v7589_v63  ;;  %5946 = vmatprep.mubr.msk.f32.mxu0 %vm1167_vm14, %v7589_v63  ;;  %v6308_v20 = vpack.c.bf16 %v4920_v23, %v4919_v44  ;;  %v1755_v44 = vrot.slane %v7012_v41, 2  ;;  %v1757_v41 = vrot.slane %v7053_v21, 2  ;;  %v1763_v63 = vrot.slane %v7137_v27, 2 }
  0xec   : > { %8940 = vst [vmem:[#allocation44_spill] sm:$0xff] %v7584_v31  ;;  %8941 = vst [vmem:[#allocation45_spill] sm:$0xff] %v7586_v12  ;;  %5694 = vmatmul.mubr.msk.f32.gmra.mrb[30].mxu1 %vm1167_vm14, %v7592_v45  ;;  %5947 = vmatmul.mubr.msk.f32.gmra.mrb[28].mxu0 %vm1167_vm14, %v7592_v45  ;;  %v2430_v6 = vrot.slane %v7586_v12, 1  ;;  %v2431_v19 = vrot.slane %v7584_v31, 1  ;;  %v1762_v45 = vrot.slane %v7107_v4, 2 }
  0xed   : > { %v951_v2 = vpop.permute.xlu0 %950  ;;  %5712 = vmatprep.mubr.msk.f32.mxu1 %vm1167_vm14, %v7028_v61 }
  0xee   : > { %v7612_v26 = vmul.f32 %v951_v2, %v664_v59  ;;  %v7615_v24 = vsel %vm1077_vm13, %v2430_v6, %v2431_v19  ;;  %v1752_v59 = vrot.slane %v7019_v50, 2  ;;  %v6312_v6 = vpack.c.bf16 %v4922_v40, %v4921_v33  ;;  %v4923_v33 = vld [vmem:[%s8814_s3 + $0xb0] sm:$0xff]  ;;  %v4924_v40 = vld [vmem:[%s8814_s3 + $0xb8] sm:$0xff] }
  0xef   : > { %8944 = vst [vmem:[#allocation48_spill] sm:$0xff] %v7615_v24  ;;  %5949 = vmatprep.mubr.msk.f32.mxu0 %vm1167_vm14, %v7615_v24  ;;  %v5079_v24 = vld [vmem:[%s8814_s3 + $0x190] sm:$0xff] }
  0xf0   : > { %v2433_v57 = vrot.slane %v7612_v26, 1  ;;  %5713 = vmatmul.mubr.msk.f32.vlgmr.msra.gmra.mrb[0].mxu1 %vm1167_vm14, %v7044_v17  ;;  %v7640_v2 = vsel %vm1746_vm4, %v1752_v59, %v1753_v29  ;;  %v7664_v59 = vsel %vm1746_vm4, %v1753_v29, %v1755_v44  ;;  %v4957_v29 = vld [vmem:[%s8814_s3 + $0xc0] sm:$0xff]  ;;  %v4958_v44 = vld [vmem:[%s8814_s3 + $0xc8] sm:$0xff] }
  0xf1   : > { %5715 = vmatprep.mubr.msk.f32.mxu1 %vm1167_vm14, %v7019_v50  ;;  %6307 = vmatpush3.bf16.msra.mxu1 %v7216_v22  ;;  %v5080_v22 = vld [vmem:[%s8814_s3 + $0x198] sm:$0xff] }
  0xf2   : > { %v7635_v23 = vsel %vm1077_vm13, %v2431_v19, %v2433_v57  ;;  %6309 = vmatprep.subr.bf16.mxu1 %v6308_v20  ;;  %v1758_v19 = vrot.slane %v7073_v36, 2  ;;  %v1760_v57 = vrot.slane %v7105_v3, 2  ;;  %v5082_v3 = vld [vmem:[%s8814_s3 + $0x1a8] sm:$0xff]  ;;  %v8946_v50 = vld [vmem:[#allocation25_spill] sm:$0xff] }
  0xf3   : > { %8945 = vst [vmem:[#allocation49_spill] sm:$0xff] %v7635_v23  ;;  %5950 = vmatmul.mubr.msk.f32.gmra.mrb[30].mxu0 %vm1167_vm14, %v7635_v23  ;;  %v6372_v23 = vpack.c.bf16 %v5080_v22, %v5079_v24  ;;  %v1803_v10 = vrot.slane %v8946_v50, 2 }
  0xf4   : > { %5716 = vmatmul.mubr.msk.f32.gmra.mrb[2].mxu1 %vm1167_vm14, %v7026_v60  ;;  %5968 = vmatprep.mubr.msk.f32.mxu0 %vm1167_vm14, %v7640_v2  ;;  %v7680_v24 = vsel %vm1746_vm4, %v1757_v41, %v1758_v19  ;;  %v7694_v22 = vsel %vm1746_vm4, %v1758_v19, %v1760_v57  ;;  %v6376_v41 = vpack.c.bf16 %v5082_v3, %v5081_v8  ;;  %v1768_v60 = vrot.slane %v7173_v48, 2  ;;  %v5084_v19 = vld [vmem:[%s8814_s3 + $0x1b8] sm:$0xff] }
  0xf5   : > { %5718 = vmatprep.mubr.msk.f32.mxu1 %vm1167_vm14, %v7053_v21  ;;  %6311 = vmatpush3.bf16.msra.mxu1 %v6308_v20  ;;  %v6316_v20 = vpack.c.bf16 %v4924_v40, %v4923_v33  ;;  %v7699_v33 = vsel %vm1746_vm4, %v1762_v45, %v1763_v63  ;;  %v1767_v40 = vrot.slane %v7171_v47, 2  ;;  %v7709_v8 = vpack.c.bf16 %v4958_v44, %v4957_v29 }
  0xf6   : > { %6313 = vmatprep.subr.bf16.mxu1 %v6312_v6  ;;  %v1770_v45 = vrot.slane %v7208_v13, 2  ;;  %v1772_v29 = vrot.slane %v7210_v14, 2  ;;  %v1773_v44 = vrot.slane %v7232_v35, 2  ;;  %v5117_v13 = vld [vmem:[%s8814_s3 + $0x1c0] sm:$0xff] }
  0xf7   : > { %5969 = vmatmul.mubr.msk.f32.vlgmr.msra.gmra.mrb[0].mxu0 %vm1167_vm14, %v7664_v59  ;;  %v7724_v3 = vsel %vm1746_vm4, %v1767_v40, %v1768_v60 }
  0xf8   : > { %6371 = vmatpush3.bf16.msra.mxu0 %v7169_v46  ;;  %5719 = vmatmul.mubr.msk.f32.gmra.mrb[4].mxu1 %vm1167_vm14, %v7073_v36  ;;  %v1765_v46 = vrot.slane %v7139_v28, 2  ;;  %v5083_v28 = vld [vmem:[%s8814_s3 + $0x1b0] sm:$0xff]  ;;  %v7750_v40 = vsel %vm1746_vm4, %v1772_v29, %v1773_v44  ;;  %v1783_v29 = vrot.slane %v7303_v1, 2 }
  0xf9   : > { %5971 = vmatprep.mubr.msk.f32.mxu0 %vm1167_vm14, %v7680_v24  ;;  %5721 = vmatprep.mubr.msk.f32.mxu1 %vm1167_vm14, %v7107_v4  ;;  %v6380_v57 = vpack.c.bf16 %v5084_v19, %v5083_v28  ;;  %v1777_v28 = vrot.slane %v7256_v5, 2  ;;  %v1778_v19 = vrot.slane %v7258_v7, 2 }
  0xfa   : > { %6373 = vmatprep.subr.bf16.mxu0 %v6372_v23  ;;  %6315 = vmatpush3.bf16.msra.mxu1 %v6312_v6  ;;  %v7719_v6 = vsel %vm1746_vm4, %v1763_v63, %v1765_v46  ;;  %v5118_v63 = vld [vmem:[%s8814_s3 + $0x1c8] sm:$0xff] }
  0xfb   : > { %5972 = vmatmul.mubr.msk.f32.gmra.mrb[2].mxu0 %vm1167_vm14, %v7694_v22  ;;  %6317 = vmatprep.subr.bf16.mxu1 %v6316_v20  ;;  %v7745_v46 = vpack.c.bf16 %v5118_v63, %v5117_v13  ;;  %v1787_v13 = vrot.slane %v7325_v55, 2  ;;  %v1788_v63 = vrot.slane %v7327_v54, 2 }
  0xfc   : > { %5722 = vmatmul.mubr.msk.f32.gmra.mrb[6].mxu1 %vm1167_vm14, %v7137_v27  ;;  %5974 = vmatprep.mubr.msk.f32.mxu0 %vm1167_vm14, %v7699_v33 }
  0xfd   : > { %5724 = vmatprep.mubr.msk.f32.mxu1 %vm1167_vm14, %v7171_v47  ;;  %6375 = vmatpush3.bf16.msra.mxu0 %v6372_v23  ;;  %v1775_v23 = vrot.slane %v7234_v38, 2 }
  0xfe   : > { %6377 = vmatprep.subr.bf16.mxu0 %v6376_v41  ;;  %6319 = vmatpush3.bf16.msra.mxu1 %v6316_v20  ;;  %v7743_v20 = vsel %vm1746_vm4, %v1768_v60, %v1770_v45  ;;  %v1780_v60 = vrot.slane %v7282_v32, 2  ;;  %v1782_v45 = vrot.slane %v7284_v34, 2  ;;  %v1785_v32 = vrot.slane %v7305_v9, 2 }
  0xff   : > { %5975 = vmatmul.mubr.msk.f32.gmra.mrb[4].mxu0 %vm1167_vm14, %v7719_v6  ;;  %6321 = vmatprep.subr.bf16.mxu1 %v7709_v8  ;;  %v7762_v38 = vsel %vm1746_vm4, %v1773_v44, %v1775_v23  ;;  %v1790_v9 = vrot.slane %v7353_v58, 2  ;;  %v1795_v58 = vrot.slane %v7374_v62, 2  ;;  %v1800_v62 = vrot.slane %v7421_v49, 2  ;;  %v8947_v49 = vld [vmem:[#allocation26_spill] sm:$0xff] }
 0x100   : > { %5725 = vmatmul.mubr.msk.f32.gmra.mrb[8].mxu1 %vm1167_vm14, %v7173_v48  ;;  %5977 = vmatprep.mubr.msk.f32.mxu0 %vm1167_vm14, %v7724_v3  ;;  %v7785_v44 = vsel %vm1746_vm4, %v1782_v45, %v1783_v29  ;;  %v7797_v23 = vsel %vm1746_vm4, %v1783_v29, %v1785_v32  ;;  %v1797_v32 = vrot.slane %v7393_v43, 2 }
 0x101   : > { %5727 = vmatprep.mubr.msk.f32.mxu1 %vm1167_vm14, %v7210_v14  ;;  %6379 = vmatpush3.bf16.msra.mxu0 %v6376_v41  ;;  %v7768_v41 = vsel %vm1746_vm4, %v1777_v28, %v1778_v19  ;;  %v7802_v28 = vsel %vm1746_vm4, %v1787_v13, %v1788_v63  ;;  %v7814_v45 = vsel %vm1746_vm4, %v1788_v63, %v1790_v9  ;;  %v1798_v13 = vrot.slane %v7395_v39, 2 }
 0x102   : > { %6381 = vmatprep.subr.bf16.mxu0 %v6380_v57 }
 0x103   : > { %5978 = vmatmul.mubr.msk.f32.gmra.mrb[6].mxu0 %vm1167_vm14, %v7743_v20  ;;  %v7836_v9 = vsel %vm1746_vm4, %v1797_v32, %v1798_v13 }
 0x104   : > { %5728 = vmatmul.mubr.msk.f32.gmra.mrb[10].mxu1 %vm1167_vm14, %v7232_v35  ;;  %5980 = vmatprep.mubr.msk.f32.mxu0 %vm1167_vm14, %v7750_v40 }
 0x105   : > { %5730 = vmatprep.mubr.msk.f32.mxu1 %vm1167_vm14, %v7256_v5  ;;  %6383 = vmatpush3.bf16.msra.mxu0 %v6380_v57  ;;  %v7780_v57 = vsel %vm1746_vm4, %v1778_v19, %v1780_v60  ;;  %v1792_v19 = vrot.slane %v7355_v56, 2  ;;  %v1793_v60 = vrot.slane %v7372_v25, 2 }
 0x106   : > { %6385 = vmatprep.subr.bf16.mxu0 %v7745_v46 }
 0x107   : > { %5981 = vmatmul.mubr.msk.f32.gmra.mrb[8].mxu0 %vm1167_vm14, %v7762_v38  ;;  %v7819_v29 = vsel %vm1746_vm4, %v1792_v19, %v1793_v60  ;;  %v7831_v63 = vsel %vm1746_vm4, %v1793_v60, %v1795_v58  ;;  %v1802_v19 = vrot.slane %v7423_v53, 2  ;;  %v1805_v60 = vrot.slane %v8947_v49, 2 }
 0x108   : > { %5731 = vmatmul.mubr.msk.f32.gmra.mrb[12].mxu1 %vm1167_vm14, %v7258_v7  ;;  %5983 = vmatprep.mubr.msk.f32.mxu0 %vm1167_vm14, %v7768_v41  ;;  %v7848_v58 = vsel %vm1746_vm4, %v1798_v13, %v1800_v62  ;;  %v8951_v13 = vld [vmem:[#allocation31_spill] sm:$0xff] }
 0x109   : > { %5733 = vmatprep.mubr.msk.f32.mxu1 %vm1167_vm14, %v7284_v34  ;;  %8948 = vst [vmem:[#allocation26_spill] sm:$0xff] %v7848_v58  ;;  %v7853_v32 = vsel %vm1746_vm4, %v1802_v19, %v1803_v10  ;;  %v1810_v62 = vrot.slane %v8951_v13, 2  ;;  %v7865_v49 = vsel %vm1746_vm4, %v1803_v10, %v1805_v60  ;;  %v1815_v10 = vrot.slane %v7513_v15, 2 }
 0x10a   : > { %8949 = vst [vmem:[#allocation50_spill] sm:$0xff] %v7853_v32  ;;  %8952 = vst [vmem:[#allocation31_spill] sm:$0xff] %v7865_v49  ;;  %v1817_v13 = vrot.slane %v7534_v11, 2 }
 0x10b   : > { %5984 = vmatmul.mubr.msk.f32.gmra.mrb[10].mxu0 %vm1167_vm14, %v7780_v57 }
 0x10c   : > { %5734 = vmatmul.mubr.msk.f32.gmra.mrb[14].mxu1 %vm1167_vm14, %v7303_v1  ;;  %5986 = vmatprep.mubr.msk.f32.mxu0 %vm1167_vm14, %v7785_v44 }
 0x10d   : > { %5736 = vmatprep.mubr.msk.f32.mxu1 %vm1167_vm14, %v7325_v55 }
 0x10f   : > { %5987 = vmatmul.mubr.msk.f32.gmra.mrb[12].mxu0 %vm1167_vm14, %v7797_v23 }
 0x110   : > { %5737 = vmatmul.mubr.msk.f32.gmra.mrb[16].mxu1 %vm1167_vm14, %v7327_v54  ;;  %5989 = vmatprep.mubr.msk.f32.mxu0 %vm1167_vm14, %v7802_v28 }
 0x111   : > { %5739 = vmatprep.mubr.msk.f32.mxu1 %vm1167_vm14, %v7355_v56 }
 0x113   : > { %5990 = vmatmul.mubr.msk.f32.gmra.mrb[14].mxu0 %vm1167_vm14, %v7814_v45 }
 0x114   : > { %5740 = vmatmul.mubr.msk.f32.gmra.mrb[18].mxu1 %vm1167_vm14, %v7372_v25  ;;  %5992 = vmatprep.mubr.msk.f32.mxu0 %vm1167_vm14, %v7819_v29 }
 0x115   : > { %5742 = vmatprep.mubr.msk.f32.mxu1 %vm1167_vm14, %v7393_v43 }
 0x117   : > { %5993 = vmatmul.mubr.msk.f32.gmra.mrb[16].mxu0 %vm1167_vm14, %v7831_v63 }
 0x118   : > { %5743 = vmatmul.mubr.msk.f32.gmra.mrb[20].mxu1 %vm1167_vm14, %v7395_v39  ;;  %5995 = vmatprep.mubr.msk.f32.mxu0 %vm1167_vm14, %v7836_v9  ;;  %v8950_v39 = vld [vmem:[#allocation28_spill] sm:$0xff] }
 0x119   : > { %5745 = vmatprep.mubr.msk.f32.mxu1 %vm1167_vm14, %v7423_v53  ;;  %v1808_v43 = vrot.slane %v8950_v39, 2  ;;  %v8954_v53 = vld [vmem:[#allocation32_spill] sm:$0xff] }
 0x11b   : > { %5996 = vmatmul.mubr.msk.f32.gmra.mrb[18].mxu0 %vm1167_vm14, %v7848_v58  ;;  %v7870_v19 = vsel %vm1746_vm4, %v1807_v52, %v1808_v43  ;;  %v1812_v58 = vrot.slane %v8954_v53, 2  ;;  %v7882_v60 = vsel %vm1746_vm4, %v1808_v43, %v1810_v62  ;;  %v1820_v43 = vrot.slane %v7557_v18, 2 }
 0x11c   : > { %5746 = vmatmul.mubr.msk.f32.gmra.mrb[22].mxu1 %vm1167_vm14, %v8946_v50  ;;  %5998 = vmatprep.mubr.msk.f32.mxu0 %vm1167_vm14, %v7853_v32  ;;  %8953 = vst [vmem:[#allocation51_spill] sm:$0xff] %v7870_v19  ;;  %v1813_v50 = vrot.slane %v7511_v42, 2  ;;  %8955 = vst [vmem:[#allocation52_spill] sm:$0xff] %v7882_v60  ;;  %v1822_v62 = vrot.slane %v7559_v30, 2 }
 0x11d   : > { %5748 = vmatprep.mubr.msk.f32.mxu1 %vm1167_vm14, %v7463_v37 }
 0x11e   : > { %v7887_v52 = vsel %vm1746_vm4, %v1812_v58, %v1813_v50  ;;  %v7899_v15 = vsel %vm1746_vm4, %v1813_v50, %v1815_v10  ;;  %v1825_v50 = vrot.slane %v7572_v51, 2  ;;  %v8960_v10 = vld [vmem:[#allocation4_spill] sm:$0xff] }
 0x11f   : > { %5999 = vmatmul.mubr.msk.f32.gmra.mrb[20].mxu0 %vm1167_vm14, %v7865_v49  ;;  %8956 = vst [vmem:[#allocation53_spill] sm:$0xff] %v7887_v52  ;;  %8957 = vst [vmem:[#allocation54_spill] sm:$0xff] %v7899_v15 }
 0x120   : > { %5749 = vmatmul.mubr.msk.f32.gmra.mrb[24].mxu1 %vm1167_vm14, %v8950_v39  ;;  %6001 = vmatprep.mubr.msk.f32.mxu0 %vm1167_vm14, %v7870_v19  ;;  %v1818_v39 = vrot.slane %v7536_v0, 2 }
 0x121   : > { %5751 = vmatprep.mubr.msk.f32.mxu1 %vm1167_vm14, %v8954_v53  ;;  %v1748_v53 = vrot.slane %v7044_v17, 2  ;;  %v2705_v17 = vrot.slane %v7586_v12, 2 }
 0x122   : > { %v7904_v58 = vsel %vm1746_vm4, %v1817_v13, %v1818_v39  ;;  %v7918_v18 = vsel %vm1746_vm4, %v1818_v39, %v1820_v43  ;;  %v1750_v13 = vrot.slane %v8960_v10, 2  ;;  %v4960_v39 = vld [vmem:[%s8814_s3 + $0xd8] sm:$0xff]  ;;  %v2708_v43 = vrot.slane %v7612_v26, 2  ;;  %v4962_v26 = vld [vmem:[%s8814_s3 + $0xe8] sm:$0xff] }
 0x123   : > { %6002 = vmatmul.mubr.msk.f32.gmra.mrb[22].mxu0 %vm1167_vm14, %v7882_v60  ;;  %8958 = vst [vmem:[#allocation55_spill] sm:$0xff] %v7904_v58  ;;  %8959 = vst [vmem:[#allocation56_spill] sm:$0xff] %v7918_v18 }
 0x124   : > { %5752 = vmatmul.mubr.msk.f32.gmra.mrb[26].mxu1 %vm1167_vm14, %v7511_v42  ;;  %6004 = vmatprep.mubr.msk.f32.mxu0 %vm1167_vm14, %v7887_v52  ;;  %v1823_v42 = vrot.slane %v7570_v16, 2  ;;  %v1747_v52 = vrot.slane %v7028_v61, 2 }
 0x125   : > { %5754 = vmatprep.mubr.msk.f32.mxu1 %vm1167_vm14, %v7534_v11 }
 0x126   : > { %v7924_v61 = vsel %vm1746_vm4, %v1822_v62, %v1823_v42  ;;  %v1749_v51 = vsel %vm1746_vm4, %v1747_v52, %v1748_v53  ;;  %v7942_v62 = vsel %vm1746_vm4, %v1823_v42, %v1825_v50  ;;  %v4961_v52 = vld [vmem:[%s8814_s3 + $0xe0] sm:$0xff]  ;;  %v5122_v50 = vld [vmem:[%s8814_s3 + $0x1e8] sm:$0xff] }
 0x127   : > { %6005 = vmatmul.mubr.msk.f32.gmra.mrb[24].mxu0 %vm1167_vm14, %v7899_v15  ;;  %8961 = vst [vmem:[#allocation4_spill] sm:$0xff] %v7924_v61  ;;  %8962 = vst [vmem:[#allocation57_spill] sm:$0xff] %v7942_v62  ;;  %v6328_v42 = vpack.c.bf16 %v4962_v26, %v4961_v52  ;;  %v5157_v26 = vld [vmem:[%s8814_s3 + $0x200] sm:$0xff] }
 0x128   : > { %5755 = vmatmul.mubr.msk.f32.gmra.mrb[28].mxu1 %vm1167_vm14, %v7536_v0  ;;  %6007 = vmatprep.mubr.msk.f32.mxu0 %vm1167_vm14, %v7904_v58  ;;  %v2706_v0 = vrot.slane %v7584_v31, 2  ;;  %v1751_v31 = vsel %vm1746_vm4, %v1748_v53, %v1750_v13 }
 0x129   : > { %5757 = vmatprep.mubr.msk.f32.mxu1 %vm1167_vm14, %v7559_v30  ;;  %v4959_v30 = vld [vmem:[%s8814_s3 + $0xd0] sm:$0xff] }
 0x12a   : > { %v6324_v10 = vpack.c.bf16 %v4960_v39, %v4959_v30  ;;  %v7948_v12 = vsel %vm1746_vm4, %v2705_v17, %v2706_v0  ;;  %v7963_v53 = vsel %vm1746_vm4, %v2706_v0, %v2708_v43  ;;  %v5119_v30 = vld [vmem:[%s8814_s3 + $0x1d0] sm:$0xff]  ;;  %v3931_v17 = vld [vmem:[%s8815_s4] sm:$0xff]  ;;  %v3932_v39 = vld [vmem:[%s8815_s4 + $0x8] sm:$0xff] }
 0x12b   : > { %6008 = vmatmul.mubr.msk.f32.gmra.mrb[26].mxu0 %vm1167_vm14, %v7918_v18  ;;  %8963 = vst [vmem:[#allocation58_spill] sm:$0xff] %v7948_v12  ;;  %8964 = vst [vmem:[#allocation59_spill] sm:$0xff] %v7963_v53  ;;  %v4963_v0 = vld [vmem:[%s8814_s3 + $0xf0] sm:$0xff]  ;;  %v5124_v43 = vld [vmem:[%s8814_s3 + $0x1f8] sm:$0xff] }
 0x12c   : > { %5758 = vmatmul.mubr.msk.f32.gmra.mrb[30].mxu1 %vm1167_vm14, %v7570_v16  ;;  %6010 = vmatprep.mubr.msk.f32.mxu0 %vm1167_vm14, %v7924_v61 }
 0x12d   : > { %5776 = vmatprep.mubr.msk.f32.mxu1 %vm1167_vm14, %v1749_v51 }
 0x12f   : > { %6011 = vmatmul.mubr.msk.f32.gmra.mrb[28].mxu0 %vm1167_vm14, %v7942_v62 }
 0x130   : > { %5777 = vmatmul.mubr.msk.f32.vlgmr.msra.gmra.mrb[0].mxu1 %vm1167_vm14, %v1751_v31  ;;  %6013 = vmatprep.mubr.msk.f32.mxu0 %vm1167_vm14, %v7948_v12  ;;  %v5120_v31 = vld [vmem:[%s8814_s3 + $0x1d8] sm:$0xff]  ;;  %v8976_v12 = vld [vmem:[#allocation38_spill] sm:$0xff] }
 0x131   : > { %5779 = vmatprep.mubr.msk.f32.mxu1 %vm1167_vm14, %v7640_v2  ;;  %6323 = vmatpush3.bf16.msra.mxu1 %v7709_v8  ;;  %v4964_v2 = vld [vmem:[%s8814_s3 + $0xf8] sm:$0xff]  ;;  %v6388_v8 = vpack.c.bf16 %v5120_v31, %v5119_v30  ;;  %v8965_v31 = vld [vmem:[#allocation19_spill] sm:$0xff] }
 0x132   : > { %6325 = vmatprep.subr.bf16.mxu1 %v6324_v10  ;;  %v6332_v13 = vpack.c.bf16 %v4964_v2, %v4963_v0  ;;  %v8966_v0 = vld [vmem:[#allocation20_spill] sm:$0xff]  ;;  %v8967_v2 = vld [vmem:[#allocation26_spill] sm:$0xff] }
 0x133   : > { %6014 = vmatmul.mubr.msk.f32.gmra.mrb[30].mxu0 %vm1167_vm14, %v7963_v53  ;;  %v8975_v53 = vld [vmem:[#allocation35_spill] sm:$0xff] }
 0x134   : > { %5780 = vmatmul.mubr.msk.f32.gmra.mrb[2].mxu1 %vm1167_vm14, %v7664_v59  ;;  %6032 = vmatprep.mubr.msk.f32.mxu0 %vm1167_vm14, %v7053_v21  ;;  %v5121_v59 = vld [vmem:[%s8814_s3 + $0x1e0] sm:$0xff] }
 0x135   : > { %5782 = vmatprep.mubr.msk.f32.mxu1 %vm1167_vm14, %v7680_v24  ;;  %6327 = vmatpush3.bf16.msra.mxu1 %v6324_v10  ;;  %v6392_v51 = vpack.c.bf16 %v5122_v50, %v5121_v59  ;;  %v8014_v10 = vpack.c.bf16 %v3932_v39, %v3931_v17  ;;  %v381_v59 = vld [vmem:[%s6957_s9 + $0x198] sm:$0xff]  ;;  %v382_v39 = vld [vmem:[%s6957_s9 + $0x1a0] sm:$0xff] }
 0x136   : > { %6329 = vmatprep.subr.bf16.mxu1 %v6328_v42  ;;  %v8969_v50 = vld [vmem:[#allocation25_spill] sm:$0xff] }
 0x137   : > { %6033 = vmatmul.mubr.msk.f32.vlgmr.msra.gmra.mrb[0].mxu0 %vm1167_vm14, %v7073_v36 }
 0x138   : > { %6387 = vmatpush3.bf16.msra.mxu0 %v7745_v46  ;;  %5783 = vmatmul.mubr.msk.f32.gmra.mrb[4].mxu1 %vm1167_vm14, %v7694_v22  ;;  %v5123_v46 = vld [vmem:[%s8814_s3 + $0x1f0] sm:$0xff] }
 0x139   : > { %6035 = vmatprep.mubr.msk.f32.mxu0 %vm1167_vm14, %v7107_v4  ;;  %5785 = vmatprep.mubr.msk.f32.mxu1 %vm1167_vm14, %v7699_v33  ;;  %v6396_v52 = vpack.c.bf16 %v5124_v43, %v5123_v46  ;;  %v8972_v46 = vld [vmem:[#allocation32_spill] sm:$0xff] }
 0x13a   : > { %6389 = vmatprep.subr.bf16.mxu0 %v6388_v8  ;;  %6331 = vmatpush3.bf16.msra.mxu1 %v6328_v42  ;;  %v5158_v42 = vld [vmem:[%s8814_s3 + $0x208] sm:$0xff] }
 0x13b   : > { %6036 = vmatmul.mubr.msk.f32.gmra.mrb[2].mxu0 %vm1167_vm14, %v7137_v27  ;;  %6333 = vmatprep.subr.bf16.mxu1 %v6332_v13  ;;  %v8037_v30 = vpack.c.bf16 %v5158_v42, %v5157_v26  ;;  %v8974_v26 = vld [vmem:[#allocation34_spill] sm:$0xff] }
 0x13c   : > { %5786 = vmatmul.mubr.msk.f32.gmra.mrb[6].mxu1 %vm1167_vm14, %v7719_v6  ;;  %6038 = vmatprep.mubr.msk.f32.mxu0 %vm1167_vm14, %v7171_v47 }
 0x13d   : > { %5788 = vmatprep.mubr.msk.f32.mxu1 %vm1167_vm14, %v7724_v3  ;;  %6391 = vmatpush3.bf16.msra.mxu0 %v6388_v8  ;;  %v8968_v8 = vld [vmem:[#allocation23_spill] sm:$0xff] }
 0x13e   : > { %6393 = vmatprep.subr.bf16.mxu0 %v6392_v51  ;;  %6335 = vmatpush3.bf16.msra.mxu1 %v6332_v13  ;;  %v8970_v13 = vld [vmem:[#allocation37_spill] sm:$0xff] }
 0x13f   : > { %6039 = vmatmul.mubr.msk.f32.gmra.mrb[4].mxu0 %vm1167_vm14, %v7173_v48  ;;  %6417 = vmatprep.subr.bf16.mxu1 %v8014_v10  ;;  %v442_v17 = vmul.f32 %v8970_v13, %v381_v59  ;;  %v443_v43 = vmul.f32 %v8970_v13, %v382_v39 }
 0x140   : > { %5789 = vmatmul.mubr.msk.f32.gmra.mrb[8].mxu1 %vm1167_vm14, %v7743_v20  ;;  %6041 = vmatprep.mubr.msk.f32.mxu0 %vm1167_vm14, %v7210_v14 }
 0x141   : > { %5791 = vmatprep.mubr.msk.f32.mxu1 %vm1167_vm14, %v7750_v40  ;;  %6395 = vmatpush3.bf16.msra.mxu0 %v6392_v51  ;;  %v8971_v51 = vld [vmem:[#allocation28_spill] sm:$0xff]  ;;  %v503_v42 = vadd.f32 %v8974_v26, %v442_v17  ;;  %v504_v59 = vadd.f32 %v8974_v26, %v443_v43  ;;  %v8977_v17 = vld [vmem:[#allocation41_spill] sm:$0xff]  ;;  %v958_v43 = vpop.permute.xlu1 %957 }
 0x142   : > { %6397 = vmatprep.subr.bf16.mxu0 %v6396_v52 }
 0x143   : > { %6042 = vmatmul.mubr.msk.f32.gmra.mrb[6].mxu0 %vm1167_vm14, %v7232_v35  ;;  %v611_v39 = vmul.f32 0.01, %v503_v42  ;;  %vm557_vm5 = vcmp.ge.f32.partialorder %v503_v42, 0.0  ;;  %vm558_vm6 = vcmp.ge.f32.partialorder %v504_v59, 0.0 }
 0x144   : > { %5792 = vmatmul.mubr.msk.f32.gmra.mrb[10].mxu1 %vm1167_vm14, %v7762_v38  ;;  %6044 = vmatprep.mubr.msk.f32.mxu0 %vm1167_vm14, %v7256_v5 }
 0x145   : > { %5794 = vmatprep.mubr.msk.f32.mxu1 %vm1167_vm14, %v7768_v41  ;;  %6399 = vmatpush3.bf16.msra.mxu0 %v6396_v52  ;;  %v8973_v52 = vld [vmem:[#allocation53_spill] sm:$0xff] }
 0x146   : > { %6401 = vmatprep.subr.bf16.mxu0 %v8037_v30 }
 0x147   : > { %6045 = vmatmul.mubr.msk.f32.gmra.mrb[8].mxu0 %vm1167_vm14, %v7258_v7 }
 0x148   : > { %5795 = vmatmul.mubr.msk.f32.gmra.mrb[12].mxu1 %vm1167_vm14, %v7780_v57  ;;  %6047 = vmatprep.mubr.msk.f32.mxu0 %vm1167_vm14, %v7284_v34 }
 0x149   : > { %5797 = vmatprep.mubr.msk.f32.mxu1 %vm1167_vm14, %v7785_v44 }
 0x14b   : > { %6048 = vmatmul.mubr.msk.f32.gmra.mrb[10].mxu0 %vm1167_vm14, %v7303_v1 }
 0x14c   : > { %5798 = vmatmul.mubr.msk.f32.gmra.mrb[14].mxu1 %vm1167_vm14, %v7797_v23  ;;  %6050 = vmatprep.mubr.msk.f32.mxu0 %vm1167_vm14, %v7325_v55 }
 0x14d   : > { %5800 = vmatprep.mubr.msk.f32.mxu1 %vm1167_vm14, %v7802_v28 }
 0x14f   : > { %6051 = vmatmul.mubr.msk.f32.gmra.mrb[12].mxu0 %vm1167_vm14, %v7327_v54 }
 0x150   : > { %5801 = vmatmul.mubr.msk.f32.gmra.mrb[16].mxu1 %vm1167_vm14, %v7814_v45  ;;  %6053 = vmatprep.mubr.msk.f32.mxu0 %vm1167_vm14, %v7355_v56 }
 0x151   : > { %5803 = vmatprep.mubr.msk.f32.mxu1 %vm1167_vm14, %v7819_v29 }
 0x153   : > { %6054 = vmatmul.mubr.msk.f32.gmra.mrb[14].mxu0 %vm1167_vm14, %v7372_v25 }
 0x154   : > { %5804 = vmatmul.mubr.msk.f32.gmra.mrb[18].mxu1 %vm1167_vm14, %v7831_v63  ;;  %6056 = vmatprep.mubr.msk.f32.mxu0 %vm1167_vm14, %v8965_v31 }
 0x155   : > { %5806 = vmatprep.mubr.msk.f32.mxu1 %vm1167_vm14, %v7836_v9 }
 0x157   : > { %6057 = vmatmul.mubr.msk.f32.gmra.mrb[16].mxu0 %vm1167_vm14, %v8966_v0 }
 0x158   : > { %5807 = vmatmul.mubr.msk.f32.gmra.mrb[20].mxu1 %vm1167_vm14, %v8967_v2  ;;  %6059 = vmatprep.mubr.msk.f32.mxu0 %vm1167_vm14, %v8968_v8  ;;  %v8980_v2 = vld [vmem:[#allocation44_spill] sm:$0xff] }
 0x159   : > { %5809 = vmatprep.mubr.msk.f32.mxu1 %vm1167_vm14, %v7853_v32 }
 0x15b   : > { %6060 = vmatmul.mubr.msk.f32.gmra.mrb[18].mxu0 %vm1167_vm14, %v8969_v50 }
 0x15c   : > { %5810 = vmatmul.mubr.msk.f32.gmra.mrb[22].mxu1 %vm1167_vm14, %v7865_v49  ;;  %6062 = vmatprep.mubr.msk.f32.mxu0 %vm1167_vm14, %v7463_v37 }
 0x15d   : > { %5812 = vmatprep.mubr.msk.f32.mxu1 %vm1167_vm14, %v7870_v19  ;;  %v8979_v19 = vld [vmem:[#allocation2_spill] sm:$0xff] }
 0x15f   : > { %6063 = vmatmul.mubr.msk.f32.gmra.mrb[20].mxu0 %vm1167_vm14, %v8971_v51 }
 0x160   : > { %5813 = vmatmul.mubr.msk.f32.gmra.mrb[24].mxu1 %vm1167_vm14, %v7882_v60  ;;  %6065 = vmatprep.mubr.msk.f32.mxu0 %vm1167_vm14, %v8972_v46 }
 0x161   : > { %5815 = vmatprep.mubr.msk.f32.mxu1 %vm1167_vm14, %v8973_v52  ;;  %v665_v52 = vsel %vm557_vm5, %v503_v42, %v611_v39  ;;  %v962_v42 = vpop.permute.xlu0 %961 }
 0x162   : > { %v8134_v60 = vmul.f32 %v958_v43, %v665_v52  ;;  %v3935_v52 = vld [vmem:[%s8815_s4 + $0x20] sm:$0xff]  ;;  %v3936_v43 = vld [vmem:[%s8815_s4 + $0x28] sm:$0xff] }
 0x163   : > { %6066 = vmatmul.mubr.msk.f32.gmra.mrb[22].mxu0 %vm1167_vm14, %v8975_v53 }
 0x164   : > { %5816 = vmatmul.mubr.msk.f32.gmra.mrb[26].mxu1 %vm1167_vm14, %v7899_v15  ;;  %6068 = vmatprep.mubr.msk.f32.mxu0 %vm1167_vm14, %v7534_v11  ;;  %v612_v15 = vmul.f32 0.01, %v504_v59 }
 0x165   : > { %5818 = vmatprep.mubr.msk.f32.mxu1 %vm1167_vm14, %v7904_v58  ;;  %v3933_v58 = vld [vmem:[%s8815_s4 + $0x10] sm:$0xff] }
 0x166   : > { %v666_v39 = vsel %vm558_vm6, %v504_v59, %v612_v15  ;;  %v5159_v15 = vld [vmem:[%s8814_s3 + $0x210] sm:$0xff]  ;;  %v8983_v59 = vld [vmem:[#allocation6_spill] sm:$0xff] }
 0x167   : > { %6069 = vmatmul.mubr.msk.f32.gmra.mrb[24].mxu0 %vm1167_vm14, %v8976_v12  ;;  %v8142_v32 = vmul.f32 %v962_v42, %v666_v39  ;;  %v5162_v42 = vld [vmem:[%s8814_s3 + $0x228] sm:$0xff] }
 0x168   : > { %5819 = vmatmul.mubr.msk.f32.gmra.mrb[28].mxu1 %vm1167_vm14, %v7918_v18  ;;  %6071 = vmatprep.mubr.msk.f32.mxu0 %vm1167_vm14, %v8977_v17  ;;  %v3934_v18 = vld [vmem:[%s8815_s4 + $0x18] sm:$0xff] }
 0x169   : > { %5821 = vmatprep.mubr.msk.f32.mxu1 %vm1167_vm14, %v7924_v61  ;;  %v8978_v61 = vld [vmem:[#allocation45_spill] sm:$0xff]  ;;  %v6420_v49 = vpack.c.bf16 %v3934_v18, %v3933_v58 }
 0x16a   : > { %v5160_v58 = vld [vmem:[%s8814_s3 + $0x218] sm:$0xff] }
 0x16b   : > { %6072 = vmatmul.mubr.msk.f32.gmra.mrb[26].mxu0 %vm1167_vm14, %v7570_v16  ;;  %v8982_v18 = vld [vmem:[#allocation5_spill] sm:$0xff] }
 0x16c   : > { %5822 = vmatmul.mubr.msk.f32.gmra.mrb[30].mxu1 %vm1167_vm14, %v7942_v62  ;;  %6074 = vmatprep.mubr.msk.f32.mxu0 %vm1167_vm14, %v8978_v61  ;;  %v8981_v62 = vld [vmem:[#allocation3_spill] sm:$0xff] }
 0x16d   : > { %5840 = vmatprep.mubr.msk.f32.mxu1 %vm1167_vm14, %v8979_v19  ;;  %v6424_v19 = vpack.c.bf16 %v3936_v43, %v3935_v52  ;;  %v8985_v52 = vld [vmem:[#allocation8_spill] sm:$0xff] }
 0x16e   : > { %v5163_v43 = vld [vmem:[%s8814_s3 + $0x230] sm:$0xff] }
 0x16f   : > { %6075 = vmatmul.mubr.msk.f32.gmra.mrb[28].mxu0 %vm1167_vm14, %v8980_v2 }
 0x170   : > { %5841 = vmatmul.mubr.msk.f32.vlgmr.msra.gmra.mrb[0].mxu1 %vm1167_vm14, %v8981_v62  ;;  %6077 = vmatprep.mubr.msk.f32.mxu0 %vm1167_vm14, %v8134_v60  ;;  %v3938_v62 = vld [vmem:[%s8815_s4 + $0x38] sm:$0xff] }
 0x171   : > { %5843 = vmatprep.mubr.msk.f32.mxu1 %vm1167_vm14, %v7053_v21  ;;  %6419 = vmatpush3.bf16.msra.mxu1 %v8014_v10  ;;  %v3937_v21 = vld [vmem:[%s8815_s4 + $0x30] sm:$0xff]  ;;  %v6404_v10 = vpack.c.bf16 %v5160_v58, %v5159_v15  ;;  %v8988_v15 = vld [vmem:[#allocation11_spill] sm:$0xff]  ;;  %v8996_v58 = vld [vmem:[#allocation21_spill] sm:$0xff] }
 0x172   : > { %6421 = vmatprep.subr.bf16.mxu1 %v6420_v49  ;;  %v6428_v39 = vpack.c.bf16 %v3938_v62, %v3937_v21  ;;  %v9003_v21 = vld [vmem:[#allocation36_spill] sm:$0xff] }
 0x173   : > { %6078 = vmatmul.mubr.msk.f32.gmra.mrb[30].mxu0 %vm1167_vm14, %v8142_v32 }
 0x174   : > { %5844 = vmatmul.mubr.msk.f32.gmra.mrb[2].mxu1 %vm1167_vm14, %v7073_v36  ;;  %6096 = vmatprep.mubr.msk.f32.mxu0 %vm1167_vm14, %v8982_v18  ;;  %v5161_v36 = vld [vmem:[%s8814_s3 + $0x220] sm:$0xff] }
 0x175   : > { %5846 = vmatprep.mubr.msk.f32.mxu1 %vm1167_vm14, %v7107_v4  ;;  %6423 = vmatpush3.bf16.msra.mxu1 %v6420_v49  ;;  %v8984_v4 = vld [vmem:[#allocation7_spill] sm:$0xff]  ;;  %v6408_v49 = vpack.c.bf16 %v5162_v42, %v5161_v36  ;;  %v9001_v18 = vld [vmem:[#allocation30_spill] sm:$0xff] }
 0x176   : > { %6425 = vmatprep.subr.bf16.mxu1 %v6424_v19  ;;  %v9007_v36 = vld [vmem:[#allocation43_spill] sm:$0xff] }
 0x177   : > { %6097 = vmatmul.mubr.msk.f32.vlgmr.msra.gmra.mrb[0].mxu0 %vm1167_vm14, %v8983_v59  ;;  %v6702_v42 = vld [vmem:[%s6957_s9 + $0x28] sm:$0x3] }
 0x178   : > { %6403 = vmatpush3.bf16.msra.mxu0 %v8037_v30  ;;  %5847 = vmatmul.mubr.msk.f32.gmra.mrb[4].mxu1 %vm1167_vm14, %v7137_v27  ;;  %v5164_v27 = vld [vmem:[%s8814_s3 + $0x238] sm:$0xff] }
 0x179   : > { %6099 = vmatprep.mubr.msk.f32.mxu0 %vm1167_vm14, %v8984_v4  ;;  %5849 = vmatprep.mubr.msk.f32.mxu1 %vm1167_vm14, %v7171_v47  ;;  %v8986_v30 = vld [vmem:[#allocation9_spill] sm:$0xff]  ;;  %v6412_v47 = vpack.c.bf16 %v5164_v27, %v5163_v43 }
 0x17a   : > { %6405 = vmatprep.subr.bf16.mxu0 %v6404_v10  ;;  %6427 = vmatpush3.bf16.msra.mxu1 %v6424_v19  ;;  %v8987_v19 = vld [vmem:[#allocation10_spill] sm:$0xff]  ;;  %v6704_v43 = vld [vmem:[%s6957_s9 + $0x38] sm:$0xff] }
 0x17b   : > { %6100 = vmatmul.mubr.msk.f32.gmra.mrb[2].mxu0 %vm1167_vm14, %v8985_v52  ;;  %6429 = vmatprep.subr.bf16.mxu1 %v6428_v39  ;;  %v3857_v27 = vrot.slane %v6704_v43, 1 }
 0x17c   : > { %5850 = vmatmul.mubr.msk.f32.gmra.mrb[6].mxu1 %vm1167_vm14, %v7173_v48  ;;  %6102 = vmatprep.mubr.msk.f32.mxu0 %vm1167_vm14, %v8986_v30  ;;  %v8989_v48 = vld [vmem:[#allocation12_spill] sm:$0xff]  ;;  %v3254_v30 = vrot.slane %v8142_v32, 1 }
 0x17d   : > { %5852 = vmatprep.mubr.msk.f32.mxu1 %vm1167_vm14, %v7210_v14  ;;  %6407 = vmatpush3.bf16.msra.mxu0 %v6404_v10  ;;  %v8990_v14 = vld [vmem:[#allocation13_spill] sm:$0xff]  ;;  %v966_v10 = vpop.permute.xlu1 %965 }
 0x17e   : > { %6409 = vmatprep.subr.bf16.mxu0 %v6408_v49  ;;  %6431 = vmatpush3.bf16.msra.mxu1 %v6428_v39  ;;  %v3854_v39 = vrot.slane %v6702_v42, 1  ;;  %v6716_v42 = vld [vmem:[%s6957_s9 + $0x98] sm:$0xff] }
 0x17f   : > { %6103 = vmatmul.mubr.msk.f32.gmra.mrb[4].mxu0 %vm1167_vm14, %v8987_v19 }
 0x180   : > { %5853 = vmatmul.mubr.msk.f32.gmra.mrb[8].mxu1 %vm1167_vm14, %v7232_v35  ;;  %6105 = vmatprep.mubr.msk.f32.mxu0 %vm1167_vm14, %v8988_v15  ;;  %v8991_v35 = vld [vmem:[#allocation14_spill] sm:$0xff] }
 0x181   : > { %5855 = vmatprep.mubr.msk.f32.mxu1 %vm1167_vm14, %v7256_v5  ;;  %6411 = vmatpush3.bf16.msra.mxu0 %v6408_v49  ;;  %v8992_v5 = vld [vmem:[#allocation15_spill] sm:$0xff]  ;;  %v6703_v49 = vld [vmem:[%s6957_s9 + $0x30] sm:$0xff]  ;;  %v6705_v15 = vld [vmem:[%s6957_s9 + $0x40] sm:$0x3] }
 0x182   : > { %6413 = vmatprep.subr.bf16.mxu0 %v6412_v47  ;;  %v3856_v52 = vrot.slane %v6703_v49, 1 }
 0x183   : > { %6106 = vmatmul.mubr.msk.f32.gmra.mrb[6].mxu0 %vm1167_vm14, %v8989_v48  ;;  %v3859_v48 = vrot.slane %v6705_v15, 1  ;;  %v6722_v15 = vld [vmem:[%s6957_s9 + $0xc8] sm:$0xff] }
 0x184   : > { %5856 = vmatmul.mubr.msk.f32.gmra.mrb[10].mxu1 %vm1167_vm14, %v7258_v7  ;;  %6108 = vmatprep.mubr.msk.f32.mxu0 %vm1167_vm14, %v8990_v14  ;;  %v8993_v7 = vld [vmem:[#allocation16_spill] sm:$0xff] }
 0x185   : > { %5858 = vmatprep.mubr.msk.f32.mxu1 %vm1167_vm14, %v7284_v34  ;;  %6415 = vmatpush3.bf16.msra.mxu0 %v6412_v47  ;;  %v8994_v34 = vld [vmem:[#allocation17_spill] sm:$0xff]  ;;  %v9009_v47 = vld [vmem:[#allocation47_spill] sm:$0xff] }
 0x187   : > { %6109 = vmatmul.mubr.msk.f32.gmra.mrb[8].mxu0 %vm1167_vm14, %v8991_v35  ;;  %v3858_v35 = vsel %vm1077_vm13, %v3856_v52, %v3857_v27  ;;  %v6718_v52 = vld [vmem:[%s6957_s9 + $0xa8] sm:$0xff] }
 0x188   : > { %5859 = vmatmul.mubr.msk.f32.gmra.mrb[12].mxu1 %vm1167_vm14, %v7303_v1  ;;  %6111 = vmatprep.mubr.msk.f32.mxu0 %vm1167_vm14, %v8992_v5  ;;  %v8995_v1 = vld [vmem:[#allocation18_spill] sm:$0xff]  ;;  %v6706_v5 = vld [vmem:[%s6957_s9 + $0x48] sm:$0xff]  ;;  %v3881_v43 = vrot.slane %v6718_v52, 1 }
 0x189   : > { %5861 = vmatprep.mubr.msk.f32.mxu1 %vm1167_vm14, %v7325_v55  ;;  %v8997_v55 = vld [vmem:[#allocation22_spill] sm:$0xff] }
 0x18b   : > { %6112 = vmatmul.mubr.msk.f32.gmra.mrb[10].mxu0 %vm1167_vm14, %v8993_v7  ;;  %v3861_v7 = vrot.slane %v6706_v5, 1  ;;  %v6724_v5 = vld [vmem:[%s6957_s9 + $0xd8] sm:$0xff] }
 0x18c   : > { %5862 = vmatmul.mubr.msk.f32.gmra.mrb[14].mxu1 %vm1167_vm14, %v7327_v54  ;;  %6114 = vmatprep.mubr.msk.f32.mxu0 %vm1167_vm14, %v8994_v34  ;;  %v8998_v54 = vld [vmem:[#allocation24_spill] sm:$0xff] }
 0x18d   : > { %5864 = vmatprep.mubr.msk.f32.mxu1 %vm1167_vm14, %v7355_v56  ;;  %v8999_v56 = vld [vmem:[#allocation27_spill] sm:$0xff]  ;;  %v6707_v34 = vld [vmem:[%s6957_s9 + $0x50] sm:$0xff] }
 0x18f   : > { %6115 = vmatmul.mubr.msk.f32.gmra.mrb[12].mxu0 %vm1167_vm14, %v8995_v1  ;;  %v9011_v1 = vld [vmem:[#allocation49_spill] sm:$0xff] }
 0x190   : > { %5865 = vmatmul.mubr.msk.f32.gmra.mrb[16].mxu1 %vm1167_vm14, %v7372_v25  ;;  %6117 = vmatprep.mubr.msk.f32.mxu0 %vm1167_vm14, %v8996_v58  ;;  %v383_v25 = vld [vmem:[%s6957_s9 + $0x1a8] sm:$0x3] }
 0x191   : > { %5867 = vmatprep.mubr.msk.f32.mxu1 %vm1167_vm14, %v8965_v31  ;;  %v9000_v31 = vld [vmem:[#allocation29_spill] sm:$0xff] }
 0x193   : > { %6118 = vmatmul.mubr.msk.f32.gmra.mrb[14].mxu0 %vm1167_vm14, %v8997_v55  ;;  %v3860_v55 = vsel %vm1077_vm13, %v3857_v27, %v3859_v48  ;;  %v6719_v27 = vld [vmem:[%s6957_s9 + $0xb0] sm:$0xff] }
 0x194   : > { %5868 = vmatmul.mubr.msk.f32.gmra.mrb[18].mxu1 %vm1167_vm14, %v8966_v0  ;;  %6120 = vmatprep.mubr.msk.f32.mxu0 %vm1167_vm14, %v8998_v54  ;;  %v444_v0 = vmul.f32 %v8970_v13, %v383_v25  ;;  %v6708_v54 = vld [vmem:[%s6957_s9 + $0x58] sm:$0x3]  ;;  %v6723_v48 = vld [vmem:[%s6957_s9 + $0xd0] sm:$0x3] }
 0x195   : > { %5870 = vmatprep.mubr.msk.f32.mxu1 %vm1167_vm14, %v8968_v8  ;;  %v9002_v8 = vld [vmem:[#allocation33_spill] sm:$0xff] }
 0x197   : > { %6121 = vmatmul.mubr.msk.f32.gmra.mrb[16].mxu0 %vm1167_vm14, %v8999_v56  ;;  %v3864_v56 = vrot.slane %v6708_v54, 1 }
 0x198   : > { %5871 = vmatmul.mubr.msk.f32.gmra.mrb[20].mxu1 %vm1167_vm14, %v8969_v50  ;;  %6123 = vmatprep.mubr.msk.f32.mxu0 %vm1167_vm14, %v9000_v31  ;;  %v505_v50 = vadd.f32 %v8974_v26, %v444_v0  ;;  %v6709_v0 = vld [vmem:[%s6957_s9 + $0x60] sm:$0xff] }
 0x199   : > { %5873 = vmatprep.mubr.msk.f32.mxu1 %vm1167_vm14, %v7463_v37  ;;  %v9004_v37 = vld [vmem:[#allocation39_spill] sm:$0xff] }
 0x19a   : > { %v613_v13 = vmul.f32 0.01, %v505_v50  ;;  %vm559_vm7 = vcmp.ge.f32.partialorder %v505_v50, 0.0 }
 0x19b   : > { %6124 = vmatmul.mubr.msk.f32.gmra.mrb[18].mxu0 %vm1167_vm14, %v9001_v18  ;;  %v3866_v18 = vrot.slane %v6709_v0, 1 }
 0x19c   : > { %5874 = vmatmul.mubr.msk.f32.gmra.mrb[22].mxu1 %vm1167_vm14, %v8971_v51  ;;  %6126 = vmatprep.mubr.msk.f32.mxu0 %vm1167_vm14, %v9002_v8  ;;  %v9005_v51 = vld [vmem:[#allocation40_spill] sm:$0xff]  ;;  %v667_v59 = vsel %vm559_vm7, %v505_v50, %v613_v13  ;;  %v6710_v8 = vld [vmem:[%s6957_s9 + $0x68] sm:$0xff] }
 0x19d   : > { %5876 = vmatprep.mubr.msk.f32.mxu1 %vm1167_vm14, %v8972_v46  ;;  %v9006_v46 = vld [vmem:[#allocation42_spill] sm:$0xff]  ;;  %v3867_v50 = vrot.slane %v6710_v8, 1 }
 0x19f   : > { %6127 = vmatmul.mubr.msk.f32.gmra.mrb[20].mxu0 %vm1167_vm14, %v9003_v21 }
 0x1a0   : > { %5877 = vmatmul.mubr.msk.f32.gmra.mrb[24].mxu1 %vm1167_vm14, %v8975_v53  ;;  %6129 = vmatprep.mubr.msk.f32.mxu0 %vm1167_vm14, %v9004_v37  ;;  %v6700_v53 = vld [vmem:[%s6957_s9 + $0x18] sm:$0xff]  ;;  %v6711_v37 = vld [vmem:[%s6957_s9 + $0x70] sm:$0x3] }
 0x1a1   : > { %5879 = vmatprep.mubr.msk.f32.mxu1 %vm1167_vm14, %v7534_v11  ;;  %v3851_v26 = vrot.slane %v6700_v53, 1  ;;  %v6701_v11 = vld [vmem:[%s6957_s9 + $0x20] sm:$0xff]  ;;  %v3869_v13 = vrot.slane %v6711_v37, 1 }
 0x1a2   : > { %v3852_v62 = vrot.slane %v6701_v11, 1 }
 0x1a3   : > { %6130 = vmatmul.mubr.msk.f32.gmra.mrb[22].mxu0 %vm1167_vm14, %v9005_v51  ;;  %v3868_v51 = vsel %vm1077_vm13, %v3866_v18, %v3867_v50  ;;  %v6730_v18 = vld [vmem:[%s6957_s9 + $0x108] sm:$0xff] }
 0x1a4   : > { %5880 = vmatmul.mubr.msk.f32.gmra.mrb[26].mxu1 %vm1167_vm14, %v8976_v12  ;;  %6132 = vmatprep.mubr.msk.f32.mxu0 %vm1167_vm14, %v9006_v46  ;;  %v9008_v12 = vld [vmem:[#allocation46_spill] sm:$0xff]  ;;  %v3853_v4 = vsel %vm1077_vm13, %v3851_v26, %v3852_v62  ;;  %v3855_v19 = vsel %vm1077_vm13, %v3852_v62, %v3854_v39  ;;  %v6712_v46 = vld [vmem:[%s6957_s9 + $0x78] sm:$0xff]  ;;  %v6714_v62 = vld [vmem:[%s6957_s9 + $0x88] sm:$0x3]  ;;  %v3901_v8 = vrot.slane %v6730_v18, 1 }
 0x1a5   : > { %5882 = vmatprep.mubr.msk.f32.mxu1 %vm1167_vm14, %v8977_v17  ;;  %v8302_v17 = vmul.f32 %v966_v10, %v667_v59  ;;  %v3871_v53 = vrot.slane %v6712_v46, 1  ;;  %v6713_v26 = vld [vmem:[%s6957_s9 + $0x80] sm:$0xff]  ;;  %v3874_v10 = vrot.slane %v6714_v62, 1  ;;  %v6736_v62 = vld [vmem:[%s6957_s9 + $0x138] sm:$0xff] }
 0x1a6   : > { %v3872_v11 = vrot.slane %v6713_v26, 1  ;;  %v6717_v39 = vld [vmem:[%s6957_s9 + $0xa0] sm:$0x3]  ;;  %v6735_v26 = vld [vmem:[%s6957_s9 + $0x130] sm:$0x3]  ;;  %v9022_v18 = vld [vmem:[#allocation57_spill] sm:$0xff] }
 0x1a7   : > { %6133 = vmatmul.mubr.msk.f32.gmra.mrb[24].mxu0 %vm1167_vm14, %v9007_v36  ;;  %v3256_v14 = vrot.slane %v8302_v17, 1  ;;  %v6715_v36 = vld [vmem:[%s6957_s9 + $0x90] sm:$0xff] }
 0x1a8   : > { %5883 = vmatmul.mubr.msk.f32.gmra.mrb[28].mxu1 %vm1167_vm14, %v7570_v16  ;;  %6135 = vmatprep.mubr.msk.f32.mxu0 %vm1167_vm14, %v9008_v12  ;;  %v3253_v16 = vrot.slane %v8134_v60, 1  ;;  %v3873_v59 = vsel %vm1077_vm13, %v3871_v53, %v3872_v11  ;;  %v3876_v12 = vrot.slane %v6715_v36, 1  ;;  %v6734_v53 = vld [vmem:[%s6957_s9 + $0x128] sm:$0xff]  ;;  %v9012_v36 = vld [vmem:[#allocation26_spill] sm:$0xff] }
 0x1a9   : > { %5885 = vmatprep.mubr.msk.f32.mxu1 %vm1167_vm14, %v8978_v61  ;;  %v9010_v61 = vld [vmem:[#allocation48_spill] sm:$0xff]  ;;  %v3257_v25 = vsel %vm1077_vm13, %v3254_v30, %v3256_v14  ;;  %v3889_v14 = vrot.slane %v6723_v48, 1 }
 0x1aa   : > { %v3255_v58 = vsel %vm1077_vm13, %v3253_v16, %v3254_v30  ;;  %v6720_v16 = vld [vmem:[%s6957_s9 + $0xb8] sm:$0x3] }
 0x1ab   : > { %6136 = vmatmul.mubr.msk.f32.gmra.mrb[26].mxu0 %vm1167_vm14, %v9009_v47  ;;  %v3884_v30 = vrot.slane %v6720_v16, 1 }
 0x1ac   : > { %5886 = vmatmul.mubr.msk.f32.gmra.mrb[30].mxu1 %vm1167_vm14, %v8980_v2  ;;  %6138 = vmatprep.mubr.msk.f32.mxu0 %vm1167_vm14, %v9010_v61  ;;  %v3862_v2 = vrot.slane %v6707_v34, 1  ;;  %v6721_v61 = vld [vmem:[%s6957_s9 + $0xc0] sm:$0xff] }
 0x1ad   : > { %6224 = vmatprep.mubr.msk.f32.mxu1 %vm1167_vm14, %v3853_v4  ;;  %v3879_v4 = vrot.slane %v6717_v39, 1  ;;  %v6725_v34 = vld [vmem:[%s6957_s9 + $0xe0] sm:$0xff]  ;;  %v6739_v39 = vld [vmem:[%s6957_s9 + $0x150] sm:$0xff] }
 0x1ae   : > { %v3863_v31 = vsel %vm1077_vm13, %v3861_v7, %v3862_v2  ;;  %v3865_v21 = vsel %vm1077_vm13, %v3862_v2, %v3864_v56  ;;  %v3891_v7 = vrot.slane %v6724_v5, 1  ;;  %v6726_v2 = vld [vmem:[%s6957_s9 + $0xe8] sm:$0x3]  ;;  %v6728_v56 = vld [vmem:[%s6957_s9 + $0xf8] sm:$0xff] }
 0x1af   : > { %6139 = vmatmul.mubr.msk.f32.gmra.mrb[28].mxu0 %vm1167_vm14, %v9011_v1  ;;  %v3894_v1 = vrot.slane %v6726_v2, 1  ;;  %v9018_v2 = vld [vmem:[#allocation54_spill] sm:$0xff] }
 0x1b0   : > { %6141 = vmatprep.mubr.msk.f32.mxu0 %vm1167_vm14, %v3255_v58  ;;  %6225 = vmatmul.mubr.msk.f32.vlgmr.msra.gmra.mrb[32].mxu1 %vm1167_vm14, %v3855_v19  ;;  %v3886_v19 = vrot.slane %v6721_v61, 1 }
 0x1b1   : > { %6227 = vmatprep.mubr.msk.f32.mxu1 %vm1167_vm14, %v3858_v35 }
 0x1b3   : > { %6142 = vmatmul.mubr.msk.f32.gmra.mrb[30].mxu0 %vm1167_vm14, %v3257_v25  ;;  %v6729_v25 = vld [vmem:[%s6957_s9 + $0x100] sm:$0x3] }
 0x1b4   : > { %6160 = vmatprep.mubr.msk.f32.mxu0 %vm1167_vm14, %v7680_v24  ;;  %6228 = vmatmul.mubr.msk.f32.gmra.mrb[34].mxu1 %vm1167_vm14, %v3860_v55  ;;  %v3870_v24 = vsel %vm1077_vm13, %v3867_v50, %v3869_v13  ;;  %v6727_v55 = vld [vmem:[%s6957_s9 + $0xf0] sm:$0xff] }
 0x1b5   : > { %6230 = vmatprep.mubr.msk.f32.mxu1 %vm1167_vm14, %v3863_v31  ;;  %v3896_v54 = vrot.slane %v6727_v55, 1  ;;  %v3899_v31 = vrot.slane %v6729_v25, 1  ;;  %v6731_v50 = vld [vmem:[%s6957_s9 + $0x110] sm:$0xff] }
 0x1b6   : > { %v6747_v55 = vld [vmem:[%s6957_s9 + $0x190] sm:$0x3] }
 0x1b7   : > { %6161 = vmatmul.mubr.msk.f32.vlgmr.msra.gmra.mrb[0].mxu0 %vm1167_vm14, %v7694_v22  ;;  %v3877_v22 = vrot.slane %v6716_v42, 1  ;;  %v6738_v42 = vld [vmem:[%s6957_s9 + $0x148] sm:$0x3] }
 0x1b8   : > { %6163 = vmatprep.mubr.msk.f32.mxu0 %vm1167_vm14, %v7699_v33  ;;  %6231 = vmatmul.mubr.msk.f32.gmra.mrb[36].mxu1 %vm1167_vm14, %v3865_v21  ;;  %v3875_v33 = vsel %vm1077_vm13, %v3872_v11, %v3874_v10  ;;  %v6732_v21 = vld [vmem:[%s6957_s9 + $0x118] sm:$0x3]  ;;  %v3909_v11 = vrot.slane %v6735_v26, 1  ;;  %v3911_v10 = vrot.slane %v6736_v62, 1 }
 0x1b9   : > { %6233 = vmatprep.mubr.msk.f32.mxu1 %vm1167_vm14, %v3868_v51  ;;  %v3878_v49 = vsel %vm1077_vm13, %v3876_v12, %v3877_v22  ;;  %v3904_v37 = vrot.slane %v6732_v21, 1  ;;  %v6733_v51 = vld [vmem:[%s6957_s9 + $0x120] sm:$0xff] }
 0x1ba   : > { %v3906_v46 = vrot.slane %v6733_v51, 1 }
 0x1bb   : > { %6164 = vmatmul.mubr.msk.f32.gmra.mrb[2].mxu0 %vm1167_vm14, %v7719_v6  ;;  %v3882_v6 = vrot.slane %v6719_v27, 1  ;;  %v9015_v27 = vld [vmem:[#allocation51_spill] sm:$0xff] }
 0x1bc   : > { %6166 = vmatprep.mubr.msk.f32.mxu0 %vm1167_vm14, %v7724_v3  ;;  %6234 = vmatmul.mubr.msk.f32.gmra.mrb[38].mxu1 %vm1167_vm14, %v3870_v24  ;;  %v3880_v3 = vsel %vm1077_vm13, %v3877_v22, %v3879_v4  ;;  %v3914_v22 = vrot.slane %v6738_v42, 1  ;;  %v3916_v4 = vrot.slane %v6739_v39, 1 }
 0x1bd   : > { %6236 = vmatprep.mubr.msk.f32.mxu1 %vm1167_vm14, %v3873_v59  ;;  %v3883_v47 = vsel %vm1077_vm13, %v3881_v43, %v3882_v6  ;;  %v6737_v59 = vld [vmem:[%s6957_s9 + $0x140] sm:$0xff]  ;;  %v9014_v43 = vld [vmem:[#allocation31_spill] sm:$0xff] }
 0x1bf   : > { %6167 = vmatmul.mubr.msk.f32.gmra.mrb[4].mxu0 %vm1167_vm14, %v7743_v20  ;;  %v3887_v20 = vrot.slane %v6722_v15, 1 }
 0x1c0   : > { %6169 = vmatprep.mubr.msk.f32.mxu0 %vm1167_vm14, %v7750_v40  ;;  %6237 = vmatmul.mubr.msk.f32.gmra.mrb[40].mxu1 %vm1167_vm14, %v3875_v33  ;;  %v3885_v40 = vsel %vm1077_vm13, %v3882_v6, %v3884_v30 }
 0x1c1   : > { %6239 = vmatprep.mubr.msk.f32.mxu1 %vm1167_vm14, %v3878_v49  ;;  %v3888_v35 = vsel %vm1077_vm13, %v3886_v19, %v3887_v20  ;;  %v6740_v49 = vld [vmem:[%s6957_s9 + $0x158] sm:$0xff]  ;;  %v6743_v19 = vld [vmem:[%s6957_s9 + $0x170] sm:$0xff] }
 0x1c2   : > { %v3917_v52 = vrot.slane %v6740_v49, 1  ;;  %v3922_v15 = vrot.slane %v6743_v19, 1 }
 0x1c3   : > { %6170 = vmatmul.mubr.msk.f32.gmra.mrb[6].mxu0 %vm1167_vm14, %v7762_v38  ;;  %v3892_v38 = vrot.slane %v6725_v34, 1 }
 0x1c4   : > { %6172 = vmatprep.mubr.msk.f32.mxu0 %vm1167_vm14, %v7768_v41  ;;  %6240 = vmatmul.mubr.msk.f32.gmra.mrb[42].mxu1 %vm1167_vm14, %v3880_v3  ;;  %v3890_v41 = vsel %vm1077_vm13, %v3887_v20, %v3889_v14  ;;  %v6741_v3 = vld [vmem:[%s6957_s9 + $0x160] sm:$0x3]  ;;  %v3918_v30 = vsel %vm1077_vm13, %v3916_v4, %v3917_v52  ;;  %v9016_v20 = vld [vmem:[#allocation52_spill] sm:$0xff]  ;;  %v6744_v14 = vld [vmem:[%s6957_s9 + $0x178] sm:$0x3] }
 0x1c5   : > { %6242 = vmatprep.mubr.msk.f32.mxu1 %vm1167_vm14, %v3883_v47  ;;  %v3893_v58 = vsel %vm1077_vm13, %v3891_v7, %v3892_v38  ;;  %v3919_v16 = vrot.slane %v6741_v3, 1  ;;  %v6742_v47 = vld [vmem:[%s6957_s9 + $0x168] sm:$0xff]  ;;  %v6745_v7 = vld [vmem:[%s6957_s9 + $0x180] sm:$0xff] }
 0x1c6   : > { %v3921_v61 = vrot.slane %v6742_v47, 1  ;;  %v3926_v34 = vrot.slane %v6745_v7, 1 }
 0x1c7   : > { %6173 = vmatmul.mubr.msk.f32.gmra.mrb[8].mxu0 %vm1167_vm14, %v7780_v57  ;;  %v3897_v57 = vrot.slane %v6728_v56, 1  ;;  %v3920_v48 = vsel %vm1077_vm13, %v3917_v52, %v3919_v16 }
 0x1c8   : > { %6175 = vmatprep.mubr.msk.f32.mxu0 %vm1167_vm14, %v7785_v44  ;;  %6243 = vmatmul.mubr.msk.f32.gmra.mrb[44].mxu1 %vm1167_vm14, %v3885_v40  ;;  %v3895_v44 = vsel %vm1077_vm13, %v3892_v38, %v3894_v1  ;;  %v9017_v40 = vld [vmem:[#allocation53_spill] sm:$0xff]  ;;  %v3923_v5 = vsel %vm1077_vm13, %v3921_v61, %v3922_v15  ;;  %v6746_v38 = vld [vmem:[%s6957_s9 + $0x188] sm:$0xff]  ;;  %s5231_s9 = sshll.u32 %s9026_s25, 8 }
 0x1c9   : > { %6245 = vmatprep.mubr.msk.f32.mxu1 %vm1167_vm14, %v3888_v35  ;;  %v3898_v0 = vsel %vm1077_vm13, %v3896_v54, %v3897_v57  ;;  %v3924_v35 = vrot.slane %v6744_v14, 1  ;;  %v9019_v1 = vld [vmem:[#allocation55_spill] sm:$0xff]  ;;  %v3929_v54 = vrot.slane %v6747_v55, 1  ;;  %s8559_s29 = scalar_lea.vmem %s8817_s6, %s5231_s9 }
 0x1cb   : > { %6176 = vmatmul.mubr.msk.f32.gmra.mrb[10].mxu0 %vm1167_vm14, %v7797_v23  ;;  %v3902_v23 = vrot.slane %v6731_v50, 1  ;;  %v3531_v50 = vrot.slane %v8302_v17, 2 }
 0x1cc   : > { %6178 = vmatprep.mubr.msk.f32.mxu0 %vm1167_vm14, %v7802_v28  ;;  %6246 = vmatmul.mubr.msk.f32.gmra.mrb[46].mxu1 %vm1167_vm14, %v3890_v41  ;;  %v3900_v28 = vsel %vm1077_vm13, %v3897_v57, %v3899_v31  ;;  %v3927_v41 = vrot.slane %v6746_v38, 1  ;;  %v9020_v57 = vld [vmem:[#allocation56_spill] sm:$0xff]  ;;  %v3528_v31 = vrot.slane %v8134_v60, 2 }
 0x1cd   : > { %6248 = vmatprep.mubr.msk.f32.mxu1 %vm1167_vm14, %v3893_v58  ;;  %v3903_v13 = vsel %vm1077_vm13, %v3901_v8, %v3902_v23  ;;  %v3925_v58 = vsel %vm1077_vm13, %v3922_v15, %v3924_v35  ;;  %v9023_v8 = vld [vmem:[#allocation58_spill] sm:$0xff] }
 0x1ce   : > { %v3928_v56 = vsel %vm1077_vm13, %v3926_v34, %v3927_v41  ;;  %v3930_v25 = vsel %vm1077_vm13, %v3927_v41, %v3929_v54 }
 0x1cf   : > { %6179 = vmatmul.mubr.msk.f32.gmra.mrb[12].mxu0 %vm1167_vm14, %v7814_v45  ;;  %v3907_v45 = vrot.slane %v6734_v53, 1 }
 0x1d0   : > { %6181 = vmatprep.mubr.msk.f32.mxu0 %vm1167_vm14, %v7819_v29  ;;  %6249 = vmatmul.mubr.msk.f32.gmra.mrb[48].mxu1 %vm1167_vm14, %v3895_v44  ;;  %v3905_v29 = vsel %vm1077_vm13, %v3902_v23, %v3904_v37  ;;  %v9021_v44 = vld [vmem:[#allocation4_spill] sm:$0xff]  ;;  %v9024_v23 = vld [vmem:[#allocation59_spill] sm:$0xff] }
 0x1d1   : > { %6251 = vmatprep.mubr.msk.f32.mxu1 %vm1167_vm14, %v3898_v0  ;;  %v3908_v24 = vsel %vm1077_vm13, %v3906_v46, %v3907_v45  ;;  %v3910_v12 = vsel %vm1077_vm13, %v3907_v45, %v3909_v11  ;;  %v3529_v0 = vrot.slane %v8142_v32, 2 }
 0x1d3   : > { %6182 = vmatmul.mubr.msk.f32.gmra.mrb[14].mxu0 %vm1167_vm14, %v7831_v63  ;;  %v3912_v63 = vrot.slane %v6737_v59, 1  ;;  %v3532_v60 = vsel %vm1746_vm4, %v3529_v0, %v3531_v50 }
 0x1d4   : > { %6184 = vmatprep.mubr.msk.f32.mxu0 %vm1167_vm14, %v7836_v9  ;;  %6252 = vmatmul.mubr.msk.f32.gmra.mrb[50].mxu1 %vm1167_vm14, %v3900_v28  ;;  %v9013_v9 = vld [vmem:[#allocation50_spill] sm:$0xff]  ;;  %v3530_v28 = vsel %vm1746_vm4, %v3528_v31, %v3529_v0 }
 0x1d5   : > { %6254 = vmatprep.mubr.msk.f32.mxu1 %vm1167_vm14, %v3903_v13  ;;  %v3913_v33 = vsel %vm1077_vm13, %v3911_v10, %v3912_v63  ;;  %v3915_v6 = vsel %vm1077_vm13, %v3912_v63, %v3914_v22  ;;  %vm4260_vm13 = vcmask 1040384  }
 0x1d7   : > { %6185 = vmatmul.mubr.msk.f32.gmra.mrb[16].mxu0 %vm1167_vm14, %v9012_v36 }
 0x1d8   : > { %6187 = vmatprep.mubr.msk.f32.mxu0 %vm1167_vm14, %v9013_v9  ;;  %6255 = vmatmul.mubr.msk.f32.gmra.mrb[52].mxu1 %vm1167_vm14, %v3905_v29 }
 0x1d9   : > { %6257 = vmatprep.mubr.msk.f32.mxu1 %vm1167_vm14, %v3908_v24 }
 0x1db   : > { %6188 = vmatmul.mubr.msk.f32.gmra.mrb[18].mxu0 %vm1167_vm14, %v9014_v43 }
 0x1dc   : > { %6190 = vmatprep.mubr.msk.f32.mxu0 %vm1167_vm14, %v9015_v27  ;;  %6258 = vmatmul.mubr.msk.f32.gmra.mrb[54].mxu1 %vm1167_vm14, %v3910_v12 }
 0x1dd   : > { %6260 = vmatprep.mubr.msk.f32.mxu1 %vm1167_vm14, %v3913_v33 }
 0x1df   : > { %6191 = vmatmul.mubr.msk.f32.gmra.mrb[20].mxu0 %vm1167_vm14, %v9016_v20 }
 0x1e0   : > { %6193 = vmatprep.mubr.msk.f32.mxu0 %vm1167_vm14, %v9017_v40  ;;  %6261 = vmatmul.mubr.msk.f32.gmra.mrb[56].mxu1 %vm1167_vm14, %v3915_v6 }
 0x1e1   : > { %6263 = vmatprep.mubr.msk.f32.mxu1 %vm1167_vm14, %v3918_v30 }
 0x1e3   : > { %6194 = vmatmul.mubr.msk.f32.gmra.mrb[22].mxu0 %vm1167_vm14, %v9018_v2 }
 0x1e4   : > { %6196 = vmatprep.mubr.msk.f32.mxu0 %vm1167_vm14, %v9019_v1  ;;  %6264 = vmatmul.mubr.msk.f32.gmra.mrb[58].mxu1 %vm1167_vm14, %v3920_v48 }
 0x1e5   : > { %6266 = vmatprep.mubr.msk.f32.mxu1 %vm1167_vm14, %v3923_v5 }
 0x1e7   : > { %6197 = vmatmul.mubr.msk.f32.gmra.mrb[24].mxu0 %vm1167_vm14, %v9020_v57 }
 0x1e8   : > { %6199 = vmatprep.mubr.msk.f32.mxu0 %vm1167_vm14, %v9021_v44  ;;  %6267 = vmatmul.mubr.msk.f32.gmra.mrb[60].mxu1 %vm1167_vm14, %v3925_v58 }
 0x1e9   : > { %6269 = vmatprep.mubr.msk.f32.mxu1 %vm1167_vm14, %v3928_v56 }
 0x1eb   : > { %6200 = vmatmul.mubr.msk.f32.gmra.mrb[26].mxu0 %vm1167_vm14, %v9022_v18 }
 0x1ec   : > { %6202 = vmatprep.mubr.msk.f32.mxu0 %vm1167_vm14, %v9023_v8  ;;  %6270 = vmatmul.mubr.msk.f32.gmra.mrb[62].mxu1 %vm1167_vm14, %v3930_v25 }
 0x1ef   : > { %6203 = vmatmul.mubr.msk.f32.gmra.mrb[28].mxu0 %vm1167_vm14, %v9024_v23 }
 0x1f0   : > { %6205 = vmatprep.mubr.msk.f32.mxu0 %vm1167_vm14, %v3530_v28 }
 0x1f3   : > { %6206 = vmatmul.mubr.msk.f32.gmra.mrb[30].mxu0 %vm1167_vm14, %v3532_v60  ;;  %vm4688_vm14 = vcmask 1041408  }
 0x243   : > { %v5842_v32 = vpop.f32.mrb[0].mxu1 }
 0x244   : > { %v2238_v21 = vpop.f32.mrb[1].mxu1 }
 0x247   : > { %v8495_v37 = vpop.f32.mrb[2].mxu1 }
 0x248   : > { %v8497_v13 = vpop.f32.mrb[3].mxu1 }
 0x24b   : > { %v8499_v51 = vpop.f32.mrb[4].mxu1 }
 0x24c   : > { %v8501_v17 = vpop.f32.mrb[5].mxu1 }
 0x24f   : > { %v8503_v46 = vpop.f32.mrb[6].mxu1 }
 0x250   : > { %v8505_v53 = vpop.f32.mrb[7].mxu1 }
 0x253   : > { %v8507_v45 = vpop.f32.mrb[8].mxu1 }
 0x254   : > { %v8509_v29 = vpop.f32.mrb[9].mxu1 }
 0x257   : > { %v8511_v26 = vpop.f32.mrb[10].mxu1 }
 0x258   : > { %v8513_v11 = vpop.f32.mrb[11].mxu1 }
 0x25b   : > { %v8515_v24 = vpop.f32.mrb[12].mxu1 }
 0x25c   : > { %v8517_v62 = vpop.f32.mrb[13].mxu1 }
 0x25f   : > { %v8519_v10 = vpop.f32.mrb[14].mxu1 }
 0x260   : > { %v8521_v59 = vpop.f32.mrb[15].mxu1 }
 0x263   : > { %v8523_v63 = vpop.f32.mrb[16].mxu1 }
 0x264   : > { %v8525_v36 = vpop.f32.mrb[17].mxu1 }
 0x267   : > { %v8527_v9 = vpop.f32.mrb[18].mxu1 }
 0x268   : > { %v8529_v12 = vpop.f32.mrb[19].mxu1 }
 0x26b   : > { %v8531_v42 = vpop.f32.mrb[20].mxu1 }
 0x26c   : > { %v8533_v22 = vpop.f32.mrb[21].mxu1 }
 0x26f   : > { %v8535_v33 = vpop.f32.mrb[22].mxu1 }
 0x270   : > { %v8537_v39 = vpop.f32.mrb[23].mxu1 }
 0x273   : > { %v8539_v4 = vpop.f32.mrb[24].mxu1 }
 0x274   : > { %v8541_v49 = vpop.f32.mrb[25].mxu1 }
 0x277   : > { %v8543_v52 = vpop.f32.mrb[26].mxu1 }
 0x278   : > { %v8545_v43 = vpop.f32.mrb[27].mxu1 }
 0x27b   : > { %v8547_v27 = vpop.f32.mrb[28].mxu1 }
 0x27c   : > { %v8549_v6 = vpop.f32.mrb[29].mxu1 }
 0x27f   : > { %v8552_v3 = vpop.f32.mrb[30].mxu1 }
 0x280   : > { %v8554_v16 = vpop.f32.mrb[31].mxu1 }
 0x283   : > { %v6226_v30 = vpop.f32.mrb[32].mxu1 }
 0x284   : > { %4444 = vst [vmem:[%s8559_s29 + $0x8] sm:$0xff] %v6226_v30  ;;  %v4619_v47 = vmul.f32 %v6226_v30, %v6226_v30  ;;  %v4069_v61 = vpop.f32.mrb[33].mxu1 }
 0x285   : > { %4443 = vst [vmem:[%s8559_s29] sm:$0xff] %v4069_v61  ;;  %v4581_v19 = vadd.f32 %v6226_v30, %v4069_v61  ;;  %v4618_v15 = vmul.f32 %v4069_v61, %v4069_v61 }
 0x287   : > { %v4650_v20 = vadd.f32 %v4619_v47, %v4618_v15  ;;  %v6229_v40 = vpop.f32.mrb[34].mxu1 }
 0x288   : > { %4446 = vst [vmem:[%s8559_s29 + $0x18] sm:$0xff] %v6229_v40  ;;  %v4079_v48 = vpop.f32.mrb[35].mxu1  ;;  %v4621_v5 = vmul.f32 %v6229_v40, %v6229_v40 }
 0x289   : > { %4445 = vst [vmem:[%s8559_s29 + $0x10] sm:$0xff] %v4079_v48  ;;  %v4582_v14 = vadd.f32 %v4581_v19, %v4079_v48  ;;  %v4620_v35 = vmul.f32 %v4079_v48, %v4079_v48 }
 0x28a   : > { %v6162_v7 = vpop.f32.mrb[0].mxu0 }
 0x28b   : > { %v6432_v34 = vadd.f32 %v6162_v7, %v5842_v32  ;;  %v4651_v38 = vadd.f32 %v4650_v20, %v4620_v35  ;;  %v3612_v41 = vpop.f32.mrb[1].mxu0  ;;  %v6232_v2 = vpop.f32.mrb[36].mxu1  ;;  %v4583_v1 = vadd.f32 %v6229_v40, %v4582_v14 }
 0x28c   : > { %v6433_v58 = vadd.f32 %v3612_v41, %v2238_v21  ;;  %4448 = vst [vmem:[%s8559_s29 + $0x28] sm:$0xff] %v6232_v2  ;;  %v4623_v55 = vmul.f32 %v6232_v2, %v6232_v2  ;;  %v4089_v54 = vpop.f32.mrb[37].mxu1 }
 0x28d   : > { %v4262_v56 = vrot.slane %v6432_v34, 7  ;;  %v4513_v57 = vmul.f32 %v6432_v34, %v6432_v34  ;;  %4447 = vst [vmem:[%s8559_s29 + $0x20] sm:$0xff] %v4089_v54  ;;  %v4584_v44 = vadd.f32 %v4583_v1, %v4089_v54  ;;  %v4622_v25 = vmul.f32 %v4089_v54, %v4089_v54 }
 0x28e   : > { %v4261_v31 = vrot.slane %v6433_v58, 7  ;;  %v4475_v0 = vadd.f32 %v6433_v58, %v6432_v34  ;;  %v4512_v18 = vmul.f32 %v6433_v58, %v6433_v58  ;;  %v6165_v8 = vpop.f32.mrb[2].mxu0  ;;  %v4652_v50 = vadd.f32 %v4651_v38, %v4621_v5 }
 0x28f   : > { %v4373_v23 = vsel %vm4260_vm13, %v4262_v56, 0.0  ;;  %v6434_v28 = vadd.f32 %v6165_v8, %v8495_v37  ;;  %v3622_v60 = vpop.f32.mrb[3].mxu0  ;;  %v6235_v32 = vpop.f32.mrb[38].mxu1  ;;  %v4585_v21 = vadd.f32 %v6232_v2, %v4584_v44 }
 0x290   : > { %4394 = vst [vmem:[%s6857_s28 + $0x28] sm:$0x3] %v4373_v23  ;;  %v4263_v30 = vsel %vm4260_vm13, %v4261_v31, %v4262_v56  ;;  %v4357_v47 = vsel %vm4260_vm13, 0.0, %v4261_v31  ;;  %v4544_v61 = vadd.f32 %v4513_v57, %v4512_v18  ;;  %v4653_v19 = vadd.f32 %v4652_v50, %v4622_v25  ;;  %4450 = vst [vmem:[%s8559_s29 + $0x38] sm:$0xff] %v6235_v32  ;;  %v4099_v15 = vpop.f32.mrb[39].mxu1 }
 0x291   : > { %4392 = vst [vmem:[%s6857_s28 + $0x18] sm:$0xff] %v4357_v47  ;;  %4393 = vst [vmem:[%s6857_s28 + $0x20] sm:$0xff] %v4263_v30  ;;  %v4265_v20 = vrot.slane %v6434_v28, 7  ;;  %v4515_v40 = vmul.f32 %v6434_v28, %v6434_v28  ;;  %v6435_v37 = vadd.f32 %v3622_v60, %v8497_v13  ;;  %v4625_v48 = vmul.f32 %v6235_v32, %v6235_v32 }
 0x292   : > { %4449 = vst [vmem:[%s8559_s29 + $0x30] sm:$0xff] %v4099_v15  ;;  %v6168_v14 = vpop.f32.mrb[4].mxu0  ;;  %v4586_v35 = vadd.f32 %v4585_v21, %v4099_v15  ;;  %v4624_v5 = vmul.f32 %v4099_v15, %v4099_v15  ;;  %v4654_v7 = vadd.f32 %v4653_v19, %v4623_v55 }
 0x293   : > { %v4374_v34 = vsel %vm4260_vm13, %v4265_v20, 0.0  ;;  %v4264_v38 = vrot.slane %v6435_v37, 7  ;;  %v4476_v41 = vadd.f32 %v6435_v37, %v4475_v0  ;;  %v4514_v2 = vmul.f32 %v6435_v37, %v6435_v37  ;;  %v3632_v1 = vpop.f32.mrb[5].mxu0  ;;  %v6238_v58 = vpop.f32.mrb[40].mxu1 }
 0x294   : > { %4397 = vst [vmem:[%s6857_s28 + $0x40] sm:$0x3] %v4374_v34  ;;  %v6436_v13 = vadd.f32 %v6168_v14, %v8499_v51  ;;  %v4655_v54 = vadd.f32 %v4654_v7, %v4624_v5  ;;  %v6437_v56 = vadd.f32 %v3632_v1, %v8501_v17  ;;  %4452 = vst [vmem:[%s8559_s29 + $0x48] sm:$0xff] %v6238_v58  ;;  %v4109_v44 = vpop.f32.mrb[41].mxu1 }
 0x295   : > { %v4627_v57 = vmul.f32 %v6238_v58, %v6238_v58  ;;  %v4266_v55 = vsel %vm4260_vm13, %v4264_v38, %v4265_v20  ;;  %v4358_v25 = vsel %vm4260_vm13, 0.0, %v4264_v38  ;;  %v4545_v31 = vadd.f32 %v4544_v61, %v4514_v2  ;;  %4451 = vst [vmem:[%s8559_s29 + $0x40] sm:$0xff] %v4109_v44 }
 0x296   : > { %v4477_v0 = vadd.f32 %v6434_v28, %v4476_v41  ;;  %4395 = vst [vmem:[%s6857_s28 + $0x30] sm:$0xff] %v4358_v25  ;;  %4396 = vst [vmem:[%s6857_s28 + $0x38] sm:$0xff] %v4266_v55  ;;  %v4268_v18 = vrot.slane %v6436_v13, 7  ;;  %v4517_v8 = vmul.f32 %v6436_v13, %v6436_v13  ;;  %v4267_v51 = vrot.slane %v6437_v56, 7  ;;  %v6171_v17 = vpop.f32.mrb[6].mxu0 }
 0x297   : > { %v4516_v50 = vmul.f32 %v6437_v56, %v6437_v56  ;;  %v4546_v60 = vadd.f32 %v4545_v31, %v4515_v40  ;;  %v6438_v21 = vadd.f32 %v6171_v17, %v8503_v46  ;;  %v4587_v30 = vadd.f32 %v6235_v32, %v4586_v35  ;;  %v3642_v47 = vpop.f32.mrb[7].mxu0  ;;  %v6241_v28 = vpop.f32.mrb[42].mxu1 }
 0x298   : > { %v4478_v23 = vadd.f32 %v6437_v56, %v4477_v0  ;;  %v4375_v61 = vsel %vm4260_vm13, %v4268_v18, 0.0  ;;  %v4269_v19 = vsel %vm4260_vm13, %v4267_v51, %v4268_v18  ;;  %v4359_v15 = vsel %vm4260_vm13, 0.0, %v4267_v51  ;;  %4454 = vst [vmem:[%s8559_s29 + $0x58] sm:$0xff] %v6241_v28  ;;  %v4119_v37 = vpop.f32.mrb[43].mxu1 }
 0x299   : > { %v4626_v20 = vmul.f32 %v4109_v44, %v4109_v44  ;;  %4400 = vst [vmem:[%s6857_s28 + $0x58] sm:$0x3] %v4375_v61  ;;  %4398 = vst [vmem:[%s6857_s28 + $0x48] sm:$0xff] %v4359_v15  ;;  %v4547_v14 = vadd.f32 %v4546_v60, %v4516_v50  ;;  %v4271_v40 = vrot.slane %v6438_v21, 7  ;;  %v4519_v46 = vmul.f32 %v6438_v21, %v6438_v21 }
 0x29a   : > { %4399 = vst [vmem:[%s6857_s28 + $0x50] sm:$0xff] %v4269_v19  ;;  %v4588_v32 = vadd.f32 %v4587_v30, %v4109_v44  ;;  %4453 = vst [vmem:[%s8559_s29 + $0x50] sm:$0xff] %v4119_v37  ;;  %v4656_v35 = vadd.f32 %v4655_v54, %v4625_v48  ;;  %v6439_v5 = vadd.f32 %v3642_v47, %v8505_v53  ;;  %v6174_v38 = vpop.f32.mrb[8].mxu0 }
 0x29b   : > { %v4479_v7 = vadd.f32 %v6436_v13, %v4478_v23  ;;  %v4629_v34 = vmul.f32 %v6241_v28, %v6241_v28  ;;  %v4376_v41 = vsel %vm4260_vm13, %v4271_v40, 0.0  ;;  %v4548_v2 = vadd.f32 %v4547_v14, %v4517_v8  ;;  %v3652_v55 = vpop.f32.mrb[9].mxu0  ;;  %v8599_v25 = vpop.f32.mrb[44].mxu1 }
 0x29c   : > { %v6440_v1 = vadd.f32 %v6174_v38, %v8507_v45  ;;  %v4589_v56 = vadd.f32 %v6238_v58, %v4588_v32  ;;  %4403 = vst [vmem:[%s6857_s28 + $0x70] sm:$0x3] %v4376_v41  ;;  %v4657_v44 = vadd.f32 %v4656_v35, %v4626_v20  ;;  %v4270_v48 = vrot.slane %v6439_v5, 7  ;;  %4456 = vst [vmem:[%s8559_s29 + $0x68] sm:$0xff] %v8599_v25  ;;  %v4129_v13 = vpop.f32.mrb[45].mxu1 }
 0x29d   : > { %v4480_v54 = vadd.f32 %v6439_v5, %v4479_v7  ;;  %v4518_v53 = vmul.f32 %v6439_v5, %v6439_v5  ;;  %v4628_v8 = vmul.f32 %v4119_v37, %v4119_v37  ;;  %4455 = vst [vmem:[%s8559_s29 + $0x60] sm:$0xff] %v4129_v13  ;;  %v6441_v60 = vadd.f32 %v3652_v55, %v8509_v29 }
 0x29e   : > { %v4274_v31 = vrot.slane %v6440_v1, 7  ;;  %v4521_v0 = vmul.f32 %v6440_v1, %v6440_v1  ;;  %v4590_v18 = vadd.f32 %v4589_v56, %v4119_v37  ;;  %v4272_v45 = vsel %vm4260_vm13, %v4270_v48, %v4271_v40  ;;  %v6177_v17 = vpop.f32.mrb[10].mxu0 }
 0x29f   : > { %v4360_v58 = vsel %vm4260_vm13, 0.0, %v4270_v48  ;;  %v4549_v51 = vadd.f32 %v4548_v2, %v4518_v53  ;;  %v4658_v50 = vadd.f32 %v4657_v44, %v4627_v57  ;;  %4402 = vst [vmem:[%s6857_s28 + $0x68] sm:$0xff] %v4272_v45  ;;  %v4481_v30 = vadd.f32 %v6438_v21, %v4480_v54  ;;  %v3662_v61 = vpop.f32.mrb[11].mxu0  ;;  %v8613_v19 = vpop.f32.mrb[46].mxu1 }
 0x2a0   : > { %4401 = vst [vmem:[%s6857_s28 + $0x60] sm:$0xff] %v4360_v58  ;;  %v4377_v23 = vsel %vm4260_vm13, %v4274_v31, 0.0  ;;  %v4631_v47 = vmul.f32 %v8599_v25, %v8599_v25  ;;  %v6442_v57 = vadd.f32 %v6177_v17, %v8511_v26  ;;  %v4591_v37 = vadd.f32 %v6241_v28, %v4590_v18  ;;  %4458 = vst [vmem:[%s8559_s29 + $0x78] sm:$0xff] %v8613_v19  ;;  %v4139_v14 = vpop.f32.mrb[47].mxu1 }
 0x2a1   : > { %4406 = vst [vmem:[%s6857_s28 + $0x88] sm:$0x3] %v4377_v23  ;;  %v4659_v15 = vadd.f32 %v4658_v50, %v4628_v8  ;;  %v4550_v20 = vadd.f32 %v4549_v51, %v4519_v46  ;;  %v4273_v40 = vrot.slane %v6441_v60, 7  ;;  %v4482_v29 = vadd.f32 %v6441_v60, %v4481_v30  ;;  %4457 = vst [vmem:[%s8559_s29 + $0x70] sm:$0xff] %v4139_v14 }
 0x2a2   : > { %v4520_v21 = vmul.f32 %v6441_v60, %v6441_v60  ;;  %v4630_v32 = vmul.f32 %v4129_v13, %v4129_v13  ;;  %v4277_v35 = vrot.slane %v6442_v57, 7  ;;  %v4523_v5 = vmul.f32 %v6442_v57, %v6442_v57  ;;  %v6180_v46 = vpop.f32.mrb[12].mxu0 }
 0x2a3   : > { %v4592_v7 = vadd.f32 %v4591_v37, %v4129_v13  ;;  %v4660_v38 = vadd.f32 %v4659_v15, %v4629_v34  ;;  %v4275_v26 = vsel %vm4260_vm13, %v4273_v40, %v4274_v31  ;;  %v4361_v28 = vsel %vm4260_vm13, 0.0, %v4273_v40  ;;  %v3672_v56 = vpop.f32.mrb[13].mxu0  ;;  %v8623_v55 = vpop.f32.mrb[48].mxu1 }
 0x2a4   : > { %v4551_v41 = vadd.f32 %v4550_v20, %v4520_v21  ;;  %v6443_v2 = vadd.f32 %v3662_v61, %v8513_v11  ;;  %4404 = vst [vmem:[%s6857_s28 + $0x78] sm:$0xff] %v4361_v28  ;;  %4405 = vst [vmem:[%s6857_s28 + $0x80] sm:$0xff] %v4275_v26  ;;  %v4378_v44 = vsel %vm4260_vm13, %v4277_v35, 0.0  ;;  %v4483_v54 = vadd.f32 %v6440_v1, %v4482_v29  ;;  %v4149_v53 = vpop.f32.mrb[49].mxu1 }
 0x2a5   : > { %v4661_v48 = vadd.f32 %v4660_v38, %v4630_v32  ;;  %v4633_v34 = vmul.f32 %v8613_v19, %v8613_v19  ;;  %4460 = vst [vmem:[%s8559_s29 + $0x88] sm:$0xff] %v8623_v55  ;;  %4409 = vst [vmem:[%s6857_s28 + $0xa0] sm:$0x3] %v4378_v44  ;;  %v6444_v18 = vadd.f32 %v6180_v46, %v8515_v24 }
 0x2a6   : > { %v4276_v13 = vrot.slane %v6443_v2, 7  ;;  %v4522_v11 = vmul.f32 %v6443_v2, %v6443_v2  ;;  %v4552_v31 = vadd.f32 %v4551_v41, %v4521_v0  ;;  %4459 = vst [vmem:[%s8559_s29 + $0x80] sm:$0xff] %v4149_v53  ;;  %v4484_v8 = vadd.f32 %v6443_v2, %v4483_v54  ;;  %v6183_v51 = vpop.f32.mrb[14].mxu0 }
 0x2a7   : > { %v4593_v45 = vadd.f32 %v8599_v25, %v4592_v7  ;;  %v4632_v1 = vmul.f32 %v4139_v14, %v4139_v14  ;;  %v4662_v58 = vadd.f32 %v4661_v48, %v4631_v47  ;;  %v4280_v60 = vrot.slane %v6444_v18, 7  ;;  %v3682_v30 = vpop.f32.mrb[15].mxu0  ;;  %v8638_v0 = vpop.f32.mrb[50].mxu1 }
 0x2a8   : > { %v4278_v50 = vsel %vm4260_vm13, %v4276_v13, %v4277_v35  ;;  %v4362_v17 = vsel %vm4260_vm13, 0.0, %v4276_v13  ;;  %v4553_v23 = vadd.f32 %v4552_v31, %v4522_v11  ;;  %v4525_v24 = vmul.f32 %v6444_v18, %v6444_v18  ;;  %4462 = vst [vmem:[%s8559_s29 + $0x98] sm:$0xff] %v8638_v0  ;;  %v4159_v47 = vpop.f32.mrb[51].mxu1 }
 0x2a9   : > { %4407 = vst [vmem:[%s6857_s28 + $0x90] sm:$0xff] %v4362_v17  ;;  %4408 = vst [vmem:[%s6857_s28 + $0x98] sm:$0xff] %v4278_v50  ;;  %v4594_v61 = vadd.f32 %v4593_v45, %v4139_v14  ;;  %v4663_v25 = vadd.f32 %v4662_v58, %v4632_v1  ;;  %v6445_v15 = vadd.f32 %v3672_v56, %v8517_v62  ;;  %v4379_v20 = vsel %vm4260_vm13, %v4280_v60, 0.0 }
 0x2aa   : > { %v4485_v37 = vadd.f32 %v6442_v57, %v4484_v8  ;;  %v4554_v40 = vadd.f32 %v4553_v23, %v4523_v5  ;;  %v4635_v29 = vmul.f32 %v8623_v55, %v8623_v55  ;;  %4461 = vst [vmem:[%s8559_s29 + $0x90] sm:$0xff] %v4159_v47  ;;  %4412 = vst [vmem:[%s6857_s28 + $0xb8] sm:$0x3] %v4379_v20  ;;  %v6186_v35 = vpop.f32.mrb[16].mxu0 }
 0x2ab   : > { %v4279_v21 = vrot.slane %v6445_v15, 7  ;;  %v4524_v32 = vmul.f32 %v6445_v15, %v6445_v15  ;;  %v6446_v14 = vadd.f32 %v6183_v51, %v8519_v10  ;;  %v4595_v62 = vadd.f32 %v8613_v19, %v4594_v61  ;;  %v3692_v5 = vpop.f32.mrb[17].mxu0  ;;  %v8653_v26 = vpop.f32.mrb[52].mxu1 }
 0x2ac   : > { %v4486_v7 = vadd.f32 %v6445_v15, %v4485_v37  ;;  %v4634_v38 = vmul.f32 %v4149_v53, %v4149_v53  ;;  %v4664_v46 = vadd.f32 %v4663_v25, %v4633_v34  ;;  %v6447_v57 = vadd.f32 %v3682_v30, %v8521_v59  ;;  %4464 = vst [vmem:[%s8559_s29 + $0xa8] sm:$0xff] %v8653_v26  ;;  %v4169_v19 = vpop.f32.mrb[53].mxu1 }
 0x2ad   : > { %v4281_v28 = vsel %vm4260_vm13, %v4279_v21, %v4280_v60  ;;  %v4363_v41 = vsel %vm4260_vm13, 0.0, %v4279_v21  ;;  %v4555_v2 = vadd.f32 %v4554_v40, %v4524_v32  ;;  %v4283_v10 = vrot.slane %v6446_v14, 7  ;;  %4463 = vst [vmem:[%s8559_s29 + $0xa0] sm:$0xff] %v4169_v19 }
 0x2ae   : > { %4410 = vst [vmem:[%s6857_s28 + $0xa8] sm:$0xff] %v4363_v41  ;;  %4411 = vst [vmem:[%s6857_s28 + $0xb0] sm:$0xff] %v4281_v28  ;;  %v4527_v56 = vmul.f32 %v6446_v14, %v6446_v14  ;;  %v4596_v44 = vadd.f32 %v4595_v62, %v4149_v53  ;;  %v4665_v48 = vadd.f32 %v4664_v46, %v4634_v38  ;;  %v4282_v59 = vrot.slane %v6447_v57, 7  ;;  %v6189_v31 = vpop.f32.mrb[18].mxu0 }
 0x2af   : > { %v4380_v54 = vsel %vm4260_vm13, %v4283_v10, 0.0  ;;  %v4487_v34 = vadd.f32 %v6444_v18, %v4486_v7  ;;  %v4526_v13 = vmul.f32 %v6447_v57, %v6447_v57  ;;  %v4556_v11 = vadd.f32 %v4555_v2, %v4525_v24  ;;  %v3702_v58 = vpop.f32.mrb[19].mxu0  ;;  %v8669_v51 = vpop.f32.mrb[54].mxu1 }
 0x2b0   : > { %4415 = vst [vmem:[%s6857_s28 + $0xd0] sm:$0x3] %v4380_v54  ;;  %v4284_v8 = vsel %vm4260_vm13, %v4282_v59, %v4283_v10  ;;  %v4364_v45 = vsel %vm4260_vm13, 0.0, %v4282_v59  ;;  %v4637_v53 = vmul.f32 %v8638_v0, %v8638_v0  ;;  %v6448_v1 = vadd.f32 %v6186_v35, %v8523_v63  ;;  %4466 = vst [vmem:[%s8559_s29 + $0xb8] sm:$0xff] %v8669_v51  ;;  %v4179_v60 = vpop.f32.mrb[55].mxu1 }
 0x2b1   : > { %4413 = vst [vmem:[%s6857_s28 + $0xc0] sm:$0xff] %v4364_v45  ;;  %4414 = vst [vmem:[%s6857_s28 + $0xc8] sm:$0xff] %v4284_v8  ;;  %v4488_v18 = vadd.f32 %v6447_v57, %v4487_v34  ;;  %v4557_v50 = vadd.f32 %v4556_v11, %v4526_v13  ;;  %v4597_v17 = vadd.f32 %v8623_v55, %v4596_v44 }
 0x2b2   : > { %v4636_v23 = vmul.f32 %v4159_v47, %v4159_v47  ;;  %v4286_v30 = vrot.slane %v6448_v1, 7  ;;  %v4529_v24 = vmul.f32 %v6448_v1, %v6448_v1  ;;  %v4666_v61 = vadd.f32 %v4665_v48, %v4635_v29  ;;  %4465 = vst [vmem:[%s8559_s29 + $0xb0] sm:$0xff] %v4179_v60  ;;  %v6192_v40 = vpop.f32.mrb[20].mxu0 }
 0x2b3   : > { %v6449_v25 = vadd.f32 %v3692_v5, %v8525_v36  ;;  %v4598_v63 = vadd.f32 %v4597_v17, %v4159_v47  ;;  %v4489_v15 = vadd.f32 %v6446_v14, %v4488_v18  ;;  %v4558_v20 = vadd.f32 %v4557_v50, %v4527_v56  ;;  %v3712_v29 = vpop.f32.mrb[21].mxu0  ;;  %v8681_v35 = vpop.f32.mrb[56].mxu1 }
 0x2b4   : > { %v4639_v37 = vmul.f32 %v8653_v26, %v8653_v26  ;;  %v4381_v55 = vsel %vm4260_vm13, %v4286_v30, 0.0  ;;  %v4667_v21 = vadd.f32 %v4666_v61, %v4636_v23  ;;  %v6450_v47 = vadd.f32 %v6189_v31, %v8527_v9  ;;  %4468 = vst [vmem:[%s8559_s29 + $0xc8] sm:$0xff] %v8681_v35  ;;  %v8688_v38 = vpop.f32.mrb[57].mxu1 }
 0x2b5   : > { %v4285_v32 = vrot.slane %v6449_v25, 7  ;;  %v4528_v62 = vmul.f32 %v6449_v25, %v6449_v25  ;;  %4418 = vst [vmem:[%s6857_s28 + $0xe8] sm:$0x3] %v4381_v55  ;;  %v4490_v36 = vadd.f32 %v6449_v25, %v4489_v15  ;;  %v4599_v14 = vadd.f32 %v8638_v0, %v4598_v63  ;;  %4467 = vst [vmem:[%s8559_s29 + $0xc0] sm:$0xff] %v8688_v38 }
 0x2b6   : > { %v4638_v7 = vmul.f32 %v4169_v19, %v4169_v19  ;;  %v4668_v28 = vadd.f32 %v4667_v21, %v4637_v53  ;;  %v4289_v41 = vrot.slane %v6450_v47, 7  ;;  %v4531_v9 = vmul.f32 %v6450_v47, %v6450_v47  ;;  %v6195_v10 = vpop.f32.mrb[22].mxu0 }
 0x2b7   : > { %v4287_v46 = vsel %vm4260_vm13, %v4285_v32, %v4286_v30  ;;  %v4365_v57 = vsel %vm4260_vm13, 0.0, %v4285_v32  ;;  %v4559_v5 = vadd.f32 %v4558_v20, %v4528_v62  ;;  %v4600_v0 = vadd.f32 %v4599_v14, %v4169_v19  ;;  %v3722_v54 = vpop.f32.mrb[23].mxu0  ;;  %v8699_v34 = vpop.f32.mrb[58].mxu1 }
 0x2b8   : > { %4416 = vst [vmem:[%s6857_s28 + $0xd8] sm:$0xff] %v4365_v57  ;;  %4417 = vst [vmem:[%s6857_s28 + $0xe0] sm:$0xff] %v4287_v46  ;;  %v6451_v2 = vadd.f32 %v3702_v58, %v8529_v12  ;;  %v4669_v56 = vadd.f32 %v4668_v28, %v4638_v7  ;;  %v4491_v44 = vadd.f32 %v6448_v1, %v4490_v36  ;;  %v4382_v13 = vsel %vm4260_vm13, %v4289_v41, 0.0  ;;  %v8705_v12 = vpop.f32.mrb[59].mxu1 }
 0x2b9   : > { %v4560_v48 = vadd.f32 %v4559_v5, %v4529_v24  ;;  %v4641_v59 = vmul.f32 %v8669_v51, %v8669_v51  ;;  %v6452_v19 = vadd.f32 %v6192_v40, %v8531_v42  ;;  %4470 = vst [vmem:[%s8559_s29 + $0xd8] sm:$0xff] %v8699_v34  ;;  %4421 = vst [vmem:[%s6857_s28 + $0x100] sm:$0x3] %v4382_v13 }
 0x2ba   : > { %v4288_v11 = vrot.slane %v6451_v2, 7  ;;  %v4530_v31 = vmul.f32 %v6451_v2, %v6451_v2  ;;  %v4492_v8 = vadd.f32 %v6451_v2, %v4491_v44  ;;  %v4601_v45 = vadd.f32 %v8653_v26, %v4600_v0  ;;  %4469 = vst [vmem:[%s8559_s29 + $0xd0] sm:$0xff] %v8705_v12  ;;  %v6198_v42 = vpop.f32.mrb[24].mxu0 }
 0x2bb   : > { %v4640_v53 = vmul.f32 %v4179_v60, %v4179_v60  ;;  %v4670_v1 = vadd.f32 %v4669_v56, %v4639_v37  ;;  %v4292_v17 = vrot.slane %v6452_v19, 7  ;;  %v4533_v23 = vmul.f32 %v6452_v19, %v6452_v19  ;;  %v3732_v61 = vpop.f32.mrb[25].mxu0  ;;  %v8716_v25 = vpop.f32.mrb[60].mxu1 }
 0x2bc   : > { %v4290_v58 = vsel %vm4260_vm13, %v4288_v11, %v4289_v41  ;;  %v4366_v18 = vsel %vm4260_vm13, 0.0, %v4288_v11  ;;  %v4561_v50 = vadd.f32 %v4560_v48, %v4530_v31  ;;  %v4602_v30 = vadd.f32 %v4601_v45, %v4179_v60  ;;  %4472 = vst [vmem:[%s8559_s29 + $0xe8] sm:$0xff] %v8716_v25  ;;  %v8723_v40 = vpop.f32.mrb[61].mxu1 }
 0x2bd   : > { %4419 = vst [vmem:[%s6857_s28 + $0xf0] sm:$0xff] %v4366_v18  ;;  %4420 = vst [vmem:[%s6857_s28 + $0xf8] sm:$0xff] %v4290_v58  ;;  %v4671_v24 = vadd.f32 %v4670_v1, %v4640_v53  ;;  %v6453_v26 = vadd.f32 %v3712_v29, %v8533_v22  ;;  %v4383_v63 = vsel %vm4260_vm13, %v4292_v17, 0.0  ;;  %v4493_v15 = vadd.f32 %v6450_v47, %v4492_v8 }
 0x2be   : > { %v4562_v20 = vadd.f32 %v4561_v50, %v4531_v9  ;;  %v4643_v37 = vmul.f32 %v8681_v35, %v8681_v35  ;;  %4424 = vst [vmem:[%s6857_s28 + $0x118] sm:$0x3] %v4383_v63  ;;  %v6454_v22 = vadd.f32 %v6195_v10, %v8535_v33  ;;  %v4603_v21 = vadd.f32 %v8669_v51, %v4602_v30  ;;  %v6201_v47 = vpop.f32.mrb[26].mxu0 }
 0x2bf   : > { %v4291_v60 = vrot.slane %v6453_v26, 7  ;;  %v4532_v55 = vmul.f32 %v6453_v26, %v6453_v26  ;;  %4471 = vst [vmem:[%s8559_s29 + $0xe0] sm:$0xff] %v8723_v40  ;;  %v4494_v32 = vadd.f32 %v6453_v26, %v4493_v15  ;;  %v4642_v62 = vmul.f32 %v8688_v38, %v8688_v38  ;;  %v3742_v51 = vpop.f32.mrb[27].mxu0  ;;  %v8735_v57 = vpop.f32.mrb[62].mxu1 }
 0x2c0   : > { %v4672_v29 = vadd.f32 %v4671_v24, %v4641_v59  ;;  %v6455_v36 = vadd.f32 %v3722_v54, %v8537_v39  ;;  %v4295_v33 = vrot.slane %v6454_v22, 7  ;;  %v4535_v5 = vmul.f32 %v6454_v22, %v6454_v22  ;;  %4474 = vst [vmem:[%s8559_s29 + $0xf8] sm:$0xff] %v8735_v57  ;;  %v8742_v9 = vpop.f32.mrb[63].mxu1 }
 0x2c1   : > { %v4293_v14 = vsel %vm4260_vm13, %v4291_v60, %v4292_v17  ;;  %v4367_v7 = vsel %vm4260_vm13, 0.0, %v4291_v60  ;;  %v4563_v46 = vadd.f32 %v4562_v20, %v4532_v55  ;;  %v4604_v28 = vadd.f32 %v4603_v21, %v8688_v38  ;;  %4473 = vst [vmem:[%s8559_s29 + $0xf0] sm:$0xff] %v8742_v9 }
 0x2c2   : > { %4422 = vst [vmem:[%s6857_s28 + $0x108] sm:$0xff] %v4367_v7  ;;  %4423 = vst [vmem:[%s6857_s28 + $0x110] sm:$0xff] %v4293_v14  ;;  %v4673_v41 = vadd.f32 %v4672_v29, %v4642_v62  ;;  %v4294_v39 = vrot.slane %v6455_v36, 7  ;;  %v4384_v0 = vsel %vm4260_vm13, %v4295_v33, 0.0  ;;  %v4495_v2 = vadd.f32 %v6452_v19, %v4494_v32  ;;  %v6204_v54 = vpop.f32.mrb[28].mxu0 }
 0x2c3   : > { %v4534_v10 = vmul.f32 %v6455_v36, %v6455_v36  ;;  %v4564_v56 = vadd.f32 %v4563_v46, %v4533_v23  ;;  %4427 = vst [vmem:[%s6857_s28 + $0x130] sm:$0x3] %v4384_v0  ;;  %v4645_v48 = vmul.f32 %v8699_v34, %v8699_v34  ;;  %v6456_v59 = vadd.f32 %v6198_v42, %v8539_v4  ;;  %v3752_v8 = vpop.f32.mrb[29].mxu0 }
 0x2c4   : > { %v4296_v44 = vsel %vm4260_vm13, %v4294_v39, %v4295_v33  ;;  %v4368_v38 = vsel %vm4260_vm13, 0.0, %v4294_v39  ;;  %v4496_v13 = vadd.f32 %v6455_v36, %v4495_v2  ;;  %v4605_v31 = vadd.f32 %v8681_v35, %v4604_v28 }
 0x2c5   : > { %4425 = vst [vmem:[%s6857_s28 + $0x120] sm:$0xff] %v4368_v38  ;;  %4426 = vst [vmem:[%s6857_s28 + $0x128] sm:$0xff] %v4296_v44  ;;  %v4565_v11 = vadd.f32 %v4564_v56, %v4534_v10  ;;  %v4644_v19 = vmul.f32 %v8705_v12, %v8705_v12  ;;  %v4298_v45 = vrot.slane %v6456_v59, 7  ;;  %v4537_v53 = vmul.f32 %v6456_v59, %v6456_v59 }
 0x2c6   : > { %v4674_v1 = vadd.f32 %v4673_v41, %v4643_v37  ;;  %v6457_v58 = vadd.f32 %v3732_v61, %v8541_v49  ;;  %v4606_v18 = vadd.f32 %v4605_v31, %v8705_v12  ;;  %v4497_v4 = vadd.f32 %v6454_v22, %v4496_v13  ;;  %v6207_v24 = vpop.f32.mrb[30].mxu0 }
 0x2c7   : > { %v4566_v50 = vadd.f32 %v4565_v11, %v4535_v5  ;;  %v4647_v17 = vmul.f32 %v8716_v25, %v8716_v25  ;;  %v4385_v35 = vsel %vm4260_vm13, %v4298_v45, 0.0  ;;  %v6458_v63 = vadd.f32 %v6201_v47, %v8543_v52  ;;  %v3762_v61 = vpop.f32.mrb[31].mxu0 }
 0x2c8   : > { %v4675_v42 = vadd.f32 %v4674_v1, %v4644_v19  ;;  %v4297_v23 = vrot.slane %v6457_v58, 7  ;;  %v4536_v30 = vmul.f32 %v6457_v58, %v6457_v58  ;;  %4430 = vst [vmem:[%s6857_s28 + $0x148] sm:$0x3] %v4385_v35  ;;  %v4498_v26 = vadd.f32 %v6457_v58, %v4497_v4 }
 0x2c9   : > { %v4607_v49 = vadd.f32 %v8699_v34, %v4606_v18  ;;  %v4646_v12 = vmul.f32 %v8723_v40, %v8723_v40  ;;  %v4301_v55 = vrot.slane %v6458_v63, 7  ;;  %v4539_v22 = vmul.f32 %v6458_v63, %v6458_v63 }
 0x2ca   : > { %v4299_v15 = vsel %vm4260_vm13, %v4297_v23, %v4298_v45  ;;  %v4369_v20 = vsel %vm4260_vm13, 0.0, %v4297_v23  ;;  %v4567_v37 = vadd.f32 %v4566_v50, %v4536_v30  ;;  %v4676_v60 = vadd.f32 %v4675_v42, %v4645_v48 }
 0x2cb   : > { %4428 = vst [vmem:[%s6857_s28 + $0x138] sm:$0xff] %v4369_v20  ;;  %4429 = vst [vmem:[%s6857_s28 + $0x140] sm:$0xff] %v4299_v15  ;;  %v4608_v21 = vadd.f32 %v4607_v49, %v8723_v40  ;;  %v6459_v52 = vadd.f32 %v3742_v51, %v8545_v43  ;;  %v4499_v32 = vadd.f32 %v6456_v59, %v4498_v26  ;;  %v4386_v36 = vsel %vm4260_vm13, %v4301_v55, 0.0 }
 0x2cc   : > { %v4677_v34 = vadd.f32 %v4676_v60, %v4646_v12  ;;  %v4568_v62 = vadd.f32 %v4567_v37, %v4537_v53  ;;  %v4649_v29 = vmul.f32 %v8735_v57, %v8735_v57  ;;  %v6460_v7 = vadd.f32 %v6204_v54, %v8547_v27  ;;  %4433 = vst [vmem:[%s6857_s28 + $0x160] sm:$0x3] %v4386_v36 }
 0x2cd   : > { %v4300_v47 = vrot.slane %v6459_v52, 7  ;;  %v4538_v14 = vmul.f32 %v6459_v52, %v6459_v52  ;;  %v4500_v46 = vadd.f32 %v6459_v52, %v4499_v32  ;;  %v4609_v40 = vadd.f32 %v8716_v25, %v4608_v21 }
 0x2ce   : > { %v4648_v43 = vmul.f32 %v8742_v9, %v8742_v9  ;;  %v4678_v33 = vadd.f32 %v4677_v34, %v4647_v17  ;;  %v4304_v41 = vrot.slane %v6460_v7, 7  ;;  %v6461_v0 = vadd.f32 %v3752_v8, %v8549_v6 }
 0x2cf   : > { %v4302_v51 = vsel %vm4260_vm13, %v4300_v47, %v4301_v55  ;;  %v4370_v5 = vsel %vm4260_vm13, 0.0, %v4300_v47  ;;  %v4569_v28 = vadd.f32 %v4568_v62, %v4538_v14  ;;  %v4610_v39 = vadd.f32 %v4609_v40, %v8742_v9 }
 0x2d0   : > { %4431 = vst [vmem:[%s6857_s28 + $0x150] sm:$0xff] %v4370_v5  ;;  %4432 = vst [vmem:[%s6857_s28 + $0x158] sm:$0xff] %v4302_v51  ;;  %v4679_v27 = vadd.f32 %v4678_v33, %v4648_v43  ;;  %v4387_v25 = vsel %vm4260_vm13, %v4304_v41, 0.0  ;;  %v4501_v2 = vadd.f32 %v6458_v63, %v4500_v46  ;;  %v6462_v56 = vadd.f32 %v6207_v24, %v8552_v3 }
 0x2d1   : > { %v4570_v10 = vadd.f32 %v4569_v28, %v4539_v22  ;;  %4436 = vst [vmem:[%s6857_s28 + $0x178] sm:$0x3] %v4387_v25  ;;  %v4611_v44 = vadd.f32 %v8735_v57, %v4610_v39  ;;  %v4303_v48 = vrot.slane %v6461_v0, 7  ;;  %v4540_v59 = vmul.f32 %v6461_v0, %v6461_v0 }
 0x2d2   : > { %v4680_v38 = vadd.f32 %v4679_v27, %v4649_v29  ;;  %v4541_v54 = vmul.f32 %v6460_v7, %v6460_v7  ;;  %v4502_v9 = vadd.f32 %v6461_v0, %v4501_v2  ;;  %v4307_v13 = vrot.slane %v6462_v56, 7 }
 0x2d3   : > { %v6463_v6 = vadd.f32 %v3762_v61, %v8554_v16  ;;  %v4612_v11 = vrot.slane %v4611_v44, 4  ;;  %v4305_v19 = vsel %vm4260_vm13, %v4303_v48, %v4304_v41  ;;  %v4371_v3 = vsel %vm4260_vm13, 0.0, %v4303_v48 }
 0x2d4   : > { %v4681_v31 = vrot.slane %v4680_v38, 4  ;;  %4434 = vst [vmem:[%s6857_s28 + $0x168] sm:$0xff] %v4371_v3  ;;  %4435 = vst [vmem:[%s6857_s28 + $0x170] sm:$0xff] %v4305_v19  ;;  %v4571_v57 = vadd.f32 %v4570_v10, %v4540_v59  ;;  %v4388_v8 = vsel %vm4260_vm13, %v4307_v13, 0.0  ;;  %v4503_v53 = vadd.f32 %v6460_v7, %v4502_v9 }
 0x2d5   : > { %v4306_v45 = vrot.slane %v6463_v6, 7  ;;  %4439 = vst [vmem:[%s6857_s28 + $0x190] sm:$0x3] %v4388_v8  ;;  %v4542_v1 = vmul.f32 %v6463_v6, %v6463_v6  ;;  %v4613_v50 = vadd.f32 %v4612_v11, %v4611_v44  ;;  %v4543_v35 = vmul.f32 %v6462_v56, %v6462_v56 }
 0x2d6   : > { %v4504_v18 = vadd.f32 %v6463_v6, %v4503_v53  ;;  %v4572_v4 = vadd.f32 %v4571_v57, %v4541_v54  ;;  %v4682_v17 = vadd.f32 %v4681_v31, %v4680_v38 }
 0x2d7   : > { %v4308_v58 = vsel %vm4260_vm13, %v4306_v45, %v4307_v13  ;;  %v4372_v16 = vsel %vm4260_vm13, 0.0, %v4306_v45  ;;  %v4614_v26 = vrot.slane %v4613_v50, 2 }
 0x2d8   : > { %4437 = vst [vmem:[%s6857_s28 + $0x180] sm:$0xff] %v4372_v16  ;;  %4438 = vst [vmem:[%s6857_s28 + $0x188] sm:$0xff] %v4308_v58  ;;  %v4505_v42 = vadd.f32 %v6462_v56, %v4504_v18  ;;  %v4573_v23 = vadd.f32 %v4572_v4, %v4542_v1  ;;  %v4683_v63 = vrot.slane %v4682_v17, 2  ;;  %s4839_s28 = sshll.u32 %s9026_s25, 2 }
 0x2d9   : > { %v4615_v20 = vadd.f32 %v4614_v26, %v4613_v50  ;;  %s329_s10 = scalar_lea.vmem %s8818_s7, %s4839_s28 }
 0x2da   : > { %v4506_v30 = vrot.slane %v4505_v42, 4  ;;  %v4574_v24 = vadd.f32 %v4573_v23, %v4543_v35  ;;  %v4684_v37 = vadd.f32 %v4683_v63, %v4682_v17 }
 0x2db   : > { %v4616_v52 = vrot.slane %v4615_v20, 1 }
 0x2dc   : > { %v4507_v49 = vadd.f32 %v4506_v30, %v4505_v42  ;;  %v4575_v12 = vrot.slane %v4574_v24, 4  ;;  %v4685_v34 = vrot.slane %v4684_v37, 1 }
 0x2dd   : > { %v4617_v36 = vadd.f32 %v4616_v52, %v4615_v20 }
 0x2de   : > { %v4508_v61 = vrot.slane %v4507_v49, 2  ;;  %v4576_v15 = vadd.f32 %v4575_v12, %v4574_v24  ;;  %v4686_v47 = vadd.f32 %v4685_v34, %v4684_v37 }
 0x2e0   : > { %v4509_v60 = vadd.f32 %v4508_v61, %v4507_v49  ;;  %v4577_v55 = vrot.slane %v4576_v15, 2 }
 0x2e2   : > { %v4510_v22 = vrot.slane %v4509_v60, 1  ;;  %v4578_v21 = vadd.f32 %v4577_v55, %v4576_v15 }
 0x2e4   : > { %v4579_v32 = vrot.slane %v4578_v21, 1  ;;  %v4511_v62 = vadd.f32 %v4510_v22, %v4509_v60 }
 0x2e6   : > { %v4580_v29 = vadd.f32 %v4579_v32, %v4578_v21 }
 0x2e8   : > { %v4687_v14 = vsel %vm4260_vm13, %v4511_v62, %v4580_v29 }
 0x2e9   : > { %v4689_v7 = vsel %vm4688_vm14, %v4687_v14, %v4617_v36 }
 0x2ea   : > { %v4691_v46 = vsel %vm4690_vm8, %v4689_v7, %v4686_v47 }
 0x2eb   : > { %4692 = vst [vmem:[%s329_s10] sm:$0xf] %v4691_v46 }
 0x2ec PF: > { %s18_s24 = sadd.s32 1, %s6754_s24  }
 0x2ed   : > { %p15_p4 = scmp.ge.s32.totalorder %s18_s24, 4  }
 0x2ef   :  { %17 = sbr.rel (!%p15_p4) target bundleno = 1 (0x1), region = 108 }

// kernel: preact_resblock_up.3
= control target key start
LH: loop header
LB: loop body
LE: loop exit
PB: predicated region body
PF: predicated region fallthrough
CT: control target
= control target key end

     0   :  { %s6070_s24 = smov 0   ;;  %s7954_s0 = inlined_call_operand.vmem [shape: f32[2,18,18,128], index: 0, kind: input, shape index: {}]   ;;  %s7955_s1 = inlined_call_operand.vmem [shape: f32[2,1,128], index: 1, kind: input, shape index: {}]   ;;  %s7956_s2 = inlined_call_operand.vmem [shape: f32[2,1,128], index: 2, kind: input, shape index: {}]   ;;  %s7957_s3 = inlined_call_operand.vmem [shape: f32[9,128,128], index: 3, kind: input, shape index: {}]   ;;  %s7958_s4 = inlined_call_operand.vmem [shape: f32[2,256,128], index: 4, kind: input, shape index: {}]   ;;  %s7959_s5 = inlined_call_operand.vmem [shape: f32[1,1,128], index: 5, kind: input, shape index: {}]   ;;  %s7960_s6 = inlined_call_operand.vmem [shape: f32[1,1,128], index: 6, kind: input, shape index: {}]   ;;  %s7961_s7 = inlined_call_operand.vmem [shape: f32[2,256,128], index: 7, kind: output, shape index: {}]  }
   0x1 LB: > { %s4114_s25 = sadd.s32 4294967295, %s6027_s24   ;;  %p4118_p0 = scmp.ge.s32.totalorder %s6027_s24, 1  ;;  %s6027_s24 = sphi %s6070_s24, %s17_s24  }
   0x2   : > { %p263_p1 = scmp.lt.s32.totalorder %s6027_s24, 3 }
   0x4   : > { %p264_p2 = pnand %p4118_p0, %p263_p1 }
   0x6   : > { %267 = sbr.rel (%p264_p2) target bundleno = 664 (0x298), region = 48 }
   0xd   : > { %v665_v0 = vlaneseq  ;;  %v1224_v1 = vld [vmem:[%s7957_s3] sm:$0xff]  ;;  %v1225_v2 = vld [vmem:[%s7957_s3 + $0x8] sm:$0xff]  ;;  %v1226_v6 = vld [vmem:[%s7957_s3 + $0x10] sm:$0xff]  ;;  %v6029_v21 = vmov 0.0   ;;  %p306_p3 = scmp.lt.s32.totalorder %s4114_s25, 1  ;;  %vm1545_vm15 = vcmask 1046528  }
   0xe   : > { %v4179_v3 = vld [vmem:[%s7957_s3 + $0x200] sm:$0xff]  ;;  %v5415_v4 = vpack.c.bf16 %v1225_v2, %v1224_v1  ;;  %v4180_v5 = vld [vmem:[%s7957_s3 + $0x208] sm:$0xff]  ;;  %v1227_v7 = vld [vmem:[%s7957_s3 + $0x18] sm:$0xff] }
   0xf   : > { %v6096_v8 = vshrl.u32 %v665_v0, 7  ;;  %v6098_v9 = vand.u32 127, %v665_v0  ;;  %v6100_v10 = vpack.c.bf16 %v4180_v5, %v4179_v3  ;;  %v5419_v11 = vpack.c.bf16 %v1227_v7, %v1226_v6  ;;  %v4181_v12 = vld [vmem:[%s7957_s3 + $0x210] sm:$0xff]  ;;  %v4182_v13 = vld [vmem:[%s7957_s3 + $0x218] sm:$0xff]  ;;  %v1228_v16 = vld [vmem:[%s7957_s3 + $0x20] sm:$0xff]  ;;  %s8233_s25 = smov (!%p306_p3, %s4114_s25), 1 }
  0x10   : > { %5416 = vmatprep.subr.bf16.mxu1 %v5415_v4  ;;  %v6108_v14 = vpack.c.bf16 %v4182_v13, %v4181_v12  ;;  %v1229_v17 = vld [vmem:[%s7957_s3 + $0x28] sm:$0xff]  ;;  %v4183_v19 = vld [vmem:[%s7957_s3 + $0x220] sm:$0xff]  ;;  %v1230_v24 = vld [vmem:[%s7957_s3 + $0x30] sm:$0xff]  ;;  %s6007_s12 = smul.u32 432, %s8233_s25  ;;  %s6316_s18 = scalar_lea.vmem %s7955_s1, %s8233_s25 }
  0x11   : > { %8080 = vst [vmem:[#allocation2_spill] sm:$0xff] %v6100_v10  ;;  %vm671_vm0 = vcmp.ge.s32.totalorder %v6096_v8, 1  ;;  %vm680_vm1 = vcmp.ge.s32.totalorder %v6098_v9, 1  ;;  %vm684_vm2 = vcmp.le.s32.totalorder %v6098_v9, 16  ;;  %v6114_v15 = vsub.s32 1, %v6096_v8  ;;  %5544 = vmatprep.subr.bf16.mxu0 %v6100_v10  ;;  %5418 = vmatpush3.bf16.msra.mxu1 %v5415_v4  ;;  %v4184_v20 = vld [vmem:[%s7957_s3 + $0x228] sm:$0xff]  ;;  %s6326_s21 = scalar_lea.vmem %s7956_s2, %s8233_s25 }
  0x12   : > { %8081 = vst [vmem:[#allocation3_spill] sm:$0xff] %v6108_v14  ;;  %vm681_vm3 = vmand %vm671_vm0, %vm680_vm1  ;;  %v6126_v18 = vsub.s32 0, %v6096_v8  ;;  %5546 = vmatpush3.bf16.msra.mxu0 %v6100_v10  ;;  %5420 = vmatprep.subr.bf16.mxu1 %v5419_v11  ;;  %v5423_v23 = vpack.c.bf16 %v1229_v17, %v1228_v16  ;;  %v6150_v27 = vpack.c.bf16 %v4184_v20, %v4183_v19  ;;  %v1231_v28 = vld [vmem:[%s7957_s3 + $0x38] sm:$0xff]  ;;  %v4185_v29 = vld [vmem:[%s7957_s3 + $0x230] sm:$0xff]  ;;  %v726_v31 = vsub.s32 2, %v6096_v8  ;;  %s6310_s15 = scalar_lea.vmem %s7954_s0, %s6007_s12 }
  0x13   : > { %vm685_vm4 = vmand %vm681_vm3, %vm684_vm2  ;;  %5548 = vmatprep.subr.bf16.mxu0 %v6108_v14  ;;  %v4186_v30 = vld [vmem:[%s7957_s3 + $0x238] sm:$0xff]  ;;  %v668_v32 = vadd.s32 16, %v6096_v8  ;;  %v5427_v33 = vpack.c.bf16 %v1231_v28, %v1230_v24  ;;  %v1232_v35 = vld [vmem:[%s7957_s3 + $0x40] sm:$0xff]  ;;  %v741_v48 = vsub.s32 3, %v6096_v8  ;;  %v756_v56 = vsub.s32 4, %v6096_v8 }
  0x14   : > { %v6139_v22 = vsel %vm685_vm4, 1.0, %v6029_v21  ;;  %8082 = vst [vmem:[#allocation4_spill] sm:$0xff] %v6150_v27  ;;  %v6165_v34 = vpack.c.bf16 %v4186_v30, %v4185_v29  ;;  %v1233_v36 = vld [vmem:[%s7957_s3 + $0x48] sm:$0xff]  ;;  %v4187_v37 = vld [vmem:[%s7957_s3 + $0x240] sm:$0xff]  ;;  %v1234_v42 = vld [vmem:[%s7957_s3 + $0x50] sm:$0xff]  ;;  %v771_v6 = vsub.s32 5, %v6096_v8 }
  0x15   : > { %v712_v25 = vrot.slane %v6139_v22, %v6114_v15  ;;  %v6148_v26 = vrot.slane %v6139_v22, %v6126_v18  ;;  %5422 = vmatpush3.bf16.msra.mxu1 %v5419_v11  ;;  %v4188_v38 = vld [vmem:[%s7957_s3 + $0x248] sm:$0xff]  ;;  %vm676_vm5 = vcmp.le.s32.totalorder %v668_v32, 16  ;;  %v727_v39 = vrot.slane %v6139_v22, %v726_v31  ;;  %v1235_v44 = vld [vmem:[%s7957_s3 + $0x58] sm:$0xff]  ;;  %v4189_v45 = vld [vmem:[%s7957_s3 + $0x250] sm:$0xff] }
  0x16   : > { %5550 = vmatpush3.bf16.msra.mxu0 %v6108_v14  ;;  %5424 = vmatprep.subr.bf16.mxu1 %v5423_v23  ;;  %8083 = vst [vmem:[#allocation5_spill] sm:$0xff] %v6165_v34  ;;  %vm683_vm6 = vmand %vm676_vm5, %vm680_vm1  ;;  %v5431_v40 = vpack.c.bf16 %v1233_v36, %v1232_v35  ;;  %v6189_v41 = vpack.c.bf16 %v4188_v38, %v4187_v37  ;;  %v4190_v46 = vld [vmem:[%s7957_s3 + $0x258] sm:$0xff]  ;;  %v1236_v51 = vld [vmem:[%s7957_s3 + $0x60] sm:$0xff]  ;;  %v786_v13 = vsub.s32 6, %v6096_v8  ;;  %v801_v17 = vsub.s32 7, %v6096_v8 }
  0x17   : > { %714 = vbcast.lane.b32.xlu0 %v712_v25, 256  ;;  %699 = vbcast.lane.b32.xlu1 %v6148_v26, 256  ;;  %vm687_vm7 = vmand %vm683_vm6, %vm684_vm2  ;;  %v5435_v49 = vpack.c.bf16 %v1235_v44, %v1234_v42  ;;  %v6214_v50 = vpack.c.bf16 %v4190_v46, %v4189_v45  ;;  %v1237_v52 = vld [vmem:[%s7957_s3 + $0x68] sm:$0xff]  ;;  %v4191_v53 = vld [vmem:[%s7957_s3 + $0x260] sm:$0xff]  ;;  %v742_v55 = vrot.slane %v6139_v22, %v741_v48  ;;  %vm1932_vm6 = vcmask 1045504  }
  0x18   : > { %5552 = vmatprep.subr.bf16.mxu0 %v6150_v27  ;;  %8084 = vst [vmem:[#allocation6_spill] sm:$0xff] %v6189_v41  ;;  %v6195_v43 = vsel %vm687_vm7, 1.0, %v6029_v21  ;;  %v4192_v54 = vld [vmem:[%s7957_s3 + $0x268] sm:$0xff]  ;;  %v5439_v57 = vpack.c.bf16 %v1237_v52, %v1236_v51  ;;  %v1238_v59 = vld [vmem:[%s7957_s3 + $0x70] sm:$0xff]  ;;  %v1239_v60 = vld [vmem:[%s7957_s3 + $0x78] sm:$0xff]  ;;  %v757_v63 = vrot.slane %v6139_v22, %v756_v56  ;;  %v772_v12 = vrot.slane %v6139_v22, %v771_v6 }
  0x19   : > { %5426 = vmatpush3.bf16.msra.mxu1 %v5423_v23  ;;  %v6209_v47 = vrot.slane %v6195_v43, %v6126_v18  ;;  %8085 = vst [vmem:[#allocation7_spill] sm:$0xff] %v6214_v50  ;;  %v6234_v58 = vpack.c.bf16 %v4192_v54, %v4191_v53  ;;  %v4193_v61 = vld [vmem:[%s7957_s3 + $0x270] sm:$0xff]  ;;  %v4194_v62 = vld [vmem:[%s7957_s3 + $0x278] sm:$0xff]  ;;  %v5443_v0 = vpack.c.bf16 %v1239_v60, %v1238_v59  ;;  %v4131_v2 = vld [vmem:[%s7957_s3 + $0x80] sm:$0xff] }
  0x1a   : > { %5554 = vmatpush3.bf16.msra.mxu0 %v6150_v27  ;;  %5428 = vmatprep.subr.bf16.mxu1 %v5427_v33  ;;  %v6253_v1 = vpack.c.bf16 %v4194_v62, %v4193_v61  ;;  %v4132_v3 = vld [vmem:[%s7957_s3 + $0x88] sm:$0xff]  ;;  %v4195_v4 = vld [vmem:[%s7957_s3 + $0x280] sm:$0xff]  ;;  %v787_v16 = vrot.slane %v6139_v22, %v786_v13  ;;  %vm686_vm8 = vmand %vm680_vm1, %vm684_vm2  ;;  %v802_v19 = vrot.slane %v6139_v22, %v801_v17 }
  0x1b   : > { %718 = vbcast.lane.b32.xlu0 %v712_v25, 264  ;;  %722 = vbcast.lane.b32.xlu1 %v712_v25, 272  ;;  %8086 = vst [vmem:[#allocation8_spill] sm:$0xff] %v6234_v58  ;;  %v4196_v5 = vld [vmem:[%s7957_s3 + $0x288] sm:$0xff]  ;;  %v6270_v7 = vpack.c.bf16 %v4132_v3, %v4131_v2  ;;  %v4127_v20 = vsel %vm686_vm8, 1.0, %v6029_v21  ;;  %v6291_v9 = vrot.slane %v6195_v43, %v6114_v15  ;;  %v330_v8 = vld [vmem:[%s6310_s15 + $0x18] sm:$0xff] }
  0x1c   : > { %5556 = vmatprep.subr.bf16.mxu0 %v6165_v34  ;;  %8087 = vst [vmem:[#allocation9_spill] sm:$0xff] %v6253_v1  ;;  %v6272_v11 = vpack.c.bf16 %v4196_v5, %v4195_v4  ;;  %v817_v23 = vrot.slane %v4127_v20, %v6126_v18  ;;  %v832_v24 = vrot.slane %v4127_v20, %v6114_v15  ;;  %v327_v29 = vld [vmem:[%s6310_s15] sm:$0xff]  ;;  %v332_v32 = vld [vmem:[%s6310_s15 + $0x28] sm:$0x3]  ;;  %v333_v37 = vld [vmem:[%s6310_s15 + $0x30] sm:$0xff] }
  0x1d   : > { %5430 = vmatpush3.bf16.msra.mxu1 %v5427_v33  ;;  %v847_v22 = vrot.slane %v4127_v20, %v726_v31  ;;  %v862_v18 = vrot.slane %v4127_v20, %v741_v48  ;;  %v877_v21 = vrot.slane %v4127_v20, %v756_v56  ;;  %v892_v15 = vrot.slane %v4127_v20, %v771_v6  ;;  %v331_v30 = vld [vmem:[%s6310_s15 + $0x20] sm:$0xff]  ;;  %v328_v33 = vld [vmem:[%s6310_s15 + $0x8] sm:$0xff]  ;;  %v334_v45 = vld [vmem:[%s6310_s15 + $0x38] sm:$0xff] }
  0x1e   : > { %5558 = vmatpush3.bf16.msra.mxu0 %v6165_v34  ;;  %5432 = vmatprep.subr.bf16.mxu1 %v5431_v40  ;;  %v907_v25 = vrot.slane %v4127_v20, %v786_v13  ;;  %v922_v28 = vrot.slane %v4127_v20, %v801_v17  ;;  %v6336_v35 = vld [vmem:[%s6326_s21] ss:$0 sm:$0xff]  ;;  %v337_v53 = vld [vmem:[%s6310_s15 + $0x50] sm:$0xff] }
  0x1f   : > { %703 = vbcast.lane.b32.xlu0 %v6148_v26, 264  ;;  %729 = vbcast.lane.b32.xlu1 %v727_v39, 256  ;;  %v335_v48 = vld [vmem:[%s6310_s15 + $0x40] sm:$0x3]  ;;  %v341_v17 = vld [vmem:[%s6310_s15 + $0x70] sm:$0x3] }
  0x20   : > { %5560 = vmatprep.subr.bf16.mxu0 %v6189_v41  ;;  %v339_v56 = vld [vmem:[%s6310_s15 + $0x60] sm:$0xff] }
  0x21   : > { %5434 = vmatpush3.bf16.msra.mxu1 %v5431_v40 }
  0x22   : > { %5562 = vmatpush3.bf16.msra.mxu0 %v6189_v41  ;;  %5436 = vmatprep.subr.bf16.mxu1 %v5435_v49 }
  0x23   : > { %733 = vbcast.lane.b32.xlu0 %v727_v39, 264  ;;  %737 = vbcast.lane.b32.xlu1 %v727_v39, 272 }
  0x24   : > { %5564 = vmatprep.subr.bf16.mxu0 %v6214_v50 }
  0x25   : > { %5438 = vmatpush3.bf16.msra.mxu1 %v5435_v49  ;;  %v336_v49 = vld [vmem:[%s6310_s15 + $0x48] sm:$0xff] }
  0x26   : > { %5566 = vmatpush3.bf16.msra.mxu0 %v6214_v50  ;;  %5440 = vmatprep.subr.bf16.mxu1 %v5439_v57 }
  0x27   : > { %744 = vbcast.lane.b32.xlu0 %v742_v55, 256  ;;  %748 = vbcast.lane.b32.xlu1 %v742_v55, 264 }
  0x28   : > { %5568 = vmatprep.subr.bf16.mxu0 %v6234_v58 }
  0x29   : > { %5442 = vmatpush3.bf16.msra.mxu1 %v5439_v57 }
  0x2a   : > { %5570 = vmatpush3.bf16.msra.mxu0 %v6234_v58  ;;  %5444 = vmatprep.subr.bf16.mxu1 %v5443_v0  ;;  %v4143_v58 = vld [vmem:[%s7957_s3 + $0xe0] sm:$0xff] }
  0x2b   : > { %752 = vbcast.lane.b32.xlu0 %v742_v55, 272  ;;  %759 = vbcast.lane.b32.xlu1 %v757_v63, 256 }
  0x2c   : > { %5572 = vmatprep.subr.bf16.mxu0 %v6253_v1 }
  0x2d   : > { %5446 = vmatpush3.bf16.msra.mxu1 %v5443_v0 }
  0x2e   : > { %5574 = vmatpush3.bf16.msra.mxu0 %v6253_v1  ;;  %5448 = vmatprep.subr.bf16.mxu1 %v6270_v7 }
  0x2f   : > { %763 = vbcast.lane.b32.xlu0 %v757_v63, 264  ;;  %767 = vbcast.lane.b32.xlu1 %v757_v63, 272 }
  0x30   : > { %5576 = vmatprep.subr.bf16.mxu0 %v6272_v11 }
  0x33   : > { %774 = vbcast.lane.b32.xlu0 %v772_v12, 256  ;;  %778 = vbcast.lane.b32.xlu1 %v772_v12, 264 }
  0x37   : > { %782 = vbcast.lane.b32.xlu0 %v772_v12, 272  ;;  %789 = vbcast.lane.b32.xlu1 %v787_v16, 256 }
  0x3b   : > { %793 = vbcast.lane.b32.xlu0 %v787_v16, 264  ;;  %797 = vbcast.lane.b32.xlu1 %v787_v16, 272  ;;  %v340_v16 = vld [vmem:[%s6310_s15 + $0x68] sm:$0xff] }
  0x3f   : > { %804 = vbcast.lane.b32.xlu0 %v802_v19, 256  ;;  %808 = vbcast.lane.b32.xlu1 %v802_v19, 264 }
  0x43   : > { %812 = vbcast.lane.b32.xlu0 %v802_v19, 272  ;;  %819 = vbcast.lane.b32.xlu1 %v817_v23, 256 }
  0x47   : > { %823 = vbcast.lane.b32.xlu0 %v817_v23, 264  ;;  %827 = vbcast.lane.b32.xlu1 %v817_v23, 272 }
  0x4b   : > { %834 = vbcast.lane.b32.xlu0 %v832_v24, 256  ;;  %838 = vbcast.lane.b32.xlu1 %v832_v24, 264 }
  0x4f   : > { %849 = vbcast.lane.b32.xlu0 %v847_v22, 256  ;;  %853 = vbcast.lane.b32.xlu1 %v847_v22, 264 }
  0x53   : > { %864 = vbcast.lane.b32.xlu0 %v862_v18, 256  ;;  %868 = vbcast.lane.b32.xlu1 %v862_v18, 264 }
  0x57   : > { %879 = vbcast.lane.b32.xlu0 %v877_v21, 256  ;;  %883 = vbcast.lane.b32.xlu1 %v877_v21, 264 }
  0x5b   : > { %894 = vbcast.lane.b32.xlu0 %v892_v15, 256  ;;  %898 = vbcast.lane.b32.xlu1 %v892_v15, 264 }
  0x5f   : > { %909 = vbcast.lane.b32.xlu0 %v907_v25, 256  ;;  %913 = vbcast.lane.b32.xlu1 %v907_v25, 264 }
  0x63   : > { %924 = vbcast.lane.b32.xlu0 %v922_v28, 256  ;;  %928 = vbcast.lane.b32.xlu1 %v922_v28, 264 }
  0x67   : > { %707 = vbcast.lane.b32.xlu0 %v6148_v26, 272  ;;  %842 = vbcast.lane.b32.xlu1 %v832_v24, 272  ;;  %v6320_v26 = vld [vmem:[%s6316_s18] ss:$0 sm:$0xff] }
  0x68   : > { %v391_v31 = vmul.f32 %v6320_v26, %v330_v8  ;;  %v388_v36 = vmul.f32 %v6320_v26, %v327_v29  ;;  %v392_v38 = vmul.f32 %v6320_v26, %v331_v30  ;;  %v393_v39 = vmul.f32 %v6320_v26, %v332_v32  ;;  %v343_v30 = vld [vmem:[%s6310_s15 + $0x80] sm:$0xff] }
  0x69   : > { %v389_v40 = vmul.f32 %v6320_v26, %v328_v33  ;;  %v394_v43 = vmul.f32 %v6320_v26, %v333_v37  ;;  %v395_v55 = vmul.f32 %v6320_v26, %v334_v45  ;;  %v396_v59 = vmul.f32 %v6320_v26, %v335_v48  ;;  %v4197_v48 = vld [vmem:[%s7957_s3 + $0x290] sm:$0xff] }
  0x6a   : > { %v452_v42 = vadd.f32 %v6336_v35, %v391_v31  ;;  %v449_v44 = vadd.f32 %v6336_v35, %v388_v36  ;;  %v453_v46 = vadd.f32 %v6336_v35, %v392_v38  ;;  %v454_v51 = vadd.f32 %v6336_v35, %v393_v39 }
  0x6b   : > { %857 = vbcast.lane.b32.xlu0 %v847_v22, 272  ;;  %872 = vbcast.lane.b32.xlu1 %v862_v18, 272  ;;  %v450_v52 = vadd.f32 %v6336_v35, %v389_v40  ;;  %v455_v54 = vadd.f32 %v6336_v35, %v394_v43  ;;  %v397_v60 = vmul.f32 %v6320_v26, %v336_v49  ;;  %v344_v43 = vld [vmem:[%s6310_s15 + $0x88] sm:$0x3]  ;;  %v4198_v49 = vld [vmem:[%s7957_s3 + $0x298] sm:$0xff] }
  0x6c   : > { %vm506_vm9 = vcmp.ge.f32.partialorder %v452_v42, 0.0  ;;  %v560_v57 = vmul.f32 0.01, %v452_v42  ;;  %vm503_vm10 = vcmp.ge.f32.partialorder %v449_v44, 0.0  ;;  %v557_v61 = vmul.f32 0.01, %v449_v44 }
  0x6d   : > { %vm507_vm11 = vcmp.ge.f32.partialorder %v453_v46, 0.0  ;;  %v398_v62 = vmul.f32 %v6320_v26, %v337_v53  ;;  %v561_v0 = vmul.f32 0.01, %v453_v46  ;;  %v562_v2 = vmul.f32 0.01, %v454_v51 }
  0x6e   : > { %v558_v3 = vmul.f32 0.01, %v450_v52  ;;  %v400_v4 = vmul.f32 %v6320_v26, %v339_v56  ;;  %vm508_vm12 = vcmp.ge.f32.partialorder %v454_v51, 0.0  ;;  %vm504_vm13 = vcmp.ge.f32.partialorder %v450_v52, 0.0 }
  0x6f   : > { %887 = vbcast.lane.b32.xlu0 %v877_v21, 272  ;;  %902 = vbcast.lane.b32.xlu1 %v892_v15, 272  ;;  %v563_v5 = vmul.f32 0.01, %v455_v54  ;;  %v456_v6 = vadd.f32 %v6336_v35, %v395_v55  ;;  %vm509_vm14 = vcmp.ge.f32.partialorder %v455_v54, 0.0  ;;  %v457_v12 = vadd.f32 %v6336_v35, %v396_v59  ;;  %v342_v15 = vld [vmem:[%s6310_s15 + $0x78] sm:$0xff] }
  0x70   : > { %v458_v13 = vadd.f32 %v6336_v35, %v397_v60  ;;  %v614_v19 = vsel %vm506_vm9, %v452_v42, %v560_v57  ;;  %v611_v20 = vsel %vm503_vm10, %v449_v44, %v557_v61  ;;  %v459_v23 = vadd.f32 %v6336_v35, %v398_v62 }
  0x71   : > { %v616_v22 = vsel %vm508_vm12, %v454_v51, %v562_v2  ;;  %v6376_v18 = vsel %vm504_vm13, %v450_v52, %v558_v3  ;;  %v461_v21 = vadd.f32 %v6336_v35, %v400_v4  ;;  %v401_v8 = vmul.f32 %v6320_v26, %v340_v16  ;;  %v345_v2 = vld [vmem:[%s6310_s15 + $0x90] sm:$0xff] }
  0x72   : > { %v402_v29 = vmul.f32 %v6320_v26, %v341_v17  ;;  %vm510_vm0 = vcmp.ge.f32.partialorder %v456_v6, 0.0  ;;  %vm511_vm1 = vcmp.ge.f32.partialorder %v457_v12, 0.0  ;;  %v565_v31 = vmul.f32 0.01, %v457_v12  ;;  %v4133_v3 = vld [vmem:[%s7957_s3 + $0x90] sm:$0xff] }
  0x73   : > { %917 = vbcast.lane.b32.xlu0 %v907_v25, 272  ;;  %932 = vbcast.lane.b32.xlu1 %v922_v28, 272  ;;  %v6380_v25 = vsel %vm509_vm14, %v455_v54, %v563_v5  ;;  %v564_v28 = vmul.f32 0.01, %v456_v6  ;;  %v566_v32 = vmul.f32 0.01, %v458_v13  ;;  %v403_v39 = vmul.f32 %v6320_v26, %v342_v15 }
  0x74   : > { %vm512_vm2 = vcmp.ge.f32.partialorder %v458_v13, 0.0  ;;  %v567_v37 = vmul.f32 0.01, %v459_v23  ;;  %vm513_vm3 = vcmp.ge.f32.partialorder %v459_v23, 0.0  ;;  %v569_v42 = vmul.f32 0.01, %v461_v21 }
  0x75   : > { %vm515_vm5 = vcmp.ge.f32.partialorder %v461_v21, 0.0  ;;  %v462_v44 = vadd.f32 %v6336_v35, %v401_v8  ;;  %v463_v45 = vadd.f32 %v6336_v35, %v402_v29  ;;  %v618_v52 = vsel %vm510_vm0, %v456_v6, %v564_v28 }
  0x76   : > { %v619_v53 = vsel %vm511_vm1, %v457_v12, %v565_v31  ;;  %v6407_v56 = vsel %vm513_vm3, %v459_v23, %v567_v37  ;;  %v464_v59 = vadd.f32 %v6336_v35, %v403_v39  ;;  %v405_v60 = vmul.f32 %v6320_v26, %v344_v43  ;;  %v4134_v12 = vld [vmem:[%s7957_s3 + $0x98] sm:$0xff]  ;;  %v4200_v37 = vld [vmem:[%s7957_s3 + $0x2a8] sm:$0xff] }
  0x77   : > { %939 = vbcast.lane.b32.xlu0 %v6209_v47, 256  ;;  %943 = vbcast.lane.b32.xlu1 %v6209_v47, 264  ;;  %vm516_vm7 = vcmp.ge.f32.partialorder %v462_v44, 0.0  ;;  %v570_v4 = vmul.f32 0.01, %v462_v44  ;;  %vm517_vm8 = vcmp.ge.f32.partialorder %v463_v45, 0.0  ;;  %v5451_v28 = vpack.c.bf16 %v4134_v12, %v4133_v3 }
  0x78   : > { %v571_v5 = vmul.f32 0.01, %v463_v45  ;;  %vm518_vm9 = vcmp.ge.f32.partialorder %v464_v59, 0.0  ;;  %v572_v23 = vmul.f32 0.01, %v464_v59  ;;  %v349_v12 = vld [vmem:[%s6310_s15 + $0xb0] sm:$0xff] }
  0x79   : > { %v6449_v8 = vsel %vm516_vm7, %v462_v44, %v570_v4 }
  0x7a   : > { %v6451_v29 = vsel %vm517_vm8, %v463_v45, %v571_v5  ;;  %v347_v45 = vld [vmem:[%s6310_s15 + $0xa0] sm:$0x3] }
  0x7b   : > { %947 = vbcast.lane.b32.xlu0 %v6209_v47, 272  ;;  %954 = vbcast.lane.b32.xlu1 %v6291_v9, 256  ;;  %v338_v47 = vld [vmem:[%s6310_s15 + $0x58] sm:$0x3] }
  0x7c   : > { %v399_v63 = vmul.f32 %v6320_v26, %v338_v47  ;;  %v6404_v47 = vsel %vm512_vm2, %v458_v13, %v566_v32 }
  0x7e   : > { %v460_v24 = vadd.f32 %v6336_v35, %v399_v63  ;;  %v6419_v63 = vsel %vm515_vm5, %v461_v21, %v569_v42 }
  0x7f   : > { %958 = vbcast.lane.b32.xlu0 %v6291_v9, 264  ;;  %962 = vbcast.lane.b32.xlu1 %v6291_v9, 272  ;;  %v615_v9 = vsel %vm507_vm11, %v453_v46, %v561_v0  ;;  %v404_v46 = vmul.f32 %v6320_v26, %v343_v30  ;;  %v6421_v0 = vpack.c.bf16 %v4198_v49, %v4197_v48 }
  0x80   : > { %v568_v38 = vmul.f32 0.01, %v460_v24  ;;  %vm514_vm4 = vcmp.ge.f32.partialorder %v460_v24, 0.0 }
  0x81   : > { %v465_v6 = vadd.f32 %v6336_v35, %v404_v46  ;;  %v4201_v46 = vld [vmem:[%s7957_s3 + $0x2b0] sm:$0xff] }
  0x82   : > { %v6410_v57 = vsel %vm514_vm4, %v460_v24, %v568_v38  ;;  %v6435_v24 = vadd.f32 %v6336_v35, %v405_v60  ;;  %v346_v38 = vld [vmem:[%s6310_s15 + $0x98] sm:$0xff] }
  0x83   : > { %vm519_vm10 = vcmp.ge.f32.partialorder %v465_v6, 0.0  ;;  %v573_v30 = vmul.f32 0.01, %v465_v6  ;;  %v407_v60 = vmul.f32 %v6320_v26, %v346_v38 }
  0x84   : > { %vm520_vm11 = vcmp.ge.f32.partialorder %v6435_v24, 0.0 }
  0x89   : > { %v715_v33 = vpop.permute.xlu0 %714  ;;  %v700_v36 = vpop.permute.xlu1 %699 }
  0x8a   : > { %v6386_v40 = vmul.f32 %v700_v36, %v611_v20  ;;  %v6398_v51 = vmul.f32 %v715_v33, %v614_v19  ;;  %v4199_v36 = vld [vmem:[%s7957_s3 + $0x2a0] sm:$0xff] }
  0x8c   : > { %8088 = vst [vmem:[#allocation10_spill] sm:$0xff] %v6398_v51  ;;  %4727 = vmatprep.mubr.f32.mxu1 %v6386_v40  ;;  %v1551_v16 = vrot.slane %v6398_v51, 1  ;;  %v1933_v39 = vrot.slane %v6386_v40, 2 }
  0x8d   : > { %v719_v54 = vpop.permute.xlu0 %718  ;;  %v723_v55 = vpop.permute.xlu1 %722 }
  0x8e   : > { %v6414_v61 = vmul.f32 %v719_v54, %v615_v9  ;;  %v6416_v62 = vmul.f32 %v723_v55, %v616_v22  ;;  %v406_v9 = vmul.f32 %v6320_v26, %v345_v2  ;;  %v4202_v54 = vld [vmem:[%s7957_s3 + $0x2b8] sm:$0xff]  ;;  %v4135_v55 = vld [vmem:[%s7957_s3 + $0xa0] sm:$0xff] }
  0x90   : > { %8089 = vst [vmem:[#allocation11_spill] sm:$0xff] %v6414_v61  ;;  %v1554_v13 = vrot.slane %v6416_v62, 1  ;;  %v1552_v17 = vrot.slane %v6414_v61, 1  ;;  %v6476_v44 = vadd.f32 %v6336_v35, %v406_v9  ;;  %v4138_v9 = vld [vmem:[%s7957_s3 + $0xb8] sm:$0xff] }
  0x91   : > { %v704_v19 = vpop.permute.xlu0 %703  ;;  %v730_v20 = vpop.permute.xlu1 %729 }
  0x92   : > { %v6439_v22 = vmul.f32 %v704_v19, %v6376_v18  ;;  %v6442_v21 = vsel %vm1545_vm15, %v1551_v16, %v1552_v17  ;;  %v6445_v15 = vsel %vm1545_vm15, %v1552_v17, %v1554_v13  ;;  %v1546_v18 = vrot.slane %v6386_v40, 1  ;;  %v348_v40 = vld [vmem:[%s6310_s15 + $0xa8] sm:$0xff] }
  0x93   : > { %5047 = vmatprep.mubr.f32.mxu0 %v6442_v21  ;;  %v6457_v33 = vmul.f32 %v730_v20, %v6380_v25  ;;  %v6472_v25 = vsel %vm518_vm9, %v464_v59, %v572_v23  ;;  %v5583_v59 = vpack.c.bf16 %v4200_v37, %v4199_v36  ;;  %v6520_v17 = vpack.c.bf16 %v4202_v54, %v4201_v46  ;;  %v4137_v23 = vld [vmem:[%s7957_s3 + $0xb0] sm:$0xff]  ;;  %v350_v37 = vld [vmem:[%s6310_s15 + $0xb8] sm:$0x3] }
  0x94   : > { %v7963_v31 = vrot.slane %v6439_v22, 1  ;;  %v7962_v32 = vrot.slane %v6439_v22, 2  ;;  %4728 = vmatmul.mubr.f32.vlgmr.msra.gmra.mrb[0].mxu1 %v6439_v22  ;;  %5048 = vmatmul.mubr.f32.vlgmr.msra.gmra.mrb[0].mxu0 %v6445_v15  ;;  %v409_v19 = vmul.f32 %v6320_v26, %v348_v40  ;;  %v5459_v46 = vpack.c.bf16 %v4138_v9, %v4137_v23 }
  0x95   : > { %v734_v42 = vpop.permute.xlu0 %733  ;;  %v738_v43 = vpop.permute.xlu1 %737  ;;  %4730 = vmatprep.mubr.f32.mxu1 %v6398_v51  ;;  %5450 = vmatpush3.bf16.msra.mxu1 %v6270_v7  ;;  %v574_v7 = vmul.f32 0.01, %v6435_v24  ;;  %v1556_v4 = vrot.slane %v6457_v33, 1  ;;  %vm521_vm12 = vcmp.ge.f32.partialorder %v6476_v44, 0.0 }
  0x96   : > { %v6483_v48 = vmul.f32 %v734_v42, %v618_v52  ;;  %v6485_v49 = vmul.f32 %v738_v43, %v619_v53  ;;  %5578 = vmatpush3.bf16.msra.mxu0 %v6272_v11  ;;  %5452 = vmatprep.subr.bf16.mxu1 %v5451_v28  ;;  %v4136_v52 = vld [vmem:[%s7957_s3 + $0xa8] sm:$0xff]  ;;  %v6501_v11 = vsel %vm1545_vm15, %v1546_v18, %v7963_v31  ;;  %v575_v43 = vmul.f32 0.01, %v6476_v44 }
  0x97   : > { %v6504_v53 = vsel %vm519_vm10, %v465_v6, %v573_v30  ;;  %5580 = vmatprep.subr.bf16.mxu0 %v6421_v0  ;;  %v6511_v2 = vsel %vm1932_vm6, %v1933_v39, %v7962_v32  ;;  %v408_v6 = vmul.f32 %v6320_v26, %v347_v45  ;;  %v5455_v20 = vpack.c.bf16 %v4136_v52, %v4135_v55  ;;  %v351_v39 = vld [vmem:[%s6310_s15 + $0xc0] sm:$0xff]  ;;  %v4204_v45 = vld [vmem:[%s7957_s3 + $0x2c8] sm:$0xff] }
  0x98   : > { %8090 = vst [vmem:[#allocation12_spill] sm:$0xff] %v6483_v48  ;;  %8091 = vst [vmem:[#allocation13_spill] sm:$0xff] %v6511_v2  ;;  %v1559_v3 = vrot.slane %v6485_v49, 1  ;;  %4731 = vmatmul.mubr.f32.gmra.mrb[2].mxu1 %v6414_v61  ;;  %v1557_v5 = vrot.slane %v6483_v48, 1  ;;  %v6547_v38 = vsel %vm520_vm11, %v6435_v24, %v574_v7  ;;  %v4203_v24 = vld [vmem:[%s7957_s3 + $0x2c0] sm:$0xff]  ;;  %v6569_v55 = vadd.f32 %v6336_v35, %v409_v19  ;;  %v4205_v19 = vld [vmem:[%s7957_s3 + $0x2d0] sm:$0xff] }
  0x99   : > { %v745_v13 = vpop.permute.xlu0 %744  ;;  %v749_v16 = vpop.permute.xlu1 %748  ;;  %4733 = vmatprep.mubr.f32.mxu1 %v6457_v33  ;;  %5454 = vmatpush3.bf16.msra.mxu1 %v5451_v28  ;;  %v6566_v54 = vadd.f32 %v6336_v35, %v408_v6  ;;  %v411_v52 = vmul.f32 %v6320_v26, %v350_v37 }
  0x9a   : > { %v6530_v30 = vmul.f32 %v745_v13, %v6404_v47  ;;  %v6533_v18 = vmul.f32 %v749_v16, %v6407_v56  ;;  %v6536_v28 = vsel %vm1545_vm15, %v1556_v4, %v1557_v5  ;;  %v6539_v36 = vsel %vm1545_vm15, %v1557_v5, %v1559_v3  ;;  %5582 = vmatpush3.bf16.msra.mxu0 %v6421_v0  ;;  %v4140_v3 = vld [vmem:[%s7957_s3 + $0xc8] sm:$0xff] }
  0x9b   : > { %8094 = vst [vmem:[#allocation16_spill] sm:$0xff] %v6539_v36  ;;  %5050 = vmatprep.mubr.f32.mxu0 %v6536_v28  ;;  %5584 = vmatprep.subr.bf16.mxu0 %v5583_v59  ;;  %v468_v47 = vadd.f32 %v6336_v35, %v407_v60  ;;  %v410_v56 = vmul.f32 %v6320_v26, %v349_v12  ;;  %v4139_v60 = vld [vmem:[%s7957_s3 + $0xc0] sm:$0xff]  ;;  %vm523_vm14 = vcmp.ge.f32.partialorder %v6566_v54, 0.0  ;;  %vm524_vm0 = vcmp.ge.f32.partialorder %v6569_v55, 0.0 }
  0x9c   : > { %8092 = vst [vmem:[#allocation14_spill] sm:$0xff] %v6530_v30  ;;  %8093 = vst [vmem:[#allocation15_spill] sm:$0xff] %v6533_v18  ;;  %4734 = vmatmul.mubr.f32.gmra.mrb[4].mxu1 %v6483_v48  ;;  %5051 = vmatmul.mubr.f32.gmra.mrb[2].mxu0 %v6539_v36  ;;  %v1561_v0 = vrot.slane %v6530_v30, 1  ;;  %v1562_v42 = vrot.slane %v6533_v18, 1  ;;  %v5591_v16 = vpack.c.bf16 %v4204_v45, %v4203_v24  ;;  %v578_v45 = vmul.f32 0.01, %v6569_v55 }
  0x9d   : > { %v753_v40 = vpop.permute.xlu0 %752  ;;  %v760_v7 = vpop.permute.xlu1 %759  ;;  %4736 = vmatprep.mubr.f32.mxu1 %v6530_v30  ;;  %5456 = vmatprep.subr.bf16.mxu1 %v5455_v20  ;;  %v576_v12 = vmul.f32 0.01, %v468_v47  ;;  %v6590_v13 = vadd.f32 %v6336_v35, %v410_v56  ;;  %vm522_vm13 = vcmp.ge.f32.partialorder %v468_v47, 0.0  ;;  %v6606_v23 = vpack.c.bf16 %v4140_v3, %v4139_v60  ;;  %v4208_v3 = vld [vmem:[%s7957_s3 + $0x2e8] sm:$0xff] }
  0x9e   : > { %v6579_v4 = vmul.f32 %v753_v40, %v6410_v57  ;;  %v6582_v5 = vmul.f32 %v760_v7, %v6419_v63  ;;  %v6585_v6 = vsel %vm1545_vm15, %v1561_v0, %v1562_v42  ;;  %5586 = vmatpush3.bf16.msra.mxu0 %v5583_v59  ;;  %5458 = vmatpush3.bf16.msra.mxu1 %v5455_v20  ;;  %v4206_v20 = vld [vmem:[%s7957_s3 + $0x2d8] sm:$0xff]  ;;  %v353_v40 = vld [vmem:[%s6310_s15 + $0xd0] sm:$0x3] }
  0x9f   : > { %8095 = vst [vmem:[#allocation17_spill] sm:$0xff] %v6585_v6  ;;  %5053 = vmatprep.mubr.f32.mxu0 %v6585_v6  ;;  %5588 = vmatprep.subr.bf16.mxu0 %v6520_v17  ;;  %v412_v57 = vmul.f32 %v6320_v26, %v351_v39  ;;  %v6598_v59 = vsel %vm521_vm12, %v6476_v44, %v575_v43  ;;  %v577_v44 = vmul.f32 0.01, %v6566_v54  ;;  %v352_v39 = vld [vmem:[%s6310_s15 + $0xc8] sm:$0xff]  ;;  %vm525_vm1 = vcmp.ge.f32.partialorder %v6590_v13, 0.0 }
  0xa0   : > { %v1564_v63 = vrot.slane %v6579_v4, 1  ;;  %4737 = vmatmul.mubr.f32.gmra.mrb[6].mxu1 %v6533_v18  ;;  %5460 = vmatprep.subr.bf16.mxu1 %v5459_v46  ;;  %v472_v56 = vadd.f32 %v6336_v35, %v411_v52  ;;  %v6628_v7 = vsel %vm522_vm13, %v468_v47, %v576_v12  ;;  %v5595_v52 = vpack.c.bf16 %v4206_v20, %v4205_v19  ;;  %v4207_v47 = vld [vmem:[%s7957_s3 + $0x2e0] sm:$0xff]  ;;  %v4141_v20 = vld [vmem:[%s7957_s3 + $0xd0] sm:$0xff] }
  0xa1   : > { %v764_v9 = vpop.permute.xlu0 %763  ;;  %v768_v37 = vpop.permute.xlu1 %767  ;;  %4739 = vmatprep.mubr.f32.mxu1 %v6582_v5  ;;  %v413_v60 = vmul.f32 %v6320_v26, %v352_v39  ;;  %v414_v19 = vmul.f32 %v6320_v26, %v353_v40  ;;  %v631_v31 = vsel %vm523_vm14, %v6566_v54, %v577_v44  ;;  %v355_v44 = vld [vmem:[%s6310_s15 + $0xe0] sm:$0xff] }
  0xa2   : > { %v6615_v0 = vmul.f32 %v764_v9, %v6449_v8  ;;  %v6618_v43 = vmul.f32 %v768_v37, %v6451_v29  ;;  %v6621_v24 = vsel %vm1545_vm15, %v1562_v42, %v1564_v63  ;;  %5590 = vmatpush3.bf16.msra.mxu0 %v6520_v17  ;;  %5462 = vmatpush3.bf16.msra.mxu1 %v5459_v46  ;;  %v579_v8 = vmul.f32 0.01, %v6590_v13  ;;  %v4142_v9 = vld [vmem:[%s7957_s3 + $0xd8] sm:$0xff] }
  0xa3   : > { %8096 = vst [vmem:[#allocation18_spill] sm:$0xff] %v6621_v24  ;;  %5054 = vmatmul.mubr.f32.gmra.mrb[4].mxu0 %v6621_v24  ;;  %5592 = vmatprep.subr.bf16.mxu0 %v5591_v16  ;;  %v6632_v29 = vadd.f32 %v6336_v35, %v412_v57  ;;  %v1566_v17 = vrot.slane %v6582_v5, 1  ;;  %vm526_vm2 = vcmp.ge.f32.partialorder %v472_v56, 0.0  ;;  %v580_v63 = vmul.f32 0.01, %v472_v56 }
  0xa4   : > { %v1569_v42 = vrot.slane %v6618_v43, 1  ;;  %4740 = vmatmul.mubr.f32.gmra.mrb[8].mxu1 %v6615_v0  ;;  %v1567_v46 = vrot.slane %v6615_v0, 1  ;;  %5464 = vmatprep.subr.bf16.mxu1 %v6606_v23  ;;  %v6682_v54 = vadd.f32 %v6336_v35, %v413_v60  ;;  %v633_v60 = vsel %vm525_vm1, %v6590_v13, %v579_v8  ;;  %v357_v8 = vld [vmem:[%s6310_s15 + $0xf0] sm:$0xff] }
  0xa5   : > { %v775_v12 = vpop.permute.xlu0 %774  ;;  %v779_v57 = vpop.permute.xlu1 %778  ;;  %vm527_vm3 = vcmp.ge.f32.partialorder %v6632_v29, 0.0  ;;  %v475_v1 = vadd.f32 %v6336_v35, %v414_v19  ;;  %v416_v50 = vmul.f32 %v6320_v26, %v355_v44 }
  0xa6   : > { %v6655_v37 = vmul.f32 %v775_v12, %v6472_v25  ;;  %v6658_v39 = vmul.f32 %v779_v57, %v6504_v53  ;;  %v6661_v32 = vsel %vm1545_vm15, %v1566_v17, %v1567_v46  ;;  %v6664_v40 = vsel %vm1545_vm15, %v1567_v46, %v1569_v42  ;;  %5594 = vmatpush3.bf16.msra.mxu0 %v5591_v16  ;;  %v354_v12 = vld [vmem:[%s6310_s15 + $0xd8] sm:$0xff] }
  0xa7   : > { %8098 = vst [vmem:[#allocation20_spill] sm:$0xff] %v6661_v32  ;;  %8099 = vst [vmem:[#allocation21_spill] sm:$0xff] %v6664_v40  ;;  %5056 = vmatprep.mubr.f32.mxu0 %v6661_v32  ;;  %v6673_v25 = vsel %vm524_vm0, %v6569_v55, %v578_v45  ;;  %v581_v53 = vmul.f32 0.01, %v6632_v29  ;;  %5596 = vmatprep.subr.bf16.mxu0 %v5595_v52  ;;  %v5599_v17 = vpack.c.bf16 %v4208_v3, %v4207_v47  ;;  %v4209_v55 = vld [vmem:[%s7957_s3 + $0x2f0] sm:$0xff]  ;;  %v4210_v45 = vld [vmem:[%s7957_s3 + $0x2f8] sm:$0xff] }
  0xa8   : > { %8097 = vst [vmem:[#allocation19_spill] sm:$0xff] %v6658_v39  ;;  %4742 = vmatprep.mubr.f32.mxu1 %v6655_v37  ;;  %5057 = vmatmul.mubr.f32.gmra.mrb[6].mxu0 %v6664_v40  ;;  %v1571_v16 = vrot.slane %v6655_v37, 1  ;;  %v1572_v42 = vrot.slane %v6658_v39, 1  ;;  %v5467_v46 = vpack.c.bf16 %v4142_v9, %v4141_v20  ;;  %v6696_v57 = vsel %vm526_vm2, %v472_v56, %v580_v63  ;;  %v4144_v20 = vld [vmem:[%s7957_s3 + $0xe8] sm:$0xff]  ;;  %v358_v63 = vld [vmem:[%s6310_s15 + $0xf8] sm:$0xff] }
  0xa9   : > { %v783_v47 = vpop.permute.xlu0 %782  ;;  %v790_v3 = vpop.permute.xlu1 %789  ;;  %4743 = vmatmul.mubr.f32.gmra.mrb[10].mxu1 %v6658_v39  ;;  %v415_v19 = vmul.f32 %v6320_v26, %v354_v12  ;;  %vm528_vm4 = vcmp.ge.f32.partialorder %v6682_v54, 0.0  ;;  %v4212_v12 = vld [vmem:[%s7957_s3 + $0x308] sm:$0xff]  ;;  %vm529_vm5 = vcmp.ge.f32.partialorder %v475_v1, 0.0 }
  0xaa   : > { %v6707_v9 = vmul.f32 %v783_v47, %v6547_v38  ;;  %v6710_v13 = vmul.f32 %v790_v3, %v6598_v59  ;;  %v6713_v56 = vsel %vm1545_vm15, %v1571_v16, %v1572_v42  ;;  %5598 = vmatpush3.bf16.msra.mxu0 %v5595_v52  ;;  %5466 = vmatpush3.bf16.msra.mxu1 %v6606_v23  ;;  %v4211_v23 = vld [vmem:[%s7957_s3 + $0x300] sm:$0xff]  ;;  %v583_v47 = vmul.f32 0.01, %v475_v1  ;;  %v360_v3 = vld [vmem:[%s6310_s15 + $0x108] sm:$0xff] }
  0xab   : > { %8100 = vst [vmem:[#allocation22_spill] sm:$0xff] %v6713_v56  ;;  %5059 = vmatprep.mubr.f32.mxu0 %v6713_v56  ;;  %5600 = vmatprep.subr.bf16.mxu0 %v5599_v17  ;;  %v5603_v38 = vpack.c.bf16 %v4210_v45, %v4209_v55  ;;  %v6726_v52 = vsel %vm527_vm3, %v6632_v29, %v581_v53  ;;  %v582_v45 = vmul.f32 0.01, %v6682_v54 }
  0xac   : > { %v1574_v59 = vrot.slane %v6707_v9, 1  ;;  %4745 = vmatprep.mubr.f32.mxu1 %v6710_v13  ;;  %5468 = vmatprep.subr.bf16.mxu1 %v5467_v46  ;;  %v6735_v16 = vpack.c.bf16 %v4144_v20, %v4143_v58  ;;  %v418_v29 = vmul.f32 %v6320_v26, %v357_v8  ;;  %v419_v53 = vmul.f32 %v6320_v26, %v358_v63  ;;  %v4146_v63 = vld [vmem:[%s7957_s3 + $0xf8] sm:$0xff] }
  0xad   : > { %v794_v44 = vpop.permute.xlu0 %793  ;;  %v798_v55 = vpop.permute.xlu1 %797  ;;  %v476_v58 = vadd.f32 %v6336_v35, %v415_v19  ;;  %v477_v20 = vadd.f32 %v6336_v35, %v416_v50  ;;  %v6752_v8 = vpack.c.bf16 %v4212_v12, %v4211_v23  ;;  %v4145_v50 = vld [vmem:[%s7957_s3 + $0xf0] sm:$0xff]  ;;  %v636_v23 = vsel %vm528_vm4, %v6682_v54, %v582_v45  ;;  %v363_v54 = vld [vmem:[%s6310_s15 + $0x120] sm:$0xff] }
  0xae   : > { %v6742_v41 = vmul.f32 %v794_v44, %v6628_v7  ;;  %v6744_v34 = vmul.f32 %v798_v55, %v631_v31  ;;  %v6747_v27 = vsel %vm1545_vm15, %v1572_v42, %v1574_v59  ;;  %5602 = vmatpush3.bf16.msra.mxu0 %v5599_v17  ;;  %5470 = vmatpush3.bf16.msra.mxu1 %v5467_v46  ;;  %v1576_v31 = vrot.slane %v6710_v13, 1  ;;  %v361_v46 = vld [vmem:[%s6310_s15 + $0x110] sm:$0xff] }
  0xaf   : > { %8101 = vst [vmem:[#allocation23_spill] sm:$0xff] %v6747_v27  ;;  %5060 = vmatmul.mubr.f32.gmra.mrb[8].mxu0 %v6747_v27  ;;  %5604 = vmatprep.subr.bf16.mxu0 %v5603_v38  ;;  %v421_v17 = vmul.f32 %v6320_v26, %v360_v3  ;;  %v637_v12 = vsel %vm529_vm5, %v475_v1, %v583_v47  ;;  %v584_v1 = vmul.f32 0.01, %v476_v58  ;;  %v585_v45 = vmul.f32 0.01, %v477_v20 }
  0xb0   : > { %v1579_v7 = vrot.slane %v6744_v34, 1  ;;  %4746 = vmatmul.mubr.f32.gmra.mrb[12].mxu1 %v6742_v41  ;;  %v1577_v42 = vrot.slane %v6742_v41, 1  ;;  %5472 = vmatprep.subr.bf16.mxu1 %v6735_v16  ;;  %v479_v44 = vadd.f32 %v6336_v35, %v418_v29  ;;  %v480_v55 = vadd.f32 %v6336_v35, %v419_v53  ;;  %v364_v53 = vld [vmem:[%s6310_s15 + $0x128] sm:$0xff] }
  0xb1   : > { %v805_v19 = vpop.permute.xlu0 %804  ;;  %v809_v59 = vpop.permute.xlu1 %808  ;;  %v5475_v47 = vpack.c.bf16 %v4146_v63, %v4145_v50  ;;  %vm530_vm7 = vcmp.ge.f32.partialorder %v476_v58, 0.0  ;;  %vm531_vm8 = vcmp.ge.f32.partialorder %v477_v20, 0.0  ;;  %v424_v63 = vmul.f32 %v6320_v26, %v363_v54 }
  0xb2   : > { %v6774_v3 = vmul.f32 %v805_v19, %v6673_v25  ;;  %v6776_v14 = vmul.f32 %v809_v59, %v633_v60  ;;  %v6779_v10 = vsel %vm1545_vm15, %v1576_v31, %v1577_v42  ;;  %v6782_v2 = vsel %vm1545_vm15, %v1577_v42, %v1579_v7  ;;  %5606 = vmatpush3.bf16.msra.mxu0 %v5603_v38  ;;  %v4147_v7 = vld [vmem:[%s7957_s3 + $0x100] sm:$0xff]  ;;  %v4148_v31 = vld [vmem:[%s7957_s3 + $0x108] sm:$0xff] }
  0xb3   : > { %8103 = vst [vmem:[#allocation25_spill] sm:$0xff] %v6779_v10  ;;  %8104 = vst [vmem:[#allocation26_spill] sm:$0xff] %v6782_v2  ;;  %5062 = vmatprep.mubr.f32.mxu0 %v6779_v10  ;;  %5608 = vmatprep.subr.bf16.mxu0 %v6752_v8  ;;  %v422_v25 = vmul.f32 %v6320_v26, %v361_v46  ;;  %v482_v38 = vadd.f32 %v6336_v35, %v421_v17  ;;  %vm533_vm9 = vcmp.ge.f32.partialorder %v479_v44, 0.0  ;;  %v366_v10 = vld [vmem:[%s6310_s15 + $0x138] sm:$0xff] }
  0xb4   : > { %8102 = vst [vmem:[#allocation24_spill] sm:$0xff] %v6776_v14  ;;  %4748 = vmatprep.mubr.f32.mxu1 %v6774_v3  ;;  %5063 = vmatmul.mubr.f32.gmra.mrb[10].mxu0 %v6782_v2  ;;  %v1581_v60 = vrot.slane %v6774_v3, 1  ;;  %v1582_v29 = vrot.slane %v6776_v14, 1  ;;  %v587_v50 = vmul.f32 0.01, %v479_v44  ;;  %vm534_vm10 = vcmp.ge.f32.partialorder %v480_v55, 0.0 }
  0xb5   : > { %v813_v42 = vpop.permute.xlu0 %812  ;;  %v820_v46 = vpop.permute.xlu1 %819  ;;  %4749 = vmatmul.mubr.f32.gmra.mrb[14].mxu1 %v6776_v14  ;;  %v588_v2 = vmul.f32 0.01, %v480_v55  ;;  %v483_v27 = vadd.f32 %v6336_v35, %v422_v25  ;;  %v425_v54 = vmul.f32 %v6320_v26, %v364_v53  ;;  %vm536_vm11 = vcmp.ge.f32.partialorder %v482_v38, 0.0 }
  0xb6   : > { %v6803_v17 = vmul.f32 %v813_v42, %v6696_v57  ;;  %v6806_v19 = vmul.f32 %v820_v46, %v6726_v52  ;;  %v6809_v59 = vsel %vm1545_vm15, %v1581_v60, %v1582_v29  ;;  %5474 = vmatpush3.bf16.msra.mxu1 %v6735_v16  ;;  %v6816_v57 = vpack.c.bf16 %v4148_v31, %v4147_v7  ;;  %v367_v16 = vld [vmem:[%s6310_s15 + $0x140] sm:$0xff] }
  0xb7   : > { %8105 = vst [vmem:[#allocation27_spill] sm:$0xff] %v6809_v59  ;;  %5065 = vmatprep.mubr.f32.mxu0 %v6809_v59  ;;  %5476 = vmatprep.subr.bf16.mxu1 %v5475_v47  ;;  %v638_v60 = vsel %vm530_vm7, %v476_v58, %v584_v1  ;;  %v639_v42 = vsel %vm531_vm8, %v477_v20, %v585_v45  ;;  %v590_v25 = vmul.f32 0.01, %v482_v38  ;;  %vm537_vm12 = vcmp.ge.f32.partialorder %v483_v27, 0.0 }
  0xb8   : > { %v1584_v52 = vrot.slane %v6803_v17, 1  ;;  %4751 = vmatprep.mubr.f32.mxu1 %v6806_v19  ;;  %v641_v56 = vsel %vm533_vm9, %v479_v44, %v587_v50  ;;  %v485_v53 = vadd.f32 %v6336_v35, %v424_v63  ;;  %v427_v7 = vmul.f32 %v6320_v26, %v366_v10 }
  0xb9   : > { %v824_v46 = vpop.permute.xlu0 %823  ;;  %v828_v59 = vpop.permute.xlu1 %827  ;;  %v642_v58 = vsel %vm534_vm10, %v480_v55, %v588_v2  ;;  %v591_v20 = vmul.f32 0.01, %v483_v27  ;;  %v486_v44 = vadd.f32 %v6336_v35, %v425_v54  ;;  %v428_v1 = vmul.f32 %v6320_v26, %v367_v16 }
  0xba   : > { %v6826_v31 = vmul.f32 %v824_v46, %v636_v23  ;;  %v6828_v40 = vmul.f32 %v828_v59, %v637_v12  ;;  %v6831_v32 = vsel %vm1545_vm15, %v1582_v29, %v1584_v52  ;;  %5478 = vmatpush3.bf16.msra.mxu1 %v5475_v47  ;;  %v1586_v23 = vrot.slane %v6806_v19, 1  ;;  %v369_v59 = vld [vmem:[%s6310_s15 + $0x150] sm:$0xff] }
  0xbb   : > { %8107 = vst [vmem:[#allocation29_spill] sm:$0xff] %v6831_v32  ;;  %5066 = vmatmul.mubr.f32.gmra.mrb[12].mxu0 %v6831_v32  ;;  %5480 = vmatprep.subr.bf16.mxu1 %v6816_v57  ;;  %v1939_v12 = vrot.slane %v6414_v61, 2  ;;  %v1938_v47 = vrot.slane %v6398_v51, 2  ;;  %v644_v29 = vsel %vm536_vm11, %v482_v38, %v590_v25  ;;  %v593_v50 = vmul.f32 0.01, %v485_v53  ;;  %v4213_v61 = vld [vmem:[%s7957_s3 + $0x310] sm:$0xff] }
  0xbc   : > { %8106 = vst [vmem:[#allocation28_spill] sm:$0xff] %v6826_v31  ;;  %v1589_v10 = vrot.slane %v6828_v40, 1  ;;  %4752 = vmatmul.mubr.f32.gmra.mrb[16].mxu1 %v6826_v31  ;;  %v1587_v2 = vrot.slane %v6826_v31, 1  ;;  %v488_v63 = vadd.f32 %v6336_v35, %v427_v7  ;;  %v4214_v38 = vld [vmem:[%s7957_s3 + $0x318] sm:$0xff]  ;;  %vm539_vm13 = vcmp.ge.f32.partialorder %v485_v53, 0.0 }
  0xbd   : > { %v835_v55 = vpop.permute.xlu0 %834  ;;  %v839_v45 = vpop.permute.xlu1 %838  ;;  %v370_v25 = vld [vmem:[%s6310_s15 + $0x158] sm:$0xff]  ;;  %v489_v7 = vadd.f32 %v6336_v35, %v428_v1  ;;  %vm540_vm14 = vcmp.ge.f32.partialorder %v486_v44, 0.0  ;;  %v647_v51 = vsel %vm539_vm13, %v485_v53, %v593_v50  ;;  %v1949_v53 = vrot.slane %v6533_v18, 2 }
  0xbe   : > { %v6847_v54 = vmul.f32 %v835_v55, %v638_v60  ;;  %v6849_v52 = vmul.f32 %v839_v45, %v639_v42  ;;  %v6852_v16 = vsel %vm1545_vm15, %v1586_v23, %v1587_v2  ;;  %v6855_v46 = vsel %vm1545_vm15, %v1587_v2, %v1589_v10 }
  0xbf   : > { %8108 = vst [vmem:[#allocation30_spill] sm:$0xff] %v6852_v16  ;;  %8109 = vst [vmem:[#allocation31_spill] sm:$0xff] %v6855_v46  ;;  %v1941_v60 = vrot.slane %v6416_v62, 2  ;;  %5068 = vmatprep.mubr.f32.mxu0 %v6852_v16  ;;  %v645_v42 = vsel %vm537_vm12, %v483_v27, %v591_v20  ;;  %v6871_v10 = vsel %vm1932_vm6, %v1938_v47, %v1939_v12  ;;  %v594_v23 = vmul.f32 0.01, %v486_v44 }
  0xc0   : > { %4754 = vmatprep.mubr.f32.mxu1 %v6847_v54  ;;  %5069 = vmatmul.mubr.f32.gmra.mrb[14].mxu0 %v6855_v46  ;;  %8110 = vst [vmem:[#allocation32_spill] sm:$0xff] %v6871_v10  ;;  %v430_v2 = vmul.f32 %v6320_v26, %v369_v59  ;;  %v1944_v27 = vrot.slane %v6483_v48, 2  ;;  %v5611_v20 = vpack.c.bf16 %v4214_v38, %v4213_v61  ;;  %vm542_vm0 = vcmp.ge.f32.partialorder %v488_v63, 0.0  ;;  %v372_v46 = vld [vmem:[%s6310_s15 + $0x168] sm:$0xff]  ;;  %v373_v38 = vld [vmem:[%s6310_s15 + $0x170] sm:$0xff] }
  0xc1   : > { %v850_v62 = vpop.permute.xlu0 %849  ;;  %v854_v55 = vpop.permute.xlu1 %853  ;;  %4755 = vmatmul.mubr.f32.gmra.mrb[18].mxu1 %v6849_v52  ;;  %5127 = vmatprep.mubr.f32.mxu0 %v6871_v10  ;;  %v431_v1 = vmul.f32 %v6320_v26, %v370_v25  ;;  %v596_v59 = vmul.f32 0.01, %v488_v63  ;;  %v1946_v16 = vrot.slane %v6485_v49, 2  ;;  %v6886_v32 = vsel %vm1932_vm6, %v1939_v12, %v1941_v60  ;;  %v4215_v49 = vld [vmem:[%s7957_s3 + $0x320] sm:$0xff]  ;;  %v4216_v12 = vld [vmem:[%s7957_s3 + $0x328] sm:$0xff] }
  0xc2   : > { %v6878_v45 = vmul.f32 %v850_v62, %v641_v56  ;;  %v6880_v47 = vmul.f32 %v854_v55, %v642_v58  ;;  %8111 = vst [vmem:[#allocation33_spill] sm:$0xff] %v6886_v32  ;;  %v1943_v10 = vrot.slane %v6457_v33, 2  ;;  %v597_v61 = vmul.f32 0.01, %v489_v7 }
  0xc3   : > { %v648_v56 = vsel %vm540_vm14, %v486_v44, %v594_v23  ;;  %v1948_v58 = vrot.slane %v6530_v30, 2  ;;  %v6895_v50 = vadd.f32 %v6336_v35, %v430_v2  ;;  %vm543_vm1 = vcmp.ge.f32.partialorder %v489_v7, 0.0 }
  0xc4   : > { %4757 = vmatprep.mubr.f32.mxu1 %v6878_v45  ;;  %5128 = vmatmul.mubr.f32.vlgmr.msra.gmra.mrb[0].mxu0 %v6886_v32  ;;  %v6907_v60 = vsel %vm1932_vm6, %v1943_v10, %v1944_v27  ;;  %v492_v23 = vadd.f32 %v6336_v35, %v431_v1  ;;  %v433_v2 = vmul.f32 %v6320_v26, %v372_v46  ;;  %v329_v32 = vld [vmem:[%s6310_s15 + $0x10] sm:$0x3]  ;;  %v1951_v18 = vrot.slane %v6579_v4, 2 }
  0xc5   : > { %5610 = vmatpush3.bf16.msra.mxu0 %v6752_v8  ;;  %v865_v44 = vpop.permute.xlu0 %864  ;;  %v869_v25 = vpop.permute.xlu1 %868  ;;  %4758 = vmatmul.mubr.f32.gmra.mrb[20].mxu1 %v6880_v47  ;;  %8112 = vst [vmem:[#allocation34_spill] sm:$0xff] %v6907_v60  ;;  %v650_v8 = vsel %vm542_vm0, %v488_v63, %v596_v59  ;;  %v6920_v10 = vsel %vm1932_vm6, %v1944_v27, %v1946_v16  ;;  %v1954_v63 = vrot.slane %v6615_v0, 2  ;;  %vm545_vm2 = vcmp.ge.f32.partialorder %v6895_v50, 0.0  ;;  %v4217_v4 = vld [vmem:[%s7957_s3 + $0x330] sm:$0xff]  ;;  %v4218_v16 = vld [vmem:[%s7957_s3 + $0x338] sm:$0xff] }
  0xc6   : > { %v6911_v62 = vmul.f32 %v865_v44, %v644_v29  ;;  %v6913_v55 = vmul.f32 %v869_v25, %v645_v42  ;;  %5130 = vmatprep.mubr.f32.mxu0 %v6907_v60  ;;  %5612 = vmatprep.subr.bf16.mxu0 %v5611_v20  ;;  %8114 = vst [vmem:[#allocation36_spill] sm:$0xff] %v6920_v10  ;;  %v600_v59 = vmul.f32 0.01, %v492_v23  ;;  %v1953_v44 = vrot.slane %v6582_v5, 2 }
  0xc7   : > { %v5615_v30 = vpack.c.bf16 %v4216_v12, %v4215_v49  ;;  %v434_v1 = vmul.f32 %v6320_v26, %v373_v38  ;;  %v6926_v29 = vsel %vm1932_vm6, %v1948_v58, %v1949_v53  ;;  %v651_v46 = vsel %vm543_vm1, %v489_v7, %v597_v61  ;;  %v356_v49 = vld [vmem:[%s6310_s15 + $0xe8] sm:$0x3] }
  0xc8   : > { %8113 = vst [vmem:[#allocation35_spill] sm:$0xff] %v6911_v62  ;;  %4760 = vmatprep.mubr.f32.mxu1 %v6911_v62  ;;  %5131 = vmatmul.mubr.f32.gmra.mrb[2].mxu0 %v6920_v10  ;;  %8115 = vst [vmem:[#allocation37_spill] sm:$0xff] %v6926_v29  ;;  %v599_v7 = vmul.f32 0.01, %v6895_v50  ;;  %v494_v61 = vadd.f32 %v6336_v35, %v433_v2  ;;  %v390_v58 = vmul.f32 %v6320_v26, %v329_v32  ;;  %v359_v26 = vld [vmem:[%s6310_s15 + $0x100] sm:$0x3] }
  0xc9   : > { %v880_v42 = vpop.permute.xlu0 %879  ;;  %v884_v27 = vpop.permute.xlu1 %883  ;;  %4761 = vmatmul.mubr.f32.gmra.mrb[22].mxu1 %v6913_v55  ;;  %5133 = vmatprep.mubr.f32.mxu0 %v6926_v29  ;;  %vm546_vm3 = vcmp.ge.f32.partialorder %v492_v23, 0.0  ;;  %v1956_v25 = vrot.slane %v6618_v43, 2  ;;  %v6950_v29 = vsel %vm1932_vm6, %v1949_v53, %v1951_v18  ;;  %v495_v2 = vadd.f32 %v6336_v35, %v434_v1  ;;  %v4219_v35 = vld [vmem:[%s7957_s3 + $0x340] sm:$0xff] }
  0xca   : > { %v6943_v12 = vmul.f32 %v880_v42, %v647_v51  ;;  %v6945_v38 = vmul.f32 %v884_v27, %v648_v56  ;;  %5614 = vmatpush3.bf16.msra.mxu0 %v5611_v20  ;;  %8117 = vst [vmem:[#allocation39_spill] sm:$0xff] %v6950_v29  ;;  %v5619_v10 = vpack.c.bf16 %v4218_v16, %v4217_v4  ;;  %v1958_v32 = vrot.slane %v6655_v37, 2  ;;  %v6962_v20 = vld [vmem:[%s6316_s18] ss:$0 sm:$0xff]  ;;  %v4220_v56 = vld [vmem:[%s7957_s3 + $0x348] sm:$0xff] }
  0xcb   : > { %5616 = vmatprep.subr.bf16.mxu0 %v5615_v30  ;;  %v6957_v51 = vsel %vm1932_vm6, %v1953_v44, %v1954_v63  ;;  %v1959_v43 = vrot.slane %v6658_v39, 2  ;;  %v417_v18 = vmul.f32 %v6962_v20, %v356_v49  ;;  %v653_v4 = vsel %vm545_vm2, %v6895_v50, %v599_v7  ;;  %v6978_v27 = vld [vmem:[%s6326_s21] ss:$0 sm:$0xff] }
  0xcc   : > { %8116 = vst [vmem:[#allocation38_spill] sm:$0xff] %v6945_v38  ;;  %4763 = vmatprep.mubr.f32.mxu1 %v6943_v12  ;;  %5134 = vmatmul.mubr.f32.gmra.mrb[4].mxu0 %v6950_v29  ;;  %8118 = vst [vmem:[#allocation40_spill] sm:$0xff] %v6957_v51  ;;  %v654_v16 = vsel %vm546_vm3, %v492_v23, %v600_v59  ;;  %v602_v42 = vmul.f32 0.01, %v494_v61  ;;  %v451_v49 = vadd.f32 %v6978_v27, %v390_v58 }
  0xcd   : > { %v895_v53 = vpop.permute.xlu0 %894  ;;  %v899_v1 = vpop.permute.xlu1 %898  ;;  %4764 = vmatmul.mubr.f32.gmra.mrb[24].mxu1 %v6945_v38  ;;  %5136 = vmatprep.mubr.f32.mxu0 %v6957_v51  ;;  %vm548_vm4 = vcmp.ge.f32.partialorder %v494_v61, 0.0  ;;  %v420_v60 = vmul.f32 %v6962_v20, %v359_v26  ;;  %v362_v51 = vld [vmem:[%s6310_s15 + $0x118] sm:$0x3]  ;;  %v1961_v39 = vrot.slane %v6707_v9, 2  ;;  %v6989_v50 = vsel %vm1932_vm6, %v1954_v63, %v1956_v25  ;;  %v4221_v9 = vld [vmem:[%s7957_s3 + $0x350] sm:$0xff] }
  0xce   : > { %v6981_v44 = vmul.f32 %v895_v53, %v650_v8  ;;  %v6983_v29 = vmul.f32 %v899_v1, %v651_v46  ;;  %5618 = vmatpush3.bf16.msra.mxu0 %v5615_v30  ;;  %8120 = vst [vmem:[#allocation42_spill] sm:$0xff] %v6989_v50  ;;  %v603_v23 = vmul.f32 0.01, %v495_v2  ;;  %v5623_v7 = vpack.c.bf16 %v4220_v56, %v4219_v35  ;;  %v4222_v63 = vld [vmem:[%s7957_s3 + $0x358] sm:$0xff]  ;;  %v365_v1 = vld [vmem:[%s6310_s15 + $0x130] sm:$0x3] }
  0xcf   : > { %5620 = vmatprep.subr.bf16.mxu0 %v5619_v10  ;;  %v6994_v8 = vsel %vm1932_vm6, %v1958_v32, %v1959_v43  ;;  %vm549_vm5 = vcmp.ge.f32.partialorder %v495_v2, 0.0  ;;  %v1964_v30 = vrot.slane %v6742_v41, 2  ;;  %v478_v46 = vadd.f32 %v6978_v27, %v417_v18 }
  0xd0   : > { %8119 = vst [vmem:[#allocation41_spill] sm:$0xff] %v6983_v29  ;;  %4766 = vmatprep.mubr.f32.mxu1 %v6981_v44  ;;  %5137 = vmatmul.mubr.f32.gmra.mrb[6].mxu0 %v6989_v50  ;;  %8121 = vst [vmem:[#allocation43_spill] sm:$0xff] %v6994_v8  ;;  %v656_v25 = vsel %vm548_vm4, %v494_v61, %v602_v42  ;;  %vm505_vm7 = vcmp.ge.f32.partialorder %v451_v49, 0.0  ;;  %v559_v26 = vmul.f32 0.01, %v451_v49  ;;  %v1963_v56 = vrot.slane %v6710_v13, 2 }
  0xd1   : > { %v910_v59 = vpop.permute.xlu0 %909  ;;  %v914_v58 = vpop.permute.xlu1 %913  ;;  %4767 = vmatmul.mubr.f32.gmra.mrb[26].mxu1 %v6983_v29  ;;  %5139 = vmatprep.mubr.f32.mxu0 %v6994_v8  ;;  %v423_v32 = vmul.f32 %v6962_v20, %v362_v51  ;;  %v481_v53 = vadd.f32 %v6978_v27, %v420_v60  ;;  %v1966_v50 = vrot.slane %v6744_v34, 2  ;;  %v7017_v8 = vsel %vm1932_vm6, %v1959_v43, %v1961_v39  ;;  %v4223_v39 = vld [vmem:[%s7957_s3 + $0x360] sm:$0xff] }
  0xd2   : > { %v7008_v18 = vmul.f32 %v910_v59, %v653_v4  ;;  %v7010_v35 = vmul.f32 %v914_v58, %v654_v16  ;;  %5622 = vmatpush3.bf16.msra.mxu0 %v5619_v10  ;;  %8124 = vst [vmem:[#allocation46_spill] sm:$0xff] %v7017_v8  ;;  %v657_v61 = vsel %vm549_vm5, %v495_v2, %v603_v23  ;;  %v586_v10 = vmul.f32 0.01, %v478_v46  ;;  %v4224_v2 = vld [vmem:[%s7957_s3 + $0x368] sm:$0xff] }
  0xd3   : > { %5624 = vmatprep.subr.bf16.mxu0 %v5623_v7  ;;  %v5627_v42 = vpack.c.bf16 %v4222_v63, %v4221_v9  ;;  %v7023_v51 = vsel %vm1932_vm6, %v1963_v56, %v1964_v30  ;;  %v1968_v60 = vrot.slane %v6774_v3, 2  ;;  %v1969_v34 = vrot.slane %v6776_v14, 2  ;;  %v368_v56 = vld [vmem:[%s6310_s15 + $0x148] sm:$0x3] }
  0xd4   : > { %8122 = vst [vmem:[#allocation44_spill] sm:$0xff] %v7008_v18  ;;  %8123 = vst [vmem:[#allocation45_spill] sm:$0xff] %v7010_v35  ;;  %4769 = vmatprep.mubr.f32.mxu1 %v7008_v18  ;;  %5140 = vmatmul.mubr.f32.gmra.mrb[8].mxu0 %v7017_v8  ;;  %v613_v16 = vsel %vm505_vm7, %v451_v49, %v559_v26  ;;  %vm532_vm8 = vcmp.ge.f32.partialorder %v478_v46, 0.0  ;;  %v484_v23 = vadd.f32 %v6978_v27, %v423_v32  ;;  %v4226_v32 = vld [vmem:[%s7957_s3 + $0x378] sm:$0xff] }
  0xd5   : > { %8125 = vst [vmem:[#allocation47_spill] sm:$0xff] %v7023_v51  ;;  %v925_v43 = vpop.permute.xlu0 %924  ;;  %v929_v4 = vpop.permute.xlu1 %928  ;;  %4770 = vmatmul.mubr.f32.gmra.mrb[28].mxu1 %v7010_v35  ;;  %5142 = vmatprep.mubr.f32.mxu0 %v7023_v51  ;;  %v426_v9 = vmul.f32 %v6962_v20, %v365_v1  ;;  %vm535_vm9 = vcmp.ge.f32.partialorder %v481_v53, 0.0  ;;  %v589_v58 = vmul.f32 0.01, %v481_v53  ;;  %v1971_v8 = vrot.slane %v6803_v17, 2 }
  0xd6   : > { %v7038_v63 = vmul.f32 %v925_v43, %v656_v25  ;;  %v7040_v59 = vmul.f32 %v929_v4, %v657_v61  ;;  %5626 = vmatpush3.bf16.msra.mxu0 %v5623_v7  ;;  %v7045_v14 = vsel %vm1932_vm6, %v1964_v30, %v1966_v50  ;;  %v1974_v49 = vrot.slane %v6826_v31, 2  ;;  %v4225_v25 = vld [vmem:[%s7957_s3 + $0x370] sm:$0xff] }
  0xd7   : > { %8126 = vst [vmem:[#allocation48_spill] sm:$0xff] %v7045_v14  ;;  %5628 = vmatprep.subr.bf16.mxu0 %v5627_v42  ;;  %v5631_v26 = vpack.c.bf16 %v4224_v2, %v4223_v39  ;;  %v640_v17 = vsel %vm532_vm8, %v478_v46, %v586_v10  ;;  %v7058_v50 = vsel %vm1932_vm6, %v1968_v60, %v1969_v34  ;;  %v592_v1 = vmul.f32 0.01, %v484_v23 }
  0xd8   : > { %4772 = vmatprep.mubr.f32.mxu1 %v7038_v63  ;;  %5143 = vmatmul.mubr.f32.gmra.mrb[10].mxu0 %v7045_v14  ;;  %8127 = vst [vmem:[#allocation49_spill] sm:$0xff] %v7058_v50  ;;  %v1973_v61 = vrot.slane %v6806_v19, 2  ;;  %v487_v39 = vadd.f32 %v6978_v27, %v426_v9  ;;  %v429_v2 = vmul.f32 %v6962_v20, %v368_v56  ;;  %vm538_vm10 = vcmp.ge.f32.partialorder %v484_v23, 0.0 }
  0xd9   : > { %v708_v7 = vpop.permute.xlu0 %707  ;;  %v843_v30 = vpop.permute.xlu1 %842  ;;  %4773 = vmatmul.mubr.f32.gmra.mrb[30].mxu1 %v7040_v59  ;;  %5145 = vmatprep.mubr.f32.mxu0 %v7058_v50  ;;  %v643_v46 = vsel %vm535_vm9, %v481_v53, %v589_v58  ;;  %v5635_v10 = vpack.c.bf16 %v4226_v32, %v4225_v25  ;;  %v1976_v60 = vrot.slane %v6828_v40, 2  ;;  %v7071_v50 = vsel %vm1932_vm6, %v1969_v34, %v1971_v8  ;;  %v4150_v53 = vld [vmem:[%s7957_s3 + $0x118] sm:$0xff]  ;;  %v371_v25 = vld [vmem:[%s6310_s15 + $0x160] sm:$0x3] }
  0xda   : > { %v966_v43 = vmul.f32 %v708_v7, %v613_v16  ;;  %4807 = vmatprep.mubr.f32.mxu1 %v6501_v11  ;;  %5630 = vmatpush3.bf16.msra.mxu0 %v5627_v42  ;;  %v7068_v4 = vmul.f32 %v843_v30, %v640_v17  ;;  %8128 = vst [vmem:[#allocation50_spill] sm:$0xff] %v7071_v50  ;;  %v4149_v11 = vld [vmem:[%s7957_s3 + $0x110] sm:$0xff]  ;;  %v1978_v8 = vrot.slane %v6847_v54, 2  ;;  %v1979_v34 = vrot.slane %v6849_v52, 2  ;;  %v374_v30 = vld [vmem:[%s6310_s15 + $0x178] sm:$0x3] }
  0xdb   : > { %v7074_v9 = vsel %vm1932_vm6, %v1973_v61, %v1974_v49  ;;  %5632 = vmatprep.subr.bf16.mxu0 %v5631_v26  ;;  %v646_v58 = vsel %vm538_vm10, %v484_v23, %v592_v1  ;;  %v7088_v56 = vadd.f32 %v6978_v27, %v429_v2  ;;  %v8130_v32 = vrot.slane %v6439_v22, 1 }
  0xdc   : > { %8129 = vst [vmem:[#allocation51_spill] sm:$0xff] %v7074_v9  ;;  %v1549_v40 = vrot.slane %v966_v43, 1  ;;  %v1936_v42 = vrot.slane %v966_v43, 2  ;;  %5146 = vmatmul.mubr.f32.gmra.mrb[12].mxu0 %v7071_v50  ;;  %vm541_vm11 = vcmp.ge.f32.partialorder %v487_v39, 0.0  ;;  %v595_v7 = vmul.f32 0.01, %v487_v39 }
  0xdd   : > { %v858_v16 = vpop.permute.xlu0 %857  ;;  %5148 = vmatprep.mubr.f32.mxu0 %v7074_v9  ;;  %v5483_v61 = vpack.c.bf16 %v4150_v53, %v4149_v11  ;;  %v375_v43 = vld [vmem:[%s6310_s15 + $0x180] sm:$0xff]  ;;  %v1981_v50 = vrot.slane %v7068_v4, 2  ;;  %v873_v1 = vpop.permute.xlu1 %872  ;;  %v7100_v2 = vsel %vm1932_vm6, %v1974_v49, %v1976_v60  ;;  %v376_v11 = vld [vmem:[%s6310_s15 + $0x188] sm:$0xff]  ;;  %v7117_v49 = vsel %vm1932_vm6, %v1978_v8, %v1979_v34 }
  0xde   : > { %v1550_v17 = vsel %vm1545_vm15, %v8130_v32, %v1549_v40  ;;  %5634 = vmatpush3.bf16.msra.mxu0 %v5631_v26  ;;  %v7097_v23 = vmul.f32 %v858_v16, %v643_v46  ;;  %8131 = vst [vmem:[#allocation52_spill] sm:$0xff] %v7100_v2  ;;  %v4151_v9 = vld [vmem:[%s7957_s3 + $0x120] sm:$0xff]  ;;  %v4152_v40 = vld [vmem:[%s7957_s3 + $0x128] sm:$0xff]  ;;  %v8132_v26 = vrot.slane %v6439_v22, 2  ;;  %8133 = vst [vmem:[#allocation53_spill] sm:$0xff] %v7117_v49  ;;  %v1983_v53 = vrot.slane %v6878_v45, 2 }
  0xdf   : > { %4808 = vmatmul.mubr.f32.vlgmr.msra.gmra.mrb[0].mxu1 %v1550_v17  ;;  %5636 = vmatprep.subr.bf16.mxu0 %v5635_v10  ;;  %v432_v60 = vmul.f32 %v6962_v20, %v371_v25  ;;  %v1984_v16 = vrot.slane %v6880_v47, 2  ;;  %v4227_v22 = vld [vmem:[%s7957_s3 + $0x380] sm:$0xff]  ;;  %v435_v8 = vmul.f32 %v6962_v20, %v374_v30  ;;  %v436_v25 = vmul.f32 %v6962_v20, %v375_v43  ;;  %v377_v30 = vld [vmem:[%s6310_s15 + $0x190] sm:$0x3] }
  0xe0   : > { %v7112_v46 = vsel %vm1932_vm6, %v8132_v26, %v1936_v42  ;;  %4810 = vmatprep.mubr.f32.mxu1 %v6442_v21  ;;  %5149 = vmatmul.mubr.f32.gmra.mrb[14].mxu0 %v7100_v2  ;;  %v4228_v42 = vld [vmem:[%s7957_s3 + $0x388] sm:$0xff]  ;;  %v598_v21 = vmul.f32 0.01, %v7088_v56  ;;  %v649_v17 = vsel %vm541_vm11, %v487_v39, %v595_v7  ;;  %vm544_vm12 = vcmp.ge.f32.partialorder %v7088_v56, 0.0  ;;  %v4153_v39 = vld [vmem:[%s7957_s3 + $0x130] sm:$0xff] }
  0xe1   : > { %5151 = vmatprep.mubr.f32.mxu0 %v7117_v49  ;;  %5482 = vmatpush3.bf16.msra.mxu1 %v6816_v57  ;;  %v888_v32 = vpop.permute.xlu0 %887  ;;  %v5487_v26 = vpack.c.bf16 %v4152_v40, %v4151_v9  ;;  %v437_v2 = vmul.f32 %v6962_v20, %v376_v11  ;;  %v1986_v14 = vrot.slane %v7097_v23, 2  ;;  %v7137_v51 = vmul.f32 %v873_v1, %v646_v58  ;;  %v4154_v9 = vld [vmem:[%s7957_s3 + $0x138] sm:$0xff]  ;;  %v903_v43 = vpop.permute.xlu1 %902 }
  0xe2   : > { %5484 = vmatprep.subr.bf16.mxu1 %v5483_v61  ;;  %v7141_v57 = vsel %vm1932_vm6, %v1979_v34, %v1981_v50  ;;  %5638 = vmatpush3.bf16.msra.mxu0 %v5635_v10  ;;  %v7150_v7 = vpack.c.bf16 %v4228_v42, %v4227_v22  ;;  %v7156_v50 = vsel %vm1932_vm6, %v1983_v53, %v1984_v16  ;;  %v1988_v34 = vrot.slane %v6911_v62, 2 }
  0xe3   : > { %4811 = vmatmul.mubr.f32.gmra.mrb[2].mxu1 %v6445_v15  ;;  %8134 = vst [vmem:[#allocation54_spill] sm:$0xff] %v7141_v57  ;;  %v493_v15 = vadd.f32 %v6978_v27, %v432_v60  ;;  %8135 = vst [vmem:[#allocation55_spill] sm:$0xff] %v7156_v50  ;;  %v1989_v58 = vrot.slane %v6913_v55, 2  ;;  %v7161_v1 = vadd.f32 %v6978_v27, %v435_v8  ;;  %v1991_v53 = vrot.slane %v7137_v51, 2  ;;  %v4156_v8 = vld [vmem:[%s7957_s3 + $0x148] sm:$0xff] }
  0xe4   : > { %4813 = vmatprep.mubr.f32.mxu1 %v6536_v28  ;;  %5152 = vmatmul.mubr.f32.gmra.mrb[16].mxu0 %v7141_v57  ;;  %v497_v10 = vadd.f32 %v6978_v27, %v436_v25  ;;  %v498_v40 = vadd.f32 %v6978_v27, %v437_v2  ;;  %v438_v11 = vmul.f32 %v6962_v20, %v377_v30  ;;  %v4155_v2 = vld [vmem:[%s7957_s3 + $0x140] sm:$0xff] }
  0xe5   : > { %5154 = vmatprep.mubr.f32.mxu0 %v7156_v50  ;;  %5486 = vmatpush3.bf16.msra.mxu1 %v5483_v61  ;;  %v5491_v60 = vpack.c.bf16 %v4154_v9, %v4153_v39  ;;  %v7168_v22 = vmul.f32 %v888_v32, %v649_v17  ;;  %v652_v42 = vsel %vm544_vm12, %v7088_v56, %v598_v21  ;;  %v918_v25 = vpop.permute.xlu0 %917  ;;  %v601_v32 = vmul.f32 0.01, %v493_v15 }
  0xe6   : > { %5488 = vmatprep.subr.bf16.mxu1 %v5487_v26  ;;  %v7175_v61 = vsel %vm1932_vm6, %v1984_v16, %v1986_v14  ;;  %5640 = vmatprep.subr.bf16.mxu0 %v7150_v7  ;;  %v7187_v56 = vsel %vm1932_vm6, %v1988_v34, %v1989_v58  ;;  %v1993_v14 = vrot.slane %v6943_v12, 2  ;;  %v1994_v16 = vrot.slane %v6945_v38, 2 }
  0xe7   : > { %4814 = vmatmul.mubr.f32.gmra.mrb[4].mxu1 %v6539_v36  ;;  %8136 = vst [vmem:[#allocation56_spill] sm:$0xff] %v7175_v61  ;;  %8137 = vst [vmem:[#allocation57_spill] sm:$0xff] %v7187_v56  ;;  %vm547_vm13 = vcmp.ge.f32.partialorder %v493_v15, 0.0  ;;  %v604_v21 = vmul.f32 0.01, %v7161_v1  ;;  %vm551_vm14 = vcmp.ge.f32.partialorder %v497_v10, 0.0  ;;  %v499_v39 = vadd.f32 %v6978_v27, %v438_v11 }
  0xe8   : > { %4816 = vmatprep.mubr.f32.mxu1 %v6585_v6  ;;  %5155 = vmatmul.mubr.f32.gmra.mrb[18].mxu0 %v7175_v61  ;;  %v605_v17 = vmul.f32 0.01, %v497_v10  ;;  %v606_v30 = vmul.f32 0.01, %v498_v40  ;;  %v5495_v9 = vpack.c.bf16 %v4156_v8, %v4155_v2  ;;  %v1996_v34 = vrot.slane %v7168_v22, 2  ;;  %v933_v6 = vpop.permute.xlu1 %932  ;;  %v4158_v11 = vld [vmem:[%s7957_s3 + $0x158] sm:$0xff] }
  0xe9   : > { %5157 = vmatprep.mubr.f32.mxu0 %v7187_v56  ;;  %5490 = vmatpush3.bf16.msra.mxu1 %v5487_v26  ;;  %v7195_v61 = vmul.f32 %v903_v43, %v652_v42  ;;  %v7199_v36 = vsel %vm1932_vm6, %v1989_v58, %v1991_v53  ;;  %vm552_vm0 = vcmp.ge.f32.partialorder %v498_v40, 0.0  ;;  %v4157_v26 = vld [vmem:[%s7957_s3 + $0x150] sm:$0xff]  ;;  %v655_v2 = vsel %vm547_vm13, %v493_v15, %v601_v32  ;;  %v940_v42 = vpop.permute.xlu0 %939  ;;  %v8140_v56 = vld [vmem:[#allocation21_spill] sm:$0xff] }
  0xea   : > { %5492 = vmatprep.subr.bf16.mxu1 %v5491_v60  ;;  %8138 = vst [vmem:[#allocation58_spill] sm:$0xff] %v7199_v36  ;;  %v8139_v8 = vld [vmem:[#allocation20_spill] sm:$0xff]  ;;  %v7211_v43 = vsel %vm1932_vm6, %v1993_v14, %v1994_v16  ;;  %v1998_v58 = vrot.slane %v6981_v44, 2  ;;  %v1999_v53 = vrot.slane %v6983_v29, 2  ;;  %vm550_vm1 = vcmp.ge.f32.partialorder %v7161_v1, 0.0 }
  0xeb   : > { %4817 = vmatmul.mubr.f32.gmra.mrb[6].mxu1 %v6621_v24  ;;  %v659_v24 = vsel %vm551_vm14, %v497_v10, %v605_v17  ;;  %v660_v15 = vsel %vm552_vm0, %v498_v40, %v606_v30  ;;  %v607_v32 = vmul.f32 0.01, %v499_v39  ;;  %v7219_v14 = vmul.f32 %v918_v25, %v655_v2  ;;  %v4160_v10 = vld [vmem:[%s7957_s3 + $0x168] sm:$0xff]  ;;  %v8142_v25 = vld [vmem:[#allocation22_spill] sm:$0xff] }
  0xec   : > { %4819 = vmatprep.mubr.f32.mxu1 %v8139_v8  ;;  %5158 = vmatmul.mubr.f32.gmra.mrb[20].mxu0 %v7199_v36  ;;  %v5499_v8 = vpack.c.bf16 %v4158_v11, %v4157_v26  ;;  %v2001_v36 = vrot.slane %v7195_v61, 2  ;;  %v7223_v50 = vsel %vm1932_vm6, %v1994_v16, %v1996_v34  ;;  %v944_v57 = vpop.permute.xlu1 %943  ;;  %vm553_vm2 = vcmp.ge.f32.partialorder %v499_v39, 0.0 }
  0xed   : > { %5160 = vmatprep.mubr.f32.mxu0 %v7211_v43  ;;  %5494 = vmatpush3.bf16.msra.mxu1 %v5491_v60  ;;  %8141 = vst [vmem:[#allocation21_spill] sm:$0xff] %v7223_v50  ;;  %v4159_v60 = vld [vmem:[%s7957_s3 + $0x160] sm:$0xff]  ;;  %v658_v40 = vsel %vm550_vm1, %v7161_v1, %v604_v21  ;;  %v7237_v16 = vsel %vm1932_vm6, %v1998_v58, %v1999_v53  ;;  %v2003_v17 = vrot.slane %v7008_v18, 2  ;;  %v2004_v30 = vrot.slane %v7010_v35, 2  ;;  %v948_v11 = vpop.permute.xlu0 %947  ;;  %v8143_v58 = vld [vmem:[#allocation23_spill] sm:$0xff] }
  0xee   : > { %5496 = vmatprep.subr.bf16.mxu1 %v5495_v9  ;;  %v7242_v34 = vmul.f32 %v940_v42, %v659_v24  ;;  %v7244_v26 = vmul.f32 %v944_v57, %v660_v15  ;;  %v661_v1 = vsel %vm553_vm2, %v499_v39, %v607_v32  ;;  %v5503_v21 = vpack.c.bf16 %v4160_v10, %v4159_v60  ;;  %v4161_v24 = vld [vmem:[%s7957_s3 + $0x170] sm:$0xff]  ;;  %v4162_v57 = vld [vmem:[%s7957_s3 + $0x178] sm:$0xff]  ;;  %v8146_v10 = vld [vmem:[#allocation26_spill] sm:$0xff] }
  0xef   : > { %4820 = vmatmul.mubr.f32.gmra.mrb[8].mxu1 %v8140_v56  ;;  %v2006_v2 = vrot.slane %v7219_v14, 2  ;;  %v8144_v39 = vld [vmem:[#allocation25_spill] sm:$0xff]  ;;  %v5507_v32 = vpack.c.bf16 %v4162_v57, %v4161_v24 }
  0xf0   : > { %4822 = vmatprep.mubr.f32.mxu1 %v8142_v25  ;;  %5161 = vmatmul.mubr.f32.gmra.mrb[22].mxu0 %v7223_v50  ;;  %v7247_v50 = vmul.f32 %v933_v6, %v658_v40  ;;  %v7251_v25 = vsel %vm1932_vm6, %v1999_v53, %v2001_v36  ;;  %v7262_v6 = vsel %vm1932_vm6, %v2003_v17, %v2004_v30  ;;  %v2009_v36 = vrot.slane %v7040_v59, 2  ;;  %v4163_v17 = vld [vmem:[%s7957_s3 + $0x180] sm:$0xff]  ;;  %v8150_v57 = vld [vmem:[#allocation29_spill] sm:$0xff] }
  0xf1   : > { %5163 = vmatprep.mubr.f32.mxu0 %v7237_v16  ;;  %5498 = vmatpush3.bf16.msra.mxu1 %v5495_v9  ;;  %v2008_v9 = vrot.slane %v7038_v63, 2  ;;  %v7267_v53 = vmul.f32 %v948_v11, %v661_v1  ;;  %v2877_v42 = vrot.slane %v7242_v34, 2  ;;  %v2878_v15 = vrot.slane %v7244_v26, 2  ;;  %v8148_v11 = vld [vmem:[#allocation27_spill] sm:$0xff] }
  0xf2   : > { %5500 = vmatprep.subr.bf16.mxu1 %v5499_v8  ;;  %v2011_v60 = vrot.slane %v7247_v50, 2  ;;  %v7274_v40 = vsel %vm1932_vm6, %v2004_v30, %v2006_v2 }
  0xf3   : > { %4823 = vmatmul.mubr.f32.gmra.mrb[10].mxu1 %v8143_v58  ;;  %8145 = vst [vmem:[#allocation23_spill] sm:$0xff] %v7267_v53  ;;  %8147 = vst [vmem:[#allocation25_spill] sm:$0xff] %v7274_v40  ;;  %v7285_v1 = vsel %vm1932_vm6, %v2008_v9, %v2009_v36  ;;  %v2880_v24 = vrot.slane %v7267_v53, 2  ;;  %v7290_v30 = vsel %vm1932_vm6, %v2877_v42, %v2878_v15  ;;  %v1592_v9 = vrot.slane %v6849_v52, 1 }
  0xf4   : > { %4825 = vmatprep.mubr.f32.mxu1 %v8144_v39  ;;  %5164 = vmatmul.mubr.f32.gmra.mrb[24].mxu0 %v7251_v25  ;;  %8149 = vst [vmem:[#allocation59_spill] sm:$0xff] %v7290_v30  ;;  %v1594_v42 = vrot.slane %v7068_v4, 1  ;;  %v1599_v4 = vrot.slane %v7097_v23, 1  ;;  %v1601_v53 = vrot.slane %v6911_v62, 1  ;;  %v4232_v23 = vld [vmem:[%s7957_s3 + $0x3a8] sm:$0xff] }
  0xf5   : > { %5166 = vmatprep.mubr.f32.mxu0 %v7262_v6  ;;  %5502 = vmatpush3.bf16.msra.mxu1 %v5499_v8  ;;  %v4164_v8 = vld [vmem:[%s7957_s3 + $0x188] sm:$0xff] }
  0xf6   : > { %5504 = vmatprep.subr.bf16.mxu1 %v5503_v21  ;;  %v7292_v2 = vpack.c.bf16 %v4164_v8, %v4163_v17  ;;  %v1596_v17 = vrot.slane %v6878_v45, 1  ;;  %v1597_v8 = vrot.slane %v6880_v47, 1 }
  0xf7   : > { %4826 = vmatmul.mubr.f32.gmra.mrb[12].mxu1 %v8146_v10  ;;  %v8151_v10 = vld [vmem:[#allocation30_spill] sm:$0xff] }
  0xf8   : > { %4828 = vmatprep.mubr.f32.mxu1 %v8148_v11  ;;  %5167 = vmatmul.mubr.f32.gmra.mrb[26].mxu0 %v7274_v40  ;;  %v7296_v11 = vsel %vm1932_vm6, %v2009_v36, %v2011_v60  ;;  %v1591_v40 = vrot.slane %v6847_v54, 1  ;;  %v8153_v36 = vld [vmem:[#allocation31_spill] sm:$0xff] }
  0xf9   : > { %5169 = vmatprep.mubr.f32.mxu0 %v7285_v1  ;;  %5506 = vmatpush3.bf16.msra.mxu1 %v5503_v21  ;;  %v7304_v21 = vsel %vm1932_vm6, %v2878_v15, %v2880_v24  ;;  %v4230_v15 = vld [vmem:[%s7957_s3 + $0x398] sm:$0xff]  ;;  %v7329_v24 = vsel %vm1545_vm15, %v1596_v17, %v1597_v8 }
  0xfa   : > { %5508 = vmatprep.subr.bf16.mxu1 %v5507_v32  ;;  %8152 = vst [vmem:[#allocation29_spill] sm:$0xff] %v7304_v21  ;;  %v7310_v60 = vsel %vm1545_vm15, %v1591_v40, %v1592_v9  ;;  %8154 = vst [vmem:[#allocation30_spill] sm:$0xff] %v7329_v24 }
  0xfb   : > { %4829 = vmatmul.mubr.f32.gmra.mrb[14].mxu1 %v8150_v57 }
  0xfc   : > { %4831 = vmatprep.mubr.f32.mxu1 %v8151_v10  ;;  %5170 = vmatmul.mubr.f32.gmra.mrb[28].mxu0 %v7296_v11 }
  0xfd   : > { %5172 = vmatprep.mubr.f32.mxu0 %v7290_v30  ;;  %5510 = vmatpush3.bf16.msra.mxu1 %v5507_v32  ;;  %v4229_v30 = vld [vmem:[%s7957_s3 + $0x390] sm:$0xff]  ;;  %v7325_v32 = vsel %vm1545_vm15, %v1592_v9, %v1594_v42  ;;  %v1604_v9 = vrot.slane %v7137_v51, 1  ;;  %v7345_v42 = vsel %vm1545_vm15, %v1597_v8, %v1599_v4  ;;  %v4234_v51 = vld [vmem:[%s7957_s3 + $0x3b8] sm:$0xff] }
  0xfe   : > { %5512 = vmatprep.subr.bf16.mxu1 %v7292_v2  ;;  %v5643_v40 = vpack.c.bf16 %v4230_v15, %v4229_v30  ;;  %v8155_v30 = vld [vmem:[#allocation14_spill] sm:$0xff] }
  0xff   : > { %4832 = vmatmul.mubr.f32.gmra.mrb[16].mxu1 %v8153_v36  ;;  %v1602_v36 = vrot.slane %v6913_v55, 1  ;;  %8156 = vst [vmem:[#allocation14_spill] sm:$0xff] %v7345_v42 }
 0x100   : > { %4834 = vmatprep.mubr.f32.mxu1 %v7310_v60  ;;  %5173 = vmatmul.mubr.f32.gmra.mrb[30].mxu0 %v7304_v21  ;;  %v4231_v21 = vld [vmem:[%s7957_s3 + $0x3a0] sm:$0xff] }
 0x101   : > { %5207 = vmatprep.mubr.f32.mxu0 %v6457_v33  ;;  %v5647_v17 = vpack.c.bf16 %v4232_v23, %v4231_v21  ;;  %v7349_v15 = vsel %vm1545_vm15, %v1601_v53, %v1602_v36  ;;  %v8158_v21 = vld [vmem:[#allocation15_spill] sm:$0xff]  ;;  %v1609_v53 = vrot.slane %v7168_v22, 1  ;;  %v7364_v8 = vsel %vm1545_vm15, %v1602_v36, %v1604_v9 }
 0x102   : > { %8157 = vst [vmem:[#allocation60_spill] sm:$0xff] %v7349_v15  ;;  %v4236_v22 = vld [vmem:[%s7957_s3 + $0x3c8] sm:$0xff]  ;;  %v1614_v36 = vrot.slane %v7195_v61, 1 }
 0x103   : > { %4835 = vmatmul.mubr.f32.gmra.mrb[18].mxu1 %v7325_v32  ;;  %v8162_v61 = vld [vmem:[#allocation19_spill] sm:$0xff] }
 0x104   : > { %4837 = vmatprep.mubr.f32.mxu1 %v7329_v24  ;;  %5208 = vmatmul.mubr.f32.vlgmr.msra.gmra.mrb[0].mxu0 %v6483_v48  ;;  %v1606_v24 = vrot.slane %v6943_v12, 1  ;;  %v1607_v48 = vrot.slane %v6945_v38, 1 }
 0x105   : > { %5642 = vmatpush3.bf16.msra.mxu0 %v7150_v7  ;;  %5210 = vmatprep.mubr.f32.mxu0 %v8155_v30  ;;  %v4233_v7 = vld [vmem:[%s7957_s3 + $0x3b0] sm:$0xff] }
 0x106   : > { %5644 = vmatprep.subr.bf16.mxu0 %v5643_v40  ;;  %v5651_v4 = vpack.c.bf16 %v4234_v51, %v4233_v7  ;;  %v7368_v23 = vsel %vm1545_vm15, %v1606_v24, %v1607_v48  ;;  %v7383_v24 = vsel %vm1545_vm15, %v1607_v48, %v1609_v53  ;;  %v1616_v51 = vrot.slane %v7008_v18, 1  ;;  %v4238_v48 = vld [vmem:[%s7957_s3 + $0x3d8] sm:$0xff] }
 0x107   : > { %4838 = vmatmul.mubr.f32.gmra.mrb[20].mxu1 %v7345_v42  ;;  %8159 = vst [vmem:[#allocation15_spill] sm:$0xff] %v7368_v23  ;;  %v1611_v42 = vrot.slane %v6981_v44, 1  ;;  %8160 = vst [vmem:[#allocation61_spill] sm:$0xff] %v7383_v24 }
 0x108   : > { %4840 = vmatprep.mubr.f32.mxu1 %v7349_v15  ;;  %5211 = vmatmul.mubr.f32.gmra.mrb[2].mxu0 %v8158_v21  ;;  %v1612_v15 = vrot.slane %v6983_v29, 1 }
 0x109   : > { %5213 = vmatprep.mubr.f32.mxu0 %v6582_v5  ;;  %5646 = vmatpush3.bf16.msra.mxu0 %v5643_v40  ;;  %v4235_v40 = vld [vmem:[%s7957_s3 + $0x3c0] sm:$0xff] }
 0x10a   : > { %5648 = vmatprep.subr.bf16.mxu0 %v5647_v17  ;;  %v5655_v9 = vpack.c.bf16 %v4236_v22, %v4235_v40  ;;  %v7387_v7 = vsel %vm1545_vm15, %v1611_v42, %v1612_v15  ;;  %v1619_v42 = vrot.slane %v7219_v14, 1  ;;  %v7402_v53 = vsel %vm1545_vm15, %v1612_v15, %v1614_v36  ;;  %v4240_v14 = vld [vmem:[%s7957_s3 + $0x3e8] sm:$0xff] }
 0x10b   : > { %4841 = vmatmul.mubr.f32.gmra.mrb[22].mxu1 %v7364_v8  ;;  %8161 = vst [vmem:[#allocation62_spill] sm:$0xff] %v7387_v7  ;;  %v1624_v15 = vrot.slane %v7247_v50, 1  ;;  %v8163_v50 = vld [vmem:[#allocation24_spill] sm:$0xff] }
 0x10c   : > { %4843 = vmatprep.mubr.f32.mxu1 %v7368_v23  ;;  %5214 = vmatmul.mubr.f32.gmra.mrb[4].mxu0 %v6615_v0  ;;  %v1617_v23 = vrot.slane %v7010_v35, 1 }
 0x10d   : > { %5216 = vmatprep.mubr.f32.mxu0 %v6655_v37  ;;  %5650 = vmatpush3.bf16.msra.mxu0 %v5647_v17  ;;  %v4237_v17 = vld [vmem:[%s7957_s3 + $0x3d0] sm:$0xff] }
 0x10e   : > { %5652 = vmatprep.subr.bf16.mxu0 %v5651_v4  ;;  %v5659_v40 = vpack.c.bf16 %v4238_v48, %v4237_v17  ;;  %v7406_v22 = vsel %vm1545_vm15, %v1616_v51, %v1617_v23  ;;  %v7421_v36 = vsel %vm1545_vm15, %v1617_v23, %v1619_v42  ;;  %v4241_v48 = vld [vmem:[%s7957_s3 + $0x3f0] sm:$0xff] }
 0x10f   : > { %4844 = vmatmul.mubr.f32.gmra.mrb[24].mxu1 %v7383_v24  ;;  %v1621_v24 = vrot.slane %v7038_v63, 1  ;;  %v4165_v42 = vld [vmem:[%s7957_s3 + $0x190] sm:$0xff] }
 0x110   : > { %4846 = vmatprep.mubr.f32.mxu1 %v7387_v7  ;;  %5217 = vmatmul.mubr.f32.gmra.mrb[6].mxu0 %v8162_v61  ;;  %v1622_v7 = vrot.slane %v7040_v59, 1 }
 0x111   : > { %5219 = vmatprep.mubr.f32.mxu0 %v6710_v13  ;;  %5654 = vmatpush3.bf16.msra.mxu0 %v5651_v4  ;;  %v4239_v4 = vld [vmem:[%s7957_s3 + $0x3e0] sm:$0xff] }
 0x112   : > { %5656 = vmatprep.subr.bf16.mxu0 %v5655_v9  ;;  %v5663_v51 = vpack.c.bf16 %v4240_v14, %v4239_v4  ;;  %v7425_v17 = vsel %vm1545_vm15, %v1621_v24, %v1622_v7  ;;  %v7437_v23 = vsel %vm1545_vm15, %v1622_v7, %v1624_v15  ;;  %v4166_v4 = vld [vmem:[%s7957_s3 + $0x198] sm:$0xff]  ;;  %v4243_v7 = vld [vmem:[%s7957_s3 + $0x400] sm:$0xff] }
 0x113   : > { %4847 = vmatmul.mubr.f32.gmra.mrb[26].mxu1 %v7402_v53  ;;  %v8164_v14 = vld [vmem:[#allocation13_spill] sm:$0xff]  ;;  %v5515_v15 = vpack.c.bf16 %v4166_v4, %v4165_v42  ;;  %v4169_v42 = vld [vmem:[%s7957_s3 + $0x1b0] sm:$0xff]  ;;  %v8167_v4 = vld [vmem:[#allocation34_spill] sm:$0xff] }
 0x114   : > { %4849 = vmatprep.mubr.f32.mxu1 %v7406_v22  ;;  %5220 = vmatmul.mubr.f32.gmra.mrb[8].mxu0 %v6742_v41 }
 0x115   : > { %5222 = vmatprep.mubr.f32.mxu0 %v6774_v3  ;;  %5658 = vmatpush3.bf16.msra.mxu0 %v5655_v9  ;;  %v4242_v9 = vld [vmem:[%s7957_s3 + $0x3f8] sm:$0xff] }
 0x116   : > { %5660 = vmatprep.subr.bf16.mxu0 %v5659_v40  ;;  %v5667_v24 = vpack.c.bf16 %v4242_v9, %v4241_v48  ;;  %v4167_v48 = vld [vmem:[%s7957_s3 + $0x1a0] sm:$0xff]  ;;  %v4168_v9 = vld [vmem:[%s7957_s3 + $0x1a8] sm:$0xff] }
 0x117   : > { %4850 = vmatmul.mubr.f32.gmra.mrb[28].mxu1 %v7421_v36 }
 0x118   : > { %4852 = vmatprep.mubr.f32.mxu1 %v7425_v17  ;;  %5223 = vmatmul.mubr.f32.gmra.mrb[10].mxu0 %v8163_v50 }
 0x119   : > { %5225 = vmatprep.mubr.f32.mxu0 %v6806_v19  ;;  %5662 = vmatpush3.bf16.msra.mxu0 %v5659_v40  ;;  %v4244_v40 = vld [vmem:[%s7957_s3 + $0x408] sm:$0xff] }
 0x11a   : > { %5664 = vmatprep.subr.bf16.mxu0 %v5663_v51 }
 0x11b   : > { %4853 = vmatmul.mubr.f32.gmra.mrb[30].mxu1 %v7437_v23 }
 0x11c   : > { %4887 = vmatprep.mubr.f32.mxu1 %v8164_v14  ;;  %5226 = vmatmul.mubr.f32.gmra.mrb[12].mxu0 %v6826_v31  ;;  %v7462_v14 = vpack.c.bf16 %v4244_v40, %v4243_v7  ;;  %v8165_v31 = vld [vmem:[#allocation32_spill] sm:$0xff]  ;;  %v378_v7 = vld [vmem:[%s6310_s15 + $0x198] sm:$0xff]  ;;  %v4171_v40 = vld [vmem:[%s7957_s3 + $0x1c0] sm:$0xff] }
 0x11d   : > { %5228 = vmatprep.mubr.f32.mxu0 %v6847_v54  ;;  %5666 = vmatpush3.bf16.msra.mxu0 %v5663_v51  ;;  %v8166_v51 = vld [vmem:[#allocation33_spill] sm:$0xff] }
 0x11e   : > { %5668 = vmatprep.subr.bf16.mxu0 %v5667_v24 }
 0x11f   : > { %4888 = vmatmul.mubr.f32.vlgmr.msra.gmra.mrb[0].mxu1 %v7112_v46  ;;  %v5519_v46 = vpack.c.bf16 %v4168_v9, %v4167_v48  ;;  %v4172_v48 = vld [vmem:[%s7957_s3 + $0x1c8] sm:$0xff]  ;;  %v8169_v9 = vld [vmem:[#allocation37_spill] sm:$0xff] }
 0x120   : > { %4890 = vmatprep.mubr.f32.mxu1 %v8165_v31  ;;  %5229 = vmatmul.mubr.f32.gmra.mrb[14].mxu0 %v6849_v52  ;;  %v4170_v31 = vld [vmem:[%s7957_s3 + $0x1b8] sm:$0xff] }
 0x121   : > { %5231 = vmatprep.mubr.f32.mxu0 %v6878_v45  ;;  %5514 = vmatpush3.bf16.msra.mxu1 %v7292_v2  ;;  %v5523_v2 = vpack.c.bf16 %v4170_v31, %v4169_v42  ;;  %v5527_v42 = vpack.c.bf16 %v4172_v48, %v4171_v40  ;;  %v8170_v31 = vld [vmem:[#allocation39_spill] sm:$0xff]  ;;  %v8172_v48 = vld [vmem:[#allocation42_spill] sm:$0xff] }
 0x122   : > { %5516 = vmatprep.subr.bf16.mxu1 %v5515_v15  ;;  %5670 = vmatpush3.bf16.msra.mxu0 %v5667_v24  ;;  %v8168_v24 = vld [vmem:[#allocation36_spill] sm:$0xff] }
 0x123   : > { %4891 = vmatmul.mubr.f32.gmra.mrb[2].mxu1 %v8166_v51  ;;  %5672 = vmatprep.subr.bf16.mxu0 %v7462_v14  ;;  %v379_v51 = vld [vmem:[%s6310_s15 + $0x1a0] sm:$0xff] }
 0x124   : > { %4893 = vmatprep.mubr.f32.mxu1 %v8167_v4  ;;  %5232 = vmatmul.mubr.f32.gmra.mrb[16].mxu0 %v6880_v47 }
 0x125   : > { %5234 = vmatprep.mubr.f32.mxu0 %v6911_v62  ;;  %5518 = vmatpush3.bf16.msra.mxu1 %v5515_v15  ;;  %v439_v15 = vmul.f32 %v6962_v20, %v378_v7  ;;  %v8171_v62 = vld [vmem:[#allocation40_spill] sm:$0xff] }
 0x126   : > { %5520 = vmatprep.subr.bf16.mxu1 %v5519_v46 }
 0x127   : > { %4894 = vmatmul.mubr.f32.gmra.mrb[4].mxu1 %v8168_v24  ;;  %v4173_v24 = vld [vmem:[%s7957_s3 + $0x1d0] sm:$0xff]  ;;  %v500_v7 = vadd.f32 %v6978_v27, %v439_v15 }
 0x128   : > { %4896 = vmatprep.mubr.f32.mxu1 %v8169_v9  ;;  %5235 = vmatmul.mubr.f32.gmra.mrb[18].mxu0 %v6913_v55  ;;  %v4174_v9 = vld [vmem:[%s7957_s3 + $0x1d8] sm:$0xff]  ;;  %v4177_v15 = vld [vmem:[%s7957_s3 + $0x1f0] sm:$0xff] }
 0x129   : > { %5237 = vmatprep.mubr.f32.mxu0 %v6943_v12  ;;  %5522 = vmatpush3.bf16.msra.mxu1 %v5519_v46  ;;  %v440_v46 = vmul.f32 %v6962_v20, %v379_v51  ;;  %v5531_v40 = vpack.c.bf16 %v4174_v9, %v4173_v24  ;;  %v8174_v9 = vld [vmem:[#allocation46_spill] sm:$0xff]  ;;  %vm554_vm3 = vcmp.ge.f32.partialorder %v500_v7, 0.0  ;;  %v4178_v51 = vld [vmem:[%s7957_s3 + $0x1f8] sm:$0xff] }
 0x12a   : > { %5524 = vmatprep.subr.bf16.mxu1 %v5523_v2 }
 0x12b   : > { %4897 = vmatmul.mubr.f32.gmra.mrb[6].mxu1 %v8170_v31  ;;  %v4175_v31 = vld [vmem:[%s7957_s3 + $0x1e0] sm:$0xff]  ;;  %v501_v20 = vadd.f32 %v6978_v27, %v440_v46  ;;  %v8177_v46 = vld [vmem:[#allocation49_spill] sm:$0xff] }
 0x12c   : > { %4899 = vmatprep.mubr.f32.mxu1 %v8171_v62  ;;  %5238 = vmatmul.mubr.f32.gmra.mrb[20].mxu0 %v6945_v38  ;;  %v4176_v62 = vld [vmem:[%s7957_s3 + $0x1e8] sm:$0xff] }
 0x12d   : > { %5240 = vmatprep.mubr.f32.mxu0 %v6981_v44  ;;  %5526 = vmatpush3.bf16.msra.mxu1 %v5523_v2  ;;  %v8173_v38 = vld [vmem:[#allocation43_spill] sm:$0xff]  ;;  %v608_v2 = vmul.f32 0.01, %v500_v7  ;;  %v5535_v24 = vpack.c.bf16 %v4176_v62, %v4175_v31  ;;  %v609_v27 = vmul.f32 0.01, %v501_v20  ;;  %vm555_vm4 = vcmp.ge.f32.partialorder %v501_v20, 0.0 }
 0x12e   : > { %5528 = vmatprep.subr.bf16.mxu1 %v5527_v42  ;;  %v8176_v31 = vld [vmem:[#allocation48_spill] sm:$0xff] }
 0x12f   : > { %4900 = vmatmul.mubr.f32.gmra.mrb[8].mxu1 %v8172_v48  ;;  %v662_v62 = vsel %vm554_vm3, %v500_v7, %v608_v2  ;;  %v8179_v2 = vld [vmem:[#allocation51_spill] sm:$0xff] }
 0x130   : > { %4902 = vmatprep.mubr.f32.mxu1 %v8173_v38  ;;  %5241 = vmatmul.mubr.f32.gmra.mrb[22].mxu0 %v6983_v29  ;;  %v8175_v29 = vld [vmem:[#allocation47_spill] sm:$0xff] }
 0x131   : > { %5243 = vmatprep.mubr.f32.mxu0 %v7008_v18  ;;  %5530 = vmatpush3.bf16.msra.mxu1 %v5527_v42  ;;  %v5539_v42 = vpack.c.bf16 %v4178_v51, %v4177_v15  ;;  %v8180_v15 = vld [vmem:[#allocation2_spill] sm:$0xff] }
 0x132   : > { %5532 = vmatprep.subr.bf16.mxu1 %v5531_v40  ;;  %v4247_v51 = vld [vmem:[%s7957_s3 + $0x420] sm:$0xff] }
 0x133   : > { %4903 = vmatmul.mubr.f32.gmra.mrb[10].mxu1 %v8174_v9  ;;  %v955_v9 = vpop.permute.xlu1 %954 }
 0x134   : > { %4905 = vmatprep.mubr.f32.mxu1 %v8175_v29  ;;  %5244 = vmatmul.mubr.f32.gmra.mrb[24].mxu0 %v7010_v35  ;;  %v7528_v18 = vmul.f32 %v955_v9, %v662_v62  ;;  %v959_v35 = vpop.permute.xlu0 %958  ;;  %v663_v29 = vsel %vm555_vm4, %v501_v20, %v609_v27  ;;  %v8181_v9 = vld [vmem:[#allocation52_spill] sm:$0xff]  ;;  %v4248_v27 = vld [vmem:[%s7957_s3 + $0x428] sm:$0xff] }
 0x135   : > { %5246 = vmatprep.mubr.f32.mxu0 %v7038_v63  ;;  %5534 = vmatpush3.bf16.msra.mxu1 %v5531_v40  ;;  %v8178_v40 = vld [vmem:[#allocation50_spill] sm:$0xff]  ;;  %v7532_v7 = vmul.f32 %v959_v35, %v663_v29  ;;  %v4245_v20 = vld [vmem:[%s7957_s3 + $0x410] sm:$0xff]  ;;  %v4246_v29 = vld [vmem:[%s7957_s3 + $0x418] sm:$0xff] }
 0x136   : > { %5536 = vmatprep.subr.bf16.mxu1 %v5535_v24  ;;  %v5675_v35 = vpack.c.bf16 %v4246_v29, %v4245_v20  ;;  %v8183_v62 = vld [vmem:[#allocation55_spill] sm:$0xff]  ;;  %v8186_v20 = vld [vmem:[#allocation56_spill] sm:$0xff] }
 0x137   : > { %4906 = vmatmul.mubr.f32.gmra.mrb[12].mxu1 %v8176_v31  ;;  %v4249_v29 = vld [vmem:[%s7957_s3 + $0x430] sm:$0xff] }
 0x138   : > { %4908 = vmatprep.mubr.f32.mxu1 %v8177_v46  ;;  %5247 = vmatmul.mubr.f32.gmra.mrb[26].mxu0 %v7040_v59 }
 0x139   : > { %5249 = vmatprep.mubr.f32.mxu0 %v7242_v34  ;;  %5538 = vmatpush3.bf16.msra.mxu1 %v5535_v24  ;;  %v8182_v24 = vld [vmem:[#allocation54_spill] sm:$0xff] }
 0x13a   : > { %5540 = vmatprep.subr.bf16.mxu1 %v5539_v42 }
 0x13b   : > { %4909 = vmatmul.mubr.f32.gmra.mrb[14].mxu1 %v8178_v40 }
 0x13c   : > { %4911 = vmatprep.mubr.f32.mxu1 %v8179_v2  ;;  %5250 = vmatmul.mubr.f32.gmra.mrb[28].mxu0 %v7244_v26 }
 0x13d   : > { %5252 = vmatprep.mubr.f32.mxu0 %v7528_v18  ;;  %5542 = vmatpush3.bf16.msra.mxu1 %v5539_v42  ;;  %v8184_v42 = vld [vmem:[#allocation16_spill] sm:$0xff] }
 0x13e   : > { %5703 = vmatprep.subr.bf16.mxu1 %v8180_v15 }
 0x13f   : > { %4912 = vmatmul.mubr.f32.gmra.mrb[16].mxu1 %v8181_v9  ;;  %v8187_v9 = vld [vmem:[#allocation57_spill] sm:$0xff] }
 0x140   : > { %4914 = vmatprep.mubr.f32.mxu1 %v7117_v49  ;;  %5253 = vmatmul.mubr.f32.gmra.mrb[30].mxu0 %v7532_v7  ;;  %v8185_v49 = vld [vmem:[#allocation17_spill] sm:$0xff] }
 0x141   : > { %5287 = vmatprep.mubr.f32.mxu0 %v6536_v28  ;;  %v5679_v28 = vpack.c.bf16 %v4248_v27, %v4247_v51  ;;  %v4251_v51 = vld [vmem:[%s7957_s3 + $0x440] sm:$0xff]  ;;  %v4252_v27 = vld [vmem:[%s7957_s3 + $0x448] sm:$0xff] }
 0x143   : > { %4915 = vmatmul.mubr.f32.gmra.mrb[18].mxu1 %v8182_v24  ;;  %v4250_v24 = vld [vmem:[%s7957_s3 + $0x438] sm:$0xff] }
 0x144   : > { %4917 = vmatprep.mubr.f32.mxu1 %v8183_v62  ;;  %5288 = vmatmul.mubr.f32.vlgmr.msra.gmra.mrb[0].mxu0 %v8184_v42  ;;  %v8188_v62 = vld [vmem:[#allocation18_spill] sm:$0xff]  ;;  %v8189_v42 = vld [vmem:[#allocation20_spill] sm:$0xff] }
 0x145   : > { %5674 = vmatpush3.bf16.msra.mxu0 %v7462_v14  ;;  %5290 = vmatprep.mubr.f32.mxu0 %v8185_v49  ;;  %v5683_v49 = vpack.c.bf16 %v4250_v24, %v4249_v29  ;;  %v8190_v14 = vld [vmem:[#allocation58_spill] sm:$0xff]  ;;  %v8192_v24 = vld [vmem:[#allocation21_spill] sm:$0xff]  ;;  %v4253_v29 = vld [vmem:[%s7957_s3 + $0x450] sm:$0xff] }
 0x146   : > { %5676 = vmatprep.subr.bf16.mxu0 %v5675_v35 }
 0x147   : > { %4918 = vmatmul.mubr.f32.gmra.mrb[20].mxu1 %v8186_v20 }
 0x148   : > { %4920 = vmatprep.mubr.f32.mxu1 %v8187_v9  ;;  %5291 = vmatmul.mubr.f32.gmra.mrb[2].mxu0 %v8188_v62  ;;  %v8191_v62 = vld [vmem:[#allocation22_spill] sm:$0xff] }
 0x149   : > { %5293 = vmatprep.mubr.f32.mxu0 %v8189_v42  ;;  %5678 = vmatpush3.bf16.msra.mxu0 %v5675_v35  ;;  %v5687_v35 = vpack.c.bf16 %v4252_v27, %v4251_v51  ;;  %v4254_v42 = vld [vmem:[%s7957_s3 + $0x458] sm:$0xff]  ;;  %v4256_v51 = vld [vmem:[%s7957_s3 + $0x468] sm:$0xff]  ;;  %v8193_v27 = vld [vmem:[#allocation26_spill] sm:$0xff] }
 0x14a   : > { %5680 = vmatprep.subr.bf16.mxu0 %v5679_v28 }
 0x14b   : > { %4921 = vmatmul.mubr.f32.gmra.mrb[22].mxu1 %v8190_v14 }
 0x14c   : > { %4923 = vmatprep.mubr.f32.mxu1 %v7211_v43  ;;  %5294 = vmatmul.mubr.f32.gmra.mrb[4].mxu0 %v8140_v56  ;;  %v5691_v56 = vpack.c.bf16 %v4254_v42, %v4253_v29  ;;  %v4258_v29 = vld [vmem:[%s7957_s3 + $0x478] sm:$0xff]  ;;  %v8196_v42 = vld [vmem:[#allocation10_spill] sm:$0xff] }
 0x14d   : > { %5296 = vmatprep.mubr.f32.mxu0 %v8191_v62  ;;  %5682 = vmatpush3.bf16.msra.mxu0 %v5679_v28  ;;  %v4255_v28 = vld [vmem:[%s7957_s3 + $0x460] sm:$0xff]  ;;  %v4257_v62 = vld [vmem:[%s7957_s3 + $0x470] sm:$0xff] }
 0x14e   : > { %5684 = vmatprep.subr.bf16.mxu0 %v5683_v49 }
 0x14f   : > { %4924 = vmatmul.mubr.f32.gmra.mrb[24].mxu1 %v8192_v24 }
 0x150   : > { %4926 = vmatprep.mubr.f32.mxu1 %v7237_v16  ;;  %5297 = vmatmul.mubr.f32.gmra.mrb[6].mxu0 %v8143_v58  ;;  %v8194_v58 = vld [vmem:[#allocation27_spill] sm:$0xff] }
 0x151   : > { %5299 = vmatprep.mubr.f32.mxu0 %v8144_v39  ;;  %5686 = vmatpush3.bf16.msra.mxu0 %v5683_v49  ;;  %v5695_v39 = vpack.c.bf16 %v4256_v51, %v4255_v28  ;;  %v8195_v49 = vld [vmem:[#allocation25_spill] sm:$0xff]  ;;  %v8197_v28 = vld [vmem:[#allocation31_spill] sm:$0xff] }
 0x152   : > { %5688 = vmatprep.subr.bf16.mxu0 %v5687_v35  ;;  %v8198_v51 = vld [vmem:[#allocation11_spill] sm:$0xff] }
 0x153   : > { %4927 = vmatmul.mubr.f32.gmra.mrb[26].mxu1 %v7251_v25 }
 0x154   : > { %4929 = vmatprep.mubr.f32.mxu1 %v7262_v6  ;;  %5300 = vmatmul.mubr.f32.gmra.mrb[8].mxu0 %v8193_v27  ;;  %v8202_v27 = vld [vmem:[#allocation14_spill] sm:$0xff] }
 0x155   : > { %5302 = vmatprep.mubr.f32.mxu0 %v8194_v58  ;;  %5690 = vmatpush3.bf16.msra.mxu0 %v5687_v35  ;;  %v5699_v35 = vpack.c.bf16 %v4258_v29, %v4257_v62  ;;  %v380_v58 = vld [vmem:[%s6310_s15 + $0x1a8] sm:$0x3]  ;;  %s4261_s15 = sshll.u32 %s8233_s25, 8 }
 0x156   : > { %5692 = vmatprep.subr.bf16.mxu0 %v5691_v56  ;;  %v8205_v29 = vld [vmem:[#allocation15_spill] sm:$0xff]  ;;  %s7762_s22 = scalar_lea.vmem %s7958_s4, %s4261_s15  ;;  %s7823_s8 = scalar_lea.vmem %s7961_s7, %s4261_s15 }
 0x157   : > { %4930 = vmatmul.mubr.f32.gmra.mrb[28].mxu1 %v8195_v49 }
 0x158   : > { %4932 = vmatprep.mubr.f32.mxu1 %v7285_v1  ;;  %5303 = vmatmul.mubr.f32.gmra.mrb[10].mxu0 %v8150_v57  ;;  %v8200_v57 = vld [vmem:[#allocation3_spill] sm:$0xff] }
 0x159   : > { %5305 = vmatprep.mubr.f32.mxu0 %v8151_v10  ;;  %5694 = vmatpush3.bf16.msra.mxu0 %v5691_v56  ;;  %v8199_v10 = vld [vmem:[#allocation30_spill] sm:$0xff]  ;;  %v8201_v56 = vld [vmem:[#allocation12_spill] sm:$0xff] }
 0x15a   : > { %5696 = vmatprep.subr.bf16.mxu0 %v5695_v39 }
 0x15b   : > { %4933 = vmatmul.mubr.f32.gmra.mrb[30].mxu1 %v7296_v11 }
 0x15c   : > { %4967 = vmatprep.mubr.f32.mxu1 %v8196_v42  ;;  %5306 = vmatmul.mubr.f32.gmra.mrb[12].mxu0 %v8197_v28  ;;  %v8207_v28 = vld [vmem:[#allocation61_spill] sm:$0xff] }
 0x15d   : > { %5308 = vmatprep.mubr.f32.mxu0 %v7310_v60  ;;  %5698 = vmatpush3.bf16.msra.mxu0 %v5695_v39  ;;  %v8203_v39 = vld [vmem:[#allocation60_spill] sm:$0xff] }
 0x15e   : > { %5700 = vmatprep.subr.bf16.mxu0 %v5699_v35 }
 0x15f   : > { %4968 = vmatmul.mubr.f32.vlgmr.msra.gmra.mrb[0].mxu1 %v8198_v51 }
 0x160   : > { %4970 = vmatprep.mubr.f32.mxu1 %v6457_v33  ;;  %5309 = vmatmul.mubr.f32.gmra.mrb[14].mxu0 %v7325_v32  ;;  %v8204_v33 = vld [vmem:[#allocation4_spill] sm:$0xff] }
 0x161   : > { %5311 = vmatprep.mubr.f32.mxu0 %v8199_v10  ;;  %5711 = vmatpush3.bf16.msra.mxu1 %v8180_v15  ;;  %v6019_v15 = vld [vmem:[%s6316_s18] ss:$0 sm:$0xff] }
 0x162   : > { %5704 = vmatprep.subr.bf16.mxu1 %v8200_v57  ;;  %5702 = vmatpush3.bf16.msra.mxu0 %v5699_v35  ;;  %v441_v62 = vmul.f32 %v6019_v15, %v380_v58  ;;  %v6020_v35 = vld [vmem:[%s6326_s21] ss:$0 sm:$0xff]  ;;  %v8212_v58 = vld [vmem:[#allocation23_spill] sm:$0xff] }
 0x163   : > { %4971 = vmatmul.mubr.f32.gmra.mrb[2].mxu1 %v8201_v56  ;;  %v8211_v56 = vld [vmem:[#allocation8_spill] sm:$0xff] }
 0x164   : > { %4973 = vmatprep.mubr.f32.mxu1 %v8155_v30  ;;  %5312 = vmatmul.mubr.f32.gmra.mrb[16].mxu0 %v8202_v27  ;;  %v8206_v30 = vld [vmem:[#allocation5_spill] sm:$0xff]  ;;  %v502_v42 = vadd.f32 %v6020_v35, %v441_v62 }
 0x165   : > { %5314 = vmatprep.mubr.f32.mxu0 %v8203_v39  ;;  %5712 = vmatpush3.bf16.msra.mxu1 %v8200_v57 }
 0x166   : > { %5705 = vmatprep.subr.bf16.mxu1 %v8204_v33  ;;  %v610_v51 = vmul.f32 0.01, %v502_v42  ;;  %vm556_vm5 = vcmp.ge.f32.partialorder %v502_v42, 0.0 }
 0x167   : > { %4974 = vmatmul.mubr.f32.gmra.mrb[4].mxu1 %v8158_v21  ;;  %v8208_v21 = vld [vmem:[#allocation62_spill] sm:$0xff] }
 0x168   : > { %4976 = vmatprep.mubr.f32.mxu1 %v6582_v5  ;;  %5315 = vmatmul.mubr.f32.gmra.mrb[18].mxu0 %v7364_v8  ;;  %v8209_v5 = vld [vmem:[#allocation6_spill] sm:$0xff]  ;;  %v664_v57 = vsel %vm556_vm5, %v502_v42, %v610_v51  ;;  %v8215_v51 = vld [vmem:[#allocation35_spill] sm:$0xff] }
 0x169   : > { %5317 = vmatprep.mubr.f32.mxu0 %v8205_v29  ;;  %5713 = vmatpush3.bf16.msra.mxu1 %v8204_v33  ;;  %v2599_v33 = vrot.slane %v8212_v58, 1 }
 0x16a   : > { %5706 = vmatprep.subr.bf16.mxu1 %v8206_v30 }
 0x16b   : > { %4977 = vmatmul.mubr.f32.gmra.mrb[6].mxu1 %v6615_v0  ;;  %v8210_v0 = vld [vmem:[#allocation7_spill] sm:$0xff] }
 0x16c   : > { %4979 = vmatprep.mubr.f32.mxu1 %v6655_v37  ;;  %5318 = vmatmul.mubr.f32.gmra.mrb[20].mxu0 %v8207_v28  ;;  %v963_v37 = vpop.permute.xlu1 %962 }
 0x16d   : > { %5320 = vmatprep.mubr.f32.mxu0 %v8208_v21  ;;  %5714 = vmatpush3.bf16.msra.mxu1 %v8206_v30  ;;  %v7655_v15 = vmul.f32 %v963_v37, %v664_v57  ;;  %v8213_v30 = vld [vmem:[#allocation9_spill] sm:$0xff]  ;;  %v8219_v37 = vld [vmem:[#allocation40_spill] sm:$0xff]  ;;  %v8223_v57 = vld [vmem:[#allocation46_spill] sm:$0xff] }
 0x16e   : > { %5707 = vmatprep.subr.bf16.mxu1 %v8209_v5 }
 0x16f   : > { %4980 = vmatmul.mubr.f32.gmra.mrb[8].mxu1 %v8162_v61  ;;  %v2596_v61 = vrot.slane %v7242_v34, 1  ;;  %v3438_v35 = vrot.slane %v7655_v15, 1 }
 0x170   : > { %4982 = vmatprep.mubr.f32.mxu1 %v6710_v13  ;;  %5321 = vmatmul.mubr.f32.gmra.mrb[22].mxu0 %v7402_v53  ;;  %v2597_v13 = vrot.slane %v7244_v26, 1 }
 0x171   : > { %5323 = vmatprep.mubr.f32.mxu0 %v7406_v22  ;;  %5715 = vmatpush3.bf16.msra.mxu1 %v8209_v5 }
 0x172   : > { %5708 = vmatprep.subr.bf16.mxu1 %v8210_v0  ;;  %v7663_v62 = vsel %vm1545_vm15, %v2596_v61, %v2597_v13  ;;  %v7671_v42 = vsel %vm1545_vm15, %v2597_v13, %v2599_v33  ;;  %v1022_v61 = vld [vmem:[%s7762_s22 + $0x20] sm:$0xff] }
 0x173   : > { %4983 = vmatmul.mubr.f32.gmra.mrb[10].mxu1 %v6742_v41  ;;  %v3435_v41 = vrot.slane %v7528_v18, 1 }
 0x174   : > { %4985 = vmatprep.mubr.f32.mxu1 %v6774_v3  ;;  %5324 = vmatmul.mubr.f32.gmra.mrb[24].mxu0 %v7421_v36  ;;  %v3436_v3 = vrot.slane %v7532_v7, 1 }
 0x175   : > { %5326 = vmatprep.mubr.f32.mxu0 %v7425_v17  ;;  %5716 = vmatpush3.bf16.msra.mxu1 %v8210_v0  ;;  %v8217_v0 = vld [vmem:[#allocation37_spill] sm:$0xff] }
 0x176   : > { %5709 = vmatprep.subr.bf16.mxu1 %v8211_v56  ;;  %v3439_v5 = vsel %vm1545_vm15, %v3436_v3, %v3438_v35 }
 0x177   : > { %4986 = vmatmul.mubr.f32.gmra.mrb[12].mxu1 %v8163_v50  ;;  %v8214_v50 = vld [vmem:[#allocation28_spill] sm:$0xff] }
 0x178   : > { %4988 = vmatprep.mubr.f32.mxu1 %v6806_v19  ;;  %5327 = vmatmul.mubr.f32.gmra.mrb[26].mxu0 %v7437_v23  ;;  %v3437_v19 = vsel %vm1545_vm15, %v3435_v41, %v3436_v3 }
 0x179   : > { %5329 = vmatprep.mubr.f32.mxu0 %v7663_v62  ;;  %5717 = vmatpush3.bf16.msra.mxu1 %v8211_v56  ;;  %v1025_v56 = vld [vmem:[%s7762_s22 + $0x38] sm:$0xff] }
 0x17a   : > { %5710 = vmatprep.subr.bf16.mxu1 %v8213_v30 }
 0x17b   : > { %4989 = vmatmul.mubr.f32.gmra.mrb[14].mxu1 %v8214_v50  ;;  %v1024_v50 = vld [vmem:[%s7762_s22 + $0x30] sm:$0xff] }
 0x17c   : > { %4991 = vmatprep.mubr.f32.mxu1 %v6847_v54  ;;  %5330 = vmatmul.mubr.f32.gmra.mrb[28].mxu0 %v7671_v42  ;;  %v8216_v54 = vld [vmem:[#allocation36_spill] sm:$0xff] }
 0x17d   : > { %5332 = vmatprep.mubr.f32.mxu0 %v3437_v19  ;;  %5718 = vmatpush3.bf16.msra.mxu1 %v8213_v30  ;;  %v1027_v19 = vld [vmem:[%s7762_s22 + $0x48] sm:$0xff] }
 0x17f   : > { %4992 = vmatmul.mubr.f32.gmra.mrb[16].mxu1 %v6849_v52  ;;  %v8218_v52 = vld [vmem:[#allocation39_spill] sm:$0xff] }
 0x180   : > { %4994 = vmatprep.mubr.f32.mxu1 %v6878_v45  ;;  %5333 = vmatmul.mubr.f32.gmra.mrb[30].mxu0 %v3439_v5  ;;  %v8220_v45 = vld [vmem:[#allocation38_spill] sm:$0xff] }
 0x181   : > { %5367 = vmatprep.mubr.f32.mxu0 %v8167_v4  ;;  %v8222_v4 = vld [vmem:[#allocation44_spill] sm:$0xff] }
 0x183   : > { %4995 = vmatmul.mubr.f32.gmra.mrb[18].mxu1 %v6880_v47  ;;  %v8221_v47 = vld [vmem:[#allocation41_spill] sm:$0xff] }
 0x184   : > { %4997 = vmatprep.mubr.f32.mxu1 %v8215_v51  ;;  %5368 = vmatmul.mubr.f32.vlgmr.msra.gmra.mrb[0].mxu0 %v8216_v54 }
 0x185   : > { %5370 = vmatprep.mubr.f32.mxu0 %v8217_v0 }
 0x187   : > { %4998 = vmatmul.mubr.f32.gmra.mrb[20].mxu1 %v6913_v55  ;;  %v8224_v55 = vld [vmem:[#allocation47_spill] sm:$0xff] }
 0x188   : > { %5000 = vmatprep.mubr.f32.mxu1 %v6943_v12  ;;  %5371 = vmatmul.mubr.f32.gmra.mrb[2].mxu0 %v8218_v52  ;;  %v8225_v12 = vld [vmem:[#allocation45_spill] sm:$0xff]  ;;  %v1026_v52 = vld [vmem:[%s7762_s22 + $0x40] sm:$0xff] }
 0x189   : > { %5373 = vmatprep.mubr.f32.mxu0 %v8219_v37 }
 0x18b   : > { %5001 = vmatmul.mubr.f32.gmra.mrb[22].mxu1 %v8220_v45 }
 0x18c   : > { %5003 = vmatprep.mubr.f32.mxu1 %v6981_v44  ;;  %5374 = vmatmul.mubr.f32.gmra.mrb[4].mxu0 %v8172_v48  ;;  %v8227_v44 = vld [vmem:[#allocation53_spill] sm:$0xff]  ;;  %v7770_v48 = vld [vmem:[%s7959_s5] ss:$0 sm:$0xff] }
 0x18d   : > { %5376 = vmatprep.mubr.f32.mxu0 %v8173_v38  ;;  %v8226_v38 = vld [vmem:[#allocation52_spill] sm:$0xff]  ;;  %v1061_v30 = vmul.f32 %v7770_v48, %v1022_v61  ;;  %v1064_v35 = vmul.f32 %v7770_v48, %v1025_v56  ;;  %v1063_v45 = vmul.f32 %v7770_v48, %v1024_v50 }
 0x18f   : > { %5004 = vmatmul.mubr.f32.gmra.mrb[24].mxu1 %v8221_v47 }
 0x190   : > { %5006 = vmatprep.mubr.f32.mxu1 %v8222_v4  ;;  %5377 = vmatmul.mubr.f32.gmra.mrb[6].mxu0 %v8223_v57  ;;  %v1066_v4 = vmul.f32 %v7770_v48, %v1027_v19 }
 0x191   : > { %5379 = vmatprep.mubr.f32.mxu0 %v8224_v55  ;;  %v1065_v55 = vmul.f32 %v7770_v48, %v1026_v52 }
 0x193   : > { %5007 = vmatmul.mubr.f32.gmra.mrb[26].mxu1 %v8225_v12 }
 0x194   : > { %5009 = vmatprep.mubr.f32.mxu1 %v7038_v63  ;;  %5380 = vmatmul.mubr.f32.gmra.mrb[8].mxu0 %v8176_v31  ;;  %v8228_v63 = vld [vmem:[#allocation54_spill] sm:$0xff] }
 0x195   : > { %5382 = vmatprep.mubr.f32.mxu0 %v8177_v46  ;;  %v1018_v46 = vld [vmem:[%s7762_s22] sm:$0xff] }
 0x197   : > { %5010 = vmatmul.mubr.f32.gmra.mrb[28].mxu1 %v7040_v59  ;;  %v8229_v59 = vld [vmem:[#allocation55_spill] sm:$0xff] }
 0x198   : > { %5012 = vmatprep.mubr.f32.mxu1 %v7242_v34  ;;  %5383 = vmatmul.mubr.f32.gmra.mrb[10].mxu0 %v8178_v40  ;;  %v3719_v34 = vrot.slane %v7655_v15, 2 }
 0x199   : > { %5385 = vmatprep.mubr.f32.mxu0 %v8179_v2  ;;  %v7781_v2 = vld [vmem:[%s7960_s6] ss:$0 sm:$0xff] }
 0x19a   : > { %v1100_v37 = vadd.f32 %v7781_v2, %v1061_v30  ;;  %v1103_v47 = vadd.f32 %v7781_v2, %v1064_v35 }
 0x19b   : > { %5013 = vmatmul.mubr.f32.gmra.mrb[30].mxu1 %v7244_v26  ;;  %v8231_v26 = vld [vmem:[#allocation29_spill] sm:$0xff] }
 0x19c   : > { %5071 = vmatprep.mubr.f32.mxu1 %v7310_v60  ;;  %5386 = vmatmul.mubr.f32.gmra.mrb[12].mxu0 %v8226_v38  ;;  %vm1132_vm10 = vcmp.ge.f32.partialorder %v1100_v37, 0.0  ;;  %vm1135_vm11 = vcmp.ge.f32.partialorder %v1103_v47, 0.0 }
 0x19d   : > { %5388 = vmatprep.mubr.f32.mxu0 %v8227_v44 }
 0x19f   : > { %5072 = vmatmul.mubr.f32.vlgmr.msra.gmra.mrb[16].mxu1 %v7325_v32 }
 0x1a0   : > { %5074 = vmatprep.mubr.f32.mxu1 %v8199_v10  ;;  %5389 = vmatmul.mubr.f32.gmra.mrb[14].mxu0 %v8228_v63 }
 0x1a1   : > { %5391 = vmatprep.mubr.f32.mxu0 %v8229_v59  ;;  %v1029_v59 = vld [vmem:[%s7762_s22 + $0x58] sm:$0xff] }
 0x1a3   : > { %5075 = vmatmul.mubr.f32.gmra.mrb[18].mxu1 %v8202_v27 }
 0x1a4   : > { %5077 = vmatprep.mubr.f32.mxu1 %v8203_v39  ;;  %5392 = vmatmul.mubr.f32.gmra.mrb[16].mxu0 %v8186_v20 }
 0x1a5   : > { %5394 = vmatprep.mubr.f32.mxu0 %v8187_v9  ;;  %v1057_v9 = vmul.f32 %v7770_v48, %v1018_v46  ;;  %v1104_v46 = vadd.f32 %v7781_v2, %v1065_v55 }
 0x1a7   : > { %5078 = vmatmul.mubr.f32.gmra.mrb[20].mxu1 %v7364_v8  ;;  %v1096_v27 = vadd.f32 %v7781_v2, %v1057_v9  ;;  %vm1136_vm14 = vcmp.ge.f32.partialorder %v1104_v46, 0.0 }
 0x1a8   : > { %5080 = vmatprep.mubr.f32.mxu1 %v8205_v29  ;;  %5395 = vmatmul.mubr.f32.gmra.mrb[18].mxu0 %v8190_v14  ;;  %v1021_v14 = vld [vmem:[%s7762_s22 + $0x18] sm:$0xff] }
 0x1a9   : > { %5397 = vmatprep.mubr.f32.mxu0 %v7211_v43  ;;  %v3716_v43 = vrot.slane %v7528_v18, 2  ;;  %v1060_v39 = vmul.f32 %v7770_v48, %v1021_v14  ;;  %v1160_v33 = vmul.f32 0.01, %v1096_v27 }
 0x1ab   : > { %5081 = vmatmul.mubr.f32.gmra.mrb[22].mxu1 %v8207_v28  ;;  %v1099_v15 = vadd.f32 %v7781_v2, %v1060_v39 }
 0x1ac   : > { %5083 = vmatprep.mubr.f32.mxu1 %v8208_v21  ;;  %5398 = vmatmul.mubr.f32.gmra.mrb[20].mxu0 %v8192_v24  ;;  %v1020_v24 = vld [vmem:[%s7762_s22 + $0x10] sm:$0xff]  ;;  %v1023_v21 = vld [vmem:[%s7762_s22 + $0x28] sm:$0xff] }
 0x1ad   : > { %5400 = vmatprep.mubr.f32.mxu0 %v7237_v16  ;;  %v3717_v16 = vrot.slane %v7532_v7, 2  ;;  %v1059_v29 = vmul.f32 %v7770_v48, %v1020_v24  ;;  %v1062_v3 = vmul.f32 %v7770_v48, %v1023_v21  ;;  %v1163_v51 = vmul.f32 0.01, %v1099_v15 }
 0x1ae   : > { %vm1131_vm7 = vcmp.ge.f32.partialorder %v1099_v15, 0.0 }
 0x1af   : > { %5084 = vmatmul.mubr.f32.gmra.mrb[24].mxu1 %v7402_v53  ;;  %v3720_v18 = vsel %vm1932_vm6, %v3717_v16, %v3719_v34  ;;  %v1098_v41 = vadd.f32 %v7781_v2, %v1059_v29  ;;  %v1101_v0 = vadd.f32 %v7781_v2, %v1062_v3  ;;  %v1195_v38 = vsel %vm1131_vm7, %v1099_v15, %v1163_v51  ;;  %v1028_v34 = vld [vmem:[%s7762_s22 + $0x50] sm:$0xff]  ;;  %v1033_v3 = vld [vmem:[%s7762_s22 + $0x78] sm:$0xff] }
 0x1b0   : > { %5086 = vmatprep.mubr.f32.mxu1 %v7406_v22  ;;  %5401 = vmatmul.mubr.f32.gmra.mrb[22].mxu0 %v7251_v25  ;;  %v8230_v25 = vld [vmem:[#allocation59_spill] sm:$0xff]  ;;  %v1067_v24 = vmul.f32 %v7770_v48, %v1028_v34  ;;  %v1168_v15 = vmul.f32 0.01, %v1104_v46 }
 0x1b1   : > { %5403 = vmatprep.mubr.f32.mxu0 %v7262_v6  ;;  %v3718_v6 = vsel %vm1932_vm6, %v3716_v43, %v3717_v16  ;;  %vm1128_vm6 = vcmp.ge.f32.partialorder %v1096_v27, 0.0  ;;  %v1162_v54 = vmul.f32 0.01, %v1098_v41  ;;  %vm1130_vm8 = vcmp.ge.f32.partialorder %v1098_v41, 0.0 }
 0x1b2   : > { %v1192_v5 = vsel %vm1128_vm6, %v1096_v27, %v1160_v33  ;;  %v1165_v63 = vmul.f32 0.01, %v1101_v0  ;;  %vm1133_vm9 = vcmp.ge.f32.partialorder %v1101_v0, 0.0  ;;  %v1164_v16 = vmul.f32 0.01, %v1100_v37 }
 0x1b3   : > { %5087 = vmatmul.mubr.f32.gmra.mrb[26].mxu1 %v7421_v36  ;;  %v1194_v44 = vsel %vm1130_vm8, %v1098_v41, %v1162_v54  ;;  %v1106_v35 = vadd.f32 %v7781_v2, %v1067_v24  ;;  %v1072_v54 = vmul.f32 %v7770_v48, %v1033_v3  ;;  %v1036_v24 = vld [vmem:[%s7762_s22 + $0x90] sm:$0xff] }
 0x1b4   : > { %5089 = vmatprep.mubr.f32.mxu1 %v7425_v17  ;;  %5404 = vmatmul.mubr.f32.gmra.mrb[24].mxu0 %v8195_v49  ;;  %v1197_v14 = vsel %vm1133_vm9, %v1101_v0, %v1165_v63  ;;  %v1196_v27 = vsel %vm1132_vm10, %v1100_v37, %v1164_v16 }
 0x1b5   : > { %5406 = vmatprep.mubr.f32.mxu0 %v7285_v1  ;;  %v1170_v55 = vmul.f32 0.01, %v1106_v35  ;;  %vm1138_vm1 = vcmp.ge.f32.partialorder %v1106_v35, 0.0  ;;  %v1111_v16 = vadd.f32 %v7781_v2, %v1072_v54 }
 0x1b7   : > { %5090 = vmatmul.mubr.f32.gmra.mrb[28].mxu1 %v7437_v23  ;;  %v1019_v23 = vld [vmem:[%s7762_s22 + $0x8] sm:$0xff]  ;;  %vm1143_vm4 = vcmp.ge.f32.partialorder %v1111_v16, 0.0 }
 0x1b8   : > { %5092 = vmatprep.mubr.f32.mxu1 %v7663_v62  ;;  %5407 = vmatmul.mubr.f32.gmra.mrb[26].mxu0 %v7296_v11  ;;  %v1058_v40 = vmul.f32 %v7770_v48, %v1019_v23 }
 0x1b9   : > { %5409 = vmatprep.mubr.f32.mxu0 %v8230_v25  ;;  %v1102_v25 = vadd.f32 %v7781_v2, %v1063_v45  ;;  %v1200_v45 = vsel %vm1136_vm14, %v1104_v46, %v1168_v15  ;;  %v1037_v46 = vld [vmem:[%s7762_s22 + $0x98] sm:$0xff] }
 0x1ba   : > { %v1097_v49 = vadd.f32 %v7781_v2, %v1058_v40  ;;  %v1068_v40 = vmul.f32 %v7770_v48, %v1029_v59 }
 0x1bb   : > { %5093 = vmatmul.mubr.f32.gmra.mrb[30].mxu1 %v7671_v42  ;;  %v1166_v39 = vmul.f32 0.01, %v1102_v25  ;;  %vm1134_vm12 = vcmp.ge.f32.partialorder %v1102_v25, 0.0 }
 0x1bc   : > { %5410 = vmatmul.mubr.f32.gmra.mrb[28].mxu0 %v8231_v26  ;;  %vm1129_vm15 = vcmp.ge.f32.partialorder %v1097_v49, 0.0  ;;  %v1161_v13 = vmul.f32 0.01, %v1097_v49  ;;  %v1107_v41 = vadd.f32 %v7781_v2, %v1068_v40 }
 0x1bd   : > { %5412 = vmatprep.mubr.f32.mxu0 %v3718_v6 }
 0x1be   : > { %v1193_v42 = vsel %vm1129_vm15, %v1097_v49, %v1161_v13  ;;  %v1030_v13 = vld [vmem:[%s7762_s22 + $0x60] sm:$0xff]  ;;  %vm1139_vm0 = vcmp.ge.f32.partialorder %v1107_v41, 0.0 }
 0x1bf   : > { %v1069_v19 = vmul.f32 %v7770_v48, %v1030_v13 }
 0x1c0   : > { %5413 = vmatmul.mubr.f32.gmra.mrb[30].mxu0 %v3720_v18  ;;  %v1167_v18 = vmul.f32 0.01, %v1103_v47 }
 0x1c2   : > { %v1199_v61 = vsel %vm1135_vm11, %v1103_v47, %v1167_v18  ;;  %v1035_v47 = vld [vmem:[%s7762_s22 + $0x88] sm:$0xff] }
 0x232   : > { %v4969_v1 = vpop.f32.mrb[0].mxu1 }
 0x233   : > { %v2402_v60 = vpop.f32.mrb[1].mxu1  ;;  %v5719_v57 = vadd.f32 %v4969_v1, %v1193_v42  ;;  %v1105_v1 = vadd.f32 %v7781_v2, %v1066_v4 }
 0x234   : > { %v5721_v12 = vadd.f32 %v2402_v60, %v1192_v5 }
 0x235   : > { %vm1137_vm13 = vcmp.ge.f32.partialorder %v1105_v1, 0.0  ;;  %v1169_v33 = vmul.f32 0.01, %v1105_v1 }
 0x236   : > { %v7744_v32 = vpop.f32.mrb[2].mxu1 }
 0x237   : > { %v7746_v11 = vpop.f32.mrb[3].mxu1  ;;  %v5723_v23 = vadd.f32 %v7744_v32, %v1195_v38  ;;  %v1031_v32 = vld [vmem:[%s7762_s22 + $0x68] sm:$0xff]  ;;  %v1201_v37 = vsel %vm1137_vm13, %v1105_v1, %v1169_v33  ;;  %v1202_v1 = vsel %vm1138_vm1, %v1106_v35, %v1170_v55 }
 0x238   : > { %v5725_v9 = vadd.f32 %v7746_v11, %v1194_v44  ;;  %v1070_v50 = vmul.f32 %v7770_v48, %v1031_v32  ;;  %v1034_v44 = vld [vmem:[%s7762_s22 + $0x80] sm:$0xff] }
 0x23a   : > { %v7748_v8 = vpop.f32.mrb[4].mxu1 }
 0x23b   : > { %v7750_v53 = vpop.f32.mrb[5].mxu1  ;;  %v5727_v11 = vadd.f32 %v7748_v8, %v1197_v14  ;;  %v1198_v8 = vsel %vm1134_vm12, %v1102_v25, %v1166_v39  ;;  %v1074_v25 = vmul.f32 %v7770_v48, %v1035_v47 }
 0x23c   : > { %v5729_v30 = vadd.f32 %v7750_v53, %v1196_v27  ;;  %v1032_v53 = vld [vmem:[%s7762_s22 + $0x70] sm:$0xff] }
 0x23d   : > { %v1071_v63 = vmul.f32 %v7770_v48, %v1032_v53 }
 0x23e   : > { %v7753_v22 = vpop.f32.mrb[6].mxu1 }
 0x23f   : > { %v7755_v36 = vpop.f32.mrb[7].mxu1  ;;  %v5731_v52 = vadd.f32 %v7753_v22, %v1199_v61  ;;  %v1108_v22 = vadd.f32 %v7781_v2, %v1069_v19  ;;  %v1041_v19 = vld [vmem:[%s7762_s22 + $0xb8] sm:$0xff] }
 0x240   : > { %v5733_v4 = vadd.f32 %v7755_v36, %v1198_v8  ;;  %v1080_v47 = vmul.f32 %v7770_v48, %v1041_v19  ;;  %v1047_v19 = vld [vmem:[%s7762_s22 + $0xe8] sm:$0xff] }
 0x241   : > { %v1172_v40 = vmul.f32 0.01, %v1108_v22  ;;  %vm1140_vm3 = vcmp.ge.f32.partialorder %v1108_v22, 0.0 }
 0x242   : > { %v7764_v17 = vpop.f32.mrb[8].mxu1 }
 0x243   : > { %v7772_v31 = vpop.f32.mrb[9].mxu1  ;;  %v5735_v34 = vadd.f32 %v7764_v17, %v1201_v37 }
 0x246   : > { %v7776_v7 = vpop.f32.mrb[10].mxu1 }
 0x247   : > { %v7784_v20 = vpop.f32.mrb[11].mxu1 }
 0x24a   : > { %v7789_v10 = vpop.f32.mrb[12].mxu1 }
 0x24b   : > { %v7794_v28 = vpop.f32.mrb[13].mxu1 }
 0x24e   : > { %v7799_v58 = vpop.f32.mrb[14].mxu1 }
 0x24f   : > { %v7804_v62 = vpop.f32.mrb[15].mxu1 }
 0x257   : > { %v5369_v43 = vpop.f32.mrb[0].mxu0 }
 0x258   : > { %v5720_v26 = vadd.f32 %v5719_v57, %v5369_v43  ;;  %v3806_v6 = vpop.f32.mrb[1].mxu0  ;;  %v1171_v57 = vmul.f32 0.01, %v1107_v41 }
 0x259   : > { %v5722_v60 = vadd.f32 %v5721_v12, %v3806_v6  ;;  %v1109_v12 = vadd.f32 %v7781_v2, %v1070_v50  ;;  %v5737_v6 = vadd.f32 %v7772_v31, %v1200_v45  ;;  %v1113_v31 = vadd.f32 %v7781_v2, %v1074_v25  ;;  %v1038_v50 = vld [vmem:[%s7762_s22 + $0xa0] sm:$0xff] }
 0x25a   : > { %3998 = vst [vmem:[%s7823_s8 + $0x8] sm:$0xff] %v5720_v26  ;;  %v1073_v26 = vmul.f32 %v7770_v48, %v1034_v44  ;;  %v1203_v18 = vsel %vm1139_vm0, %v1107_v41, %v1171_v57  ;;  %v1039_v41 = vld [vmem:[%s7762_s22 + $0xa8] sm:$0xff]  ;;  %v1077_v37 = vmul.f32 %v7770_v48, %v1038_v50 }
 0x25b   : > { %3997 = vst [vmem:[%s7823_s8] sm:$0xff] %v5722_v60  ;;  %v5372_v49 = vpop.f32.mrb[2].mxu0  ;;  %v1173_v60 = vmul.f32 0.01, %v1109_v12  ;;  %vm1141_vm2 = vcmp.ge.f32.partialorder %v1109_v12, 0.0  ;;  %v5739_v39 = vadd.f32 %v7776_v7, %v1203_v18  ;;  %v1177_v35 = vmul.f32 0.01, %v1113_v31 }
 0x25c   : > { %v5724_v29 = vadd.f32 %v5723_v23, %v5372_v49  ;;  %v3816_v21 = vpop.f32.mrb[3].mxu0  ;;  %v1175_v49 = vmul.f32 0.01, %v1111_v16  ;;  %v1112_v32 = vadd.f32 %v7781_v2, %v1073_v26  ;;  %vm1145_vm15 = vcmp.ge.f32.partialorder %v1113_v31, 0.0  ;;  %v1043_v44 = vld [vmem:[%s7762_s22 + $0xc8] sm:$0xff] }
 0x25d   : > { %v5726_v56 = vadd.f32 %v5725_v9, %v3816_v21  ;;  %v1110_v9 = vadd.f32 %v7781_v2, %v1071_v63  ;;  %v5741_v21 = vadd.f32 %v7784_v20, %v1202_v1  ;;  %v1205_v61 = vsel %vm1141_vm2, %v1109_v12, %v1173_v60 }
 0x25e   : > { %4000 = vst [vmem:[%s7823_s8 + $0x18] sm:$0xff] %v5724_v29  ;;  %v1076_v29 = vmul.f32 %v7770_v48, %v1037_v46  ;;  %v1207_v3 = vsel %vm1143_vm4, %v1111_v16, %v1175_v49  ;;  %v5743_v20 = vadd.f32 %v7789_v10, %v1205_v61  ;;  %vm1144_vm6 = vcmp.ge.f32.partialorder %v1112_v32, 0.0  ;;  %v1045_v49 = vld [vmem:[%s7762_s22 + $0xd8] sm:$0xff] }
 0x25f   : > { %3999 = vst [vmem:[%s7823_s8 + $0x10] sm:$0xff] %v5726_v56  ;;  %v5375_v42 = vpop.f32.mrb[4].mxu0  ;;  %v1075_v56 = vmul.f32 %v7770_v48, %v1036_v24  ;;  %v1174_v33 = vmul.f32 0.01, %v1110_v9  ;;  %vm1142_vm5 = vcmp.ge.f32.partialorder %v1110_v9, 0.0  ;;  %v1078_v53 = vmul.f32 %v7770_v48, %v1039_v41 }
 0x260   : > { %v5728_v5 = vadd.f32 %v5727_v11, %v5375_v42  ;;  %v3826_v51 = vpop.f32.mrb[5].mxu0  ;;  %v1204_v11 = vsel %vm1140_vm3, %v1108_v22, %v1172_v40  ;;  %v1176_v42 = vmul.f32 0.01, %v1112_v32  ;;  %v1115_v8 = vadd.f32 %v7781_v2, %v1076_v29  ;;  %v1044_v29 = vld [vmem:[%s7762_s22 + $0xd0] sm:$0xff] }
 0x261   : > { %v5730_v0 = vadd.f32 %v5729_v30, %v3826_v51  ;;  %v1114_v54 = vadd.f32 %v7781_v2, %v1075_v56  ;;  %v1206_v10 = vsel %vm1142_vm5, %v1110_v9, %v1174_v33  ;;  %v1209_v57 = vsel %vm1145_vm15, %v1113_v31, %v1177_v35 }
 0x262   : > { %4002 = vst [vmem:[%s7823_s8 + $0x28] sm:$0xff] %v5728_v5  ;;  %v5745_v5 = vadd.f32 %v7794_v28, %v1204_v11  ;;  %v1040_v28 = vld [vmem:[%s7762_s22 + $0xb0] sm:$0xff]  ;;  %v1208_v12 = vsel %vm1144_vm6, %v1112_v32, %v1176_v42  ;;  %v5749_v22 = vadd.f32 %v7804_v62, %v1206_v10  ;;  %vm1147_vm7 = vcmp.ge.f32.partialorder %v1115_v8, 0.0 }
 0x263   : > { %4001 = vst [vmem:[%s7823_s8 + $0x20] sm:$0xff] %v5730_v0  ;;  %v5378_v38 = vpop.f32.mrb[6].mxu0  ;;  %v1117_v16 = vadd.f32 %v7781_v2, %v1078_v53  ;;  %vm1146_vm8 = vcmp.ge.f32.partialorder %v1114_v54, 0.0  ;;  %v1079_v26 = vmul.f32 %v7770_v48, %v1040_v28  ;;  %v1119_v62 = vadd.f32 %v7781_v2, %v1080_v47  ;;  %v1046_v53 = vld [vmem:[%s7762_s22 + $0xe0] sm:$0xff] }
 0x264   : > { %v5732_v59 = vadd.f32 %v5731_v52, %v5378_v38  ;;  %v3836_v43 = vpop.f32.mrb[7].mxu0  ;;  %v1179_v38 = vmul.f32 0.01, %v1115_v8  ;;  %v1082_v18 = vmul.f32 %v7770_v48, %v1043_v44  ;;  %v1083_v35 = vmul.f32 %v7770_v48, %v1044_v29 }
 0x265   : > { %v5734_v36 = vadd.f32 %v5733_v4, %v3836_v43  ;;  %v5747_v4 = vadd.f32 %v7799_v58, %v1207_v3  ;;  %v1178_v43 = vmul.f32 0.01, %v1114_v54  ;;  %v1181_v24 = vmul.f32 0.01, %v1117_v16 }
 0x266   : > { %4004 = vst [vmem:[%s7823_s8 + $0x38] sm:$0xff] %v5732_v59  ;;  %v1211_v40 = vsel %vm1147_vm7, %v1115_v8, %v1179_v38  ;;  %vm1149_vm9 = vcmp.ge.f32.partialorder %v1117_v16, 0.0  ;;  %v1118_v32 = vadd.f32 %v7781_v2, %v1079_v26  ;;  %v1183_v61 = vmul.f32 0.01, %v1119_v62 }
 0x267   : > { %4003 = vst [vmem:[%s7823_s8 + $0x30] sm:$0xff] %v5734_v36  ;;  %v5381_v23 = vpop.f32.mrb[8].mxu0  ;;  %v1042_v36 = vld [vmem:[%s7762_s22 + $0xc0] sm:$0xff]  ;;  %v1210_v9 = vsel %vm1146_vm8, %v1114_v54, %v1178_v43  ;;  %vm1151_vm11 = vcmp.ge.f32.partialorder %v1119_v62, 0.0  ;;  %v1213_v41 = vsel %vm1149_vm9, %v1117_v16, %v1181_v24  ;;  %v1085_v44 = vmul.f32 %v7770_v48, %v1046_v53  ;;  %v1048_v43 = vld [vmem:[%s7762_s22 + $0xf0] sm:$0xff] }
 0x268   : > { %v5736_v14 = vadd.f32 %v5735_v34, %v5381_v23  ;;  %v3846_v17 = vpop.f32.mrb[9].mxu0  ;;  %v1116_v34 = vadd.f32 %v7781_v2, %v1077_v37  ;;  %v1081_v23 = vmul.f32 %v7770_v48, %v1042_v36  ;;  %v1182_v8 = vmul.f32 0.01, %v1118_v32 }
 0x269   : > { %v5738_v27 = vadd.f32 %v5737_v6, %v3846_v17  ;;  %vm1150_vm12 = vcmp.ge.f32.partialorder %v1118_v32, 0.0 }
 0x26a   : > { %4006 = vst [vmem:[%s7823_s8 + $0x48] sm:$0xff] %v5736_v14  ;;  %vm1148_vm10 = vcmp.ge.f32.partialorder %v1116_v34, 0.0  ;;  %v1120_v33 = vadd.f32 %v7781_v2, %v1081_v23 }
 0x26b   : > { %4005 = vst [vmem:[%s7823_s8 + $0x40] sm:$0xff] %v5738_v27  ;;  %v5384_v13 = vpop.f32.mrb[10].mxu0 }
 0x26c   : > { %v5740_v7 = vadd.f32 %v5739_v39, %v5384_v13  ;;  %v3856_v15 = vpop.f32.mrb[11].mxu0  ;;  %v1180_v39 = vmul.f32 0.01, %v1116_v34  ;;  %v1121_v13 = vadd.f32 %v7781_v2, %v1082_v18  ;;  %vm1152_vm14 = vcmp.ge.f32.partialorder %v1120_v33, 0.0 }
 0x26d   : > { %v5742_v30 = vadd.f32 %v5741_v21, %v3856_v15 }
 0x26e   : > { %4008 = vst [vmem:[%s7823_s8 + $0x58] sm:$0xff] %v5740_v7  ;;  %v1084_v7 = vmul.f32 %v7770_v48, %v1045_v49  ;;  %v1212_v50 = vsel %vm1148_vm10, %v1116_v34, %v1180_v39  ;;  %v1185_v54 = vmul.f32 0.01, %v1121_v13  ;;  %vm1153_vm13 = vcmp.ge.f32.partialorder %v1121_v13, 0.0 }
 0x26f   : > { %4007 = vst [vmem:[%s7823_s8 + $0x50] sm:$0xff] %v5742_v30  ;;  %v5387_v51 = vpop.f32.mrb[12].mxu0 }
 0x270   : > { %v5744_v0 = vadd.f32 %v5743_v20, %v5387_v51  ;;  %v3866_v52 = vpop.f32.mrb[13].mxu0  ;;  %v1215_v51 = vsel %vm1151_vm11, %v1119_v62, %v1183_v61  ;;  %v1123_v37 = vadd.f32 %v7781_v2, %v1084_v7 }
 0x271   : > { %v5746_v45 = vadd.f32 %v5745_v5, %v3866_v52  ;;  %v1184_v52 = vmul.f32 0.01, %v1120_v33 }
 0x272   : > { %4010 = vst [vmem:[%s7823_s8 + $0x68] sm:$0xff] %v5744_v0  ;;  %v5073_v55 = vpop.f32.mrb[16].mxu1  ;;  %vm1155_vm0 = vcmp.ge.f32.partialorder %v1123_v37, 0.0 }
 0x273   : > { %4009 = vst [vmem:[%s7823_s8 + $0x60] sm:$0xff] %v5746_v45  ;;  %v2766_v63 = vpop.f32.mrb[17].mxu1  ;;  %v5390_v59 = vpop.f32.mrb[14].mxu0  ;;  %v5751_v1 = vadd.f32 %v5073_v55, %v1209_v57  ;;  %v1086_v57 = vmul.f32 %v7770_v48, %v1047_v19  ;;  %v1214_v55 = vsel %vm1150_vm12, %v1118_v32, %v1182_v8 }
 0x274   : > { %v5748_v58 = vadd.f32 %v5747_v4, %v5390_v59  ;;  %v3876_v25 = vpop.f32.mrb[15].mxu0  ;;  %v5753_v46 = vadd.f32 %v2766_v63, %v1208_v12  ;;  %v1122_v4 = vadd.f32 %v7781_v2, %v1083_v35  ;;  %v1217_v59 = vsel %vm1153_vm13, %v1121_v13, %v1185_v54 }
 0x275   : > { %v5750_v6 = vadd.f32 %v5749_v22, %v3876_v25  ;;  %v1049_v22 = vld [vmem:[%s7762_s22 + $0xf8] sm:$0xff]  ;;  %v1187_v25 = vmul.f32 0.01, %v1123_v37  ;;  %v1125_v18 = vadd.f32 %v7781_v2, %v1086_v57 }
 0x276   : > { %4012 = vst [vmem:[%s7823_s8 + $0x78] sm:$0xff] %v5748_v58  ;;  %v5076_v60 = vpop.f32.mrb[18].mxu1  ;;  %v1216_v58 = vsel %vm1152_vm14, %v1120_v33, %v1184_v52  ;;  %v1186_v62 = vmul.f32 0.01, %v1122_v4  ;;  %vm1154_vm1 = vcmp.ge.f32.partialorder %v1122_v4, 0.0 }
 0x277   : > { %4011 = vst [vmem:[%s7823_s8 + $0x70] sm:$0xff] %v5750_v6  ;;  %v2776_v14 = vpop.f32.mrb[19].mxu1  ;;  %v5393_v17 = vpop.f32.mrb[16].mxu0  ;;  %v5755_v56 = vadd.f32 %v5076_v60, %v1211_v40  ;;  %v1087_v40 = vmul.f32 %v7770_v48, %v1048_v43  ;;  %v1189_v32 = vmul.f32 0.01, %v1125_v18  ;;  %vm1157_vm2 = vcmp.ge.f32.partialorder %v1125_v18, 0.0 }
 0x278   : > { %v5752_v27 = vadd.f32 %v5751_v1, %v5393_v17  ;;  %v3886_v31 = vpop.f32.mrb[17].mxu0  ;;  %v5757_v15 = vadd.f32 %v2776_v14, %v1210_v9  ;;  %v1088_v1 = vmul.f32 %v7770_v48, %v1049_v22  ;;  %v1219_v17 = vsel %vm1155_vm0, %v1123_v37, %v1187_v25 }
 0x279   : > { %v5754_v21 = vadd.f32 %v5753_v46, %v3886_v31  ;;  %v1124_v46 = vadd.f32 %v7781_v2, %v1085_v44  ;;  %v1126_v13 = vadd.f32 %v7781_v2, %v1087_v40 }
 0x27a   : > { %4014 = vst [vmem:[%s7823_s8 + $0x88] sm:$0xff] %v5752_v27  ;;  %v5079_v11 = vpop.f32.mrb[20].mxu1  ;;  %v1218_v27 = vsel %vm1154_vm1, %v1122_v4, %v1186_v62  ;;  %v1127_v29 = vadd.f32 %v7781_v2, %v1088_v1 }
 0x27b   : > { %4013 = vst [vmem:[%s7823_s8 + $0x80] sm:$0xff] %v5754_v21  ;;  %v2786_v3 = vpop.f32.mrb[21].mxu1  ;;  %v5396_v30 = vpop.f32.mrb[18].mxu0  ;;  %v5759_v10 = vadd.f32 %v5079_v11, %v1213_v41  ;;  %v1188_v48 = vmul.f32 0.01, %v1124_v46  ;;  %vm1156_vm3 = vcmp.ge.f32.partialorder %v1124_v46, 0.0 }
 0x27c   : > { %v5756_v20 = vadd.f32 %v5755_v56, %v5396_v30  ;;  %v3896_v42 = vpop.f32.mrb[19].mxu0  ;;  %v5761_v45 = vadd.f32 %v2786_v3, %v1212_v50  ;;  %v1191_v30 = vmul.f32 0.01, %v1127_v29  ;;  %vm1159_vm4 = vcmp.ge.f32.partialorder %v1127_v29, 0.0 }
 0x27d   : > { %v5758_v5 = vadd.f32 %v5757_v15, %v3896_v42  ;;  %v1221_v15 = vsel %vm1157_vm2, %v1125_v18, %v1189_v32  ;;  %v1220_v35 = vsel %vm1156_vm3, %v1124_v46, %v1188_v48  ;;  %v1190_v42 = vmul.f32 0.01, %v1126_v13 }
 0x27e   : > { %4016 = vst [vmem:[%s7823_s8 + $0x98] sm:$0xff] %v5756_v20  ;;  %v5082_v0 = vpop.f32.mrb[22].mxu1  ;;  %vm1158_vm5 = vcmp.ge.f32.partialorder %v1126_v13, 0.0 }
 0x27f   : > { %4015 = vst [vmem:[%s7823_s8 + $0x90] sm:$0xff] %v5758_v5  ;;  %v2796_v47 = vpop.f32.mrb[23].mxu1  ;;  %v5399_v28 = vpop.f32.mrb[20].mxu0  ;;  %v5763_v16 = vadd.f32 %v5082_v0, %v1215_v51  ;;  %v1223_v51 = vsel %vm1159_vm4, %v1127_v29, %v1191_v30 }
 0x280   : > { %v5760_v12 = vadd.f32 %v5759_v10, %v5399_v28  ;;  %v3906_v38 = vpop.f32.mrb[21].mxu0  ;;  %v5765_v34 = vadd.f32 %v2796_v47, %v1214_v55  ;;  %v1222_v10 = vsel %vm1158_vm5, %v1126_v13, %v1190_v42 }
 0x281   : > { %v5762_v63 = vadd.f32 %v5761_v45, %v3906_v38 }
 0x282   : > { %4018 = vst [vmem:[%s7823_s8 + $0xa8] sm:$0xff] %v5760_v12  ;;  %v5085_v36 = vpop.f32.mrb[24].mxu1 }
 0x283   : > { %4017 = vst [vmem:[%s7823_s8 + $0xa0] sm:$0xff] %v5762_v63  ;;  %v2806_v26 = vpop.f32.mrb[25].mxu1  ;;  %v5402_v6 = vpop.f32.mrb[22].mxu0  ;;  %v5767_v14 = vadd.f32 %v5085_v36, %v1217_v59 }
 0x284   : > { %v5764_v60 = vadd.f32 %v5763_v16, %v5402_v6  ;;  %v3916_v23 = vpop.f32.mrb[23].mxu0  ;;  %v5769_v49 = vadd.f32 %v2806_v26, %v1216_v58 }
 0x285   : > { %v5766_v9 = vadd.f32 %v5765_v34, %v3916_v23 }
 0x286   : > { %4020 = vst [vmem:[%s7823_s8 + $0xb8] sm:$0xff] %v5764_v60  ;;  %v5088_v24 = vpop.f32.mrb[26].mxu1 }
 0x287   : > { %4019 = vst [vmem:[%s7823_s8 + $0xb0] sm:$0xff] %v5766_v9  ;;  %v2816_v31 = vpop.f32.mrb[27].mxu1  ;;  %v5405_v39 = vpop.f32.mrb[24].mxu0  ;;  %v5771_v11 = vadd.f32 %v5088_v24, %v1219_v17 }
 0x288   : > { %v5768_v21 = vadd.f32 %v5767_v14, %v5405_v39  ;;  %v3926_v61 = vpop.f32.mrb[25].mxu0  ;;  %v5773_v7 = vadd.f32 %v2816_v31, %v1218_v27 }
 0x289   : > { %v5770_v56 = vadd.f32 %v5769_v49, %v3926_v61 }
 0x28a   : > { %4022 = vst [vmem:[%s7823_s8 + $0xc8] sm:$0xff] %v5768_v21  ;;  %v5091_v33 = vpop.f32.mrb[28].mxu1 }
 0x28b   : > { %4021 = vst [vmem:[%s7823_s8 + $0xc0] sm:$0xff] %v5770_v56  ;;  %v2826_v41 = vpop.f32.mrb[29].mxu1  ;;  %v5408_v3 = vpop.f32.mrb[26].mxu0  ;;  %v5775_v8 = vadd.f32 %v5091_v33, %v1221_v15 }
 0x28c   : > { %v5772_v50 = vadd.f32 %v5771_v11, %v5408_v3  ;;  %v3936_v20 = vpop.f32.mrb[27].mxu0  ;;  %v5777_v5 = vadd.f32 %v2826_v41, %v1220_v35 }
 0x28d   : > { %v5774_v2 = vadd.f32 %v5773_v7, %v3936_v20 }
 0x28e   : > { %4024 = vst [vmem:[%s7823_s8 + $0xd8] sm:$0xff] %v5772_v50  ;;  %v5094_v19 = vpop.f32.mrb[30].mxu1 }
 0x28f   : > { %4023 = vst [vmem:[%s7823_s8 + $0xd0] sm:$0xff] %v5774_v2  ;;  %v2836_v54 = vpop.f32.mrb[31].mxu1  ;;  %v5411_v53 = vpop.f32.mrb[28].mxu0  ;;  %v5779_v45 = vadd.f32 %v5094_v19, %v1223_v51 }
 0x290   : > { %v5776_v0 = vadd.f32 %v5775_v8, %v5411_v53  ;;  %v3946_v52 = vpop.f32.mrb[29].mxu0  ;;  %v5781_v47 = vadd.f32 %v2836_v54, %v1222_v10 }
 0x291   : > { %v5778_v37 = vadd.f32 %v5777_v5, %v3946_v52 }
 0x292   : > { %4026 = vst [vmem:[%s7823_s8 + $0xe8] sm:$0xff] %v5776_v0 }
 0x293   : > { %4025 = vst [vmem:[%s7823_s8 + $0xe0] sm:$0xff] %v5778_v37  ;;  %v5414_v28 = vpop.f32.mrb[30].mxu0 }
 0x294   : > { %v5780_v4 = vadd.f32 %v5779_v45, %v5414_v28  ;;  %v3956_v57 = vpop.f32.mrb[31].mxu0 }
 0x295   : > { %v5782_v55 = vadd.f32 %v5781_v47, %v3956_v57 }
 0x296   : > { %4028 = vst [vmem:[%s7823_s8 + $0xf8] sm:$0xff] %v5780_v4 }
 0x297   : > { %4027 = vst [vmem:[%s7823_s8 + $0xf0] sm:$0xff] %v5782_v55 }
 0x298 PF: > { %s17_s24 = sadd.s32 1, %s6027_s24  }
 0x299   : > { %p14_p4 = scmp.ge.s32.totalorder %s17_s24, 4  }
 0x29b   :  { %16 = sbr.rel (!%p14_p4) target bundleno = 1 (0x1), region = 95 }

</bundles_post_ra>
